<compile_context>
chip_gen: v7x
topology: tpu7x:2x2x1
jax: 0.10.0
libtpu: 0.0.40
codegen_flags: <defaults>
</compile_context>

<pallas_src>
import functools
import math

import jax
import jax.numpy as jnp
from jax.experimental import pallas as pl
from jax.experimental.pallas import tpu as pltpu


_HALO = 128                       # in-kernel zero halo (lanes); needs W+3 <= 128
_VMEM_LIMIT = 48 * 1024 * 1024    # above v5e/v6e defaults, below v7x physical


def _round_up(v, m):
    return (v + m - 1) // m * m


# ---------------------------------------------------------------------------
# Padded-flat layout helpers (wrapper-side XLA glue, pure data movement).
# ---------------------------------------------------------------------------

def _mpad(h, w):
    return _round_up((h + 2) * (w + 2), 128)


def to_padded_flat(x, c_pad=None):
    """(N,C,H,W) -> (N,Cpad,Mpad): zero 1-px border folded onto the flat axis,
    channels padded to a sublane multiple, lanes padded to a multiple of 128."""
    n, c, h, w = x.shape
    cp = c_pad or c
    m_true = (h + 2) * (w + 2)
    mp = _mpad(h, w)
    xp = jnp.pad(x, ((0, 0), (0, cp - c), (1, 1), (1, 1)))
    xf = xp.reshape(n, cp, m_true)
    if mp > m_true:
        xf = jnp.pad(xf, ((0, 0), (0, 0), (0, mp - m_true)))
    return xf


def from_padded_flat(xpf, h, w):
    n, c, _ = xpf.shape
    m_true = (h + 2) * (w + 2)
    return xpf[:, :, :m_true].reshape(n, c, h + 2, w + 2)[:, :, 1:h + 1, 1:w + 1]


def interior_mask(h, w):
    """(1, Mpad) f32 mask: 1 on real interior pixels, 0 on border + lane pad."""
    m_true = (h + 2) * (w + 2)
    mp = _mpad(h, w)
    m2 = jnp.zeros((h + 2, w + 2), jnp.float32).at[1:h + 1, 1:w + 1].set(1.0)
    m = m2.reshape(1, m_true)
    if mp > m_true:
        m = jnp.pad(m, ((0, 0), (0, mp - m_true)))
    return m


def pixel_shuffle(x, r):
    # TODO(synk): PixelShuffle is pure data movement; kept as an XLA
    # reshape/transpose in the wrapper rather than a Pallas kernel.
    n, c, h, w = x.shape
    co = c // (r * r)
    x = x.reshape(n, co, r, r, h, w)
    x = jnp.transpose(x, (0, 1, 4, 2, 5, 3))
    return x.reshape(n, co, h * r, w * r)


def _shuffle_and_repad(y_pf, h, w, r):
    # TODO(synk): this un-pad -> PixelShuffle -> re-pad re-layout could be
    # folded into the producing conv's output store (strided out BlockSpec)
    # to save the extra XLA copies over the largest tensor of the network.
    img = pixel_shuffle(from_padded_flat(y_pf, h, w), r)
    return to_padded_flat(img), h * r, w * r


def _tap_slice_starts(w):
    """Static lane offsets of the 9 tap windows inside the halo-extended row."""
    p = w + 2
    assert p + 1 <= _HALO, "image width too large for the fixed in-kernel halo"
    return tuple(_HALO - (p + 1) + ky * p + kx
                 for ky in range(3) for kx in range(3))


def _prep_conv(wb, c_pad=None):
    """(Cout,Cin,3,3) weight + (Cout,) bias -> im2col (Cout, 9*Cin_pad), (Cout,1)."""
    wgt, bias = wb
    cout, cin = wgt.shape[0], wgt.shape[1]
    cp = max(cin, c_pad or cin)
    if cp > cin:
        wgt = jnp.pad(wgt, ((0, 0), (0, cp - cin), (0, 0), (0, 0)))
    # K ordering = tap-major (ky*3+kx), channel-minor -> matches the sublane
    # stacking of the 9 shifted windows inside the kernel.
    wmat = jnp.transpose(wgt, (0, 2, 3, 1)).reshape(cout, 9 * cp)
    return [wmat.astype(jnp.float32), bias.reshape(cout, 1).astype(jnp.float32)]


# ---------------------------------------------------------------------------
# In-kernel building blocks
# ---------------------------------------------------------------------------

def _conv3x3_apply(v, wmat, bias, mask, slice_starts, halo, mpad):
    """3x3 "same" conv on a padded-flat (C, Mpad) activation value.

    Builds the 9 shifted tap windows from an in-kernel zero halo (lane-aligned
    concat + static lane slices), stacks them along sublanes and contracts in
    ONE MXU matmul with K = 9*Cin.  Bias is added and the folded 1-px border
    (+ lane padding) is re-zeroed so the result is again a valid padded-flat
    tensor (required by the next conv and by the CA average pool).
    """
    c = v.shape[0]
    zeros = jnp.zeros((c, halo), jnp.float32)
    vh = jnp.concatenate([zeros, v, zeros], axis=1)        # (C, Mpad + 2*halo)
    taps = [vh[:, s:s + mpad] for s in slice_starts]       # 9 x (C, Mpad)
    stack = jnp.concatenate(taps, axis=0)                  # (9*C, Mpad)
    y = jnp.dot(wmat, stack, preferred_element_type=jnp.float32)
    return (y + bias) * mask


def _fused_network_kernel(*refs, n_block, slice_starts, halo, mpad, inv_hw):
    """head conv -> NAFBlocks (convs + CALayer + residuals) -> body-tail conv
    + skip -> final conv (tail or first upscale conv), all VMEM-resident."""
    x_ref, mask_ref = refs[0], refs[1]
    o_ref = refs[-1]
    it = iter(refs[2:-1])

    mask = mask_ref[...]                                   # (1, Mpad)

    def conv(v):
        w_ref = next(it)
        b_ref = next(it)
        return _conv3x3_apply(v, w_ref[...], b_ref[...], mask,
                              slice_starts, halo, mpad)

    feat = conv(x_ref[0].astype(jnp.float32))              # head
    res = feat
    for _ in range(n_block):                               # NAFBlocks (unrolled)
        t = conv(res)                                      # conv1 (c -> 2c)
        t = conv(t)                                        # conv2 (2c -> c)
        t = conv(t)                                        # conv3 (c -> c)
        w1_ref, b1_ref = next(it), next(it)
        w2_ref, b2_ref = next(it), next(it)
        # CALayer: avgpool -> 1x1 -> ReLU -> 1x1 -> sigmoid -> channel scale.
        # `t` is already border/pad-masked; the extra *mask keeps the H*W
        # divisor exact even if a future producer forgets to mask.
        pooled = jnp.sum(t * mask, axis=1, keepdims=True) * inv_hw     # (C, 1)
        z = jnp.dot(w1_ref[...], pooled, preferred_element_type=jnp.float32)
        z = jnp.maximum(z + b1_ref[...], 0.0)
        s = jnp.dot(w2_ref[...], z, preferred_element_type=jnp.float32)
        s = 1.0 / (1.0 + jnp.exp(-(s + b2_ref[...])))                  # (C, 1)
        y = res + t * s                                    # inp + sca(conv3(.))
        t = conv(y)                                        # conv4
        t = conv(t)                                        # conv5
        res = y + t
    res = conv(res) + feat                                 # body-tail conv + skip
    o_ref[0] = conv(res).astype(o_ref.dtype)               # tail / upscale conv


def _conv3x3_kernel(x_ref, mask_ref, w_ref, b_ref, o_ref, *,
                    slice_starts, halo, mpad):
    y = _conv3x3_apply(x_ref[0].astype(jnp.float32), w_ref[...], b_ref[...],
                       mask_ref[...], slice_starts, halo, mpad)
    o_ref[0] = y.astype(o_ref.dtype)


# ---------------------------------------------------------------------------
# Pallas wrappers
# ---------------------------------------------------------------------------

def fused_network_core(p, x_pf, mask, h, w, final_wb):
    """One pallas_call for head + all NAFBlocks + body-tail(+skip) + final conv."""
    n, c_pad, mpad = x_pf.shape
    params = []
    params += _prep_conv(p["head"], c_pad)
    for bp in p["blocks"]:
        params += _prep_conv(bp["c1"])
        params += _prep_conv(bp["c2"])
        params += _prep_conv(bp["c3"])
        sca = bp["sca"]
        params += [sca["w1"].astype(jnp.float32),
                   sca["b1"].reshape(-1, 1).astype(jnp.float32),
                   sca["w2"].astype(jnp.float32),
                   sca["b2"].reshape(-1, 1).astype(jnp.float32)]
        params += _prep_conv(bp["c4"])
        params += _prep_conv(bp["c5"])
    params += _prep_conv(p["body_tail"])
    params += _prep_conv(final_wb)
    cout = final_wb[0].shape[0]

    kernel = functools.partial(
        _fused_network_kernel, n_block=len(p["blocks"]),
        slice_starts=_tap_slice_starts(w), halo=_HALO, mpad=mpad,
        inv_hw=1.0 / float(h * w))

    in_specs = [pl.BlockSpec((1, c_pad, mpad), lambda i: (i, 0, 0)),
                pl.BlockSpec((1, mpad), lambda i: (0, 0))]
    in_specs += [pl.BlockSpec(prm.shape, lambda i: (0, 0)) for prm in params]

    # TODO(synk): at real SR resolutions (e.g. 512x512) add a spatial row-band
    # grid axis so the resident activations stay within the VMEM budget.
    return pl.pallas_call(
        kernel,
        out_shape=jax.ShapeDtypeStruct((n, cout, mpad), x_pf.dtype),
        grid=(n,),
        in_specs=in_specs,
        out_specs=pl.BlockSpec((1, cout, mpad), lambda i: (i, 0, 0)),
        compiler_params=pltpu.CompilerParams(
            dimension_semantics=("parallel",),
            vmem_limit_bytes=_VMEM_LIMIT),
    )(x_pf, mask, *params)


def conv3x3_pf(x_pf, wb, mask, h, w):
    """Standalone fused 3x3 conv (full Cout, grid over batch only)."""
    n, cin, mpad = x_pf.shape
    wmat, bias = _prep_conv(wb, cin)
    cout = wmat.shape[0]
    kernel = functools.partial(_conv3x3_kernel,
                               slice_starts=_tap_slice_starts(w),
                               halo=_HALO, mpad=mpad)
    return pl.pallas_call(
        kernel,
        out_shape=jax.ShapeDtypeStruct((n, cout, mpad), x_pf.dtype),
        grid=(n,),
        in_specs=[pl.BlockSpec((1, cin, mpad), lambda i: (i, 0, 0)),
                  pl.BlockSpec((1, mpad), lambda i: (0, 0)),
                  pl.BlockSpec(wmat.shape, lambda i: (0, 0)),
                  pl.BlockSpec(bias.shape, lambda i: (0, 0))],
        out_specs=pl.BlockSpec((1, cout, mpad), lambda i: (i, 0, 0)),
        compiler_params=pltpu.CompilerParams(
            dimension_semantics=("parallel",),
            vmem_limit_bytes=_VMEM_LIMIT),
    )(x_pf, mask, wmat, bias)


# ---------------------------------------------------------------------------
# Network forward (Pallas) — mirrors OurNetwork / SingleNetwork / NAFBlock.
# ---------------------------------------------------------------------------

def single_network_forward_pallas(p, x, scale):
    n, c, h, w = x.shape
    c_pad = _round_up(c, 8)
    x_pf = to_padded_flat(x, c_pad)
    mask = interior_mask(h, w)

    final_wb = p["tail"] if scale == 1 else p["upscale"][0]
    y_pf = fused_network_core(p, x_pf, mask, h, w, final_wb)

    if scale == 1:
        return from_padded_flat(y_pf, h, w)

    r = 2 if scale in (2, 4) else 3
    cur_pf, ch, cw = _shuffle_and_repad(y_pf, h, w, r)
    for uwb in p["upscale"][1:]:                       # only scale == 4
        cur_pf = conv3x3_pf(cur_pf, uwb, interior_mask(ch, cw), ch, cw)
        cur_pf, ch, cw = _shuffle_and_repad(cur_pf, ch, cw, r)
    out_pf = conv3x3_pf(cur_pf, p["tail"], interior_mask(ch, cw), ch, cw)
    return from_padded_flat(out_pf, ch, cw)


def our_network_forward_pallas(networks, x, target_scale):
    assert target_scale in (1, 2, 3, 4)
    return single_network_forward_pallas(networks[target_scale], x, target_scale)


# ---------------------------------------------------------------------------
# Pure-JAX reference of the PyTorch forward (for the correctness check).
# ---------------------------------------------------------------------------

def _conv3x3_ref(x, w, b):
    y = jax.lax.conv_general_dilated(
        x, w, window_strides=(1, 1), padding=((1, 1), (1, 1)),
        dimension_numbers=("NCHW", "OIHW", "NCHW"),
        precision=jax.lax.Precision.HIGHEST)
    return y + b.reshape(1, -1, 1, 1)


def _ca_ref(x, sca):
    pooled = jnp.mean(x, axis=(2, 3))
    z = jnp.maximum(pooled @ sca["w1"].T + sca["b1"], 0.0)
    s = jax.nn.sigmoid(z @ sca["w2"].T + sca["b2"])
    return x * s[:, :, None, None]


def single_network_forward_ref(p, x, scale):
    feat = _conv3x3_ref(x, *p["head"])
    res = feat
    for bp in p["blocks"]:
        t = _conv3x3_ref(res, *bp["c1"])
        t = _conv3x3_ref(t, *bp["c2"])
        t = _conv3x3_ref(t, *bp["c3"])
        y = res + _ca_ref(t, bp["sca"])
        t = _conv3x3_ref(y, *bp["c4"])
        t = _conv3x3_ref(t, *bp["c5"])
        res = y + t
    res = _conv3x3_ref(res, *p["body_tail"]) + feat
    cur = res
    if scale > 1:
        r = 2 if scale in (2, 4) else 3
        for uw, ub in p["upscale"]:
            cur = pixel_shuffle(_conv3x3_ref(cur, uw, ub), r)
    return _conv3x3_ref(cur, *p["tail"])


# ---------------------------------------------------------------------------
# Parameter init (mirrors the PyTorch module structure).
# ---------------------------------------------------------------------------

def _init_conv(key, cout, cin, k=3):
    kw, kb = jax.random.split(key)
    std = 1.0 / math.sqrt(cin * k * k)
    w = jax.random.normal(kw, (cout, cin, k, k), jnp.float32) * std
    b = jax.random.normal(kb, (cout,), jnp.float32) * 0.01
    return w, b


def init_single_network(key, num_block, feat, num_channel, scale):
    assert scale in (1, 2, 3, 4)
    assert feat % 16 == 0, "CALayer(reduction=16) needs feature % 16 == 0"
    cr = feat // 16
    keys = iter(jax.random.split(key, 8 * num_block + 8))
    p = {"head": _init_conv(next(keys), feat, num_channel)}
    blocks = []
    for _ in range(num_block):
        k1, k2, k3, k4 = jax.random.split(next(keys), 4)
        blocks.append({
            "c1": _init_conv(next(keys), 2 * feat, feat),
            "c2": _init_conv(next(keys), feat, 2 * feat),
            "c3": _init_conv(next(keys), feat, feat),
            "sca": {
                "w1": jax.random.normal(k1, (cr, feat), jnp.float32) / math.sqrt(feat),
                "b1": jax.random.normal(k2, (cr,), jnp.float32) * 0.01,
                "w2": jax.random.normal(k3, (feat, cr), jnp.float32) / math.sqrt(cr),
                "b2": jax.random.normal(k4, (feat,), jnp.float32) * 0.01,
            },
            "c4": _init_conv(next(keys), feat, feat),
            "c5": _init_conv(next(keys), feat, feat),
        })
    p["blocks"] = blocks
    p["body_tail"] = _init_conv(next(keys), feat, feat)
    ups = []
    if scale in (2, 4):
        for _ in range(int(round(math.log2(scale)))):
            ups.append(_init_conv(next(keys), 4 * feat, feat))
    elif scale == 3:
        ups.append(_init_conv(next(keys), 9 * feat, feat))
    p["upscale"] = ups
    p["tail"] = _init_conv(next(keys), num_channel, feat)
    return p


if __name__ == "__main__":
    root = jax.random.PRNGKey(0)
    kparams, kx = jax.random.split(root)

    # OurNetwork: one SingleNetwork per scale in [1, 2, 3, 4], num_channel=3.
    config = {s: {"block": 1, "feature": 16} for s in (1, 2, 3, 4)}
    skeys = jax.random.split(kparams, 4)
    networks = {
        s: init_single_network(skeys[i], config[s]["block"],
                               config[s]["feature"], 3, s)
        for i, s in enumerate((1, 2, 3, 4))
    }

    target_scale = 2                       # OurNetwork.set_target_scale(2)
    n, c, h, w = 2, 3, 14, 14              # padded plane = 16*16 = 256 lanes
    x = jax.random.normal(kx, (n, c, h, w), jnp.float32)

    fwd = jax.jit(functools.partial(our_network_forward_pallas,
                                    target_scale=target_scale))
    y = fwd(networks, x)
    jax.block_until_ready(y)

    ref = single_network_forward_ref(networks[target_scale], x, target_scale)
    assert y.shape == (n, c, h * target_scale, w * target_scale), y.shape
    # Tolerance sized for MXU-vs-XLA f32 accumulation-order differences.
    err = float(jnp.max(jnp.abs(y - ref)))
    assert jnp.allclose(y, ref, atol=5e-2, rtol=5e-2), err
    print("KERNEL_OK")
</pallas_src>

<mosaic_0001>
module attributes {stable_mosaic.version = 11 : i64} {
  func.func @_fused_network_kernel(%arg0: i32, %arg1: memref<1x8x256xf32, #tpu.memory_space<vmem>>, %arg2: memref<1x256xf32, #tpu.memory_space<vmem>>, %arg3: memref<16x72xf32, #tpu.memory_space<vmem>>, %arg4: memref<16x1xf32, #tpu.memory_space<vmem>>, %arg5: memref<32x144xf32, #tpu.memory_space<vmem>>, %arg6: memref<32x1xf32, #tpu.memory_space<vmem>>, %arg7: memref<16x288xf32, #tpu.memory_space<vmem>>, %arg8: memref<16x1xf32, #tpu.memory_space<vmem>>, %arg9: memref<16x144xf32, #tpu.memory_space<vmem>>, %arg10: memref<16x1xf32, #tpu.memory_space<vmem>>, %arg11: memref<1x16xf32, #tpu.memory_space<vmem>>, %arg12: memref<1x1xf32, #tpu.memory_space<vmem>>, %arg13: memref<16x1xf32, #tpu.memory_space<vmem>>, %arg14: memref<16x1xf32, #tpu.memory_space<vmem>>, %arg15: memref<16x144xf32, #tpu.memory_space<vmem>>, %arg16: memref<16x1xf32, #tpu.memory_space<vmem>>, %arg17: memref<16x144xf32, #tpu.memory_space<vmem>>, %arg18: memref<16x1xf32, #tpu.memory_space<vmem>>, %arg19: memref<16x144xf32, #tpu.memory_space<vmem>>, %arg20: memref<16x1xf32, #tpu.memory_space<vmem>>, %arg21: memref<64x144xf32, #tpu.memory_space<vmem>>, %arg22: memref<64x1xf32, #tpu.memory_space<vmem>>, %arg23: memref<1x64x256xf32, #tpu.memory_space<vmem>>) attributes {dimension_semantics = [#tpu.dimension_semantics<parallel>], iteration_bounds = array<i64: 2>, scalar_prefetch = 0 : i64, scratch_operands = 0 : i64, tpu.core_type = #tpu.core_type<tc>, window_params = [{transform_indices = @transform_0, window_bounds = array<i64: 1, 8, 256>}, {pipeline_mode = #tpu.pipeline_mode<synchronous>, transform_indices = @transform_1, window_bounds = array<i64: 1, 256>}, {pipeline_mode = #tpu.pipeline_mode<synchronous>, transform_indices = @transform_2, window_bounds = array<i64: 16, 72>}, {pipeline_mode = #tpu.pipeline_mode<synchronous>, transform_indices = @transform_3, window_bounds = array<i64: 16, 1>}, {pipeline_mode = #tpu.pipeline_mode<synchronous>, transform_indices = @transform_4, window_bounds = array<i64: 32, 144>}, {pipeline_mode = #tpu.pipeline_mode<synchronous>, transform_indices = @transform_5, window_bounds = array<i64: 32, 1>}, {pipeline_mode = #tpu.pipeline_mode<synchronous>, transform_indices = @transform_6, window_bounds = array<i64: 16, 288>}, {pipeline_mode = #tpu.pipeline_mode<synchronous>, transform_indices = @transform_7, window_bounds = array<i64: 16, 1>}, {pipeline_mode = #tpu.pipeline_mode<synchronous>, transform_indices = @transform_8, window_bounds = array<i64: 16, 144>}, {pipeline_mode = #tpu.pipeline_mode<synchronous>, transform_indices = @transform_9, window_bounds = array<i64: 16, 1>}, {pipeline_mode = #tpu.pipeline_mode<synchronous>, transform_indices = @transform_10, window_bounds = array<i64: 1, 16>}, {pipeline_mode = #tpu.pipeline_mode<synchronous>, transform_indices = @transform_11, window_bounds = array<i64: 1, 1>}, {pipeline_mode = #tpu.pipeline_mode<synchronous>, transform_indices = @transform_12, window_bounds = array<i64: 16, 1>}, {pipeline_mode = #tpu.pipeline_mode<synchronous>, transform_indices = @transform_13, window_bounds = array<i64: 16, 1>}, {pipeline_mode = #tpu.pipeline_mode<synchronous>, transform_indices = @transform_14, window_bounds = array<i64: 16, 144>}, {pipeline_mode = #tpu.pipeline_mode<synchronous>, transform_indices = @transform_15, window_bounds = array<i64: 16, 1>}, {pipeline_mode = #tpu.pipeline_mode<synchronous>, transform_indices = @transform_16, window_bounds = array<i64: 16, 144>}, {pipeline_mode = #tpu.pipeline_mode<synchronous>, transform_indices = @transform_17, window_bounds = array<i64: 16, 1>}, {pipeline_mode = #tpu.pipeline_mode<synchronous>, transform_indices = @transform_18, window_bounds = array<i64: 16, 144>}, {pipeline_mode = #tpu.pipeline_mode<synchronous>, transform_indices = @transform_19, window_bounds = array<i64: 16, 1>}, {pipeline_mode = #tpu.pipeline_mode<synchronous>, transform_indices = @transform_20, window_bounds = array<i64: 64, 144>}, {pipeline_mode = #tpu.pipeline_mode<synchronous>, transform_indices = @transform_21, window_bounds = array<i64: 64, 1>}, {transform_indices = @transform_22, window_bounds = array<i64: 1, 64, 256>}]} {
    %c0 = arith.constant 0 : index
    %c0_0 = arith.constant 0 : index
    %0 = vector.load %arg2[%c0, %c0_0] : memref<1x256xf32, #tpu.memory_space<vmem>>, vector<1x256xf32>
    %c0_1 = arith.constant 0 : index
    %c0_2 = arith.constant 0 : index
    %c0_3 = arith.constant 0 : index
    %1 = vector.load %arg1[%c0_1, %c0_2, %c0_3] : memref<1x8x256xf32, #tpu.memory_space<vmem>>, vector<1x8x256xf32>
    %2 = vector.shape_cast %1 : vector<1x8x256xf32> to vector<8x256xf32>
    %c0_4 = arith.constant 0 : index
    %c0_5 = arith.constant 0 : index
    %3 = vector.load %arg3[%c0_4, %c0_5] : memref<16x72xf32, #tpu.memory_space<vmem>>, vector<16x72xf32>
    %c0_6 = arith.constant 0 : index
    %c0_7 = arith.constant 0 : index
    %4 = vector.load %arg4[%c0_6, %c0_7] : memref<16x1xf32, #tpu.memory_space<vmem>>, vector<16x1xf32>
    %cst = arith.constant 0.000000e+00 : f32
    %5 = vector.broadcast %cst : f32 to vector<8x128xf32>
    %6 = tpu.concatenate %5, %2, %5 in 1 : vector<8x128xf32>, vector<8x256xf32>, vector<8x128xf32> -> vector<8x512xf32>
    %7 = vector.extract_strided_slice %6 {offsets = [0, 111], sizes = [8, 256], strides = [1, 1]} : vector<8x512xf32> to vector<8x256xf32>
    %8 = vector.extract_strided_slice %6 {offsets = [0, 112], sizes = [8, 256], strides = [1, 1]} : vector<8x512xf32> to vector<8x256xf32>
    %9 = vector.extract_strided_slice %6 {offsets = [0, 113], sizes = [8, 256], strides = [1, 1]} : vector<8x512xf32> to vector<8x256xf32>
    %10 = vector.extract_strided_slice %6 {offsets = [0, 127], sizes = [8, 256], strides = [1, 1]} : vector<8x512xf32> to vector<8x256xf32>
    %11 = vector.extract_strided_slice %6 {offsets = [0, 128], sizes = [8, 256], strides = [1, 1]} : vector<8x512xf32> to vector<8x256xf32>
    %12 = vector.extract_strided_slice %6 {offsets = [0, 129], sizes = [8, 256], strides = [1, 1]} : vector<8x512xf32> to vector<8x256xf32>
    %13 = vector.extract_strided_slice %6 {offsets = [0, 143], sizes = [8, 256], strides = [1, 1]} : vector<8x512xf32> to vector<8x256xf32>
    %14 = vector.extract_strided_slice %6 {offsets = [0, 144], sizes = [8, 256], strides = [1, 1]} : vector<8x512xf32> to vector<8x256xf32>
    %15 = vector.extract_strided_slice %6 {offsets = [0, 145], sizes = [8, 256], strides = [1, 1]} : vector<8x512xf32> to vector<8x256xf32>
    %16 = tpu.concatenate %7, %8, %9, %10, %11, %12, %13, %14, %15 in 0 : vector<8x256xf32>, vector<8x256xf32>, vector<8x256xf32>, vector<8x256xf32>, vector<8x256xf32>, vector<8x256xf32>, vector<8x256xf32>, vector<8x256xf32>, vector<8x256xf32> -> vector<72x256xf32>
    %cst_8 = arith.constant dense<0.000000e+00> : vector<16x256xf32>
    %17 = tpu.matmul %3, %16, %cst_8 {dimension_numbers = #tpu.dot_dimension_numbers<[1], [0], [0], [1], [0, 0, 1, 1], [], []>} : vector<16x72xf32>, vector<72x256xf32>, vector<16x256xf32> -> vector<16x256xf32>
    %18 = vector.broadcast %4 : vector<16x1xf32> to vector<16x256xf32>
    %19 = arith.addf %17, %18 : vector<16x256xf32>
    %20 = vector.broadcast %0 : vector<1x256xf32> to vector<16x256xf32>
    %21 = arith.mulf %19, %20 : vector<16x256xf32>
    %c0_9 = arith.constant 0 : index
    %c0_10 = arith.constant 0 : index
    %22 = vector.load %arg5[%c0_9, %c0_10] : memref<32x144xf32, #tpu.memory_space<vmem>>, vector<32x144xf32>
    %c0_11 = arith.constant 0 : index
    %c0_12 = arith.constant 0 : index
    %23 = vector.load %arg6[%c0_11, %c0_12] : memref<32x1xf32, #tpu.memory_space<vmem>>, vector<32x1xf32>
    %cst_13 = arith.constant 0.000000e+00 : f32
    %24 = vector.broadcast %cst_13 : f32 to vector<16x128xf32>
    %25 = tpu.concatenate %24, %21, %24 in 1 : vector<16x128xf32>, vector<16x256xf32>, vector<16x128xf32> -> vector<16x512xf32>
    %26 = vector.extract_strided_slice %25 {offsets = [0, 111], sizes = [16, 256], strides = [1, 1]} : vector<16x512xf32> to vector<16x256xf32>
    %27 = vector.extract_strided_slice %25 {offsets = [0, 112], sizes = [16, 256], strides = [1, 1]} : vector<16x512xf32> to vector<16x256xf32>
    %28 = vector.extract_strided_slice %25 {offsets = [0, 113], sizes = [16, 256], strides = [1, 1]} : vector<16x512xf32> to vector<16x256xf32>
    %29 = vector.extract_strided_slice %25 {offsets = [0, 127], sizes = [16, 256], strides = [1, 1]} : vector<16x512xf32> to vector<16x256xf32>
    %30 = vector.extract_strided_slice %25 {offsets = [0, 128], sizes = [16, 256], strides = [1, 1]} : vector<16x512xf32> to vector<16x256xf32>
    %31 = vector.extract_strided_slice %25 {offsets = [0, 129], sizes = [16, 256], strides = [1, 1]} : vector<16x512xf32> to vector<16x256xf32>
    %32 = vector.extract_strided_slice %25 {offsets = [0, 143], sizes = [16, 256], strides = [1, 1]} : vector<16x512xf32> to vector<16x256xf32>
    %33 = vector.extract_strided_slice %25 {offsets = [0, 144], sizes = [16, 256], strides = [1, 1]} : vector<16x512xf32> to vector<16x256xf32>
    %34 = vector.extract_strided_slice %25 {offsets = [0, 145], sizes = [16, 256], strides = [1, 1]} : vector<16x512xf32> to vector<16x256xf32>
    %35 = tpu.concatenate %26, %27, %28, %29, %30, %31, %32, %33, %34 in 0 : vector<16x256xf32>, vector<16x256xf32>, vector<16x256xf32>, vector<16x256xf32>, vector<16x256xf32>, vector<16x256xf32>, vector<16x256xf32>, vector<16x256xf32>, vector<16x256xf32> -> vector<144x256xf32>
    %cst_14 = arith.constant dense<0.000000e+00> : vector<32x256xf32>
    %36 = tpu.matmul %22, %35, %cst_14 {dimension_numbers = #tpu.dot_dimension_numbers<[1], [0], [0], [1], [0, 0, 1, 1], [], []>} : vector<32x144xf32>, vector<144x256xf32>, vector<32x256xf32> -> vector<32x256xf32>
    %37 = vector.broadcast %23 : vector<32x1xf32> to vector<32x256xf32>
    %38 = arith.addf %36, %37 : vector<32x256xf32>
    %39 = vector.broadcast %0 : vector<1x256xf32> to vector<32x256xf32>
    %40 = arith.mulf %38, %39 : vector<32x256xf32>
    %c0_15 = arith.constant 0 : index
    %c0_16 = arith.constant 0 : index
    %41 = vector.load %arg7[%c0_15, %c0_16] : memref<16x288xf32, #tpu.memory_space<vmem>>, vector<16x288xf32>
    %c0_17 = arith.constant 0 : index
    %c0_18 = arith.constant 0 : index
    %42 = vector.load %arg8[%c0_17, %c0_18] : memref<16x1xf32, #tpu.memory_space<vmem>>, vector<16x1xf32>
    %cst_19 = arith.constant 0.000000e+00 : f32
    %43 = vector.broadcast %cst_19 : f32 to vector<32x128xf32>
    %44 = tpu.concatenate %43, %40, %43 in 1 : vector<32x128xf32>, vector<32x256xf32>, vector<32x128xf32> -> vector<32x512xf32>
    %45 = vector.extract_strided_slice %44 {offsets = [0, 111], sizes = [32, 256], strides = [1, 1]} : vector<32x512xf32> to vector<32x256xf32>
    %46 = vector.extract_strided_slice %44 {offsets = [0, 112], sizes = [32, 256], strides = [1, 1]} : vector<32x512xf32> to vector<32x256xf32>
    %47 = vector.extract_strided_slice %44 {offsets = [0, 113], sizes = [32, 256], strides = [1, 1]} : vector<32x512xf32> to vector<32x256xf32>
    %48 = vector.extract_strided_slice %44 {offsets = [0, 127], sizes = [32, 256], strides = [1, 1]} : vector<32x512xf32> to vector<32x256xf32>
    %49 = vector.extract_strided_slice %44 {offsets = [0, 128], sizes = [32, 256], strides = [1, 1]} : vector<32x512xf32> to vector<32x256xf32>
    %50 = vector.extract_strided_slice %44 {offsets = [0, 129], sizes = [32, 256], strides = [1, 1]} : vector<32x512xf32> to vector<32x256xf32>
    %51 = vector.extract_strided_slice %44 {offsets = [0, 143], sizes = [32, 256], strides = [1, 1]} : vector<32x512xf32> to vector<32x256xf32>
    %52 = vector.extract_strided_slice %44 {offsets = [0, 144], sizes = [32, 256], strides = [1, 1]} : vector<32x512xf32> to vector<32x256xf32>
    %53 = vector.extract_strided_slice %44 {offsets = [0, 145], sizes = [32, 256], strides = [1, 1]} : vector<32x512xf32> to vector<32x256xf32>
    %54 = tpu.concatenate %45, %46, %47, %48, %49, %50, %51, %52, %53 in 0 : vector<32x256xf32>, vector<32x256xf32>, vector<32x256xf32>, vector<32x256xf32>, vector<32x256xf32>, vector<32x256xf32>, vector<32x256xf32>, vector<32x256xf32>, vector<32x256xf32> -> vector<288x256xf32>
    %cst_20 = arith.constant dense<0.000000e+00> : vector<16x256xf32>
    %55 = tpu.matmul %41, %54, %cst_20 {dimension_numbers = #tpu.dot_dimension_numbers<[1], [0], [0], [1], [0, 0, 1, 1], [], []>} : vector<16x288xf32>, vector<288x256xf32>, vector<16x256xf32> -> vector<16x256xf32>
    %56 = vector.broadcast %42 : vector<16x1xf32> to vector<16x256xf32>
    %57 = arith.addf %55, %56 : vector<16x256xf32>
    %58 = vector.broadcast %0 : vector<1x256xf32> to vector<16x256xf32>
    %59 = arith.mulf %57, %58 : vector<16x256xf32>
    %c0_21 = arith.constant 0 : index
    %c0_22 = arith.constant 0 : index
    %60 = vector.load %arg9[%c0_21, %c0_22] : memref<16x144xf32, #tpu.memory_space<vmem>>, vector<16x144xf32>
    %c0_23 = arith.constant 0 : index
    %c0_24 = arith.constant 0 : index
    %61 = vector.load %arg10[%c0_23, %c0_24] : memref<16x1xf32, #tpu.memory_space<vmem>>, vector<16x1xf32>
    %cst_25 = arith.constant 0.000000e+00 : f32
    %62 = vector.broadcast %cst_25 : f32 to vector<16x128xf32>
    %63 = tpu.concatenate %62, %59, %62 in 1 : vector<16x128xf32>, vector<16x256xf32>, vector<16x128xf32> -> vector<16x512xf32>
    %64 = vector.extract_strided_slice %63 {offsets = [0, 111], sizes = [16, 256], strides = [1, 1]} : vector<16x512xf32> to vector<16x256xf32>
    %65 = vector.extract_strided_slice %63 {offsets = [0, 112], sizes = [16, 256], strides = [1, 1]} : vector<16x512xf32> to vector<16x256xf32>
    %66 = vector.extract_strided_slice %63 {offsets = [0, 113], sizes = [16, 256], strides = [1, 1]} : vector<16x512xf32> to vector<16x256xf32>
    %67 = vector.extract_strided_slice %63 {offsets = [0, 127], sizes = [16, 256], strides = [1, 1]} : vector<16x512xf32> to vector<16x256xf32>
    %68 = vector.extract_strided_slice %63 {offsets = [0, 128], sizes = [16, 256], strides = [1, 1]} : vector<16x512xf32> to vector<16x256xf32>
    %69 = vector.extract_strided_slice %63 {offsets = [0, 129], sizes = [16, 256], strides = [1, 1]} : vector<16x512xf32> to vector<16x256xf32>
    %70 = vector.extract_strided_slice %63 {offsets = [0, 143], sizes = [16, 256], strides = [1, 1]} : vector<16x512xf32> to vector<16x256xf32>
    %71 = vector.extract_strided_slice %63 {offsets = [0, 144], sizes = [16, 256], strides = [1, 1]} : vector<16x512xf32> to vector<16x256xf32>
    %72 = vector.extract_strided_slice %63 {offsets = [0, 145], sizes = [16, 256], strides = [1, 1]} : vector<16x512xf32> to vector<16x256xf32>
    %73 = tpu.concatenate %64, %65, %66, %67, %68, %69, %70, %71, %72 in 0 : vector<16x256xf32>, vector<16x256xf32>, vector<16x256xf32>, vector<16x256xf32>, vector<16x256xf32>, vector<16x256xf32>, vector<16x256xf32>, vector<16x256xf32>, vector<16x256xf32> -> vector<144x256xf32>
    %cst_26 = arith.constant dense<0.000000e+00> : vector<16x256xf32>
    %74 = tpu.matmul %60, %73, %cst_26 {dimension_numbers = #tpu.dot_dimension_numbers<[1], [0], [0], [1], [0, 0, 1, 1], [], []>} : vector<16x144xf32>, vector<144x256xf32>, vector<16x256xf32> -> vector<16x256xf32>
    %75 = vector.broadcast %61 : vector<16x1xf32> to vector<16x256xf32>
    %76 = arith.addf %74, %75 : vector<16x256xf32>
    %77 = vector.broadcast %0 : vector<1x256xf32> to vector<16x256xf32>
    %78 = arith.mulf %76, %77 : vector<16x256xf32>
    %79 = vector.broadcast %0 : vector<1x256xf32> to vector<16x256xf32>
    %80 = arith.mulf %78, %79 : vector<16x256xf32>
    %cst_27 = arith.constant dense<0.000000e+00> : vector<16xf32>
    %81 = vector.multi_reduction <add>, %80, %cst_27 [1] : vector<16x256xf32> to vector<16xf32>
    %82 = vector.shape_cast %81 : vector<16xf32> to vector<16x1xf32>
    %cst_28 = arith.constant 0.00510204071 : f32
    %83 = vector.broadcast %cst_28 : f32 to vector<16x1xf32>
    %84 = arith.mulf %82, %83 : vector<16x1xf32>
    %c0_29 = arith.constant 0 : index
    %c0_30 = arith.constant 0 : index
    %85 = vector.load %arg11[%c0_29, %c0_30] : memref<1x16xf32, #tpu.memory_space<vmem>>, vector<1x16xf32>
    %cst_31 = arith.constant dense<0.000000e+00> : vector<1x1xf32>
    %86 = tpu.matmul %85, %84, %cst_31 {dimension_numbers = #tpu.dot_dimension_numbers<[1], [0], [0], [1], [0, 0, 1, 1], [], []>} : vector<1x16xf32>, vector<16x1xf32>, vector<1x1xf32> -> vector<1x1xf32>
    %c0_32 = arith.constant 0 : index
    %c0_33 = arith.constant 0 : index
    %87 = vector.load %arg12[%c0_32, %c0_33] : memref<1x1xf32, #tpu.memory_space<vmem>>, vector<1x1xf32>
    %88 = arith.addf %86, %87 : vector<1x1xf32>
    %cst_34 = arith.constant 0.000000e+00 : f32
    %89 = vector.broadcast %cst_34 : f32 to vector<1x1xf32>
    %90 = arith.maximumf %88, %89 : vector<1x1xf32>
    %c0_35 = arith.constant 0 : index
    %c0_36 = arith.constant 0 : index
    %91 = vector.load %arg13[%c0_35, %c0_36] : memref<16x1xf32, #tpu.memory_space<vmem>>, vector<16x1xf32>
    %cst_37 = arith.constant dense<0.000000e+00> : vector<16x1xf32>
    %92 = tpu.matmul %91, %90, %cst_37 {dimension_numbers = #tpu.dot_dimension_numbers<[1], [0], [0], [1], [0, 0, 1, 1], [], []>} : vector<16x1xf32>, vector<1x1xf32>, vector<16x1xf32> -> vector<16x1xf32>
    %c0_38 = arith.constant 0 : index
    %c0_39 = arith.constant 0 : index
    %93 = vector.load %arg14[%c0_38, %c0_39] : memref<16x1xf32, #tpu.memory_space<vmem>>, vector<16x1xf32>
    %94 = arith.addf %92, %93 : vector<16x1xf32>
    %cst_40 = arith.constant 0.000000e+00 : f32
    %95 = vector.broadcast %cst_40 : f32 to vector<16x1xf32>
    %96 = arith.subf %95, %94 : vector<16x1xf32>
    %97 = math.exp %96 : vector<16x1xf32>
    %cst_41 = arith.constant 1.000000e+00 : f32
    %98 = vector.broadcast %cst_41 : f32 to vector<16x1xf32>
    %99 = arith.addf %98, %97 : vector<16x1xf32>
    %cst_42 = arith.constant 1.000000e+00 : f32
    %100 = vector.broadcast %cst_42 : f32 to vector<16x1xf32>
    %101 = arith.divf %100, %99 : vector<16x1xf32>
    %102 = vector.broadcast %101 : vector<16x1xf32> to vector<16x256xf32>
    %103 = arith.mulf %78, %102 : vector<16x256xf32>
    %104 = arith.addf %21, %103 : vector<16x256xf32>
    %c0_43 = arith.constant 0 : index
    %c0_44 = arith.constant 0 : index
    %105 = vector.load %arg15[%c0_43, %c0_44] : memref<16x144xf32, #tpu.memory_space<vmem>>, vector<16x144xf32>
    %c0_45 = arith.constant 0 : index
    %c0_46 = arith.constant 0 : index
    %106 = vector.load %arg16[%c0_45, %c0_46] : memref<16x1xf32, #tpu.memory_space<vmem>>, vector<16x1xf32>
    %cst_47 = arith.constant 0.000000e+00 : f32
    %107 = vector.broadcast %cst_47 : f32 to vector<16x128xf32>
    %108 = tpu.concatenate %107, %104, %107 in 1 : vector<16x128xf32>, vector<16x256xf32>, vector<16x128xf32> -> vector<16x512xf32>
    %109 = vector.extract_strided_slice %108 {offsets = [0, 111], sizes = [16, 256], strides = [1, 1]} : vector<16x512xf32> to vector<16x256xf32>
    %110 = vector.extract_strided_slice %108 {offsets = [0, 112], sizes = [16, 256], strides = [1, 1]} : vector<16x512xf32> to vector<16x256xf32>
    %111 = vector.extract_strided_slice %108 {offsets = [0, 113], sizes = [16, 256], strides = [1, 1]} : vector<16x512xf32> to vector<16x256xf32>
    %112 = vector.extract_strided_slice %108 {offsets = [0, 127], sizes = [16, 256], strides = [1, 1]} : vector<16x512xf32> to vector<16x256xf32>
    %113 = vector.extract_strided_slice %108 {offsets = [0, 128], sizes = [16, 256], strides = [1, 1]} : vector<16x512xf32> to vector<16x256xf32>
    %114 = vector.extract_strided_slice %108 {offsets = [0, 129], sizes = [16, 256], strides = [1, 1]} : vector<16x512xf32> to vector<16x256xf32>
    %115 = vector.extract_strided_slice %108 {offsets = [0, 143], sizes = [16, 256], strides = [1, 1]} : vector<16x512xf32> to vector<16x256xf32>
    %116 = vector.extract_strided_slice %108 {offsets = [0, 144], sizes = [16, 256], strides = [1, 1]} : vector<16x512xf32> to vector<16x256xf32>
    %117 = vector.extract_strided_slice %108 {offsets = [0, 145], sizes = [16, 256], strides = [1, 1]} : vector<16x512xf32> to vector<16x256xf32>
    %118 = tpu.concatenate %109, %110, %111, %112, %113, %114, %115, %116, %117 in 0 : vector<16x256xf32>, vector<16x256xf32>, vector<16x256xf32>, vector<16x256xf32>, vector<16x256xf32>, vector<16x256xf32>, vector<16x256xf32>, vector<16x256xf32>, vector<16x256xf32> -> vector<144x256xf32>
    %cst_48 = arith.constant dense<0.000000e+00> : vector<16x256xf32>
    %119 = tpu.matmul %105, %118, %cst_48 {dimension_numbers = #tpu.dot_dimension_numbers<[1], [0], [0], [1], [0, 0, 1, 1], [], []>} : vector<16x144xf32>, vector<144x256xf32>, vector<16x256xf32> -> vector<16x256xf32>
    %120 = vector.broadcast %106 : vector<16x1xf32> to vector<16x256xf32>
    %121 = arith.addf %119, %120 : vector<16x256xf32>
    %122 = vector.broadcast %0 : vector<1x256xf32> to vector<16x256xf32>
    %123 = arith.mulf %121, %122 : vector<16x256xf32>
    %c0_49 = arith.constant 0 : index
    %c0_50 = arith.constant 0 : index
    %124 = vector.load %arg17[%c0_49, %c0_50] : memref<16x144xf32, #tpu.memory_space<vmem>>, vector<16x144xf32>
    %c0_51 = arith.constant 0 : index
    %c0_52 = arith.constant 0 : index
    %125 = vector.load %arg18[%c0_51, %c0_52] : memref<16x1xf32, #tpu.memory_space<vmem>>, vector<16x1xf32>
    %cst_53 = arith.constant 0.000000e+00 : f32
    %126 = vector.broadcast %cst_53 : f32 to vector<16x128xf32>
    %127 = tpu.concatenate %126, %123, %126 in 1 : vector<16x128xf32>, vector<16x256xf32>, vector<16x128xf32> -> vector<16x512xf32>
    %128 = vector.extract_strided_slice %127 {offsets = [0, 111], sizes = [16, 256], strides = [1, 1]} : vector<16x512xf32> to vector<16x256xf32>
    %129 = vector.extract_strided_slice %127 {offsets = [0, 112], sizes = [16, 256], strides = [1, 1]} : vector<16x512xf32> to vector<16x256xf32>
    %130 = vector.extract_strided_slice %127 {offsets = [0, 113], sizes = [16, 256], strides = [1, 1]} : vector<16x512xf32> to vector<16x256xf32>
    %131 = vector.extract_strided_slice %127 {offsets = [0, 127], sizes = [16, 256], strides = [1, 1]} : vector<16x512xf32> to vector<16x256xf32>
    %132 = vector.extract_strided_slice %127 {offsets = [0, 128], sizes = [16, 256], strides = [1, 1]} : vector<16x512xf32> to vector<16x256xf32>
    %133 = vector.extract_strided_slice %127 {offsets = [0, 129], sizes = [16, 256], strides = [1, 1]} : vector<16x512xf32> to vector<16x256xf32>
    %134 = vector.extract_strided_slice %127 {offsets = [0, 143], sizes = [16, 256], strides = [1, 1]} : vector<16x512xf32> to vector<16x256xf32>
    %135 = vector.extract_strided_slice %127 {offsets = [0, 144], sizes = [16, 256], strides = [1, 1]} : vector<16x512xf32> to vector<16x256xf32>
    %136 = vector.extract_strided_slice %127 {offsets = [0, 145], sizes = [16, 256], strides = [1, 1]} : vector<16x512xf32> to vector<16x256xf32>
    %137 = tpu.concatenate %128, %129, %130, %131, %132, %133, %134, %135, %136 in 0 : vector<16x256xf32>, vector<16x256xf32>, vector<16x256xf32>, vector<16x256xf32>, vector<16x256xf32>, vector<16x256xf32>, vector<16x256xf32>, vector<16x256xf32>, vector<16x256xf32> -> vector<144x256xf32>
    %cst_54 = arith.constant dense<0.000000e+00> : vector<16x256xf32>
    %138 = tpu.matmul %124, %137, %cst_54 {dimension_numbers = #tpu.dot_dimension_numbers<[1], [0], [0], [1], [0, 0, 1, 1], [], []>} : vector<16x144xf32>, vector<144x256xf32>, vector<16x256xf32> -> vector<16x256xf32>
    %139 = vector.broadcast %125 : vector<16x1xf32> to vector<16x256xf32>
    %140 = arith.addf %138, %139 : vector<16x256xf32>
    %141 = vector.broadcast %0 : vector<1x256xf32> to vector<16x256xf32>
    %142 = arith.mulf %140, %141 : vector<16x256xf32>
    %143 = arith.addf %104, %142 : vector<16x256xf32>
    %c0_55 = arith.constant 0 : index
    %c0_56 = arith.constant 0 : index
    %144 = vector.load %arg19[%c0_55, %c0_56] : memref<16x144xf32, #tpu.memory_space<vmem>>, vector<16x144xf32>
    %c0_57 = arith.constant 0 : index
    %c0_58 = arith.constant 0 : index
    %145 = vector.load %arg20[%c0_57, %c0_58] : memref<16x1xf32, #tpu.memory_space<vmem>>, vector<16x1xf32>
    %cst_59 = arith.constant 0.000000e+00 : f32
    %146 = vector.broadcast %cst_59 : f32 to vector<16x128xf32>
    %147 = tpu.concatenate %146, %143, %146 in 1 : vector<16x128xf32>, vector<16x256xf32>, vector<16x128xf32> -> vector<16x512xf32>
    %148 = vector.extract_strided_slice %147 {offsets = [0, 111], sizes = [16, 256], strides = [1, 1]} : vector<16x512xf32> to vector<16x256xf32>
    %149 = vector.extract_strided_slice %147 {offsets = [0, 112], sizes = [16, 256], strides = [1, 1]} : vector<16x512xf32> to vector<16x256xf32>
    %150 = vector.extract_strided_slice %147 {offsets = [0, 113], sizes = [16, 256], strides = [1, 1]} : vector<16x512xf32> to vector<16x256xf32>
    %151 = vector.extract_strided_slice %147 {offsets = [0, 127], sizes = [16, 256], strides = [1, 1]} : vector<16x512xf32> to vector<16x256xf32>
    %152 = vector.extract_strided_slice %147 {offsets = [0, 128], sizes = [16, 256], strides = [1, 1]} : vector<16x512xf32> to vector<16x256xf32>
    %153 = vector.extract_strided_slice %147 {offsets = [0, 129], sizes = [16, 256], strides = [1, 1]} : vector<16x512xf32> to vector<16x256xf32>
    %154 = vector.extract_strided_slice %147 {offsets = [0, 143], sizes = [16, 256], strides = [1, 1]} : vector<16x512xf32> to vector<16x256xf32>
    %155 = vector.extract_strided_slice %147 {offsets = [0, 144], sizes = [16, 256], strides = [1, 1]} : vector<16x512xf32> to vector<16x256xf32>
    %156 = vector.extract_strided_slice %147 {offsets = [0, 145], sizes = [16, 256], strides = [1, 1]} : vector<16x512xf32> to vector<16x256xf32>
    %157 = tpu.concatenate %148, %149, %150, %151, %152, %153, %154, %155, %156 in 0 : vector<16x256xf32>, vector<16x256xf32>, vector<16x256xf32>, vector<16x256xf32>, vector<16x256xf32>, vector<16x256xf32>, vector<16x256xf32>, vector<16x256xf32>, vector<16x256xf32> -> vector<144x256xf32>
    %cst_60 = arith.constant dense<0.000000e+00> : vector<16x256xf32>
    %158 = tpu.matmul %144, %157, %cst_60 {dimension_numbers = #tpu.dot_dimension_numbers<[1], [0], [0], [1], [0, 0, 1, 1], [], []>} : vector<16x144xf32>, vector<144x256xf32>, vector<16x256xf32> -> vector<16x256xf32>
    %159 = vector.broadcast %145 : vector<16x1xf32> to vector<16x256xf32>
    %160 = arith.addf %158, %159 : vector<16x256xf32>
    %161 = vector.broadcast %0 : vector<1x256xf32> to vector<16x256xf32>
    %162 = arith.mulf %160, %161 : vector<16x256xf32>
    %163 = arith.addf %162, %21 : vector<16x256xf32>
    %c0_61 = arith.constant 0 : index
    %c0_62 = arith.constant 0 : index
    %164 = vector.load %arg21[%c0_61, %c0_62] : memref<64x144xf32, #tpu.memory_space<vmem>>, vector<64x144xf32>
    %c0_63 = arith.constant 0 : index
    %c0_64 = arith.constant 0 : index
    %165 = vector.load %arg22[%c0_63, %c0_64] : memref<64x1xf32, #tpu.memory_space<vmem>>, vector<64x1xf32>
    %cst_65 = arith.constant 0.000000e+00 : f32
    %166 = vector.broadcast %cst_65 : f32 to vector<16x128xf32>
    %167 = tpu.concatenate %166, %163, %166 in 1 : vector<16x128xf32>, vector<16x256xf32>, vector<16x128xf32> -> vector<16x512xf32>
    %168 = vector.extract_strided_slice %167 {offsets = [0, 111], sizes = [16, 256], strides = [1, 1]} : vector<16x512xf32> to vector<16x256xf32>
    %169 = vector.extract_strided_slice %167 {offsets = [0, 112], sizes = [16, 256], strides = [1, 1]} : vector<16x512xf32> to vector<16x256xf32>
    %170 = vector.extract_strided_slice %167 {offsets = [0, 113], sizes = [16, 256], strides = [1, 1]} : vector<16x512xf32> to vector<16x256xf32>
    %171 = vector.extract_strided_slice %167 {offsets = [0, 127], sizes = [16, 256], strides = [1, 1]} : vector<16x512xf32> to vector<16x256xf32>
    %172 = vector.extract_strided_slice %167 {offsets = [0, 128], sizes = [16, 256], strides = [1, 1]} : vector<16x512xf32> to vector<16x256xf32>
    %173 = vector.extract_strided_slice %167 {offsets = [0, 129], sizes = [16, 256], strides = [1, 1]} : vector<16x512xf32> to vector<16x256xf32>
    %174 = vector.extract_strided_slice %167 {offsets = [0, 143], sizes = [16, 256], strides = [1, 1]} : vector<16x512xf32> to vector<16x256xf32>
    %175 = vector.extract_strided_slice %167 {offsets = [0, 144], sizes = [16, 256], strides = [1, 1]} : vector<16x512xf32> to vector<16x256xf32>
    %176 = vector.extract_strided_slice %167 {offsets = [0, 145], sizes = [16, 256], strides = [1, 1]} : vector<16x512xf32> to vector<16x256xf32>
    %177 = tpu.concatenate %168, %169, %170, %171, %172, %173, %174, %175, %176 in 0 : vector<16x256xf32>, vector<16x256xf32>, vector<16x256xf32>, vector<16x256xf32>, vector<16x256xf32>, vector<16x256xf32>, vector<16x256xf32>, vector<16x256xf32>, vector<16x256xf32> -> vector<144x256xf32>
    %cst_66 = arith.constant dense<0.000000e+00> : vector<64x256xf32>
    %178 = tpu.matmul %164, %177, %cst_66 {dimension_numbers = #tpu.dot_dimension_numbers<[1], [0], [0], [1], [0, 0, 1, 1], [], []>} : vector<64x144xf32>, vector<144x256xf32>, vector<64x256xf32> -> vector<64x256xf32>
    %179 = vector.broadcast %165 : vector<64x1xf32> to vector<64x256xf32>
    %180 = arith.addf %178, %179 : vector<64x256xf32>
    %181 = vector.broadcast %0 : vector<1x256xf32> to vector<64x256xf32>
    %182 = arith.mulf %180, %181 : vector<64x256xf32>
    %c0_67 = arith.constant 0 : index
    %c0_68 = arith.constant 0 : index
    %c0_69 = arith.constant 0 : index
    %183 = vector.load %arg23[%c0_67, %c0_68, %c0_69] : memref<1x64x256xf32, #tpu.memory_space<vmem>>, vector<1x64x256xf32>
    %184 = vector.shape_cast %183 : vector<1x64x256xf32> to vector<64x256xf32>
    %185 = vector.shape_cast %182 : vector<64x256xf32> to vector<1x64x256xf32>
    tpu.vector_store %arg23[%c0_67, %c0_68, %c0_69], %185 {strides = array<i32>} : memref<1x64x256xf32, #tpu.memory_space<vmem>>, vector<1x64x256xf32>,
    return
  }
  func.func @transform_0(%arg0: i32) -> (i32, i32, i32) {
    %c0_i32 = arith.constant 0 : i32
    %c0_i32_0 = arith.constant 0 : i32
    %c0_i32_1 = arith.constant 0 : i32
    return %arg0, %c0_i32, %c0_i32_0 : i32, i32, i32
  }
  func.func @transform_1(%arg0: i32) -> (i32, i32) {
    %c0_i32 = arith.constant 0 : i32
    %c0_i32_0 = arith.constant 0 : i32
    %c0_i32_1 = arith.constant 0 : i32
    return %c0_i32, %c0_i32_0 : i32, i32
  }
  func.func @transform_2(%arg0: i32) -> (i32, i32) {
    %c0_i32 = arith.constant 0 : i32
    %c0_i32_0 = arith.constant 0 : i32
    %c0_i32_1 = arith.constant 0 : i32
    return %c0_i32, %c0_i32_0 : i32, i32
  }
  func.func @transform_3(%arg0: i32) -> (i32, i32) {
    %c0_i32 = arith.constant 0 : i32
    %c0_i32_0 = arith.constant 0 : i32
    %c0_i32_1 = arith.constant 0 : i32
    return %c0_i32, %c0_i32_0 : i32, i32
  }
  func.func @transform_4(%arg0: i32) -> (i32, i32) {
    %c0_i32 = arith.constant 0 : i32
    %c0_i32_0 = arith.constant 0 : i32
    %c0_i32_1 = arith.constant 0 : i32
    return %c0_i32, %c0_i32_0 : i32, i32
  }
  func.func @transform_5(%arg0: i32) -> (i32, i32) {
    %c0_i32 = arith.constant 0 : i32
    %c0_i32_0 = arith.constant 0 : i32
    %c0_i32_1 = arith.constant 0 : i32
    return %c0_i32, %c0_i32_0 : i32, i32
  }
  func.func @transform_6(%arg0: i32) -> (i32, i32) {
    %c0_i32 = arith.constant 0 : i32
    %c0_i32_0 = arith.constant 0 : i32
    %c0_i32_1 = arith.constant 0 : i32
    return %c0_i32, %c0_i32_0 : i32, i32
  }
  func.func @transform_7(%arg0: i32) -> (i32, i32) {
    %c0_i32 = arith.constant 0 : i32
    %c0_i32_0 = arith.constant 0 : i32
    %c0_i32_1 = arith.constant 0 : i32
    return %c0_i32, %c0_i32_0 : i32, i32
  }
  func.func @transform_8(%arg0: i32) -> (i32, i32) {
    %c0_i32 = arith.constant 0 : i32
    %c0_i32_0 = arith.constant 0 : i32
    %c0_i32_1 = arith.constant 0 : i32
    return %c0_i32, %c0_i32_0 : i32, i32
  }
  func.func @transform_9(%arg0: i32) -> (i32, i32) {
    %c0_i32 = arith.constant 0 : i32
    %c0_i32_0 = arith.constant 0 : i32
    %c0_i32_1 = arith.constant 0 : i32
    return %c0_i32, %c0_i32_0 : i32, i32
  }
  func.func @transform_10(%arg0: i32) -> (i32, i32) {
    %c0_i32 = arith.constant 0 : i32
    %c0_i32_0 = arith.constant 0 : i32
    %c0_i32_1 = arith.constant 0 : i32
    return %c0_i32, %c0_i32_0 : i32, i32
  }
  func.func @transform_11(%arg0: i32) -> (i32, i32) {
    %c0_i32 = arith.constant 0 : i32
    %c0_i32_0 = arith.constant 0 : i32
    %c0_i32_1 = arith.constant 0 : i32
    return %c0_i32, %c0_i32_0 : i32, i32
  }
  func.func @transform_12(%arg0: i32) -> (i32, i32) {
    %c0_i32 = arith.constant 0 : i32
    %c0_i32_0 = arith.constant 0 : i32
    %c0_i32_1 = arith.constant 0 : i32
    return %c0_i32, %c0_i32_0 : i32, i32
  }
  func.func @transform_13(%arg0: i32) -> (i32, i32) {
    %c0_i32 = arith.constant 0 : i32
    %c0_i32_0 = arith.constant 0 : i32
    %c0_i32_1 = arith.constant 0 : i32
    return %c0_i32, %c0_i32_0 : i32, i32
  }
  func.func @transform_14(%arg0: i32) -> (i32, i32) {
    %c0_i32 = arith.constant 0 : i32
    %c0_i32_0 = arith.constant 0 : i32
    %c0_i32_1 = arith.constant 0 : i32
    return %c0_i32, %c0_i32_0 : i32, i32
  }
  func.func @transform_15(%arg0: i32) -> (i32, i32) {
    %c0_i32 = arith.constant 0 : i32
    %c0_i32_0 = arith.constant 0 : i32
    %c0_i32_1 = arith.constant 0 : i32
    return %c0_i32, %c0_i32_0 : i32, i32
  }
  func.func @transform_16(%arg0: i32) -> (i32, i32) {
    %c0_i32 = arith.constant 0 : i32
    %c0_i32_0 = arith.constant 0 : i32
    %c0_i32_1 = arith.constant 0 : i32
    return %c0_i32, %c0_i32_0 : i32, i32
  }
  func.func @transform_17(%arg0: i32) -> (i32, i32) {
    %c0_i32 = arith.constant 0 : i32
    %c0_i32_0 = arith.constant 0 : i32
    %c0_i32_1 = arith.constant 0 : i32
    return %c0_i32, %c0_i32_0 : i32, i32
  }
  func.func @transform_18(%arg0: i32) -> (i32, i32) {
    %c0_i32 = arith.constant 0 : i32
    %c0_i32_0 = arith.constant 0 : i32
    %c0_i32_1 = arith.constant 0 : i32
    return %c0_i32, %c0_i32_0 : i32, i32
  }
  func.func @transform_19(%arg0: i32) -> (i32, i32) {
    %c0_i32 = arith.constant 0 : i32
    %c0_i32_0 = arith.constant 0 : i32
    %c0_i32_1 = arith.constant 0 : i32
    return %c0_i32, %c0_i32_0 : i32, i32
  }
  func.func @transform_20(%arg0: i32) -> (i32, i32) {
    %c0_i32 = arith.constant 0 : i32
    %c0_i32_0 = arith.constant 0 : i32
    %c0_i32_1 = arith.constant 0 : i32
    return %c0_i32, %c0_i32_0 : i32, i32
  }
  func.func @transform_21(%arg0: i32) -> (i32, i32) {
    %c0_i32 = arith.constant 0 : i32
    %c0_i32_0 = arith.constant 0 : i32
    %c0_i32_1 = arith.constant 0 : i32
    return %c0_i32, %c0_i32_0 : i32, i32
  }
  func.func @transform_22(%arg0: i32) -> (i32, i32, i32) {
    %c0_i32 = arith.constant 0 : i32
    %c0_i32_0 = arith.constant 0 : i32
    %c0_i32_1 = arith.constant 0 : i32
    return %arg0, %c0_i32, %c0_i32_0 : i32, i32, i32
  }
}

module attributes {stable_mosaic.version = 11 : i64} {
  func.func @_conv3x3_kernel(%arg0: i32, %arg1: memref<1x16x1024xf32, #tpu.memory_space<vmem>>, %arg2: memref<1x1024xf32, #tpu.memory_space<vmem>>, %arg3: memref<3x144xf32, #tpu.memory_space<vmem>>, %arg4: memref<3x1xf32, #tpu.memory_space<vmem>>, %arg5: memref<1x3x1024xf32, #tpu.memory_space<vmem>>) attributes {dimension_semantics = [#tpu.dimension_semantics<parallel>], iteration_bounds = array<i64: 2>, scalar_prefetch = 0 : i64, scratch_operands = 0 : i64, tpu.core_type = #tpu.core_type<tc>, window_params = [{transform_indices = @transform_0, window_bounds = array<i64: 1, 16, 1024>}, {pipeline_mode = #tpu.pipeline_mode<synchronous>, transform_indices = @transform_1, window_bounds = array<i64: 1, 1024>}, {pipeline_mode = #tpu.pipeline_mode<synchronous>, transform_indices = @transform_2, window_bounds = array<i64: 3, 144>}, {pipeline_mode = #tpu.pipeline_mode<synchronous>, transform_indices = @transform_3, window_bounds = array<i64: 3, 1>}, {transform_indices = @transform_4, window_bounds = array<i64: 1, 3, 1024>}]} {
    %c0 = arith.constant 0 : index
    %c0_0 = arith.constant 0 : index
    %c0_1 = arith.constant 0 : index
    %0 = vector.load %arg1[%c0, %c0_0, %c0_1] : memref<1x16x1024xf32, #tpu.memory_space<vmem>>, vector<1x16x1024xf32>
    %1 = vector.shape_cast %0 : vector<1x16x1024xf32> to vector<16x1024xf32>
    %c0_2 = arith.constant 0 : index
    %c0_3 = arith.constant 0 : index
    %2 = vector.load %arg3[%c0_2, %c0_3] : memref<3x144xf32, #tpu.memory_space<vmem>>, vector<3x144xf32>
    %c0_4 = arith.constant 0 : index
    %c0_5 = arith.constant 0 : index
    %3 = vector.load %arg4[%c0_4, %c0_5] : memref<3x1xf32, #tpu.memory_space<vmem>>, vector<3x1xf32>
    %c0_6 = arith.constant 0 : index
    %c0_7 = arith.constant 0 : index
    %4 = vector.load %arg2[%c0_6, %c0_7] : memref<1x1024xf32, #tpu.memory_space<vmem>>, vector<1x1024xf32>
    %cst = arith.constant 0.000000e+00 : f32
    %5 = vector.broadcast %cst : f32 to vector<16x128xf32>
    %6 = tpu.concatenate %5, %1, %5 in 1 : vector<16x128xf32>, vector<16x1024xf32>, vector<16x128xf32> -> vector<16x1280xf32>
    %7 = vector.extract_strided_slice %6 {offsets = [0, 97], sizes = [16, 1024], strides = [1, 1]} : vector<16x1280xf32> to vector<16x1024xf32>
    %8 = vector.extract_strided_slice %6 {offsets = [0, 98], sizes = [16, 1024], strides = [1, 1]} : vector<16x1280xf32> to vector<16x1024xf32>
    %9 = vector.extract_strided_slice %6 {offsets = [0, 99], sizes = [16, 1024], strides = [1, 1]} : vector<16x1280xf32> to vector<16x1024xf32>
    %10 = vector.extract_strided_slice %6 {offsets = [0, 127], sizes = [16, 1024], strides = [1, 1]} : vector<16x1280xf32> to vector<16x1024xf32>
    %11 = vector.extract_strided_slice %6 {offsets = [0, 128], sizes = [16, 1024], strides = [1, 1]} : vector<16x1280xf32> to vector<16x1024xf32>
    %12 = vector.extract_strided_slice %6 {offsets = [0, 129], sizes = [16, 1024], strides = [1, 1]} : vector<16x1280xf32> to vector<16x1024xf32>
    %13 = vector.extract_strided_slice %6 {offsets = [0, 157], sizes = [16, 1024], strides = [1, 1]} : vector<16x1280xf32> to vector<16x1024xf32>
    %14 = vector.extract_strided_slice %6 {offsets = [0, 158], sizes = [16, 1024], strides = [1, 1]} : vector<16x1280xf32> to vector<16x1024xf32>
    %15 = vector.extract_strided_slice %6 {offsets = [0, 159], sizes = [16, 1024], strides = [1, 1]} : vector<16x1280xf32> to vector<16x1024xf32>
    %16 = tpu.concatenate %7, %8, %9, %10, %11, %12, %13, %14, %15 in 0 : vector<16x1024xf32>, vector<16x1024xf32>, vector<16x1024xf32>, vector<16x1024xf32>, vector<16x1024xf32>, vector<16x1024xf32>, vector<16x1024xf32>, vector<16x1024xf32>, vector<16x1024xf32> -> vector<144x1024xf32>
    %cst_8 = arith.constant dense<0.000000e+00> : vector<3x1024xf32>
    %17 = tpu.matmul %2, %16, %cst_8 {dimension_numbers = #tpu.dot_dimension_numbers<[1], [0], [0], [1], [0, 0, 1, 1], [], []>} : vector<3x144xf32>, vector<144x1024xf32>, vector<3x1024xf32> -> vector<3x1024xf32>
    %18 = vector.broadcast %3 : vector<3x1xf32> to vector<3x1024xf32>
    %19 = arith.addf %17, %18 : vector<3x1024xf32>
    %20 = vector.broadcast %4 : vector<1x1024xf32> to vector<3x1024xf32>
    %21 = arith.mulf %19, %20 : vector<3x1024xf32>
    %c0_9 = arith.constant 0 : index
    %c0_10 = arith.constant 0 : index
    %c0_11 = arith.constant 0 : index
    %22 = vector.load %arg5[%c0_9, %c0_10, %c0_11] : memref<1x3x1024xf32, #tpu.memory_space<vmem>>, vector<1x3x1024xf32>
    %23 = vector.shape_cast %22 : vector<1x3x1024xf32> to vector<3x1024xf32>
    %24 = vector.shape_cast %21 : vector<3x1024xf32> to vector<1x3x1024xf32>
    tpu.vector_store %arg5[%c0_9, %c0_10, %c0_11], %24 {strides = array<i32>} : memref<1x3x1024xf32, #tpu.memory_space<vmem>>, vector<1x3x1024xf32>,
    return
  }
  func.func @transform_0(%arg0: i32) -> (i32, i32, i32) {
    %c0_i32 = arith.constant 0 : i32
    %c0_i32_0 = arith.constant 0 : i32
    %c0_i32_1 = arith.constant 0 : i32
    return %arg0, %c0_i32, %c0_i32_0 : i32, i32, i32
  }
  func.func @transform_1(%arg0: i32) -> (i32, i32) {
    %c0_i32 = arith.constant 0 : i32
    %c0_i32_0 = arith.constant 0 : i32
    %c0_i32_1 = arith.constant 0 : i32
    return %c0_i32, %c0_i32_0 : i32, i32
  }
  func.func @transform_2(%arg0: i32) -> (i32, i32) {
    %c0_i32 = arith.constant 0 : i32
    %c0_i32_0 = arith.constant 0 : i32
    %c0_i32_1 = arith.constant 0 : i32
    return %c0_i32, %c0_i32_0 : i32, i32
  }
  func.func @transform_3(%arg0: i32) -> (i32, i32) {
    %c0_i32 = arith.constant 0 : i32
    %c0_i32_0 = arith.constant 0 : i32
    %c0_i32_1 = arith.constant 0 : i32
    return %c0_i32, %c0_i32_0 : i32, i32
  }
  func.func @transform_4(%arg0: i32) -> (i32, i32, i32) {
    %c0_i32 = arith.constant 0 : i32
    %c0_i32_0 = arith.constant 0 : i32
    %c0_i32_1 = arith.constant 0 : i32
    return %arg0, %c0_i32, %c0_i32_0 : i32, i32, i32
  }
}

</mosaic_0001>

<bundles_post_ra>
// kernel: our_network_forward_pallas.3
= control target key start
LH: loop header
LB: loop body
LE: loop exit
PB: predicated region body
PF: predicated region fallthrough
CT: control target
= control target key end

     0   :  { %s2621_s15 = smov 0   ;;  %s3702_s0 = inlined_call_operand.vmem [shape: f32[2,16,1024], index: 0, kind: input, shape index: {}]   ;;  %s3703_s1 = inlined_call_operand.vmem [shape: f32[1,1024], index: 1, kind: input, shape index: {}]   ;;  %s3704_s2 = inlined_call_operand.vmem [shape: f32[3,144], index: 2, kind: input, shape index: {}]   ;;  %s3705_s3 = inlined_call_operand.vmem [shape: f32[3,1], index: 3, kind: input, shape index: {}]   ;;  %s3706_s4 = inlined_call_operand.vmem [shape: f32[2,3,1024], index: 4, kind: output, shape index: {}]  }
   0x1 LB: > { %s1667_s16 = sadd.s32 4294967295, %s2583_s15   ;;  %p1671_p0 = scmp.ge.s32.totalorder %s2583_s15, 1  ;;  %s2583_s15 = sphi %s2621_s15, %s14_s15  }
   0x2   : > { %p162_p1 = scmp.lt.s32.totalorder %s2583_s15, 3 }
   0x4   : > { %p163_p2 = pnand %p1671_p0, %p162_p1 }
   0x6   : > { %166 = sbr.rel (%p163_p2) target bundleno = 687 (0x2af), region = 36 }
   0xd   : > { %p188_p3 = scmp.lt.s32.totalorder %s1667_s16, 1  ;;  %v2585_v4 = vmov 0.0   ;;  %s2586_s21 = smov 127   ;;  %vm268_vm0 = vcmask 1039360   ;;  %vm319_vm1 = vcmask 1031168   ;;  %vm370_vm2 = vcmask 801792  }
   0xe   : > { %s2587_s22 = smov 126   ;;  %s2588_s23 = smov 98   ;;  %vm419_vm3 = vcmask 793600   ;;  %vm468_vm4 = vcmask 785408   ;;  %vm519_vm5 = vcmask 556032   ;;  %vm570_vm6 = vcmask 547840  }
   0xf   : > { %s3786_s16 = smov (!%p188_p3, %s1667_s16), 1  ;;  %s2589_s24 = smov 97   ;;  %vm621_vm7 = vcmask 539648   ;;  %vm967_vm8 = vcmask 252928   ;;  %vm1256_vm9 = vcmask 130048  }
  0x10   : > { %s1682_s17 = sshll.u32 %s3786_s16, 7  ;;  %s2590_s25 = smov 96  }
  0x11   : > { %s2635_s20 = scalar_lea.vmem %s3702_s0, %s1682_s17  ;;  %s2591_s26 = smov 68  }
  0x12   : > { %v201_v0 = vld [vmem:[%s2635_s20 + $0x18] sm:$0xff]  ;;  %v2639_v1 = vld [vmem:[%s2635_s20 + $0x20] sm:$0xff]  ;;  %v203_v6 = vld [vmem:[%s2635_s20 + $0x28] sm:$0xff]  ;;  %s2592_s27 = smov 67   ;;  %s2593_s28 = smov 66  }
  0x13   : > { %v198_v2 = vld [vmem:[%s2635_s20] sm:$0xff]  ;;  %v1857_v3 = vpack.i.bf16 %v2639_v1, %v201_v0  ;;  %v2646_v7 = vld [vmem:[%s2635_s20 + $0x30] sm:$0xff]  ;;  %v199_v8 = vld [vmem:[%s2635_s20 + $0x8] sm:$0xff]  ;;  %v1977_v29 = vpack.i.bf16 %v203_v6, %v2639_v1  ;;  %s2594_s29 = smov 31   ;;  %s1683_s12 = sshll.u32 %s3786_s16, 5 }
  0x14   : > { %v1847_v5 = vpack.i.bf16 %v198_v2, %v2585_v4  ;;  %v200_v9 = vld [vmem:[%s2635_s20 + $0x10] sm:$0xff]  ;;  %v2653_v10 = vpack.i.bf16 %v2646_v7, %v203_v6  ;;  %v207_v12 = vld [vmem:[%s2635_s20 + $0x48] sm:$0xff]  ;;  %v2658_v14 = vld [vmem:[%s2635_s20 + $0x38] sm:$0xff]  ;;  %v2676_v22 = vpack.i.bf16 %v199_v8, %v198_v2  ;;  %s197_s17 = scalar_lea.vmem %s3706_s4, %s1683_s12 }
  0x15   : > { %1858 = vrot.lane.b32.xlu1 %v1857_v3, %s2586_s21  ;;  %v1852_v11 = vpack.i.bf16 %v200_v9, %v199_v8  ;;  %v208_v13 = vld [vmem:[%s2635_s20 + $0x50] sm:$0xff]  ;;  %v2661_v15 = vld [vmem:[%s2635_s20 + $0x40] sm:$0xff]  ;;  %v211_v18 = vld [vmem:[%s2635_s20 + $0x68] sm:$0xff]  ;;  %v2680_v24 = vpack.i.bf16 %v201_v0, %v200_v9  ;;  %v1982_v30 = vpack.i.bf16 %v2658_v14, %v2646_v7 }
  0x16   : > { %1848 = vrot.lane.b32.xlu0 %v1847_v5, %s2586_s21  ;;  %v2666_v16 = vpack.i.bf16 %v208_v13, %v207_v12  ;;  %v1867_v17 = vpack.i.bf16 %v2661_v15, %v2658_v14  ;;  %v212_v19 = vld [vmem:[%s2635_s20 + $0x70] sm:$0xff]  ;;  %v209_v20 = vld [vmem:[%s2635_s20 + $0x58] sm:$0xff]  ;;  %v2674_v21 = vld [vmem:[%s2635_s20 + $0x60] sm:$0xff]  ;;  %v2691_v27 = vpack.i.bf16 %v207_v12, %v2661_v15  ;;  %v2027_v33 = vpack.i.bf16 %v2661_v15, %v2585_v4 }
  0x17   : > { %v2678_v23 = vpack.i.bf16 %v212_v19, %v211_v18  ;;  %v2686_v25 = vpack.i.bf16 %v2674_v21, %v209_v20  ;;  %v2688_v26 = vpack.i.bf16 %v209_v20, %v208_v13  ;;  %v2698_v28 = vld [vmem:[%s2635_s20 + $0x78] sm:$0xff]  ;;  %v1997_v31 = vpack.i.bf16 %v211_v18, %v2674_v21 }
  0x18   : > { %v2002_v32 = vpack.i.bf16 %v2698_v28, %v212_v19  ;;  %v2112_v34 = vpack.i.bf16 %v2646_v7, %v2674_v21  ;;  %v2127_v37 = vpack.i.bf16 %v2661_v15, %v2639_v1  ;;  %v2813_v18 = vpack.i.bf16 %v2585_v4, %v2658_v14 }
  0x19   : > { %1863 = vrot.lane.b32.xlu1 %v2653_v10, %s2586_s21 }
  0x1a   : > { %1853 = vrot.lane.b32.xlu0 %v1852_v11, %s2586_s21 }
  0x1d   : > { %1873 = vrot.lane.b32.xlu1 %v2666_v16, %s2586_s21 }
  0x1e   : > { %1868 = vrot.lane.b32.xlu0 %v1867_v17, %s2586_s21 }
  0x21   : > { %1883 = vrot.lane.b32.xlu1 %v2678_v23, %s2586_s21 }
  0x22   : > { %1878 = vrot.lane.b32.xlu0 %v2686_v25, %s2586_s21 }
  0x25   : > { %1888 = vrot.lane.b32.xlu1 %v1847_v5, %s2587_s22 }
  0x26   : > { %266 = vrot.lane.b32.xlu0 %v2698_v28, %s2586_s21 }
  0x29   : > { %1898 = vrot.lane.b32.xlu1 %v1857_v3, %s2587_s22 }
  0x2a   : > { %1893 = vrot.lane.b32.xlu0 %v1852_v11, %s2587_s22 }
  0x2d   : > { %1908 = vrot.lane.b32.xlu1 %v1867_v17, %s2587_s22 }
  0x2e   : > { %1903 = vrot.lane.b32.xlu0 %v2653_v10, %s2587_s22 }
  0x31   : > { %1918 = vrot.lane.b32.xlu1 %v2686_v25, %s2587_s22 }
  0x32   : > { %1913 = vrot.lane.b32.xlu0 %v2666_v16, %s2587_s22 }
  0x35   : > { %317 = vrot.lane.b32.xlu1 %v2698_v28, %s2587_s22 }
  0x36   : > { %1923 = vrot.lane.b32.xlu0 %v2678_v23, %s2587_s22 }
  0x39   : > { %1933 = vrot.lane.b32.xlu1 %v1852_v11, %s2588_s23 }
  0x3a   : > { %1928 = vrot.lane.b32.xlu0 %v1847_v5, %s2588_s23 }
  0x3d   : > { %1943 = vrot.lane.b32.xlu1 %v2653_v10, %s2588_s23 }
  0x3e   : > { %1938 = vrot.lane.b32.xlu0 %v1857_v3, %s2588_s23 }
  0x41   : > { %1953 = vrot.lane.b32.xlu1 %v2666_v16, %s2588_s23 }
  0x42   : > { %1948 = vrot.lane.b32.xlu0 %v1867_v17, %s2588_s23 }
  0x45   : > { %1963 = vrot.lane.b32.xlu1 %v2678_v23, %s2588_s23 }
  0x46   : > { %1958 = vrot.lane.b32.xlu0 %v2686_v25, %s2588_s23 }
  0x49   : > { %1968 = vrot.lane.b32.xlu1 %v2676_v22, %s2589_s24 }
  0x4a   : > { %368 = vrot.lane.b32.xlu0 %v2698_v28, %s2588_s23 }
  0x4d   : > { %1978 = vrot.lane.b32.xlu1 %v1977_v29, %s2589_s24 }
  0x4e   : > { %1973 = vrot.lane.b32.xlu0 %v2680_v24, %s2589_s24 }
  0x51   : > { %1988 = vrot.lane.b32.xlu1 %v2691_v27, %s2589_s24 }
  0x52   : > { %1983 = vrot.lane.b32.xlu0 %v1982_v30, %s2589_s24 }
  0x55   : > { %1998 = vrot.lane.b32.xlu1 %v1997_v31, %s2589_s24 }
  0x56   : > { %1993 = vrot.lane.b32.xlu0 %v2688_v26, %s2589_s24 }
  0x59   : > { %2008 = vrot.lane.b32.xlu1 %v2676_v22, %s2590_s25 }
  0x5a   : > { %2003 = vrot.lane.b32.xlu0 %v2002_v32, %s2589_s24 }
  0x5d   : > { %2018 = vrot.lane.b32.xlu1 %v1977_v29, %s2590_s25 }
  0x5e   : > { %2013 = vrot.lane.b32.xlu0 %v2680_v24, %s2590_s25 }
  0x61   : > { %2028 = vrot.lane.b32.xlu1 %v2027_v33, %s2590_s25 }
  0x62   : > { %2023 = vrot.lane.b32.xlu0 %v1982_v30, %s2590_s25 }
  0x65   : > { %2038 = vrot.lane.b32.xlu1 %v2686_v25, %s2590_s25 }
  0x66   : > { %2033 = vrot.lane.b32.xlu0 %v2666_v16, %s2590_s25 }
  0x69   : > { %466 = vrot.lane.b32.xlu1 %v2698_v28, %s2590_s25 }
  0x6a   : > { %2043 = vrot.lane.b32.xlu0 %v2678_v23, %s2590_s25 }
  0x6d   : > { %2053 = vrot.lane.b32.xlu1 %v2680_v24, %s2591_s26 }
  0x6e   : > { %2048 = vrot.lane.b32.xlu0 %v2676_v22, %s2591_s26 }
  0x71   : > { %2063 = vrot.lane.b32.xlu1 %v1982_v30, %s2591_s26 }
  0x72   : > { %2058 = vrot.lane.b32.xlu0 %v1977_v29, %s2591_s26 }
  0x75   : > { %2073 = vrot.lane.b32.xlu1 %v2666_v16, %s2591_s26 }
  0x76   : > { %2068 = vrot.lane.b32.xlu0 %v2027_v33, %s2591_s26 }
  0x79   : > { %2083 = vrot.lane.b32.xlu1 %v2678_v23, %s2591_s26 }
  0x7a   : > { %2078 = vrot.lane.b32.xlu0 %v2686_v25, %s2591_s26 }
  0x7d   : > { %2088 = vrot.lane.b32.xlu1 %v2676_v22, %s2592_s27 }
  0x7e   : > { %517 = vrot.lane.b32.xlu0 %v2698_v28, %s2591_s26 }
  0x81   : > { %2098 = vrot.lane.b32.xlu1 %v1977_v29, %s2592_s27 }
  0x82   : > { %2093 = vrot.lane.b32.xlu0 %v2680_v24, %s2592_s27 }
  0x85   : > { %2108 = vrot.lane.b32.xlu1 %v2688_v26, %s2592_s27 }
  0x86   : > { %2103 = vrot.lane.b32.xlu0 %v2691_v27, %s2592_s27 }
  0x87   : > { %v1859_v35 = vpop.permute.xlu1 %1858 }
  0x88   : > { %v2746_v36 = vpop.permute.xlu0 %1848  ;;  %v1861_v40 = vunpack.i.h.bf16 %v1859_v35  ;;  %v1860_v51 = vunpack.i.l.bf16 %v1859_v35 }
  0x89   : > { %2118 = vrot.lane.b32.xlu1 %v2676_v22, %s2593_s28  ;;  %v1851_v52 = vunpack.i.h.bf16 %v2746_v36  ;;  %v1850_v6 = vunpack.i.l.bf16 %v2746_v36 }
  0x8a   : > { %2113 = vrot.lane.b32.xlu0 %v2112_v34, %s2592_s27  ;;  %v273_v8 = vsel %vm268_vm0, %v1860_v51, %v1861_v40 }
  0x8b   : > { %v2753_v38 = vpop.permute.xlu1 %1863  ;;  %v269_v20 = vsel %vm268_vm0, %v1850_v6, %v1851_v52 }
  0x8c   : > { %v1854_v39 = vpop.permute.xlu0 %1853  ;;  %v3722_v41 = vunpack.i.l.bf16 %v2753_v38 }
  0x8d   : > { %2128 = vrot.lane.b32.xlu1 %v2127_v37, %s2593_s28  ;;  %v1856_v45 = vunpack.i.h.bf16 %v1854_v39  ;;  %v1855_v46 = vunpack.i.l.bf16 %v1854_v39 }
  0x8e   : > { %2123 = vrot.lane.b32.xlu0 %v2680_v24, %s2593_s28  ;;  %v2762_v42 = vsel %vm268_vm0, %v1861_v40, %v3722_v41 }
  0x8f   : > { %v1874_v43 = vpop.permute.xlu1 %1873  ;;  %v271_v56 = vsel %vm268_vm0, %v1855_v46, %v1856_v45  ;;  %v272_v57 = vsel %vm268_vm0, %v1856_v45, %v1860_v51  ;;  %v270_v61 = vsel %vm268_vm0, %v1851_v52, %v1855_v46 }
  0x90   : > { %v2764_v44 = vpop.permute.xlu0 %1868  ;;  %v1875_v58 = vunpack.i.l.bf16 %v1874_v43  ;;  %v1876_v62 = vunpack.i.h.bf16 %v1874_v43  ;;  %v2167_v1 = vpack.i.bf16 %v272_v57, %v271_v56  ;;  %v2162_v2 = vpack.i.bf16 %v270_v61, %v2585_v4 }
  0x91   : > { %2138 = vrot.lane.b32.xlu1 %v2686_v25, %s2593_s28  ;;  %v1871_v59 = vunpack.i.h.bf16 %v2764_v44 }
  0x92   : > { %2133 = vrot.lane.b32.xlu0 %v2666_v16, %s2593_s28  ;;  %v279_v7 = vsel %vm268_vm0, %v1875_v58, %v1876_v62 }
  0x93   : > { %v2770_v47 = vpop.permute.xlu1 %1883  ;;  %v278_v5 = vsel %vm268_vm0, %v1871_v59, %v1875_v58  ;;  %v277_v45 = vsel %vm268_vm0, %v1850_v6, %v1871_v59 }
  0x94   : > { %v1879_v48 = vpop.permute.xlu0 %1878  ;;  %v3719_v49 = vunpack.i.l.bf16 %v2770_v47  ;;  %v2172_v13 = vpack.i.bf16 %v278_v5, %v273_v8 }
  0x95   : > { %v1881_v50 = vunpack.i.h.bf16 %v1879_v48  ;;  %2148 = vrot.lane.b32.xlu1 %v2680_v24, %s2594_s29  ;;  %v1880_v60 = vunpack.i.l.bf16 %v1879_v48 }
  0x96   : > { %2143 = vrot.lane.b32.xlu0 %v2676_v22, %s2594_s29 }
  0x97   : > { %v2781_v53 = vsel %vm268_vm0, %v1881_v50, %v3719_v49  ;;  %v2783_v54 = vpop.permute.xlu1 %1888  ;;  %v280_v3 = vsel %vm268_vm0, %v1876_v62, %v1880_v60  ;;  %v281_v17 = vsel %vm268_vm0, %v1880_v60, %v1881_v50 }
  0x98   : > { %v2785_v55 = vpop.permute.xlu0 %266  ;;  %v2177_v12 = vpack.i.bf16 %v280_v3, %v279_v7  ;;  %v2182_v29 = vpack.i.bf16 %v269_v20, %v281_v17  ;;  %v1891_v30 = vunpack.i.h.bf16 %v2783_v54  ;;  %v1890_v58 = vunpack.i.l.bf16 %v2783_v54 }
  0x99   : > { %2158 = vrot.lane.b32.xlu1 %v2688_v26, %s2594_s29 }
  0x9a   : > { %2153 = vrot.lane.b32.xlu0 %v2691_v27, %s2594_s29  ;;  %v320_v3 = vsel %vm319_vm1, %v1890_v58, %v1891_v30 }
  0x9b   : > { %v1899_v63 = vpop.permute.xlu1 %1898 }
  0x9c   : > { %v1894_v0 = vpop.permute.xlu0 %1893  ;;  %v1901_v15 = vunpack.i.h.bf16 %v1899_v63  ;;  %v1900_v22 = vunpack.i.l.bf16 %v1899_v63 }
  0x9d   : > { %2168 = vrot.lane.b32.xlu1 %v2167_v1, %s2594_s29  ;;  %v1896_v24 = vunpack.i.h.bf16 %v1894_v0  ;;  %v1895_v25 = vunpack.i.l.bf16 %v1894_v0 }
  0x9e   : > { %2163 = vrot.lane.b32.xlu0 %v2162_v2, %s2594_s29  ;;  %v324_v60 = vsel %vm319_vm1, %v1900_v22, %v1901_v15 }
  0x9f   : > { %v2803_v9 = vpop.permute.xlu1 %1908  ;;  %v322_v32 = vsel %vm319_vm1, %v1895_v25, %v1896_v24  ;;  %v323_v33 = vsel %vm319_vm1, %v1896_v24, %v1900_v22  ;;  %v321_v34 = vsel %vm319_vm1, %v1891_v30, %v1895_v25 }
  0xa0   : > { %v2805_v11 = vpop.permute.xlu0 %1903  ;;  %v1911_v40 = vunpack.i.h.bf16 %v2803_v9  ;;  %v2202_v50 = vpack.i.bf16 %v323_v33, %v322_v32  ;;  %v2197_v51 = vpack.i.bf16 %v321_v34, %v277_v45 }
  0xa1   : > { %v3718_v16 = vunpack.i.l.bf16 %v2805_v11  ;;  %2178 = vrot.lane.b32.xlu1 %v2177_v12, %s2594_s29 }
  0xa2   : > { %2173 = vrot.lane.b32.xlu0 %v2172_v13, %s2594_s29 }
  0xa3   : > { %v2818_v19 = vsel %vm319_vm1, %v1901_v15, %v3718_v16  ;;  %v1919_v26 = vpop.permute.xlu1 %1918 }
  0xa4   : > { %v1914_v27 = vpop.permute.xlu0 %1913  ;;  %v1921_v4 = vunpack.i.h.bf16 %v1919_v26  ;;  %v1920_v35 = vunpack.i.l.bf16 %v1919_v26 }
  0xa5   : > { %2188 = vrot.lane.b32.xlu1 %v2813_v18, %s2592_s27  ;;  %v1916_v36 = vunpack.i.h.bf16 %v1914_v27  ;;  %v1915_v37 = vunpack.i.l.bf16 %v1914_v27 }
  0xa6   : > { %2183 = vrot.lane.b32.xlu0 %v2182_v29, %s2594_s29  ;;  %v332_v2 = vsel %vm319_vm1, %v1920_v35, %v1921_v4  ;;  %v328_v29 = vsel %vm319_vm1, %v1890_v58, %v1911_v40 }
  0xa7   : > { %v2825_v14 = vpop.permute.xlu1 %317  ;;  %v330_v52 = vsel %vm319_vm1, %v1915_v37, %v1916_v36  ;;  %v331_v56 = vsel %vm319_vm1, %v1916_v36, %v1920_v35  ;;  %v329_v57 = vsel %vm319_vm1, %v1911_v40, %v1915_v37  ;;  %v2217_v7 = vpack.i.bf16 %v320_v3, %v332_v2 }
  0xa8   : > { %v2827_v31 = vpop.permute.xlu0 %1923  ;;  %v2212_v62 = vpack.i.bf16 %v331_v56, %v330_v52  ;;  %v2207_v63 = vpack.i.bf16 %v329_v57, %v324_v60 }
  0xa9   : > { %v3717_v39 = vunpack.i.l.bf16 %v2827_v31  ;;  %568 = vrot.lane.b32.xlu1 %v2698_v28, %s2592_s27 }
  0xaa   : > { %2193 = vrot.lane.b32.xlu0 %v2678_v23, %s2592_s27 }
  0xab   : > { %v2841_v43 = vsel %vm319_vm1, %v1921_v4, %v3717_v39  ;;  %v1934_v46 = vpop.permute.xlu1 %1933 }
  0xac   : > { %v2844_v48 = vpop.permute.xlu0 %1928  ;;  %v1935_v8 = vunpack.i.l.bf16 %v1934_v46  ;;  %v1936_v27 = vunpack.i.h.bf16 %v1934_v46 }
  0xad   : > { %2203 = vrot.lane.b32.xlu1 %v2202_v50, %s2594_s29  ;;  %v1931_v12 = vunpack.i.h.bf16 %v2844_v48  ;;  %v1930_v37 = vunpack.i.l.bf16 %v2844_v48 }
  0xae   : > { %2198 = vrot.lane.b32.xlu0 %v2197_v51, %s2594_s29  ;;  %v373_v36 = vsel %vm370_vm2, %v1935_v8, %v1936_v27 }
  0xaf   : > { %v2853_v59 = vpop.permute.xlu1 %1943  ;;  %v372_v26 = vsel %vm370_vm2, %v1931_v12, %v1935_v8 }
  0xb0   : > { %v1939_v61 = vpop.permute.xlu0 %1938  ;;  %v3716_v0 = vunpack.i.l.bf16 %v2853_v59  ;;  %v2237_v33 = vpack.i.bf16 %v372_v26, %v328_v29 }
  0xb1   : > { %v1941_v1 = vunpack.i.h.bf16 %v1939_v61  ;;  %2213 = vrot.lane.b32.xlu1 %v2212_v62, %s2594_s29  ;;  %v1940_v13 = vunpack.i.l.bf16 %v1939_v61  ;;  %v371_v62 = vsel %vm370_vm2, %v1930_v37, %v1931_v12 }
  0xb2   : > { %2208 = vrot.lane.b32.xlu0 %v2207_v63, %s2594_s29 }
  0xb3   : > { %v2862_v54 = vsel %vm370_vm2, %v1941_v1, %v3716_v0  ;;  %v1954_v5 = vpop.permute.xlu1 %1953 }
  0xb4   : > { %v2865_v6 = vpop.permute.xlu0 %1948  ;;  %v1955_v15 = vunpack.i.l.bf16 %v1954_v5  ;;  %v1956_v35 = vunpack.i.h.bf16 %v1954_v5 }
  0xb5   : > { %2223 = vrot.lane.b32.xlu1 %v2653_v10, %s2593_s28  ;;  %v1951_v17 = vunpack.i.h.bf16 %v2865_v6 }
  0xb6   : > { %2218 = vrot.lane.b32.xlu0 %v2217_v7, %s2594_s29  ;;  %v381_v63 = vsel %vm370_vm2, %v1955_v15, %v1956_v35 }
  0xb7   : > { %v2872_v20 = vpop.permute.xlu1 %1963  ;;  %v380_v34 = vsel %vm370_vm2, %v1951_v17, %v1955_v15  ;;  %v379_v12 = vsel %vm370_vm2, %v1930_v37, %v1951_v17 }
  0xb8   : > { %v1959_v22 = vpop.permute.xlu0 %1958  ;;  %v3715_v24 = vunpack.i.l.bf16 %v2872_v20 }
  0xb9   : > { %v1961_v25 = vunpack.i.h.bf16 %v1959_v22  ;;  %2233 = vrot.lane.b32.xlu1 %v2678_v23, %s2593_s28  ;;  %v1960_v30 = vunpack.i.l.bf16 %v1959_v22  ;;  %v374_v23 = vsel %vm370_vm2, %v1936_v27, %v1940_v13 }
  0xba   : > { %2228 = vrot.lane.b32.xlu0 %v2813_v18, %s2593_s28  ;;  %v375_v18 = vsel %vm370_vm2, %v1940_v13, %v1941_v1  ;;  %v2242_v45 = vpack.i.bf16 %v374_v23, %v373_v36 }
  0xbb   : > { %v2883_v10 = vsel %vm370_vm2, %v1961_v25, %v3715_v24  ;;  %v2886_v4 = vpop.permute.xlu1 %1968  ;;  %v2247_v40 = vpack.i.bf16 %v380_v34, %v375_v18  ;;  %v383_v56 = vsel %vm370_vm2, %v1960_v30, %v1961_v25 }
  0xbc   : > { %v2888_v32 = vpop.permute.xlu0 %368  ;;  %v1971_v46 = vunpack.i.h.bf16 %v2886_v4  ;;  %v1970_v50 = vunpack.i.l.bf16 %v2886_v4  ;;  %v2257_v3 = vpack.i.bf16 %v371_v62, %v383_v56 }
  0xbd   : > { %2238 = vrot.lane.b32.xlu1 %v2237_v33, %s2594_s29 }
  0xbe   : > { %619 = vrot.lane.b32.xlu0 %v2698_v28, %s2593_s28  ;;  %v382_v28 = vsel %vm370_vm2, %v1956_v35, %v1960_v30  ;;  %v420_v7 = vsel %vm419_vm3, %v1970_v50, %v1971_v46 }
  0xbf   : > { %v2900_v51 = vpop.permute.xlu1 %1978  ;;  %v2252_v5 = vpack.i.bf16 %v382_v28, %v381_v63  ;;  %v2262_v29 = vpack.i.bf16 %v420_v7, %v379_v12 }
  0xc0   : > { %v1974_v52 = vpop.permute.xlu0 %1973  ;;  %v3714_v57 = vunpack.i.h.bf16 %v2900_v51  ;;  %v1980_v58 = vunpack.i.l.bf16 %v2900_v51 }
  0xc1   : > { %v1976_v60 = vunpack.i.h.bf16 %v1974_v52  ;;  %v1975_v48 = vunpack.i.l.bf16 %v1974_v52  ;;  %2248 = vrot.lane.b32.xlu1 %v2247_v40, %s2594_s29 }
  0xc2   : > { %2243 = vrot.lane.b32.xlu0 %v2242_v45, %s2594_s29  ;;  %v2911_v61 = vsel %vm419_vm3, %v1980_v58, %v3714_v57 }
  0xc3   : > { %v1989_v1 = vpop.permute.xlu1 %1988  ;;  %v421_v22 = vsel %vm419_vm3, %v1971_v46, %v1975_v48  ;;  %v422_v25 = vsel %vm419_vm3, %v1975_v48, %v1976_v60  ;;  %v423_v36 = vsel %vm419_vm3, %v1976_v60, %v1980_v58 }
  0xc4   : > { %v2915_v2 = vpop.permute.xlu0 %1983  ;;  %v1991_v8 = vunpack.i.h.bf16 %v1989_v1  ;;  %v1990_v13 = vunpack.i.l.bf16 %v1989_v1  ;;  %v2267_v27 = vpack.i.bf16 %v422_v25, %v421_v22 }
  0xc5   : > { %2258 = vrot.lane.b32.xlu1 %v2257_v3, %s2594_s29 }
  0xc6   : > { %2253 = vrot.lane.b32.xlu0 %v2252_v5, %s2594_s29  ;;  %v427_v30 = vsel %vm419_vm3, %v1990_v13, %v1991_v8 }
  0xc7   : > { %v2923_v15 = vpop.permute.xlu1 %1998  ;;  %v2272_v46 = vpack.i.bf16 %v427_v30, %v423_v36 }
  0xc8   : > { %v1994_v26 = vpop.permute.xlu0 %1993  ;;  %v3713_v4 = vunpack.i.h.bf16 %v2923_v15  ;;  %v2000_v33 = vunpack.i.l.bf16 %v2923_v15 }
  0xc9   : > { %v1996_v34 = vunpack.i.h.bf16 %v1994_v26  ;;  %v1995_v23 = vunpack.i.l.bf16 %v1994_v26  ;;  %2268 = vrot.lane.b32.xlu1 %v2267_v27, %s2594_s29 }
  0xca   : > { %2263 = vrot.lane.b32.xlu0 %v2262_v29, %s2594_s29  ;;  %v2933_v17 = vsel %vm419_vm3, %v2000_v33, %v3713_v4 }
  0xcb   : > { %v428_v35 = vsel %vm419_vm3, %v1991_v8, %v1995_v23  ;;  %v429_v18 = vsel %vm419_vm3, %v1995_v23, %v1996_v34  ;;  %v2009_v37 = vpop.permute.xlu1 %2008  ;;  %v430_v28 = vsel %vm419_vm3, %v1996_v34, %v2000_v33 }
  0xcc   : > { %v2938_v40 = vpop.permute.xlu0 %2003  ;;  %v2277_v45 = vpack.i.bf16 %v429_v18, %v428_v35  ;;  %v2011_v52 = vunpack.i.h.bf16 %v2009_v37  ;;  %v2010_v56 = vunpack.i.l.bf16 %v2009_v37  ;;  %v2282_v60 = vpack.i.bf16 %v1970_v50, %v430_v28 }
  0xce   : > { %2278 = vrot.lane.b32.xlu1 %v2277_v45, %s2594_s29  ;;  %2273 = vrot.lane.b32.xlu0 %v2272_v46, %s2594_s29  ;;  %v469_v48 = vsel %vm468_vm4, %v2010_v56, %v2011_v52 }
  0xcf   : > { %v2944_v62 = vpop.permute.xlu1 %2018  ;;  %v2287_v58 = vpack.i.bf16 %v469_v48, %v1990_v13 }
  0xd0   : > { %v2014_v63 = vpop.permute.xlu0 %2013  ;;  %v3711_v1 = vunpack.i.h.bf16 %v2944_v62  ;;  %v2020_v3 = vunpack.i.l.bf16 %v2944_v62 }
  0xd1   : > { %v2016_v5 = vunpack.i.h.bf16 %v2014_v63  ;;  %v2015_v7 = vunpack.i.l.bf16 %v2014_v63 }
  0xd2   : > { %2288 = vrot.lane.b32.xlu1 %v2287_v58, %s2594_s29  ;;  %2283 = vrot.lane.b32.xlu0 %v2282_v60, %s2594_s29  ;;  %v2953_v8 = vsel %vm468_vm4, %v2020_v3, %v3711_v1 }
  0xd3   : > { %v470_v22 = vsel %vm468_vm4, %v2011_v52, %v2015_v7  ;;  %v471_v13 = vsel %vm468_vm4, %v2015_v7, %v2016_v5  ;;  %v2029_v50 = vpop.permute.xlu1 %2028  ;;  %v472_v18 = vsel %vm468_vm4, %v2016_v5, %v2020_v3 }
  0xd4   : > { %v2957_v25 = vpop.permute.xlu0 %2023  ;;  %v2292_v12 = vpack.i.bf16 %v471_v13, %v470_v22  ;;  %v2031_v26 = vunpack.i.h.bf16 %v2029_v50  ;;  %v2030_v35 = vunpack.i.l.bf16 %v2029_v50 }
  0xd5   : > { %v3709_v36 = vunpack.i.h.bf16 %v2957_v25 }
  0xd6   : > { %2293 = vrot.lane.b32.xlu0 %v2292_v12, %s2594_s29 }
  0xd7   : > { %v2039_v27 = vpop.permute.xlu1 %2038  ;;  %v2976_v3 = vsel %vm468_vm4, %v3709_v36, %v2030_v35 }
  0xd8   : > { %v2034_v29 = vpop.permute.xlu0 %2033  ;;  %v2041_v30 = vunpack.i.h.bf16 %v2039_v27  ;;  %v2040_v33 = vunpack.i.l.bf16 %v2039_v27 }
  0xd9   : > { %v2036_v34 = vunpack.i.h.bf16 %v2034_v29  ;;  %v2035_v23 = vunpack.i.l.bf16 %v2034_v29 }
  0xda   : > { %v480_v58 = vsel %vm468_vm4, %v2040_v33, %v2041_v30 }
  0xdb   : > { %v479_v37 = vsel %vm468_vm4, %v2036_v34, %v2040_v33  ;;  %v478_v45 = vsel %vm468_vm4, %v2035_v23, %v2036_v34  ;;  %v477_v46 = vsel %vm468_vm4, %v2031_v26, %v2035_v23  ;;  %v2965_v52 = vpop.permute.xlu1 %466  ;;  %v2307_v13 = vpack.i.bf16 %v2010_v56, %v480_v58 }
  0xdc   : > { %v2967_v28 = vpop.permute.xlu0 %2043  ;;  %v2297_v48 = vpack.i.bf16 %v477_v46, %v472_v18  ;;  %v2302_v63 = vpack.i.bf16 %v479_v37, %v478_v45 }
  0xdd   : > { %v3708_v60 = vunpack.i.l.bf16 %v2967_v28 }
  0xde   : > { %2298 = vrot.lane.b32.xlu1 %v2297_v48, %s2594_s29  ;;  %2303 = vrot.lane.b32.xlu0 %v2302_v63, %s2594_s29  ;;  %v2999_v63 = vsel %vm468_vm4, %v2965_v52, %v2030_v35 }
  0xdf   : > { %v2981_v5 = vsel %vm468_vm4, %v2041_v30, %v3708_v60  ;;  %v2054_v7 = vpop.permute.xlu1 %2053 }
  0xe0   : > { %v2049_v22 = vpop.permute.xlu0 %2048  ;;  %v2056_v12 = vunpack.i.h.bf16 %v2054_v7  ;;  %v2055_v27 = vunpack.i.l.bf16 %v2054_v7 }
  0xe1   : > { %v2051_v29 = vunpack.i.h.bf16 %v2049_v22  ;;  %v2050_v33 = vunpack.i.l.bf16 %v2049_v22 }
  0xe2   : > { %2308 = vrot.lane.b32.xlu1 %v2307_v13, %s2594_s29  ;;  %v522_v34 = vsel %vm519_vm5, %v2055_v27, %v2056_v12 }
  0xe3   : > { %v521_v23 = vsel %vm519_vm5, %v2051_v29, %v2055_v27  ;;  %v520_v30 = vsel %vm519_vm5, %v2050_v33, %v2051_v29  ;;  %v2989_v18 = vpop.permute.xlu1 %2063 }
  0xe4   : > { %v2991_v37 = vpop.permute.xlu0 %2058  ;;  %v2317_v56 = vpack.i.bf16 %v522_v34, %v521_v23  ;;  %v2312_v45 = vpack.i.bf16 %v520_v30, %v2031_v26 }
  0xe5   : > { %v3707_v46 = vunpack.i.h.bf16 %v2991_v37  ;;  %v2060_v48 = vunpack.i.l.bf16 %v2991_v37 }
  0xe6   : > { %2318 = vrot.lane.b32.xlu1 %v2317_v56, %s2594_s29  ;;  %2313 = vrot.lane.b32.xlu0 %v2312_v45, %s2594_s29 }
  0xe7   : > { %v3004_v58 = vsel %vm519_vm5, %v2060_v48, %v3707_v46  ;;  %v2074_v7 = vpop.permute.xlu1 %2073  ;;  %v523_v34 = vsel %vm519_vm5, %v2056_v12, %v2060_v48  ;;  %v3710_v46 = vunpack.i.h.bf16 %v2989_v18 }
  0xe8   : > { %v2069_v22 = vpop.permute.xlu0 %2068  ;;  %v2075_v13 = vunpack.i.l.bf16 %v2074_v7  ;;  %v2076_v29 = vunpack.i.h.bf16 %v2074_v7 }
  0xe9   : > { %v2071_v27 = vunpack.i.h.bf16 %v2069_v22  ;;  %v2070_v30 = vunpack.i.l.bf16 %v2069_v22 }
  0xea   : > { %v529_v26 = vsel %vm519_vm5, %v2075_v13, %v2076_v29 }
  0xeb   : > { %v528_v23 = vsel %vm519_vm5, %v2071_v27, %v2075_v13  ;;  %v3010_v35 = vpop.permute.xlu1 %2083  ;;  %v3019_v12 = vsel %vm519_vm5, %v3710_v46, %v2070_v30 }
  0xec   : > { %v2079_v56 = vpop.permute.xlu0 %2078  ;;  %v2322_v45 = vpack.i.bf16 %v528_v23, %v523_v34  ;;  %v3712_v50 = vunpack.i.l.bf16 %v3010_v35  ;;  %3739 = vst [vmem:[#allocation2_spill] sm:$0xff] %v3019_v12  ;;  %v2575_v12 = vld [vmem:[%s2635_s20 + $0x78] sm:$0xff] }
  0xed   : > { %v2081_v60 = vunpack.i.h.bf16 %v2079_v56  ;;  %v2080_v36 = vunpack.i.l.bf16 %v2079_v56 }
  0xee   : > { %2323 = vrot.lane.b32.xlu0 %v2322_v45, %s2594_s29 }
  0xef   : > { %v3024_v48 = vsel %vm519_vm5, %v2081_v60, %v3712_v50  ;;  %v530_v7 = vsel %vm519_vm5, %v2076_v29, %v2080_v36  ;;  %v531_v22 = vsel %vm519_vm5, %v2080_v36, %v2081_v60  ;;  %v2089_v34 = vpop.permute.xlu1 %2088 }
  0xf0   : > { %3740 = vst [vmem:[#allocation3_spill] sm:$0xff] %v3024_v48  ;;  %v3028_v23 = vpop.permute.xlu0 %517  ;;  %v2327_v13 = vpack.i.bf16 %v530_v7, %v529_v26  ;;  %v2332_v56 = vpack.i.bf16 %v2050_v33, %v531_v22  ;;  %v2091_v46 = vunpack.i.h.bf16 %v2089_v34  ;;  %v2090_v1 = vunpack.i.l.bf16 %v2089_v34 }
  0xf1   : > { %v3038_v33 = vsel %vm519_vm5, %v3028_v23, %v2070_v30 }
  0xf2   : > { %2328 = vrot.lane.b32.xlu1 %v2327_v13, %s2594_s29  ;;  %2333 = vrot.lane.b32.xlu0 %v2332_v56, %s2594_s29  ;;  %v571_v50 = vsel %vm570_vm6, %v2090_v1, %v2091_v46  ;;  %3741 = vst [vmem:[#allocation4_spill] sm:$0xff] %v3038_v33 }
  0xf3   : > { %v2099_v29 = vpop.permute.xlu1 %2098  ;;  %v2337_v36 = vpack.i.bf16 %v571_v50, %v2071_v27 }
  0xf4   : > { %v2094_v4 = vpop.permute.xlu0 %2093  ;;  %v2101_v60 = vunpack.i.h.bf16 %v2099_v29  ;;  %v2100_v57 = vunpack.i.l.bf16 %v2099_v29 }
  0xf5   : > { %v2096_v24 = vunpack.i.h.bf16 %v2094_v4  ;;  %v2095_v0 = vunpack.i.l.bf16 %v2094_v4 }
  0xf6   : > { %2338 = vrot.lane.b32.xlu1 %v2337_v36, %s2594_s29  ;;  %v3041_v26 = vsel %vm570_vm6, %v2100_v57, %v2101_v60 }
  0xf7   : > { %3742 = vst [vmem:[#allocation5_spill] sm:$0xff] %v3041_v26  ;;  %v572_v7 = vsel %vm570_vm6, %v2091_v46, %v2095_v0  ;;  %v573_v22 = vsel %vm570_vm6, %v2095_v0, %v2096_v24  ;;  %v2109_v27 = vpop.permute.xlu1 %2108  ;;  %v574_v30 = vsel %vm570_vm6, %v2096_v24, %v2100_v57 }
  0xf8   : > { %v2104_v34 = vpop.permute.xlu0 %2103  ;;  %v2342_v13 = vpack.i.bf16 %v573_v22, %v572_v7  ;;  %v2111_v4 = vunpack.i.h.bf16 %v2109_v27  ;;  %v2110_v56 = vunpack.i.l.bf16 %v2109_v27 }
  0xf9   : > { %v2106_v29 = vunpack.i.h.bf16 %v2104_v34  ;;  %v2105_v36 = vunpack.i.l.bf16 %v2104_v34 }
  0xfa   : > { %2343 = vrot.lane.b32.xlu0 %v2342_v13, %s2594_s29  ;;  %v581_v45 = vsel %vm570_vm6, %v2110_v56, %v2111_v4 }
  0xfb   : > { %v580_v46 = vsel %vm570_vm6, %v2106_v29, %v2110_v56  ;;  %v579_v0 = vsel %vm570_vm6, %v2105_v36, %v2106_v29  ;;  %v2119_v50 = vpop.permute.xlu1 %2118 }
  0xfc   : > { %v2352_v39 = vpack.i.bf16 %v581_v45, %v580_v46  ;;  %v2347_v16 = vpack.i.bf16 %v579_v0, %v574_v30  ;;  %v3052_v49 = vpop.permute.xlu0 %2113  ;;  %v2121_v7 = vunpack.i.h.bf16 %v2119_v50  ;;  %v2120_v22 = vunpack.i.l.bf16 %v2119_v50 }
  0xfd   : > { %v3721_v27 = vunpack.i.h.bf16 %v3052_v49  ;;  %v3720_v34 = vunpack.i.l.bf16 %v3052_v49 }
  0xfe   : > { %2348 = vrot.lane.b32.xlu1 %v2347_v16, %s2594_s29  ;;  %2353 = vrot.lane.b32.xlu0 %v2352_v39, %s2594_s29  ;;  %v622_v24 = vsel %vm621_vm7, %v2120_v22, %v2121_v7 }
  0xff   : > { %v3062_v57 = vsel %vm570_vm6, %v2101_v60, %v3721_v27  ;;  %v582_v45 = vsel %vm570_vm6, %v2111_v4, %v3720_v34  ;;  %v2362_v50 = vpack.i.bf16 %v622_v24, %v2105_v36  ;;  %v3067_v56 = vpop.permute.xlu1 %2128 }
 0x100   : > { %v2357_v13 = vpack.i.bf16 %v2090_v1, %v582_v45  ;;  %v2124_v29 = vpop.permute.xlu0 %2123  ;;  %v3723_v39 = vunpack.i.l.bf16 %v3067_v56  ;;  %v2131_v0 = vunpack.i.h.bf16 %v3067_v56 }
 0x101   : > { %v2126_v30 = vunpack.i.h.bf16 %v2124_v29  ;;  %v2125_v16 = vunpack.i.l.bf16 %v2124_v29 }
 0x102   : > { %2358 = vrot.lane.b32.xlu1 %v2357_v13, %s2594_s29  ;;  %2363 = vrot.lane.b32.xlu0 %v2362_v50, %s2594_s29 }
 0x103   : > { %v623_v60 = vsel %vm621_vm7, %v2121_v7, %v2125_v16  ;;  %v624_v46 = vsel %vm621_vm7, %v2125_v16, %v2126_v30  ;;  %v3075_v36 = vpop.permute.xlu1 %2138  ;;  %v625_v7 = vsel %vm621_vm7, %v2126_v30, %v3723_v39 }
 0x104   : > { %v2367_v4 = vpack.i.bf16 %v624_v46, %v623_v60  ;;  %v2134_v1 = vpop.permute.xlu0 %2133  ;;  %v3725_v24 = vunpack.i.h.bf16 %v3075_v36  ;;  %v2140_v45 = vunpack.i.l.bf16 %v3075_v36 }
 0x105   : > { %v2136_v29 = vunpack.i.h.bf16 %v2134_v1  ;;  %v2135_v13 = vunpack.i.l.bf16 %v2134_v1 }
 0x106   : > { %2368 = vrot.lane.b32.xlu1 %v2367_v4, %s2594_s29  ;;  %v633_v46 = vsel %vm621_vm7, %v2140_v45, %v3725_v24 }
 0x107   : > { %v632_v50 = vsel %vm621_vm7, %v2136_v29, %v2140_v45  ;;  %v631_v16 = vsel %vm621_vm7, %v2135_v13, %v2136_v29  ;;  %v630_v60 = vsel %vm621_vm7, %v2131_v0, %v2135_v13  ;;  %v3089_v1 = vpop.permute.xlu1 %2148  ;;  %v2569_v29 = vld [vmem:[%s2635_s20 + $0x20] sm:$0xff]  ;;  %v2382_v45 = vpack.i.bf16 %v2120_v22, %v633_v46  ;;  %v2570_v46 = vld [vmem:[%s2635_s20 + $0x38] sm:$0xff] }
 0x108   : > { %v2377_v34 = vpack.i.bf16 %v632_v50, %v631_v16  ;;  %v2372_v27 = vpack.i.bf16 %v630_v60, %v625_v7  ;;  %3743 = vst [vmem:[#allocation6_spill] sm:$0xff] %v3089_v1  ;;  %v2144_v4 = vpop.permute.xlu0 %2143  ;;  %v3726_v41 = vunpack.i.h.bf16 %v3089_v1  ;;  %v2150_v30 = vunpack.i.l.bf16 %v3089_v1  ;;  %v3108_v22 = vld [vmem:[%s3704_s2] sm:$0x77] }
 0x109   : > { %v2146_v39 = vunpack.i.h.bf16 %v2144_v4  ;;  %v2145_v33 = vunpack.i.l.bf16 %v2144_v4  ;;  %v2387_v13 = vpack.i.bf16 %v2569_v29, %v2131_v0  ;;  %3745 = vst [vmem:[#allocation8_spill] sm:$0xff] %v3108_v22  ;;  %v2397_v29 = vpack.i.bf16 %v2674_v21, %v2570_v46 }
 0x10a   : > { %2378 = vrot.lane.b32.xlu1 %v2377_v34, %s2594_s29  ;;  %2373 = vrot.lane.b32.xlu0 %v2372_v27, %s2594_s29  ;;  %v971_v60 = vsel %vm967_vm8, %v2150_v30, %v3726_v41  ;;  %v2571_v41 = vld [vmem:[%s2635_s20 + $0x28] sm:$0xff]  ;;  %v3118_v34 = vcombine.high %v3108_v22, %v3108_v22 }
 0x10b   : > { %v3096_v7 = vpop.permute.xlu1 %2158  ;;  %v969_v16 = vsel %vm967_vm8, %v2145_v33, %v2146_v39  ;;  %v970_v4 = vsel %vm967_vm8, %v2146_v39, %v2150_v30  ;;  %v2572_v39 = vld [vmem:[%s2635_s20 + $0x30] sm:$0xff] }
 0x10c   : > { %3744 = vst [vmem:[#allocation7_spill] sm:$0xff] %v3096_v7  ;;  %v2154_v50 = vpop.permute.xlu0 %2153  ;;  %v2160_v27 = vunpack.i.l.bf16 %v3096_v7  ;;  %v2392_v30 = vpack.i.bf16 %v2572_v39, %v2571_v41  ;;  %3746 = vst [vmem:[#allocation9_spill] sm:$0xff] %v3118_v34  ;;  %v3747_v1 = vunpack.i.h.bf16 %v3096_v7  ;;  %1676 = vmatprep.mubr.msk.f32.mxu0 %vm1256_vm9, %v3118_v34  ;;  %1677 = vmatprep.mubr.msk.f32.mxu1 %vm1256_vm9, %v3118_v34  ;;  %v1866_v7 = vunpack.i.h.bf16 %v2753_v38 }
 0x10d   : > { %v2156_v24 = vunpack.i.h.bf16 %v2154_v50  ;;  %v2155_v0 = vunpack.i.l.bf16 %v2154_v50 }
 0x10e   : > { %2388 = vrot.lane.b32.xlu1 %v2387_v13, %s2594_s29  ;;  %2383 = vrot.lane.b32.xlu0 %v2382_v45, %s2594_s29  ;;  %v979_v26 = vsel %vm967_vm8, %v2160_v27, %v3747_v1 }
 0x10f   : > { %v977_v50 = vsel %vm967_vm8, %v2155_v0, %v2156_v24  ;;  %v978_v13 = vsel %vm967_vm8, %v2156_v24, %v2160_v27  ;;  %v3125_v45 = vpop.permute.xlu1 %2168  ;;  %v1720_v46 = vpack.c.bf16 %v979_v26, %v971_v60  ;;  %v1870_v24 = vunpack.i.l.bf16 %v2764_v44  ;;  %v2573_v26 = vld [vmem:[%s2635_s20 + $0x68] sm:$0xff] }
 0x110   : > { %v3127_v21 = vpop.permute.xlu0 %2163  ;;  %v1684_v41 = vpack.c.bf16 %v977_v50, %v969_v16  ;;  %v1722_v39 = vpack.c.bf16 %v978_v13, %v970_v4  ;;  %v1886_v27 = vunpack.i.h.bf16 %v2770_v47  ;;  %v2574_v16 = vld [vmem:[%s2635_s20 + $0x70] sm:$0xff]  ;;  %v2170_v4 = vunpack.i.l.bf16 %v3125_v45 }
 0x111   : > { %v2165_v1 = vunpack.i.l.bf16 %v3127_v21  ;;  %v2402_v60 = vpack.i.bf16 %v2574_v16, %v2573_v26  ;;  %1721 = vmatprep.subr.bf16.mxu1 %v1720_v46  ;;  %v3748_v16 = vunpack.i.l.bf16 %v2753_v38 }
 0x112   : > { %2398 = vrot.lane.b32.xlu1 %v2397_v29, %s2594_s29  ;;  %2393 = vrot.lane.b32.xlu0 %v2392_v30, %s2594_s29  ;;  %v2407_v29 = vpack.i.bf16 %v2762_v42, %v2575_v12  ;;  %v3750_v12 = vunpack.i.h.bf16 %v3127_v21 }
 0x113   : > { %1685 = vmatprep.subr.bf16.mxu0 %v1684_v41  ;;  %v968_v13 = vsel %vm967_vm8, %v2165_v1, %v2145_v33  ;;  %v976_v34 = vsel %vm967_vm8, %v2165_v1, %v2155_v0  ;;  %v2179_v44 = vpop.permute.xlu1 %2178  ;;  %1723 = vmatpush1.bf16.msra.mxu1 %v1722_v39  ;;  %v275_v41 = vsel %vm268_vm0, %v3748_v16, %v1866_v7  ;;  %v3749_v0 = vunpack.i.l.bf16 %v2770_v47 }
 0x114   : > { %v3145_v22 = vpop.permute.xlu0 %2173  ;;  %v1686_v30 = vpack.c.bf16 %v976_v34, %v968_v13  ;;  %v2180_v48 = vunpack.i.l.bf16 %v2179_v44  ;;  %v276_v33 = vsel %vm268_vm0, %v1866_v7, %v1870_v24  ;;  %v2181_v50 = vunpack.i.h.bf16 %v2179_v44 }
 0x115   : > { %v2176_v26 = vunpack.i.h.bf16 %v3145_v22  ;;  %v283_v46 = vsel %vm268_vm0, %v3749_v0, %v1886_v27  ;;  %v3736_v42 = vunpack.i.l.bf16 %v3145_v22  ;;  %v985_v38 = vsel %vm967_vm8, %v3750_v12, %v2170_v4 }
 0x116   : > { %2408 = vrot.lane.b32.xlu1 %v2407_v29, %s2594_s29  ;;  %1687 = vmatpush1.bf16.msra.mxu0 %v1686_v30  ;;  %v284_v34 = vsel %vm268_vm0, %v1886_v27, %v2785_v55  ;;  %v2171_v39 = vunpack.i.h.bf16 %v3125_v45  ;;  %v2417_v13 = vpack.i.bf16 %v2781_v53, %v1870_v24  ;;  %v2412_v16 = vpack.i.bf16 %v276_v33, %v275_v41 }
 0x117   : > { %2403 = vrot.lane.b32.xlu0 %v2402_v60, %s2594_s29  ;;  %v993_v7 = vsel %vm967_vm8, %v2176_v26, %v2180_v48  ;;  %v3169_v47 = vpop.permute.xlu1 %2188  ;;  %v1910_v0 = vunpack.i.l.bf16 %v2803_v9  ;;  %v1906_v27 = vunpack.i.h.bf16 %v2805_v11  ;;  %v994_v45 = vsel %vm967_vm8, %v2180_v48, %v2181_v50 }
 0x118   : > { %v3171_v1 = vpop.permute.xlu0 %2183  ;;  %v1688_v60 = vpack.c.bf16 %v993_v7, %v985_v38  ;;  %v2191_v44 = vunpack.i.h.bf16 %v3169_v47  ;;  %v2190_v29 = vunpack.i.l.bf16 %v3169_v47  ;;  %v2422_v12 = vpack.i.bf16 %v284_v34, %v283_v46 }
 0x119   : > { %v3737_v30 = vunpack.i.l.bf16 %v3171_v1  ;;  %v3751_v53 = vunpack.i.h.bf16 %v3052_v49  ;;  %v987_v41 = vsel %vm967_vm8, %v2171_v39, %v3736_v42  ;;  %v2427_v38 = vpack.i.bf16 %v2818_v19, %v2785_v55 }
 0x11a   : > { %2418 = vrot.lane.b32.xlu1 %v2417_v13, %s2594_s29  ;;  %1689 = vmatprep.subr.bf16.mxu0 %v1688_v60  ;;  %v986_v34 = vsel %vm967_vm8, %v2170_v4, %v2171_v39  ;;  %v1926_v13 = vunpack.i.h.bf16 %v2827_v31  ;;  %v3206_v60 = vsel %vm570_vm6, %v2190_v29, %v2191_v44  ;;  %v3752_v42 = vunpack.i.l.bf16 %v2805_v11 }
 0x11b   : > { %v3184_v24 = vsel %vm570_vm6, %v3751_v53, %v2190_v29  ;;  %2413 = vrot.lane.b32.xlu0 %v2412_v16, %s2594_s29  ;;  %v995_v9 = vsel %vm967_vm8, %v2181_v50, %v3737_v30  ;;  %v3195_v48 = vpop.permute.xlu1 %568  ;;  %v1726_v16 = vpack.c.bf16 %v994_v45, %v986_v34  ;;  %v327_v53 = vsel %vm319_vm1, %v1906_v27, %v1910_v0 }
 0x11c   : > { %v2532_v33 = vpack.i.bf16 %v3184_v24, %v3062_v57  ;;  %v3197_v46 = vpop.permute.xlu0 %2193  ;;  %v1724_v7 = vpack.c.bf16 %v995_v9, %v987_v41  ;;  %v326_v30 = vsel %vm319_vm1, %v3752_v42, %v1906_v27  ;;  %v2186_v55 = vunpack.i.h.bf16 %v3171_v1 }
 0x11d   : > { %v2195_v50 = vunpack.i.l.bf16 %v3197_v46  ;;  %v3753_v19 = vunpack.i.l.bf16 %v3052_v49  ;;  %v2437_v29 = vpack.i.bf16 %v2841_v43, %v1910_v0  ;;  %v335_v27 = vsel %vm319_vm1, %v1926_v13, %v2825_v14 }
 0x11e   : > { %2428 = vrot.lane.b32.xlu1 %v2427_v38, %s2594_s29  ;;  %1725 = vmatprep.subr.bf16.mxu1 %v1724_v7  ;;  %v2432_v49 = vpack.i.bf16 %v327_v53, %v326_v30  ;;  %v3754_v41 = vunpack.i.l.bf16 %v2827_v31  ;;  %v1950_v38 = vunpack.i.l.bf16 %v2865_v6  ;;  %v1966_v7 = vunpack.i.h.bf16 %v2872_v20 }
 0x11f   : > { %v3220_v4 = vsel %vm570_vm6, %v3753_v19, %v2195_v50  ;;  %2423 = vrot.lane.b32.xlu0 %v2422_v12, %s2594_s29  ;;  %1727 = vmatpush1.bf16.msra.mxu1 %v1726_v16  ;;  %v2204_v39 = vpop.permute.xlu1 %2203  ;;  %v1946_v12 = vunpack.i.h.bf16 %v2853_v59  ;;  %v3755_v0 = vunpack.i.h.bf16 %v3127_v21  ;;  %v2447_v6 = vpack.i.bf16 %v2862_v54, %v2825_v14 }
 0x120   : > { %v2537_v11 = vpack.i.bf16 %v3220_v4, %v3206_v60  ;;  %v3225_v42 = vpop.permute.xlu0 %2198  ;;  %v334_v9 = vsel %vm319_vm1, %v3754_v41, %v1926_v13  ;;  %v2205_v34 = vunpack.i.l.bf16 %v2204_v39  ;;  %v3758_v47 = vunpack.i.l.bf16 %v3067_v56 }
 0x121   : > { %v2200_v45 = vunpack.i.l.bf16 %v3225_v42  ;;  %v2201_v43 = vunpack.i.h.bf16 %v3225_v42  ;;  %v984_v30 = vsel %vm967_vm8, %v2186_v55, %v3755_v0  ;;  %v2442_v41 = vpack.i.bf16 %v335_v27, %v334_v9 }
 0x122   : > { %2438 = vrot.lane.b32.xlu1 %v2437_v29, %s2594_s29  ;;  %v378_v55 = vsel %vm370_vm2, %v1946_v12, %v1950_v38  ;;  %v386_v27 = vsel %vm370_vm2, %v1966_v7, %v2888_v32  ;;  %v2206_v9 = vunpack.i.h.bf16 %v2204_v39  ;;  %v1986_v39 = vunpack.i.h.bf16 %v2915_v2 }
 0x123   : > { %2433 = vrot.lane.b32.xlu0 %v2432_v49, %s2594_s29  ;;  %v992_v31 = vsel %vm967_vm8, %v2200_v45, %v2176_v26  ;;  %v2214_v13 = vpop.permute.xlu1 %2213  ;;  %v3756_v49 = vunpack.i.l.bf16 %v2853_v59  ;;  %v3757_v26 = vunpack.i.l.bf16 %v2872_v20  ;;  %v1001_v59 = vsel %vm967_vm8, %v2201_v43, %v2205_v34 }
 0x124   : > { %v3246_v16 = vpop.permute.xlu0 %2208  ;;  %v1690_v53 = vpack.c.bf16 %v992_v31, %v984_v30  ;;  %v2215_v19 = vunpack.i.l.bf16 %v2214_v13  ;;  %v2216_v0 = vunpack.i.h.bf16 %v2214_v13  ;;  %v2457_v30 = vpack.i.bf16 %v2883_v10, %v1950_v38 }
 0x125   : > { %v2211_v29 = vunpack.i.h.bf16 %v3246_v16  ;;  %v377_v21 = vsel %vm370_vm2, %v3756_v49, %v1946_v12  ;;  %v385_v45 = vsel %vm370_vm2, %v3757_v26, %v1966_v7  ;;  %v2210_v14 = vunpack.i.l.bf16 %v3246_v16 }
 0x126   : > { %2448 = vrot.lane.b32.xlu1 %v2447_v6, %s2594_s29  ;;  %1691 = vmatpush1.bf16.msra.mxu0 %v1690_v53  ;;  %v3278_v13 = vsel %vm570_vm6, %v3195_v48, %v2191_v44  ;;  %v1985_v7 = vunpack.i.l.bf16 %v2915_v2  ;;  %v1010_v10 = vsel %vm967_vm8, %v2215_v19, %v2216_v0  ;;  %v2462_v38 = vpack.i.bf16 %v386_v27, %v385_v45 }
 0x127   : > { %2443 = vrot.lane.b32.xlu0 %v2442_v41, %s2594_s29  ;;  %v1009_v54 = vsel %vm967_vm8, %v2211_v29, %v2215_v19  ;;  %v3269_v12 = vpop.permute.xlu1 %2223  ;;  %v2452_v41 = vpack.i.bf16 %v378_v55, %v377_v21  ;;  %v1003_v49 = vsel %vm967_vm8, %v2206_v9, %v2210_v14  ;;  %v2467_v56 = vpack.i.bf16 %v2911_v61, %v2888_v32 }
 0x128   : > { %v3271_v20 = vpop.permute.xlu0 %2218  ;;  %v1692_v31 = vpack.c.bf16 %v1009_v54, %v1001_v59  ;;  %v2225_v6 = vunpack.i.l.bf16 %v3269_v12  ;;  %v1002_v45 = vsel %vm967_vm8, %v2205_v34, %v2206_v9  ;;  %v2005_v32 = vunpack.i.l.bf16 %v2938_v40 }
 0x129   : > { %v2220_v53 = vunpack.i.l.bf16 %v3271_v20  ;;  %v2221_v61 = vunpack.i.h.bf16 %v3271_v20  ;;  %v3760_v34 = vunpack.i.h.bf16 %v3075_v36  ;;  %v2477_v36 = vpack.i.bf16 %v2933_v17, %v1986_v39 }
 0x12a   : > { %2458 = vrot.lane.b32.xlu1 %v2457_v30, %s2594_s29  ;;  %1693 = vmatprep.subr.bf16.mxu0 %v1692_v31  ;;  %v3291_v44 = vsel %vm621_vm7, %v3758_v47, %v2225_v6  ;;  %v3759_v30 = vunpack.i.h.bf16 %v2900_v51  ;;  %v2006_v47 = vunpack.i.h.bf16 %v2938_v40  ;;  %v3763_v42 = vunpack.i.h.bf16 %v2957_v25 }
 0x12b   : > { %2453 = vrot.lane.b32.xlu0 %v2452_v41, %s2594_s29  ;;  %v1011_v2 = vsel %vm967_vm8, %v2216_v0, %v2220_v53  ;;  %v2547_v19 = vpack.i.bf16 %v3291_v44, %v3278_v13  ;;  %v3302_v21 = vpop.permute.xlu1 %2233  ;;  %v1730_v0 = vpack.c.bf16 %v1010_v10, %v1002_v45  ;;  %v426_v41 = vsel %vm419_vm3, %v1985_v7, %v1986_v39 }
 0x12c   : > { %v3304_v55 = vpop.permute.xlu0 %2228  ;;  %v1728_v26 = vpack.c.bf16 %v1011_v2, %v1003_v49  ;;  %v2235_v59 = vunpack.i.l.bf16 %v3302_v21  ;;  %v425_v31 = vsel %vm419_vm3, %v3759_v30, %v1985_v7  ;;  %v2025_v49 = vunpack.i.l.bf16 %v2957_v25 }
 0x12d   : > { %v2231_v54 = vunpack.i.h.bf16 %v3304_v55  ;;  %v2230_v27 = vunpack.i.l.bf16 %v3304_v55  ;;  %v2046_v39 = vunpack.i.h.bf16 %v2967_v28 }
 0x12e   : > { %2468 = vrot.lane.b32.xlu1 %v2467_v56, %s2594_s29  ;;  %1729 = vmatprep.subr.bf16.mxu1 %v1728_v26  ;;  %v3325_v9 = vsel %vm621_vm7, %v3760_v34, %v2235_v59  ;;  %v2472_v56 = vpack.i.bf16 %v426_v41, %v425_v31  ;;  %v3761_v26 = vunpack.i.h.bf16 %v2923_v15  ;;  %v2487_v31 = vpack.i.bf16 %v2953_v8, %v2006_v47 }
 0x12f   : > { %v3332_v51 = vsel %vm621_vm7, %v2230_v27, %v2231_v54  ;;  %2463 = vrot.lane.b32.xlu0 %v2462_v38, %s2594_s29  ;;  %1731 = vmatpush1.bf16.msra.mxu1 %v1730_v0  ;;  %v3337_v7 = vpop.permute.xlu1 %2238  ;;  %v433_v38 = vsel %vm419_vm3, %v2005_v32, %v2006_v47  ;;  %v1000_v0 = vsel %vm967_vm8, %v2221_v61, %v2201_v43 }
 0x130   : > { %v2557_v40 = vpack.i.bf16 %v3325_v9, %v3332_v51  ;;  %v3339_v10 = vpop.permute.xlu0 %619  ;;  %v2240_v2 = vunpack.i.l.bf16 %v3337_v7  ;;  %v432_v45 = vsel %vm419_vm3, %v3761_v26, %v2005_v32  ;;  %v3762_v32 = vunpack.i.h.bf16 %v2944_v62 }
 0x131   : > { %v475_v43 = vsel %vm468_vm4, %v2025_v49, %v3763_v42  ;;  %v2482_v61 = vpack.i.bf16 %v433_v38, %v432_v45  ;;  %v483_v8 = vsel %vm468_vm4, %v2046_v39, %v2965_v52  ;;  %v3764_v62 = vunpack.i.l.bf16 %v2967_v28 }
 0x132   : > { %2478 = vrot.lane.b32.xlu1 %v2477_v36, %s2594_s29  ;;  %v1008_v17 = vsel %vm967_vm8, %v2240_v2, %v2211_v29  ;;  %v474_v34 = vsel %vm468_vm4, %v3762_v32, %v2025_v49  ;;  %v2241_v25 = vunpack.i.h.bf16 %v3337_v7  ;;  %v3765_v52 = vpack.i.bf16 %v2981_v5, %v2976_v3 }
 0x133   : > { %2473 = vrot.lane.b32.xlu0 %v2472_v56, %s2594_s29  ;;  %v3357_v30 = vpop.permute.xlu1 %2248  ;;  %v1694_v41 = vpack.c.bf16 %v1008_v17, %v1000_v0  ;;  %v482_v47 = vsel %vm468_vm4, %v3764_v62, %v2046_v39  ;;  %v2492_v26 = vpack.i.bf16 %v475_v43, %v474_v34  ;;  %v637_v9 = vsel %vm621_vm7, %v3339_v10, %v2231_v54 }
 0x134   : > { %v2244_v15 = vpop.permute.xlu0 %2243  ;;  %v3738_v36 = vunpack.i.l.bf16 %v3357_v30  ;;  %v2251_v45 = vunpack.i.h.bf16 %v3357_v30 }
 0x135   : > { %v2246_v29 = vunpack.i.h.bf16 %v2244_v15  ;;  %v2245_v2 = vunpack.i.l.bf16 %v2244_v15  ;;  %1695 = vmatpush1.bf16.msra.mxu0 %v1694_v41  ;;  %v2065_v15 = vunpack.i.l.bf16 %v2989_v18 }
 0x136   : > { %2488 = vrot.lane.b32.xlu1 %v2487_v31, %s2594_s29 }
 0x137   : > { %2483 = vrot.lane.b32.xlu0 %v2482_v61, %s2594_s29  ;;  %v3375_v49 = vpop.permute.xlu1 %2258  ;;  %v1017_v28 = vsel %vm967_vm8, %v2241_v25, %v2245_v2  ;;  %v1019_v7 = vsel %vm967_vm8, %v2246_v29, %v3738_v36  ;;  %v1018_v39 = vsel %vm967_vm8, %v2245_v2, %v2246_v29  ;;  %v3766_v29 = vunpack.i.h.bf16 %v2989_v18 }
 0x138   : > { %v2254_v56 = vpop.permute.xlu0 %2253  ;;  %v2260_v38 = vunpack.i.l.bf16 %v3375_v49  ;;  %v2261_v31 = vunpack.i.h.bf16 %v3375_v49  ;;  %v2086_v36 = vunpack.i.h.bf16 %v3010_v35 }
 0x139   : > { %v2256_v0 = vunpack.i.h.bf16 %v2254_v56  ;;  %v2255_v17 = vunpack.i.l.bf16 %v2254_v56  ;;  %v2502_v56 = vpack.i.bf16 %v483_v8, %v482_v47  ;;  %v526_v2 = vsel %vm519_vm5, %v2065_v15, %v3766_v29 }
 0x13a   : > { %2498 = vrot.lane.b32.xlu1 %v3765_v52, %s2594_s29  ;;  %v1016_v18 = vsel %vm967_vm8, %v2261_v31, %v2241_v25  ;;  %v3771_v31 = vld [vmem:[#allocation2_spill] sm:$0xff] }
 0x13b   : > { %2493 = vrot.lane.b32.xlu0 %v2492_v26, %s2594_s29  ;;  %v1025_v41 = vsel %vm967_vm8, %v2251_v45, %v2255_v17  ;;  %v1027_v32 = vsel %vm967_vm8, %v2256_v0, %v2260_v38  ;;  %v1026_v3 = vsel %vm967_vm8, %v2255_v17, %v2256_v0  ;;  %v2269_v5 = vpop.permute.xlu1 %2268  ;;  %v3767_v26 = vunpack.i.h.bf16 %v2991_v37 }
 0x13c   : > { %v2264_v34 = vpop.permute.xlu0 %2263  ;;  %v1696_v42 = vpack.c.bf16 %v1025_v41, %v1017_v28  ;;  %v1732_v43 = vpack.c.bf16 %v1027_v32, %v1019_v7  ;;  %v1734_v61 = vpack.c.bf16 %v1026_v3, %v1018_v39  ;;  %v3768_v0 = vpack.i.bf16 %v3004_v58, %v2999_v63 }
 0x13d   : > { %v2265_v62 = vunpack.i.l.bf16 %v2264_v34  ;;  %v525_v52 = vsel %vm519_vm5, %v3767_v26, %v2065_v15  ;;  %v2270_v17 = vunpack.i.l.bf16 %v2269_v5  ;;  %v2266_v28 = vunpack.i.h.bf16 %v2264_v34 }
 0x13e   : > { %2508 = vrot.lane.b32.xlu1 %v3768_v0, %s2594_s29  ;;  %1697 = vmatprep.subr.bf16.mxu0 %v1696_v42  ;;  %v2512_v63 = vpack.i.bf16 %v526_v2, %v525_v52  ;;  %v3769_v58 = vunpack.i.l.bf16 %v3010_v35  ;;  %v534_v32 = vsel %vm519_vm5, %v2086_v36, %v3028_v23  ;;  %v2196_v26 = vunpack.i.h.bf16 %v3197_v46  ;;  %v3773_v52 = vld [vmem:[#allocation5_spill] sm:$0xff]  ;;  %v3774_v0 = vld [vmem:[#allocation4_spill] sm:$0xff] }
 0x13f   : > { %2503 = vrot.lane.b32.xlu0 %v2502_v56, %s2594_s29  ;;  %1733 = vmatprep.subr.bf16.mxu1 %v1732_v43  ;;  %v1024_v8 = vsel %vm967_vm8, %v2265_v62, %v2251_v45  ;;  %v3770_v45 = vld [vmem:[#allocation3_spill] sm:$0xff]  ;;  %v1033_v42 = vsel %vm967_vm8, %v2266_v28, %v2270_v17  ;;  %v2271_v43 = vunpack.i.h.bf16 %v2269_v5 }
 0x140   : > { %1735 = vmatpush1.bf16.msra.mxu1 %v1734_v61  ;;  %v2279_v37 = vpop.permute.xlu1 %2278  ;;  %v3410_v47 = vpop.permute.xlu0 %2273  ;;  %v1698_v15 = vpack.c.bf16 %v1024_v8, %v1016_v18  ;;  %v533_v41 = vsel %vm519_vm5, %v3769_v58, %v2086_v36  ;;  %v3772_v3 = vpack.i.bf16 %v3770_v45, %v3771_v31  ;;  %v3775_v18 = vpack.i.bf16 %v3773_v52, %v3774_v0 }
 0x141   : > { %v2280_v7 = vunpack.i.l.bf16 %v2279_v37  ;;  %v2276_v39 = vunpack.i.h.bf16 %v3410_v47  ;;  %v2275_v25 = vunpack.i.l.bf16 %v3410_v47  ;;  %v2281_v34 = vunpack.i.h.bf16 %v2279_v37 }
 0x142   : > { %2518 = vrot.lane.b32.xlu1 %v3772_v3, %s2594_s29  ;;  %1699 = vmatpush1.bf16.msra.mxu0 %v1698_v15  ;;  %v2522_v36 = vpack.i.bf16 %v534_v32, %v533_v41  ;;  %v1034_v32 = vsel %vm967_vm8, %v2270_v17, %v2271_v43  ;;  %v585_v45 = vsel %vm570_vm6, %v2196_v26, %v3195_v48  ;;  %v2236_v17 = vunpack.i.h.bf16 %v3302_v21 }
 0x143   : > { %2513 = vrot.lane.b32.xlu0 %v2512_v63, %s2594_s29  ;;  %v1041_v35 = vsel %vm967_vm8, %v2276_v39, %v2280_v7  ;;  %v1035_v5 = vsel %vm967_vm8, %v2271_v43, %v2275_v25  ;;  %v1042_v63 = vsel %vm967_vm8, %v2280_v7, %v2281_v34  ;;  %v584_v31 = vsel %vm570_vm6, %v2195_v50, %v2196_v26 }
 0x144   : > { %v3426_v61 = vpop.permute.xlu1 %2288  ;;  %v3428_v62 = vpop.permute.xlu0 %2283  ;;  %v1700_v23 = vpack.c.bf16 %v1041_v35, %v1033_v42  ;;  %v1738_v7 = vpack.c.bf16 %v1042_v63, %v1034_v32  ;;  %v2542_v46 = vpack.i.bf16 %v585_v45, %v584_v31  ;;  %v636_v13 = vsel %vm621_vm7, %v2236_v17, %v3339_v10 }
 0x145   : > { %v2290_v56 = vunpack.i.l.bf16 %v3426_v61  ;;  %v2286_v29 = vunpack.i.h.bf16 %v3428_v62  ;;  %v2285_v2 = vunpack.i.l.bf16 %v3428_v62  ;;  %v2595_v42 = vmov 0  }
 0x146   : > { %2528 = vrot.lane.b32.xlu1 %v3775_v18, %s2594_s29  ;;  %1701 = vmatprep.subr.bf16.mxu0 %v1700_v23 }
 0x147   : > { %2523 = vrot.lane.b32.xlu0 %v2522_v36, %s2594_s29  ;;  %v1032_v8 = vsel %vm967_vm8, %v2286_v29, %v2266_v28  ;;  %v1040_v37 = vsel %vm967_vm8, %v2290_v56, %v2276_v39  ;;  %v1043_v15 = vsel %vm967_vm8, %v2281_v34, %v2285_v2  ;;  %v2226_v28 = vunpack.i.h.bf16 %v3269_v12  ;;  %v215_v36 = vld [vmem:[%s3705_s3] sm:$0x7] }
 0x148   : > { %v1702_v58 = vpack.c.bf16 %v1040_v37, %v1032_v8  ;;  %v1736_v41 = vpack.c.bf16 %v1043_v15, %v1035_v5  ;;  %v2294_v48 = vpop.permute.xlu0 %2293  ;;  %2567 = vset.pattern.permute.xlu0 %v2595_v42 }
 0x149   : > { %v627_v50 = vsel %vm621_vm7, %v2225_v6, %v2226_v28  ;;  %v628_v60 = vsel %vm621_vm7, %v2226_v28, %v2230_v27  ;;  %v2295_v57 = vunpack.i.l.bf16 %v2294_v48  ;;  %v635_v27 = vsel %vm621_vm7, %v2235_v59, %v2236_v17 }
 0x14a   : > { %2538 = vrot.lane.b32.xlu1 %v2537_v11, %s2594_s29  ;;  %1703 = vmatpush1.bf16.msra.mxu0 %v1702_v58  ;;  %v2552_v4 = vpack.i.bf16 %v628_v60, %v627_v50  ;;  %v2291_v11 = vunpack.i.h.bf16 %v3426_v61  ;;  %v2296_v21 = vunpack.i.h.bf16 %v2294_v48  ;;  %v2562_v35 = vpack.i.bf16 %v636_v13, %v635_v27 }
 0x14b   : > { %2533 = vrot.lane.b32.xlu0 %v2532_v33, %s2594_s29  ;;  %1737 = vmatprep.subr.bf16.mxu1 %v1736_v41 }
 0x14c   : > { %1739 = vmatpush1.bf16.msra.mxu1 %v1738_v7  ;;  %v1049_v39 = vsel %vm967_vm8, %v2291_v11, %v2295_v57  ;;  %v1050_v23 = vsel %vm967_vm8, %v2295_v57, %v2296_v21 }
 0x14e   : > { %2548 = vrot.lane.b32.xlu1 %v2547_v19, %s2594_s29 }
 0x14f   : > { %2543 = vrot.lane.b32.xlu0 %v2542_v46, %s2594_s29 }
 0x150   : > { %v3475_v24 = vpop.permute.xlu1 %2298  ;;  %v2304_v33 = vpop.permute.xlu0 %2303 }
 0x151   : > { %v2301_v12 = vunpack.i.h.bf16 %v3475_v24  ;;  %v2305_v6 = vunpack.i.l.bf16 %v2304_v33  ;;  %v2306_v44 = vunpack.i.h.bf16 %v2304_v33  ;;  %v2300_v19 = vunpack.i.l.bf16 %v3475_v24 }
 0x152   : > { %2558 = vrot.lane.b32.xlu1 %v2557_v40, %s2594_s29 }
 0x153   : > { %2553 = vrot.lane.b32.xlu0 %v2552_v4, %s2594_s29  ;;  %v1057_v3 = vsel %vm967_vm8, %v2301_v12, %v2305_v6  ;;  %v1058_v40 = vsel %vm967_vm8, %v2305_v6, %v2306_v44  ;;  %v1051_v61 = vsel %vm967_vm8, %v2296_v21, %v2300_v19 }
 0x154   : > { %v3492_v34 = vpop.permute.xlu1 %2308  ;;  %v1704_v59 = vpack.c.bf16 %v1057_v3, %v1049_v39  ;;  %v1742_v29 = vpack.c.bf16 %v1058_v40, %v1050_v23 }
 0x155   : > { %v2310_v51 = vunpack.i.l.bf16 %v3492_v34  ;;  %v2311_v43 = vunpack.i.h.bf16 %v3492_v34 }
 0x156   : > { %965 = vrot.lane.b32.xlu1 %v637_v9, %s2594_s29  ;;  %1705 = vmatprep.subr.bf16.mxu0 %v1704_v59 }
 0x157   : > { %2563 = vrot.lane.b32.xlu0 %v2562_v35, %s2594_s29  ;;  %v1059_v55 = vsel %vm967_vm8, %v2306_v44, %v2310_v51  ;;  %v1048_v26 = vsel %vm967_vm8, %v2311_v43, %v2291_v11 }
 0x158   : > { %v2314_v54 = vpop.permute.xlu0 %2313  ;;  %v1740_v10 = vpack.c.bf16 %v1059_v55, %v1051_v61  ;;  %v2319_v18 = vpop.permute.xlu1 %2318 }
 0x159   : > { %v2315_v56 = vunpack.i.l.bf16 %v2314_v54  ;;  %v2321_v8 = vunpack.i.h.bf16 %v2319_v18  ;;  %v2320_v37 = vunpack.i.l.bf16 %v2319_v18  ;;  %v2316_v15 = vunpack.i.h.bf16 %v2314_v54 }
 0x15a   : > { %1741 = vmatprep.subr.bf16.mxu1 %v1740_v10 }
 0x15b   : > { %1743 = vmatpush1.bf16.msra.mxu1 %v1742_v29  ;;  %v1056_v52 = vsel %vm967_vm8, %v2315_v56, %v2301_v12  ;;  %640 = vperm.xlu0 %2567, %v215_v36   ;;  %v1065_v7 = vsel %vm967_vm8, %v2316_v15, %v2320_v37  ;;  %v1066_v46 = vsel %vm967_vm8, %v2320_v37, %v2321_v8 }
 0x15c   : > { %v1706_v0 = vpack.c.bf16 %v1056_v52, %v1048_v26 }
 0x15e   : > { %1707 = vmatpush1.bf16.msra.mxu0 %v1706_v0 }
 0x160   : > { %v3515_v5 = vpop.permute.xlu0 %2323 }
 0x161   : > { %v2325_v63 = vunpack.i.l.bf16 %v3515_v5  ;;  %v2326_v32 = vunpack.i.h.bf16 %v3515_v5 }
 0x163   : > { %v1067_v48 = vsel %vm967_vm8, %v2321_v8, %v2325_v63 }
 0x164   : > { %v2329_v58 = vpop.permute.xlu1 %2328  ;;  %v3518_v41 = vpop.permute.xlu0 %2333 }
 0x165   : > { %v2331_v45 = vunpack.i.h.bf16 %v2329_v58  ;;  %v2330_v31 = vunpack.i.l.bf16 %v2329_v58  ;;  %v2335_v28 = vunpack.i.l.bf16 %v3518_v41  ;;  %v2336_v50 = vunpack.i.h.bf16 %v3518_v41 }
 0x167   : > { %v1073_v17 = vsel %vm967_vm8, %v2326_v32, %v2330_v31  ;;  %v1075_v60 = vsel %vm967_vm8, %v2331_v45, %v2335_v28  ;;  %v1074_v57 = vsel %vm967_vm8, %v2330_v31, %v2331_v45  ;;  %v1064_v27 = vsel %vm967_vm8, %v2336_v50, %v2316_v15 }
 0x168   : > { %v2339_v33 = vpop.permute.xlu1 %2338  ;;  %v1708_v4 = vpack.c.bf16 %v1073_v17, %v1065_v7  ;;  %v1744_v11 = vpack.c.bf16 %v1075_v60, %v1067_v48  ;;  %v1746_v12 = vpack.c.bf16 %v1074_v57, %v1066_v46 }
 0x169   : > { %v2340_v6 = vunpack.i.l.bf16 %v2339_v33  ;;  %v2341_v42 = vunpack.i.h.bf16 %v2339_v33 }
 0x16a   : > { %1709 = vmatprep.subr.bf16.mxu0 %v1708_v4  ;;  %1745 = vmatprep.subr.bf16.mxu1 %v1744_v11 }
 0x16b   : > { %1747 = vmatpush1.bf16.msra.mxu1 %v1746_v12  ;;  %v1072_v13 = vsel %vm967_vm8, %v2340_v6, %v2326_v32 }
 0x16c   : > { %v2344_v44 = vpop.permute.xlu0 %2343  ;;  %v1710_v39 = vpack.c.bf16 %v1072_v13, %v1064_v27 }
 0x16d   : > { %v2345_v3 = vunpack.i.l.bf16 %v2344_v44  ;;  %v2346_v54 = vunpack.i.h.bf16 %v2344_v44 }
 0x16e   : > { %1711 = vmatpush1.bf16.msra.mxu0 %v1710_v39 }
 0x16f   : > { %v1081_v61 = vsel %vm967_vm8, %v2341_v42, %v2345_v3  ;;  %v1082_v45 = vsel %vm967_vm8, %v2345_v3, %v2346_v54 }
 0x170   : > { %v3535_v21 = vpop.permute.xlu1 %2348  ;;  %v2354_v59 = vpop.permute.xlu0 %2353 }
 0x171   : > { %v2351_v35 = vunpack.i.h.bf16 %v3535_v21  ;;  %v2355_v9 = vunpack.i.l.bf16 %v2354_v59  ;;  %v2356_v40 = vunpack.i.h.bf16 %v2354_v59  ;;  %v2350_v43 = vunpack.i.l.bf16 %v3535_v21 }
 0x173   : > { %v1089_v55 = vsel %vm967_vm8, %v2351_v35, %v2355_v9  ;;  %v1090_v52 = vsel %vm967_vm8, %v2355_v9, %v2356_v40  ;;  %v1083_v8 = vsel %vm967_vm8, %v2346_v54, %v2350_v43 }
 0x174   : > { %v3541_v10 = vpop.permute.xlu1 %2358  ;;  %v2364_v23 = vpop.permute.xlu0 %2363  ;;  %v1712_v36 = vpack.c.bf16 %v1089_v55, %v1081_v61  ;;  %v1750_v31 = vpack.c.bf16 %v1090_v52, %v1082_v45 }
 0x175   : > { %v2361_v56 = vunpack.i.h.bf16 %v3541_v10  ;;  %v2360_v29 = vunpack.i.l.bf16 %v3541_v10  ;;  %v2365_v26 = vunpack.i.l.bf16 %v2364_v23  ;;  %v2366_v50 = vunpack.i.h.bf16 %v2364_v23 }
 0x176   : > { %1713 = vmatprep.subr.bf16.mxu0 %v1712_v36 }
 0x177   : > { %v1080_v0 = vsel %vm967_vm8, %v2361_v56, %v2341_v42  ;;  %v1088_v18 = vsel %vm967_vm8, %v2365_v26, %v2351_v35  ;;  %v1091_v37 = vsel %vm967_vm8, %v2356_v40, %v2360_v29 }
 0x178   : > { %v2369_v15 = vpop.permute.xlu1 %2368  ;;  %v1714_v58 = vpack.c.bf16 %v1088_v18, %v1080_v0  ;;  %v1748_v32 = vpack.c.bf16 %v1091_v37, %v1083_v8 }
 0x179   : > { %v2370_v7 = vunpack.i.l.bf16 %v2369_v15  ;;  %v2371_v12 = vunpack.i.h.bf16 %v2369_v15 }
 0x17a   : > { %1715 = vmatpush1.bf16.msra.mxu0 %v1714_v58  ;;  %1749 = vmatprep.subr.bf16.mxu1 %v1748_v32  ;;  %v3776_v32 = vld [vmem:[#allocation8_spill] sm:$0xff] }
 0x17b   : > { %1751 = vmatpush1.bf16.msra.mxu1 %v1750_v31  ;;  %v1097_v4 = vsel %vm967_vm8, %v2366_v50, %v2370_v7  ;;  %v1098_v36 = vsel %vm967_vm8, %v2370_v7, %v2371_v12  ;;  %v3778_v7 = vld [vmem:[#allocation7_spill] sm:$0xff] }
 0x17c   : > { %v2379_v48 = vpop.permute.xlu1 %2378  ;;  %v3555_v46 = vpop.permute.xlu0 %2373 }
 0x17d   : > { %v2380_v17 = vunpack.i.l.bf16 %v2379_v48  ;;  %v2376_v60 = vunpack.i.h.bf16 %v3555_v46  ;;  %v2381_v57 = vunpack.i.h.bf16 %v2379_v48  ;;  %v2375_v33 = vunpack.i.l.bf16 %v3555_v46  ;;  %v3777_v48 = vld [vmem:[#allocation9_spill] sm:$0xff] }
 0x17f   : > { %v1105_v11 = vsel %vm967_vm8, %v2376_v60, %v2380_v17  ;;  %v1106_v59 = vsel %vm967_vm8, %v2380_v17, %v2381_v57  ;;  %v1099_v9 = vsel %vm967_vm8, %v2371_v12, %v2375_v33 }
 0x180   : > { %v2389_v6 = vpop.permute.xlu1 %2388  ;;  %v3561_v27 = vpop.permute.xlu0 %2383  ;;  %v1716_v13 = vpack.c.bf16 %v1105_v11, %v1097_v4  ;;  %v1754_v56 = vpack.c.bf16 %v1106_v59, %v1098_v36 }
 0x181   : > { %v2390_v44 = vunpack.i.l.bf16 %v2389_v6  ;;  %v2386_v39 = vunpack.i.h.bf16 %v3561_v27  ;;  %v2385_v3 = vunpack.i.l.bf16 %v3561_v27  ;;  %v2391_v8 = vunpack.i.h.bf16 %v2389_v6 }
 0x182   : > { %1717 = vmatprep.subr.bf16.mxu0 %v1716_v13  ;;  %v3780_v13 = vld [vmem:[#allocation6_spill] sm:$0xff] }
 0x183   : > { %v1096_v42 = vsel %vm967_vm8, %v2386_v39, %v2366_v50  ;;  %v1104_v35 = vsel %vm967_vm8, %v2390_v44, %v2376_v60  ;;  %v1107_v40 = vsel %vm967_vm8, %v2381_v57, %v2385_v3  ;;  %v3779_v50 = vunpack.i.h.bf16 %v3778_v7 }
 0x184   : > { %v2399_v61 = vpop.permute.xlu1 %2398  ;;  %v2394_v55 = vpop.permute.xlu0 %2393  ;;  %v1718_v54 = vpack.c.bf16 %v1104_v35, %v1096_v42  ;;  %v1752_v23 = vpack.c.bf16 %v1107_v40, %v1099_v9  ;;  %v3781_v44 = vunpack.i.h.bf16 %v3780_v13 }
 0x185   : > { %v2401_v26 = vunpack.i.h.bf16 %v2399_v61  ;;  %v2396_v52 = vunpack.i.h.bf16 %v2394_v55  ;;  %v2395_v0 = vunpack.i.l.bf16 %v2394_v55  ;;  %v2400_v37 = vunpack.i.l.bf16 %v2399_v61 }
 0x186   : > { %1719 = vmatpush1.bf16.msra.mxu0 %v1718_v54  ;;  %1753 = vmatprep.subr.bf16.mxu1 %v1752_v23  ;;  %v972_v39 = vsel %vm967_vm8, %v3781_v44, %v2391_v8 }
 0x187   : > { %1755 = vmatpush1.bf16.msra.mxu1 %v1754_v56  ;;  %v980_v17 = vsel %vm967_vm8, %v3779_v50, %v2401_v26  ;;  %v974_v60 = vsel %vm967_vm8, %v2395_v0, %v2396_v52  ;;  %v973_v11 = vsel %vm967_vm8, %v2391_v8, %v2395_v0  ;;  %v975_v9 = vsel %vm967_vm8, %v2396_v52, %v2400_v37 }
 0x188   : > { %v2409_v18 = vpop.permute.xlu1 %2408  ;;  %v1758_v40 = vpack.c.bf16 %v980_v17, %v972_v39  ;;  %v3783_v50 = vunpack.i.l.bf16 %v3145_v22 }
 0x189   : > { %v2410_v15 = vunpack.i.l.bf16 %v2409_v18  ;;  %v2404_v58 = vpop.permute.xlu0 %2403  ;;  %1324 = vmatmul.mubr.f32.vlgmr.msra.gmra.mrb[0].mxu0 %v3776_v32  ;;  %v2411_v56 = vunpack.i.h.bf16 %v2409_v18 }
 0x18a   : > { %v2406_v45 = vunpack.i.h.bf16 %v2404_v58  ;;  %v2405_v31 = vunpack.i.l.bf16 %v2404_v58  ;;  %1395 = vmatmul.mubr.f32.vlgmr.msra.gmra.mrb[0].mxu1 %v3776_v32  ;;  %1678 = vmatprep.mubr.msk.f32.mxu0 %vm1256_vm9, %v3777_v48  ;;  %v3782_v32 = vunpack.i.l.bf16 %v3171_v1 }
 0x18b   : > { %1679 = vmatprep.mubr.msk.f32.mxu1 %vm1256_vm9, %v3777_v48  ;;  %v988_v17 = vsel %vm967_vm8, %v3783_v50, %v2411_v56 }
 0x18c   : > { %v982_v57 = vsel %vm967_vm8, %v2405_v31, %v2406_v45  ;;  %v2419_v4 = vpop.permute.xlu1 %2418  ;;  %v981_v12 = vsel %vm967_vm8, %v2401_v26, %v2405_v31  ;;  %v983_v6 = vsel %vm967_vm8, %v2406_v45, %v2410_v15 }
 0x18d   : > { %v1794_v59 = vpack.c.bf16 %v982_v57, %v974_v60  ;;  %v2414_v42 = vpop.permute.xlu0 %2413  ;;  %v1756_v35 = vpack.c.bf16 %v981_v12, %v973_v11  ;;  %v1792_v61 = vpack.c.bf16 %v983_v6, %v975_v9  ;;  %v2421_v55 = vunpack.i.h.bf16 %v2419_v4 }
 0x18e   : > { %v2416_v54 = vunpack.i.h.bf16 %v2414_v42  ;;  %v2415_v23 = vunpack.i.l.bf16 %v2414_v42  ;;  %v2420_v26 = vunpack.i.l.bf16 %v2419_v4 }
 0x18f   : > { %1757 = vmatprep.subr.bf16.mxu0 %v1756_v35  ;;  %1793 = vmatprep.subr.bf16.mxu1 %v1792_v61  ;;  %v996_v52 = vsel %vm967_vm8, %v3782_v32, %v2421_v55 }
 0x190   : > { %1759 = vmatpush1.bf16.msra.mxu0 %v1758_v40  ;;  %v2429_v36 = vpop.permute.xlu1 %2428  ;;  %1795 = vmatpush1.bf16.msra.mxu1 %v1794_v59  ;;  %v990_v37 = vsel %vm967_vm8, %v2415_v23, %v2416_v54  ;;  %v989_v48 = vsel %vm967_vm8, %v2411_v56, %v2415_v23  ;;  %v991_v4 = vsel %vm967_vm8, %v2416_v54, %v2420_v26 }
 0x191   : > { %v2430_v0 = vunpack.i.l.bf16 %v2429_v36  ;;  %v2424_v15 = vpop.permute.xlu0 %2423  ;;  %v1762_v11 = vpack.c.bf16 %v996_v52, %v988_v17  ;;  %v2431_v59 = vunpack.i.h.bf16 %v2429_v36 }
 0x192   : > { %v2426_v8 = vunpack.i.h.bf16 %v2424_v15  ;;  %v2425_v58 = vunpack.i.l.bf16 %v2424_v15 }
 0x194   : > { %v998_v45 = vsel %vm967_vm8, %v2425_v58, %v2426_v8  ;;  %v2439_v31 = vpop.permute.xlu1 %2438  ;;  %v997_v7 = vsel %vm967_vm8, %v2421_v55, %v2425_v58  ;;  %v999_v18 = vsel %vm967_vm8, %v2426_v8, %v2430_v0  ;;  %v1004_v0 = vsel %vm967_vm8, %v2210_v14, %v2431_v59 }
 0x195   : > { %v1798_v60 = vpack.c.bf16 %v998_v45, %v990_v37  ;;  %v2434_v57 = vpop.permute.xlu0 %2433  ;;  %v1760_v1 = vpack.c.bf16 %v997_v7, %v989_v48  ;;  %v1796_v12 = vpack.c.bf16 %v999_v18, %v991_v4  ;;  %v2441_v6 = vunpack.i.h.bf16 %v2439_v31 }
 0x196   : > { %v2436_v13 = vunpack.i.h.bf16 %v2434_v57  ;;  %v2435_v44 = vunpack.i.l.bf16 %v2434_v57  ;;  %v2440_v42 = vunpack.i.l.bf16 %v2439_v31 }
 0x197   : > { %1761 = vmatprep.subr.bf16.mxu0 %v1760_v1  ;;  %1797 = vmatprep.subr.bf16.mxu1 %v1796_v12  ;;  %v1012_v61 = vsel %vm967_vm8, %v2220_v53, %v2441_v6 }
 0x198   : > { %1763 = vmatpush1.bf16.msra.mxu0 %v1762_v11  ;;  %v2449_v39 = vpop.permute.xlu1 %2448  ;;  %1799 = vmatpush1.bf16.msra.mxu1 %v1798_v60  ;;  %v1006_v55 = vsel %vm967_vm8, %v2435_v44, %v2436_v13  ;;  %v1005_v56 = vsel %vm967_vm8, %v2431_v59, %v2435_v44  ;;  %v1007_v53 = vsel %vm967_vm8, %v2436_v13, %v2440_v42 }
 0x199   : > { %v2450_v22 = vunpack.i.l.bf16 %v2449_v39  ;;  %v2444_v35 = vpop.permute.xlu0 %2443  ;;  %v1766_v58 = vpack.c.bf16 %v1012_v61, %v1004_v0  ;;  %v2451_v48 = vunpack.i.h.bf16 %v2449_v39 }
 0x19a   : > { %v2446_v9 = vunpack.i.h.bf16 %v2444_v35  ;;  %v2445_v40 = vunpack.i.l.bf16 %v2444_v35 }
 0x19c   : > { %v1014_v54 = vsel %vm967_vm8, %v2445_v40, %v2446_v9  ;;  %v2459_v23 = vpop.permute.xlu1 %2458  ;;  %v1013_v26 = vsel %vm967_vm8, %v2441_v6, %v2445_v40  ;;  %v1015_v36 = vsel %vm967_vm8, %v2446_v9, %v2450_v22  ;;  %v3784_v6 = vunpack.i.l.bf16 %v3357_v30 }
 0x19d   : > { %v1802_v15 = vpack.c.bf16 %v1014_v54, %v1006_v55  ;;  %v2454_v8 = vpop.permute.xlu0 %2453  ;;  %v1764_v20 = vpack.c.bf16 %v1013_v26, %v1005_v56  ;;  %v1800_v32 = vpack.c.bf16 %v1015_v36, %v1007_v53  ;;  %v2461_v52 = vunpack.i.h.bf16 %v2459_v23 }
 0x19e   : > { %v2456_v37 = vunpack.i.h.bf16 %v2454_v8  ;;  %v2455_v45 = vunpack.i.l.bf16 %v2454_v8  ;;  %v2460_v7 = vunpack.i.l.bf16 %v2459_v23  ;;  %v1020_v13 = vsel %vm967_vm8, %v3784_v6, %v2451_v48 }
 0x19f   : > { %1765 = vmatprep.subr.bf16.mxu0 %v1764_v20  ;;  %1801 = vmatprep.subr.bf16.mxu1 %v1800_v32  ;;  %v1028_v17 = vsel %vm967_vm8, %v2260_v38, %v2461_v52 }
 0x1a0   : > { %1767 = vmatpush1.bf16.msra.mxu0 %v1766_v58  ;;  %v2469_v31 = vpop.permute.xlu1 %2468  ;;  %1803 = vmatpush1.bf16.msra.mxu1 %v1802_v15  ;;  %v1022_v60 = vsel %vm967_vm8, %v2455_v45, %v2456_v37  ;;  %v1021_v4 = vsel %vm967_vm8, %v2451_v48, %v2455_v45  ;;  %v1023_v38 = vsel %vm967_vm8, %v2456_v37, %v2460_v7 }
 0x1a1   : > { %v2470_v16 = vunpack.i.l.bf16 %v2469_v31  ;;  %v2464_v18 = vpop.permute.xlu0 %2463  ;;  %v1770_v59 = vpack.c.bf16 %v1028_v17, %v1020_v13  ;;  %v2471_v61 = vunpack.i.h.bf16 %v2469_v31 }
 0x1a2   : > { %v2466_v14 = vunpack.i.h.bf16 %v2464_v18  ;;  %v2465_v50 = vunpack.i.l.bf16 %v2464_v18 }
 0x1a3   : > { %v1036_v58 = vsel %vm967_vm8, %v2275_v25, %v2471_v61 }
 0x1a4   : > { %v1030_v57 = vsel %vm967_vm8, %v2465_v50, %v2466_v14  ;;  %v2479_v1 = vpop.permute.xlu1 %2478  ;;  %v1029_v11 = vsel %vm967_vm8, %v2461_v52, %v2465_v50  ;;  %v1031_v12 = vsel %vm967_vm8, %v2466_v14, %v2470_v16 }
 0x1a5   : > { %v1806_v44 = vpack.c.bf16 %v1030_v57, %v1022_v60  ;;  %v2474_v39 = vpop.permute.xlu0 %2473  ;;  %v1768_v49 = vpack.c.bf16 %v1029_v11, %v1021_v4  ;;  %v1804_v42 = vpack.c.bf16 %v1031_v12, %v1023_v38  ;;  %v2481_v22 = vunpack.i.h.bf16 %v2479_v1 }
 0x1a6   : > { %v2476_v35 = vunpack.i.h.bf16 %v2474_v39  ;;  %v2475_v9 = vunpack.i.l.bf16 %v2474_v39  ;;  %v2480_v55 = vunpack.i.l.bf16 %v2479_v1 }
 0x1a7   : > { %1769 = vmatprep.subr.bf16.mxu0 %v1768_v49  ;;  %1805 = vmatprep.subr.bf16.mxu1 %v1804_v42  ;;  %v1044_v26 = vsel %vm967_vm8, %v2285_v2, %v2481_v22 }
 0x1a8   : > { %1771 = vmatpush1.bf16.msra.mxu0 %v1770_v59  ;;  %v2489_v40 = vpop.permute.xlu1 %2488  ;;  %1807 = vmatpush1.bf16.msra.mxu1 %v1806_v44  ;;  %v1038_v36 = vsel %vm967_vm8, %v2475_v9, %v2476_v35  ;;  %v1037_v8 = vsel %vm967_vm8, %v2471_v61, %v2475_v9  ;;  %v1039_v2 = vsel %vm967_vm8, %v2476_v35, %v2480_v55 }
 0x1a9   : > { %v2490_v30 = vunpack.i.l.bf16 %v2489_v40  ;;  %v2484_v54 = vpop.permute.xlu0 %2483  ;;  %v1774_v37 = vpack.c.bf16 %v1044_v26, %v1036_v58  ;;  %v2491_v18 = vunpack.i.h.bf16 %v2489_v40 }
 0x1aa   : > { %v2486_v23 = vunpack.i.h.bf16 %v2484_v54  ;;  %v2485_v56 = vunpack.i.l.bf16 %v2484_v54 }
 0x1ab   : > { %v1052_v13 = vsel %vm967_vm8, %v2300_v19, %v2491_v18 }
 0x1ac   : > { %v1046_v0 = vsel %vm967_vm8, %v2485_v56, %v2486_v23  ;;  %v2499_v15 = vpop.permute.xlu1 %2498  ;;  %v1045_v20 = vsel %vm967_vm8, %v2481_v22, %v2485_v56  ;;  %v1047_v53 = vsel %vm967_vm8, %v2486_v23, %v2490_v30 }
 0x1ad   : > { %v1810_v32 = vpack.c.bf16 %v1046_v0, %v1038_v36  ;;  %v2494_v52 = vpop.permute.xlu0 %2493  ;;  %v1772_v62 = vpack.c.bf16 %v1045_v20, %v1037_v8  ;;  %v1808_v45 = vpack.c.bf16 %v1047_v53, %v1039_v2  ;;  %v2501_v31 = vunpack.i.h.bf16 %v2499_v15 }
 0x1ae   : > { %v2496_v48 = vunpack.i.h.bf16 %v2494_v52  ;;  %v2495_v7 = vunpack.i.l.bf16 %v2494_v52  ;;  %v2500_v14 = vunpack.i.l.bf16 %v2499_v15 }
 0x1af   : > { %1773 = vmatprep.subr.bf16.mxu0 %v1772_v62  ;;  %1809 = vmatprep.subr.bf16.mxu1 %v1808_v45  ;;  %v1060_v60 = vsel %vm967_vm8, %v2310_v51, %v2501_v31 }
 0x1b0   : > { %1775 = vmatpush1.bf16.msra.mxu0 %v1774_v37  ;;  %v2509_v16 = vpop.permute.xlu1 %2508  ;;  %1811 = vmatpush1.bf16.msra.mxu1 %v1810_v32  ;;  %v1054_v57 = vsel %vm967_vm8, %v2495_v7, %v2496_v48  ;;  %v1053_v11 = vsel %vm967_vm8, %v2491_v18, %v2495_v7  ;;  %v1055_v51 = vsel %vm967_vm8, %v2496_v48, %v2500_v14 }
 0x1b1   : > { %v2510_v47 = vunpack.i.l.bf16 %v2509_v16  ;;  %v2504_v50 = vpop.permute.xlu0 %2503  ;;  %v1778_v49 = vpack.c.bf16 %v1060_v60, %v1052_v13  ;;  %v2511_v9 = vunpack.i.h.bf16 %v2509_v16 }
 0x1b2   : > { %v2506_v25 = vunpack.i.h.bf16 %v2504_v50  ;;  %v2505_v17 = vunpack.i.l.bf16 %v2504_v50 }
 0x1b3   : > { %v1068_v15 = vsel %vm967_vm8, %v2325_v63, %v2511_v9 }
 0x1b4   : > { %v1062_v1 = vsel %vm967_vm8, %v2505_v17, %v2506_v25  ;;  %v2519_v4 = vpop.permute.xlu1 %2518  ;;  %v1061_v12 = vsel %vm967_vm8, %v2501_v31, %v2505_v17  ;;  %v1063_v6 = vsel %vm967_vm8, %v2506_v25, %v2510_v47 }
 0x1b5   : > { %v1814_v44 = vpack.c.bf16 %v1062_v1, %v1054_v57  ;;  %v2514_v39 = vpop.permute.xlu0 %2513  ;;  %v1776_v34 = vpack.c.bf16 %v1061_v12, %v1053_v11  ;;  %v1812_v38 = vpack.c.bf16 %v1063_v6, %v1055_v51  ;;  %v2521_v59 = vunpack.i.h.bf16 %v2519_v4 }
 0x1b6   : > { %v2516_v42 = vunpack.i.h.bf16 %v2514_v39  ;;  %v2515_v22 = vunpack.i.l.bf16 %v2514_v39  ;;  %v2520_v40 = vunpack.i.l.bf16 %v2519_v4 }
 0x1b7   : > { %1777 = vmatprep.subr.bf16.mxu0 %v1776_v34  ;;  %1813 = vmatprep.subr.bf16.mxu1 %v1812_v38  ;;  %v1076_v30 = vsel %vm967_vm8, %v2335_v28, %v2521_v59 }
 0x1b8   : > { %1779 = vmatpush1.bf16.msra.mxu0 %v1778_v49  ;;  %v2529_v35 = vpop.permute.xlu1 %2528  ;;  %1815 = vmatpush1.bf16.msra.mxu1 %v1814_v44  ;;  %v1070_v54 = vsel %vm967_vm8, %v2515_v22, %v2516_v42  ;;  %v1069_v26 = vsel %vm967_vm8, %v2511_v9, %v2515_v22  ;;  %v1071_v28 = vsel %vm967_vm8, %v2516_v42, %v2520_v40 }
 0x1b9   : > { %v2530_v24 = vunpack.i.l.bf16 %v2529_v35  ;;  %v2524_v61 = vpop.permute.xlu0 %2523  ;;  %v1782_v53 = vpack.c.bf16 %v1076_v30, %v1068_v15  ;;  %v2531_v37 = vunpack.i.h.bf16 %v2529_v35 }
 0x1ba   : > { %v2526_v19 = vunpack.i.h.bf16 %v2524_v61  ;;  %v2525_v55 = vunpack.i.l.bf16 %v2524_v61 }
 0x1bb   : > { %v1084_v17 = vsel %vm967_vm8, %v2350_v43, %v2531_v37 }
 0x1bc   : > { %v1078_v23 = vsel %vm967_vm8, %v2525_v55, %v2526_v19  ;;  %v2539_v56 = vpop.permute.xlu1 %2538  ;;  %v1077_v36 = vsel %vm967_vm8, %v2521_v59, %v2525_v55  ;;  %v1079_v0 = vsel %vm967_vm8, %v2526_v19, %v2530_v24  ;;  %v1544_v19 = vlaneseq }
 0x1bd   : > { %v1818_v8 = vpack.c.bf16 %v1078_v23, %v1070_v54  ;;  %v2534_v20 = vpop.permute.xlu0 %2533  ;;  %v1780_v41 = vpack.c.bf16 %v1077_v36, %v1069_v26  ;;  %v1816_v58 = vpack.c.bf16 %v1079_v0, %v1071_v28  ;;  %v2541_v62 = vunpack.i.h.bf16 %v2539_v56 }
 0x1be   : > { %v2536_v32 = vunpack.i.h.bf16 %v2534_v20  ;;  %v2535_v52 = vunpack.i.l.bf16 %v2534_v20  ;;  %v2540_v45 = vunpack.i.l.bf16 %v2539_v56  ;;  %v1545_v55 = vshrl.u32 %v1544_v19, 7 }
 0x1bf   : > { %1781 = vmatprep.subr.bf16.mxu0 %v1780_v41  ;;  %1817 = vmatprep.subr.bf16.mxu1 %v1816_v58  ;;  %v1092_v16 = vsel %vm967_vm8, %v2360_v29, %v2541_v62 }
 0x1c0   : > { %1783 = vmatpush1.bf16.msra.mxu0 %v1782_v53  ;;  %v2549_v2 = vpop.permute.xlu1 %2548  ;;  %1819 = vmatpush1.bf16.msra.mxu1 %v1818_v8  ;;  %v1086_v7 = vsel %vm967_vm8, %v2535_v52, %v2536_v32  ;;  %v1085_v47 = vsel %vm967_vm8, %v2531_v37, %v2535_v52  ;;  %v1087_v10 = vsel %vm967_vm8, %v2536_v32, %v2540_v45  ;;  %v1546_v46 = vsub.s32 0, %v1545_v55 }
 0x1c1   : > { %v2544_v5 = vpop.permute.xlu0 %2543  ;;  %v2550_v31 = vunpack.i.l.bf16 %v2549_v2  ;;  %v1786_v4 = vpack.c.bf16 %v1092_v16, %v1084_v17  ;;  %v2551_v44 = vunpack.i.h.bf16 %v2549_v2  ;;  %v1550_v30 = vsub.s32 1, %v1545_v55 }
 0x1c2   : > { %v2546_v63 = vunpack.i.h.bf16 %v2544_v5  ;;  %v2545_v48 = vunpack.i.l.bf16 %v2544_v5  ;;  %v1554_v54 = vsub.s32 2, %v1545_v55  ;;  %v1558_v23 = vsub.s32 3, %v1545_v55 }
 0x1c3   : > { %v1100_v9 = vsel %vm967_vm8, %v2375_v33, %v2551_v44  ;;  %v216_v33 = vld [vmem:[%s3703_s1] sm:$0xff]  ;;  %v1574_v16 = vsub.s32 7, %v1545_v55 }
 0x1c4   : > { %v1094_v18 = vsel %vm967_vm8, %v2545_v48, %v2546_v63  ;;  %v2559_v14 = vpop.permute.xlu1 %2558  ;;  %v1093_v50 = vsel %vm967_vm8, %v2541_v62, %v2545_v48  ;;  %v1095_v25 = vsel %vm967_vm8, %v2546_v63, %v2550_v31  ;;  %v1547_v26 = vrot.slane %v216_v33, %v1546_v46 }
 0x1c5   : > { %v1822_v60 = vpack.c.bf16 %v1094_v18, %v1086_v7  ;;  %v2554_v57 = vpop.permute.xlu0 %2553  ;;  %v1784_v1 = vpack.c.bf16 %v1093_v50, %v1085_v47  ;;  %v1820_v29 = vpack.c.bf16 %v1095_v25, %v1087_v10  ;;  %v2561_v6 = vunpack.i.h.bf16 %v2559_v14 }
 0x1c6   : > { %v2556_v11 = vunpack.i.h.bf16 %v2554_v57  ;;  %v2555_v12 = vunpack.i.l.bf16 %v2554_v57  ;;  %v2560_v13 = vunpack.i.l.bf16 %v2559_v14  ;;  %v1551_v0 = vrot.slane %v216_v33, %v1550_v30 }
 0x1c7   : > { %1785 = vmatprep.subr.bf16.mxu0 %v1784_v1  ;;  %1821 = vmatprep.subr.bf16.mxu1 %v1820_v29  ;;  %v1108_v51 = vsel %vm967_vm8, %v2385_v3, %v2561_v6  ;;  %v2576_v3 = vld [vmem:[%s3704_s2] sm:$0x77]  ;;  %v1555_v15 = vrot.slane %v216_v33, %v1554_v54  ;;  %v1559_v28 = vrot.slane %v216_v33, %v1558_v23  ;;  %v1562_v63 = vsub.s32 4, %v1545_v55 }
 0x1c8   : > { %1787 = vmatpush1.bf16.msra.mxu0 %v1786_v4  ;;  %1823 = vmatpush1.bf16.msra.mxu1 %v1822_v60  ;;  %v1102_v43 = vsel %vm967_vm8, %v2555_v12, %v2556_v11  ;;  %v966_v49 = vpop.permute.xlu1 %965  ;;  %v1103_v38 = vsel %vm967_vm8, %v2556_v11, %v2560_v13  ;;  %v1101_v22 = vsel %vm967_vm8, %v2551_v44, %v2555_v12  ;;  %v1570_v48 = vsub.s32 6, %v1545_v55 }
 0x1c9   : > { %v2564_v39 = vpop.permute.xlu0 %2563  ;;  %v1790_v61 = vpack.c.bf16 %v1108_v51, %v1100_v9  ;;  %v1566_v7 = vsub.s32 5, %v1545_v55  ;;  %v1563_v18 = vrot.slane %v216_v33, %v1562_v63  ;;  %v1575_v17 = vrot.slane %v216_v33, %v1574_v16 }
 0x1ca   : > { %v2566_v21 = vunpack.i.h.bf16 %v2564_v39  ;;  %v2565_v34 = vunpack.i.l.bf16 %v2564_v39  ;;  %v1571_v14 = vrot.slane %v216_v33, %v1570_v48 }
 0x1cb   : > { %v1567_v25 = vrot.slane %v216_v33, %v1566_v7 }
 0x1cc   : > { %v1110_v59 = vsel %vm967_vm8, %v2565_v34, %v2566_v21  ;;  %v1111_v42 = vsel %vm967_vm8, %v2566_v21, %v966_v49  ;;  %v1109_v35 = vsel %vm967_vm8, %v2561_v6, %v2565_v34 }
 0x1cd   : > { %v1826_v40 = vpack.c.bf16 %v1110_v59, %v1102_v43  ;;  %v1824_v24 = vpack.c.bf16 %v1111_v42, %v1103_v38  ;;  %v1788_v27 = vpack.c.bf16 %v1109_v35, %v1101_v22 }
 0x1cf   : > { %1789 = vmatprep.subr.bf16.mxu0 %v1788_v27  ;;  %1825 = vmatprep.subr.bf16.mxu1 %v1824_v24 }
 0x1d0   : > { %1791 = vmatpush1.bf16.msra.mxu0 %v1790_v61  ;;  %1827 = vmatpush1.bf16.msra.mxu1 %v1826_v40 }
 0x1d3   : > { %1466 = vmatmul.mubr.f32.vlgmr.msra.gmra.mrb[2].mxu0 %v2576_v3  ;;  %1537 = vmatmul.mubr.f32.vlgmr.msra.gmra.mrb[2].mxu1 %v2576_v3 }
 0x1da   : > { %v641_v56 = vpop.permute.xlu0 %640 }
 0x25c   : > { %v1325_v36 = vpop.f32.mrb[0].mxu0 }
 0x25d   : > { %v1396_v8 = vpop.f32.mrb[0].mxu1  ;;  %v1326_v20 = vadd.f32 %v1325_v36, %v641_v56  ;;  %v1327_v41 = vpop.f32.mrb[1].mxu0 }
 0x25e   : > { %v1328_v53 = vadd.f32 %v1327_v41, %v641_v56  ;;  %v1397_v58 = vadd.f32 %v1396_v8, %v641_v56  ;;  %v1398_v32 = vpop.f32.mrb[1].mxu1 }
 0x25f   : > { %v1584_v52 = vmul.f32 %v1547_v26, %v1326_v20  ;;  %v1399_v62 = vadd.f32 %v1398_v32, %v641_v56 }
 0x260   : > { %v1585_v2 = vmul.f32 %v1551_v0, %v1328_v53  ;;  %v1586_v37 = vmul.f32 %v1555_v15, %v1397_v58 }
 0x261   : > { %v1587_v45 = vmul.f32 %v1559_v28, %v1399_v62 }
 0x262   : > { %v1600_v5 = vcombine.low %v1584_v52, %v1585_v2 }
 0x263   : > { %v1601_v31 = vcombine.low %v1586_v37, %v1587_v45 }
 0x264   : > { %1608 = vst [vmem:[%s197_s17] sm:$0x77] %v1600_v5 }
 0x265   : > { %1609 = vst [vmem:[%s197_s17 + $0x8] sm:$0x77] %v1601_v31 }
 0x2a6   : > { %v1467_v47 = vpop.f32.mrb[2].mxu0  ;;  %v1538_v50 = vpop.f32.mrb[2].mxu1 }
 0x2a7   : > { %v1468_v60 = vadd.f32 %v1467_v47, %v641_v56  ;;  %v1539_v57 = vadd.f32 %v1538_v50, %v641_v56  ;;  %v1469_v1 = vpop.f32.mrb[3].mxu0  ;;  %v1540_v10 = vpop.f32.mrb[3].mxu1 }
 0x2a8   : > { %v1470_v4 = vadd.f32 %v1469_v1, %v641_v56  ;;  %v1541_v29 = vadd.f32 %v1540_v10, %v641_v56 }
 0x2a9   : > { %v1588_v11 = vmul.f32 %v1563_v18, %v1468_v60  ;;  %v1590_v12 = vmul.f32 %v1571_v14, %v1539_v57 }
 0x2aa   : > { %v1589_v6 = vmul.f32 %v1567_v25, %v1470_v4  ;;  %v1591_v13 = vmul.f32 %v1575_v17, %v1541_v29 }
 0x2ac   : > { %v1602_v44 = vcombine.low %v1588_v11, %v1589_v6  ;;  %v1603_v39 = vcombine.low %v1590_v12, %v1591_v13 }
 0x2ae   : > { %1610 = vst [vmem:[%s197_s17 + $0x10] sm:$0x77] %v1602_v44  ;;  %1611 = vst [vmem:[%s197_s17 + $0x18] sm:$0x77] %v1603_v39 }
 0x2af PF: > { %s14_s15 = sadd.s32 1, %s2583_s15  }
 0x2b0   : > { %p11_p4 = scmp.ge.s32.totalorder %s14_s15, 4  }
 0x2b2   :  { %13 = sbr.rel (!%p11_p4) target bundleno = 1 (0x1), region = 66 }

// kernel: our_network_forward_pallas.2
= control target key start
LH: loop header
LB: loop body
LE: loop exit
PB: predicated region body
PF: predicated region fallthrough
CT: control target
= control target key end

     0   :  { %s6717_s29 = smov 0   ;;  %s8560_s0 = inlined_call_operand.vmem [shape: f32[2,8,256], index: 0, kind: input, shape index: {}]   ;;  %s8561_s1 = inlined_call_operand.vmem [shape: f32[1,256], index: 1, kind: input, shape index: {}]   ;;  %s8562_s2 = inlined_call_operand.vmem [shape: f32[16,72], index: 2, kind: input, shape index: {}]   ;;  %s8563_s3 = inlined_call_operand.vmem [shape: f32[16,1], index: 3, kind: input, shape index: {}]   ;;  %s8564_s4 = inlined_call_operand.vmem [shape: f32[32,144], index: 4, kind: input, shape index: {}]   ;;  %s8565_s5 = inlined_call_operand.vmem [shape: f32[32,1], index: 5, kind: input, shape index: {}]   ;;  %s8566_s6 = inlined_call_operand.vmem [shape: f32[16,288], index: 6, kind: input, shape index: {}]   ;;  %s8567_s7 = inlined_call_operand.vmem [shape: f32[16,1], index: 7, kind: input, shape index: {}]   ;;  %s8568_s8 = inlined_call_operand.vmem [shape: f32[16,144], index: 8, kind: input, shape index: {}]   ;;  %s8569_s9 = inlined_call_operand.vmem [shape: f32[16,1], index: 9, kind: input, shape index: {}]   ;;  %s8570_s10 = inlined_call_operand.vmem [shape: f32[1,16], index: 10, kind: input, shape index: {}]   ;;  %s8571_s11 = inlined_call_operand.<no memory space> [shape: f32[1,1], index: 11, kind: input, shape index: {}]   ;;  %s8572_s12 = inlined_call_operand.vmem [shape: f32[16,1], index: 12, kind: input, shape index: {}]   ;;  %s8573_s13 = inlined_call_operand.vmem [shape: f32[16,1], index: 13, kind: input, shape index: {}]   ;;  %s8574_s14 = inlined_call_operand.vmem [shape: f32[16,144], index: 14, kind: input, shape index: {}]   ;;  %s8575_s15 = inlined_call_operand.vmem [shape: f32[16,1], index: 15, kind: input, shape index: {}]   ;;  %s8576_s16 = inlined_call_operand.vmem [shape: f32[16,144], index: 16, kind: input, shape index: {}]   ;;  %s8577_s17 = inlined_call_operand.vmem [shape: f32[16,1], index: 17, kind: input, shape index: {}]   ;;  %s8578_s18 = inlined_call_operand.vmem [shape: f32[16,144], index: 18, kind: input, shape index: {}]   ;;  %s8579_s19 = inlined_call_operand.vmem [shape: f32[16,1], index: 19, kind: input, shape index: {}]   ;;  %s8580_s20 = inlined_call_operand.vmem [shape: f32[64,144], index: 20, kind: input, shape index: {}]   ;;  %s8581_s21 = inlined_call_operand.vmem [shape: f32[64,1], index: 21, kind: input, shape index: {}]   ;;  %s8582_s22 = inlined_call_operand.vmem [shape: f32[2,64,256], index: 22, kind: output, shape index: {}]  }
   0x1   :  { %8611 = sst [smem:[#allocation3_spill]] %s8560_s0  ;;  %v27_v0 = vstv %s8571_s11 }
   0x2   :  { %8612 = sst [smem:[#allocation4_spill]] %s8561_s1  ;;  %28 = vst [vmem:[#allocation2] sm:$0x1] %v27_v0 }
   0x3   :  { %8613 = sst [smem:[#allocation5_spill]] %s8562_s2 }
   0x4   :  { %8614 = sst [smem:[#allocation6_spill]] %s8563_s3 }
   0x5   :  { %8615 = sst [smem:[#allocation7_spill]] %s8564_s4 }
   0x6   :  { %8616 = sst [smem:[#allocation8_spill]] %s8565_s5 }
   0x7   :  { %8617 = sst [smem:[#allocation9_spill]] %s8566_s6 }
   0x8   :  { %8618 = sst [smem:[#allocation10_spill]] %s8567_s7 }
   0x9 LB: > { %s4398_s30 = sadd.s32 4294967295, %s6584_s29   ;;  %p4402_p0 = scmp.ge.s32.totalorder %s6584_s29, 1  ;;  %s6584_s29 = sphi %s6717_s29, %s34_s29  }
   0xa   : > { %p614_p1 = scmp.lt.s32.totalorder %s6584_s29, 3 }
   0xc   : > { %p615_p2 = pnand %p4402_p0, %p614_p1 }
   0xd   : > { %p676_p3 = scmp.lt.s32.totalorder (!%p615_p2), %s4398_s30, 1  ;;  %v6586_v1 = vmov (!%p615_p2), 0.0   ;;  %s8604_s4 = smov (!%p615_p2), 127   ;;  %vm702_vm0 = vcmask (!%p615_p2), 1039360   ;;  %vm711_vm1 = vcmask (!%p615_p2), 1031168   ;;  %vm720_vm2 = vcmask (!%p615_p2), 916480  }
   0xe   : > { %618 = sbr.rel (%p615_p2) target bundleno = 4954 (0x135a), region = 108  ;;  %696 = vrot.lane.b32.xlu0 (!%p615_p2), %v6586_v1, %s8604_s4  ;;  %937 = vmatprep.mubr.f32.mxu1 (!%p615_p2), %v6586_v1  ;;  %s8619_s1 = sld [smem:[#allocation3_spill]] (!%p615_p2)  ;;  %vm735_vm3 = vcmask (!%p615_p2), 900096   ;;  %vm744_vm4 = vcmask (!%p615_p2), 785408   ;;  %vm727_vm5 = vcmask (!%p615_p2), 908288   ;;  %vm753_vm6 = vcmask (!%p615_p2), 777216  }
   0xf   : > { %s8602_s24 = smov (!%p615_p2), 126   ;;  %s8600_s6 = smov (!%p615_p2), 112   ;;  %vm762_vm7 = vcmask (!%p615_p2), 769024   ;;  %v6596_v62 = vmov (!%p615_p2), 0   ;;  %vm829_vm8 = vcmask (!%p615_p2), 138240   ;;  %vm866_vm9 = vcmask (!%p615_p2), 588800  }
  0x10   : > { %s8598_s25 = smov (!%p615_p2), 111   ;;  %s8596_s26 = smov (!%p615_p2), 110   ;;  %4888 = vset.pattern.permute.xlu1 (!%p615_p2), %v6596_v62  ;;  %4889 = vset.pattern.permute.xlu0 (!%p615_p2), %v6596_v62  ;;  %vm1271_vm10 = vcmask (!%p615_p2), 130048   ;;  %vm1947_vm11 = vcmask (!%p615_p2), 261120   ;;  %vm6598_vm12 = vmmov (!%p615_p2), 0   ;;  %vm2581_vm13 = vcmask (!%p615_p2), 7168  }
  0x11   : > { %s8594_s2 = smov (!%p615_p2), 96   ;;  %s8592_s27 = smov (!%p615_p2), 95   ;;  %vm2588_vm14 = vcmask (!%p615_p2), 1040384  }
  0x12   : > { %s8590_s3 = smov (!%p615_p2), 94   ;;  %s8588_s28 = smov (!%p615_p2), 17  }
  0x13   : > { %s8620_s23 = sld [smem:[#allocation6_spill]] (!%p615_p2)  ;;  %s8630_s0 = smov (!%p615_p2), 126  }
  0x14   : > { %s8635_s7 = sld [smem:[#allocation10_spill]] (!%p615_p2) }
  0x15   : > { %s8637_s30 = smov (!%p676_p3, %s4398_s30), 1 }
  0x16   : > { %s4437_s11 = sshll.u32 %s8637_s30, 4 }
  0x17   : > { %s680_s5 = scalar_lea.vmem %s8619_s1, %s4437_s11  ;;  %s8621_s1 = sld [smem:[#allocation5_spill]] }
  0x18   : > { %v687_v2 = vld [vmem:[%s680_s5] sm:$0xff]  ;;  %v688_v3 = vld [vmem:[%s680_s5 + $0x8] sm:$0xff]  ;;  %s8627_s5 = sld [smem:[#allocation7_spill]]  ;;  %s8629_s11 = smov 127  }
  0x19   : > { %v4798_v4 = vpack.i.bf16 %v688_v3, %v687_v2  ;;  %v691_v61 = vld [vmem:[%s8620_s23] sm:$0xff]  ;;  %v692_v63 = vld [vmem:[%s8620_s23 + $0x8] sm:$0xff] }
  0x1b   : > { %4799 = vrot.lane.b32.xlu1 %v4798_v4, %s8602_s24  ;;  %4794 = vrot.lane.b32.xlu0 %v4798_v4, %s8604_s4 }
  0x1f   : > { %4804 = vrot.lane.b32.xlu1 %v4798_v4, %s8600_s6  ;;  %705 = vrot.lane.b32.xlu0 %v6586_v1, %s8602_s24 }
  0x23   : > { %714 = vrot.lane.b32.xlu1 %v6586_v1, %s8600_s6  ;;  %4809 = vrot.lane.b32.xlu0 %v4798_v4, %s8598_s25 }
  0x27   : > { %4814 = vrot.lane.b32.xlu1 %v4798_v4, %s8596_s26  ;;  %733 = vrot.lane.b32.xlu0 %v6586_v1, %s8596_s26 }
  0x2b   : > { %4819 = vrot.lane.b32.xlu1 %v4798_v4, %s8594_s2  ;;  %742 = vrot.lane.b32.xlu0 %v6586_v1, %s8594_s2  ;;  %s8622_s2 = sld [smem:[#allocation4_spill]] }
  0x2f   : > { %4824 = vrot.lane.b32.xlu1 %v4798_v4, %s8592_s27  ;;  %751 = vrot.lane.b32.xlu0 %v6586_v1, %s8592_s27  ;;  %s8624_s27 = smov 95  }
  0x33   : > { %756 = vrot.lane.b32.xlu1 %v687_v2, %s8590_s3  ;;  %758 = vrot.lane.b32.xlu0 %v688_v3, %s8590_s3 }
  0x37   : > { %760 = vrot.lane.b32.xlu1 %v6586_v1, %s8590_s3  ;;  %4829 = vrot.lane.b32.xlu0 %v4798_v4, %s8588_s28  ;;  %s8625_s3 = smov 94  }
  0x80   : > { %v6756_v5 = vpop.permute.xlu0 %696 }
  0x8d   : > { %v4800_v6 = vpop.permute.xlu1 %4799  ;;  %v4795_v7 = vpop.permute.xlu0 %4794 }
  0x8e   : > { %v4802_v8 = vunpack.i.h.bf16 %v4800_v6  ;;  %v4801_v9 = vunpack.i.l.bf16 %v4800_v6  ;;  %v4797_v10 = vunpack.i.h.bf16 %v4795_v7  ;;  %v4796_v11 = vunpack.i.l.bf16 %v4795_v7 }
  0x90   : > { %v704_v12 = vsel %vm702_vm0, %v4796_v11, %v4797_v10  ;;  %v713_v16 = vsel %vm711_vm1, %v4801_v9, %v4802_v8  ;;  %v703_v36 = vsel %vm702_vm0, %v6756_v5, %v4796_v11 }
  0x91   : > { %v4805_v13 = vpop.permute.xlu1 %4804  ;;  %v6759_v14 = vpop.permute.xlu0 %705  ;;  %v4838_v15 = vpack.i.bf16 %v4797_v10, %v704_v12  ;;  %v4848_v20 = vpack.i.bf16 %v4802_v8, %v713_v16  ;;  %v4843_v39 = vpack.i.bf16 %v703_v36, %v6586_v1 }
  0x92   : > { %v4806_v17 = vunpack.i.l.bf16 %v4805_v13  ;;  %v712_v23 = vsel %vm711_vm1, %v6759_v14, %v4801_v9  ;;  %v4807_v32 = vunpack.i.h.bf16 %v4805_v13 }
  0x93   : > { %4839 = vrot.lane.b32.xlu1 %v4838_v15, %s8588_s28 }
  0x94   : > { %v722_v45 = vsel %vm720_vm2, %v4806_v17, %v4807_v32 }
  0x95   : > { %v6763_v18 = vpop.permute.xlu1 %714  ;;  %v4810_v19 = vpop.permute.xlu0 %4809  ;;  %v4853_v49 = vpack.i.bf16 %v4807_v32, %v722_v45 }
  0x96   : > { %v721_v21 = vsel %vm720_vm2, %v6763_v18, %v4806_v17  ;;  %v4811_v22 = vunpack.i.l.bf16 %v4810_v19  ;;  %v4812_v42 = vunpack.i.h.bf16 %v4810_v19 }
  0x97   : > { %4849 = vrot.lane.b32.xlu1 %v4848_v20, %s8588_s28  ;;  %v4858_v26 = vpack.i.bf16 %v721_v21, %v712_v23 }
  0x98   : > { %v728_v51 = vsel %vm727_vm5, %v4811_v22, %v4812_v42 }
  0x99   : > { %v4815_v24 = vpop.permute.xlu1 %4814  ;;  %v6770_v25 = vpop.permute.xlu0 %733  ;;  %v4863_v56 = vpack.i.bf16 %v4812_v42, %v728_v51 }
  0x9a   : > { %v4817_v27 = vunpack.i.h.bf16 %v4815_v24  ;;  %v4816_v28 = vunpack.i.l.bf16 %v4815_v24 }
  0x9b   : > { %4859 = vrot.lane.b32.xlu1 %v4858_v26, %s8588_s28 }
  0x9c   : > { %v4833_v29 = vpack.i.bf16 %v4816_v28, %v4811_v22  ;;  %v736_v30 = vsel %vm735_vm3, %v4816_v28, %v4817_v27  ;;  %v737_v31 = vsel %vm735_vm3, %v4817_v27, %v6770_v25 }
  0x9d   : > { %v4820_v33 = vpop.permute.xlu1 %4819  ;;  %v4868_v34 = vpack.i.bf16 %v737_v31, %v736_v30  ;;  %v6776_v35 = vpop.permute.xlu0 %742 }
  0x9e   : > { %4834 = vrot.lane.b32.xlu0 %v4833_v29, %s8588_s28  ;;  %v4822_v37 = vunpack.i.h.bf16 %v4820_v33  ;;  %v4821_v38 = vunpack.i.l.bf16 %v4820_v33 }
  0x9f   : > { %4869 = vrot.lane.b32.xlu1 %v4868_v34, %s8588_s28 }
  0xa0   : > { %v745_v40 = vsel %vm744_vm4, %v4821_v38, %v4822_v37  ;;  %v746_v41 = vsel %vm744_vm4, %v4822_v37, %v6776_v35 }
  0xa1   : > { %v4825_v43 = vpop.permute.xlu1 %4824  ;;  %v4873_v44 = vpack.i.bf16 %v746_v41, %v745_v40  ;;  %v6789_v48 = vpop.permute.xlu0 %751 }
  0xa2   : > { %4844 = vrot.lane.b32.xlu0 %v4843_v39, %s8588_s28  ;;  %v4826_v46 = vunpack.i.l.bf16 %v4825_v43  ;;  %v4827_v47 = vunpack.i.h.bf16 %v4825_v43 }
  0xa3   : > { %4874 = vrot.lane.b32.xlu1 %v4873_v44, %s8588_s28 }
  0xa4   : > { %v4878_v50 = vpack.i.bf16 %v4826_v46, %v4821_v38  ;;  %v754_v53 = vsel %vm753_vm6, %v4826_v46, %v4827_v47  ;;  %v755_v54 = vsel %vm753_vm6, %v4827_v47, %v6789_v48 }
  0xa5   : > { %v757_v52 = vpop.permute.xlu1 %756  ;;  %v759_v55 = vpop.permute.xlu0 %758  ;;  %v4883_v58 = vpack.i.bf16 %v755_v54, %v754_v53 }
  0xa6   : > { %4854 = vrot.lane.b32.xlu0 %v4853_v49, %s8588_s28  ;;  %v763_v60 = vsel %vm762_vm7, %v757_v52, %v759_v55 }
  0xa7   : > { %4879 = vrot.lane.b32.xlu1 %v4878_v50, %s8588_s28 }
  0xa9   : > { %v6797_v57 = vpop.permute.xlu1 %760  ;;  %v4830_v0 = vpop.permute.xlu0 %4829 }
  0xaa   : > { %4864 = vrot.lane.b32.xlu0 %v4863_v56, %s8588_s28  ;;  %v764_v59 = vsel %vm762_vm7, %v759_v55, %v6797_v57  ;;  %v4832_v2 = vunpack.i.h.bf16 %v4830_v0  ;;  %v4831_v3 = vunpack.i.l.bf16 %v4830_v0 }
  0xab   : > { %827 = vrot.lane.b32.xlu1 %v764_v59, %s8588_s28 }
  0xac   : > { %v831_v8 = vsel %vm829_vm8, %v4831_v3, %v4832_v2 }
  0xae   : > { %4884 = vrot.lane.b32.xlu0 %v4883_v58, %s8588_s28 }
  0xaf   : > { %767 = vperm.xlu1 %4888, %v691_v61  }
  0xb2   : > { %825 = vrot.lane.b32.xlu0 %v763_v60, %s8588_s28 }
  0xb6   : > { %823 = vrot.lane.b32.xlu0 %v757_v52, %s8588_s28  ;;  %s8626_s28 = smov 17  }
  0xba   : > { %772 = vperm.xlu0 %4889, %v692_v63  }
 0x105   : > { %v4840_v4 = vpop.permute.xlu1 %4839 }
 0x106   : > { %v4842_v6 = vunpack.i.h.bf16 %v4840_v4  ;;  %v4841_v7 = vunpack.i.l.bf16 %v4840_v4 }
 0x108   : > { %v833_v9 = vsel %vm829_vm8, %v4841_v7, %v4842_v6 }
 0x109   : > { %v4850_v10 = vpop.permute.xlu1 %4849  ;;  %v4457_v11 = vpack.c.bf16 %v833_v9, %v831_v8 }
 0x10a   : > { %v4852_v20 = vunpack.i.h.bf16 %v4850_v10  ;;  %v4851_v22 = vunpack.i.l.bf16 %v4850_v10 }
 0x10b   : > { %4458 = vmatprep.subr.bf16.mxu1 %v4457_v11  ;;  %v689_v11 = vld [vmem:[%s8621_s1] sm:$0xff] }
 0x10c   : > { %v835_v36 = vsel %vm829_vm8, %v4851_v22, %v4852_v20 }
 0x10d   : > { %v4860_v12 = vpop.permute.xlu1 %4859 }
 0x10e   : > { %v4861_v23 = vunpack.i.l.bf16 %v4860_v12  ;;  %v4862_v29 = vunpack.i.h.bf16 %v4860_v12  ;;  %v690_v12 = vld [vmem:[%s8621_s1 + $0x8] sm:$0xff]  ;;  %s8634_s1 = sld [smem:[#allocation9_spill]] }
 0x110   : > { %v4835_v13 = vpop.permute.xlu0 %4834  ;;  %v834_v38 = vsel %vm829_vm8, %v4861_v23, %v4851_v22 }
 0x111   : > { %v4870_v15 = vpop.permute.xlu1 %4869  ;;  %v4837_v32 = vunpack.i.h.bf16 %v4835_v13  ;;  %v4836_v44 = vunpack.i.l.bf16 %v4835_v13  ;;  %v951_v13 = vlaneseq }
 0x112   : > { %v4872_v33 = vunpack.i.h.bf16 %v4870_v15  ;;  %v4871_v34 = vunpack.i.l.bf16 %v4870_v15 }
 0x113   : > { %v952_v15 = vshrl.u32 %v951_v13, 7 }
 0x114   : > { %v4845_v16 = vpop.permute.xlu0 %4844  ;;  %v841_v49 = vsel %vm829_vm8, %v4871_v34, %v4872_v33  ;;  %v840_v50 = vsel %vm829_vm8, %v4837_v32, %v4871_v34 }
 0x115   : > { %v4847_v17 = vunpack.i.h.bf16 %v4845_v16  ;;  %v6815_v19 = vunpack.i.l.bf16 %v4845_v16  ;;  %v4875_v21 = vpop.permute.xlu1 %4874  ;;  %v953_v16 = vsub.s32 0, %v952_v15  ;;  %v957_v20 = vsub.s32 1, %v952_v15 }
 0x116   : > { %v4877_v47 = vunpack.i.h.bf16 %v4875_v21  ;;  %v4876_v51 = vunpack.i.l.bf16 %v4875_v21 }
 0x117   : > { %v830_v24 = vsel %vm829_vm8, %v6815_v19, %v4831_v3  ;;  %v832_v26 = vsel %vm829_vm8, %v4847_v17, %v4841_v7  ;;  %v686_v17 = vld [vmem:[%s8622_s2] sm:$0x3]  ;;  %s8623_s2 = smov 96  }
 0x118   : > { %v4855_v27 = vpop.permute.xlu0 %4854  ;;  %v4459_v28 = vpack.c.bf16 %v832_v26, %v830_v24  ;;  %v843_v62 = vsel %vm829_vm8, %v4876_v51, %v4877_v47  ;;  %v6844_v22 = vrot.slane %v686_v17, %v953_v16  ;;  %v6846_v24 = vrot.slane %v686_v17, %v957_v20 }
 0x119   : > { %v4857_v30 = vunpack.i.h.bf16 %v4855_v27  ;;  %v4856_v31 = vunpack.i.l.bf16 %v4855_v27  ;;  %v4880_v40 = vpop.permute.xlu1 %4879 }
 0x11a   : > { %4460 = vmatpush1.bf16.msra.mxu1 %v4459_v28  ;;  %v4881_v52 = vunpack.i.l.bf16 %v4880_v40  ;;  %v4882_v59 = vunpack.i.h.bf16 %v4880_v40 }
 0x11b   : > { %v837_v37 = vsel %vm829_vm8, %v4856_v31, %v4857_v30  ;;  %v836_v39 = vsel %vm829_vm8, %v4862_v29, %v4856_v31 }
 0x11c   : > { %v4865_v41 = vpop.permute.xlu0 %4864  ;;  %v4461_v42 = vpack.c.bf16 %v837_v37, %v835_v36  ;;  %v4463_v43 = vpack.c.bf16 %v836_v39, %v834_v38  ;;  %v842_v0 = vsel %vm829_vm8, %v4881_v52, %v4876_v51 }
 0x11d   : > { %v4867_v45 = vunpack.i.h.bf16 %v4865_v41  ;;  %v4866_v46 = vunpack.i.l.bf16 %v4865_v41  ;;  %v828_v3 = vpop.permute.xlu1 %827 }
 0x11e   : > { %4462 = vmatprep.subr.bf16.mxu1 %v4461_v42 }
 0x11f   : > { %4464 = vmatpush1.bf16.msra.mxu1 %v4463_v43  ;;  %v839_v53 = vsel %vm829_vm8, %v4866_v46, %v4867_v45  ;;  %v838_v54 = vsel %vm829_vm8, %v4836_v44, %v4866_v46 }
 0x120   : > { %v4885_v55 = vpop.permute.xlu0 %4884  ;;  %v4465_v56 = vpack.c.bf16 %v841_v49, %v839_v53  ;;  %v4467_v58 = vpack.c.bf16 %v840_v50, %v838_v54 }
 0x121   : > { %v4887_v60 = vunpack.i.h.bf16 %v4885_v55  ;;  %v4886_v61 = vunpack.i.l.bf16 %v4885_v55 }
 0x122   : > { %4466 = vmatprep.subr.bf16.mxu1 %v4465_v56 }
 0x123   : > { %4468 = vmatpush1.bf16.msra.mxu1 %v4467_v58  ;;  %v845_v63 = vsel %vm829_vm8, %v4886_v61, %v4887_v60  ;;  %v844_v2 = vsel %vm829_vm8, %v4882_v59, %v4886_v61 }
 0x124   : > { %v826_v4 = vpop.permute.xlu0 %825  ;;  %v4469_v6 = vpack.c.bf16 %v845_v63, %v843_v62  ;;  %v4471_v7 = vpack.c.bf16 %v844_v2, %v842_v0 }
 0x125   : > { %v847_v8 = vsel %vm829_vm8, %v826_v4, %v828_v3 }
 0x126   : > { %4470 = vmatprep.subr.bf16.mxu1 %v4469_v6 }
 0x127   : > { %4472 = vmatpush1.bf16.msra.mxu1 %v4471_v7 }
 0x128   : > { %v824_v9 = vpop.permute.xlu0 %823  ;;  %889 = vmatprep.subr.mxu1 %v847_v8 }
 0x129   : > { %v846_v10 = vsel %vm829_vm8, %v824_v9, %v826_v4 }
 0x12b   : > { %890 = vmatpush1.msra.mxu1 %v846_v10 }
 0x12c   : > { %4407 = vmatmul.mubr.msk.f32.vlgmr.msra.gmra.mrb[0].mxu1 %vm866_vm9, %v689_v11 }
 0x12d   : > { %943 = vmatprep.mubr.f32.mxu1 %v6586_v1 }
 0x12e   : > { %v768_v21 = vpop.permute.xlu1 %767 }
 0x130   : > { %4408 = vmatmul.mubr.msk.f32.gmra.mrb[2].mxu1 %vm866_vm9, %v690_v12 }
 0x139   : > { %v773_v29 = vpop.permute.xlu0 %772 }
 0x1ff   : > { %v939_v23 = vpop.f32.mrb[0].mxu1 }
 0x200   : > { %v940_v26 = vadd.f32 %v939_v23, %v768_v21  ;;  %v941_v27 = vpop.f32.mrb[1].mxu1 }
 0x201   : > { %v942_v28 = vadd.f32 %v941_v27, %v768_v21 }
 0x202   : > { %v6849_v30 = vmul.f32 %v6844_v22, %v940_v26 }
 0x203   : > { %v6852_v31 = vmul.f32 %v6846_v24, %v942_v28  ;;  %v945_v32 = vpop.f32.mrb[2].mxu1 }
 0x204   : > { %v946_v33 = vadd.f32 %v945_v32, %v773_v29  ;;  %v947_v34 = vpop.f32.mrb[3].mxu1 }
 0x205   : > { %v948_v36 = vadd.f32 %v947_v34, %v773_v29  ;;  %v4895_v37 = vpack.i.bf16 %v6852_v31, %v6849_v30 }
 0x206   : > { %v6857_v38 = vmul.f32 %v6844_v22, %v946_v33 }
 0x207   : > { %v6860_v39 = vmul.f32 %v6846_v24, %v948_v36  ;;  %4896 = vrot.lane.b32.xlu0 %v4895_v37, %s8602_s24  ;;  %4891 = vrot.lane.b32.xlu1 %v4895_v37, %s8604_s4 }
 0x209   : > { %v4930_v40 = vpack.i.bf16 %v6860_v39, %v6857_v38 }
 0x20b   : > { %4901 = vrot.lane.b32.xlu0 %v4895_v37, %s8600_s6  ;;  %4931 = vrot.lane.b32.xlu1 %v4930_v40, %s8604_s4  ;;  %s8631_s4 = smov 112  }
 0x20f   : > { %4906 = vrot.lane.b32.xlu0 %v4895_v37, %s8598_s25  ;;  %4936 = vrot.lane.b32.xlu1 %v4930_v40, %s8602_s24  ;;  %s8632_s24 = smov 111  }
 0x213   : > { %4911 = vrot.lane.b32.xlu0 %v4895_v37, %s8596_s26  ;;  %4941 = vrot.lane.b32.xlu1 %v4930_v40, %s8600_s6  ;;  %s8628_s6 = sld [smem:[#allocation8_spill]] }
 0x217   : > { %4916 = vrot.lane.b32.xlu0 %v4895_v37, %s8623_s2  ;;  %4946 = vrot.lane.b32.xlu1 %v4930_v40, %s8598_s25  ;;  %s8633_s25 = smov 110  }
 0x21b   : > { %4921 = vrot.lane.b32.xlu0 %v4895_v37, %s8624_s27  ;;  %4951 = vrot.lane.b32.xlu1 %v4930_v40, %s8596_s26 }
 0x21f   : > { %4926 = vrot.lane.b32.xlu0 %v4895_v37, %s8625_s3  ;;  %4956 = vrot.lane.b32.xlu1 %v4930_v40, %s8623_s2 }
 0x223   : > { %4971 = vrot.lane.b32.xlu0 %v4895_v37, %s8626_s28  ;;  %4961 = vrot.lane.b32.xlu1 %v4930_v40, %s8624_s27 }
 0x227   : > { %4966 = vrot.lane.b32.xlu1 %v4930_v40, %s8625_s3 }
 0x22b   : > { %4976 = vrot.lane.b32.xlu1 %v4930_v40, %s8626_s28 }
 0x279   : > { %v4897_v41 = vpop.permute.xlu0 %4896  ;;  %v4892_v42 = vpop.permute.xlu1 %4891 }
 0x27a   : > { %v4899_v43 = vunpack.i.h.bf16 %v4897_v41  ;;  %v4898_v44 = vunpack.i.l.bf16 %v4897_v41  ;;  %v4894_v45 = vunpack.i.h.bf16 %v4892_v42  ;;  %v4893_v46 = vunpack.i.l.bf16 %v4892_v42 }
 0x27c   : > { %v1002_v47 = vsel %vm711_vm1, %v4898_v44, %v4899_v43  ;;  %v990_v49 = vsel %vm702_vm0, %v4893_v46, %v4894_v45  ;;  %v989_v4 = vsel %vm702_vm0, %v6756_v5, %v4893_v46  ;;  %v1001_v16 = vsel %vm711_vm1, %v6759_v14, %v4898_v44 }
 0x27d   : > { %v4902_v50 = vpop.permute.xlu0 %4901  ;;  %v4932_v51 = vpop.permute.xlu1 %4931  ;;  %v4985_v52 = vpack.i.bf16 %v4899_v43, %v1002_v47  ;;  %v4980_v53 = vpack.i.bf16 %v4894_v45, %v990_v49 }
 0x27e   : > { %v4904_v54 = vunpack.i.h.bf16 %v4902_v50  ;;  %v4903_v55 = vunpack.i.l.bf16 %v4902_v50  ;;  %v4933_v56 = vunpack.i.l.bf16 %v4932_v51  ;;  %v4934_v6 = vunpack.i.h.bf16 %v4932_v51 }
 0x27f   : > { %4986 = vrot.lane.b32.xlu1 %v4985_v52, %s8626_s28  ;;  %4981 = vrot.lane.b32.xlu0 %v4980_v53, %s8626_s28 }
 0x280   : > { %v1014_v58 = vsel %vm720_vm2, %v4903_v55, %v4904_v54  ;;  %v991_v2 = vsel %vm702_vm0, %v6756_v5, %v4933_v56  ;;  %v1013_v17 = vsel %vm720_vm2, %v6763_v18, %v4903_v55  ;;  %v992_v29 = vsel %vm702_vm0, %v4933_v56, %v4934_v6 }
 0x281   : > { %v4907_v59 = vpop.permute.xlu0 %4906  ;;  %v4937_v60 = vpop.permute.xlu1 %4936  ;;  %v4990_v61 = vpack.i.bf16 %v4904_v54, %v1014_v58  ;;  %v5000_v10 = vpack.i.bf16 %v991_v2, %v989_v4  ;;  %v5015_v40 = vpack.i.bf16 %v4934_v6, %v992_v29 }
 0x282   : > { %v4909_v62 = vunpack.i.h.bf16 %v4907_v59  ;;  %v4908_v63 = vunpack.i.l.bf16 %v4907_v59  ;;  %v4938_v0 = vunpack.i.l.bf16 %v4937_v60  ;;  %v4939_v21 = vunpack.i.h.bf16 %v4937_v60 }
 0x283   : > { %4991 = vrot.lane.b32.xlu0 %v4990_v61, %s8626_s28 }
 0x284   : > { %v1025_v3 = vsel %vm727_vm5, %v4908_v63, %v4909_v62  ;;  %v1003_v15 = vsel %vm711_vm1, %v6759_v14, %v4938_v0  ;;  %v1004_v42 = vsel %vm711_vm1, %v4938_v0, %v4939_v21 }
 0x285   : > { %v4912_v7 = vpop.permute.xlu0 %4911  ;;  %v4942_v8 = vpop.permute.xlu1 %4941  ;;  %v4995_v9 = vpack.i.bf16 %v4909_v62, %v1025_v3  ;;  %v5005_v27 = vpack.i.bf16 %v1003_v15, %v1001_v16  ;;  %v5030_v44 = vpack.i.bf16 %v4939_v21, %v1004_v42 }
 0x286   : > { %v4914_v11 = vunpack.i.h.bf16 %v4912_v7  ;;  %v4913_v12 = vunpack.i.l.bf16 %v4912_v7  ;;  %v4943_v13 = vunpack.i.l.bf16 %v4942_v8  ;;  %v4944_v43 = vunpack.i.h.bf16 %v4942_v8 }
 0x287   : > { %4996 = vrot.lane.b32.xlu1 %v4995_v9, %s8626_s28  ;;  %5001 = vrot.lane.b32.xlu0 %v5000_v10, %s8626_s28 }
 0x288   : > { %v1015_v20 = vsel %vm720_vm2, %v6763_v18, %v4943_v13  ;;  %v1035_v32 = vsel %vm735_vm3, %v4913_v12, %v4914_v11  ;;  %v1036_v33 = vsel %vm735_vm3, %v4914_v11, %v6770_v25  ;;  %v1016_v52 = vsel %vm720_vm2, %v4943_v13, %v4944_v43 }
 0x289   : > { %v6903_v23 = vpop.permute.xlu0 %4916  ;;  %v4947_v26 = vpop.permute.xlu1 %4946  ;;  %v5010_v28 = vpack.i.bf16 %v1015_v20, %v1013_v17  ;;  %v5025_v41 = vpack.i.bf16 %v1036_v33, %v1035_v32  ;;  %v5040_v55 = vpack.i.bf16 %v4944_v43, %v1016_v52 }
 0x28a   : > { %v4948_v34 = vunpack.i.l.bf16 %v4947_v26  ;;  %v4919_v45 = vunpack.i.h.bf16 %v6903_v23  ;;  %v4918_v46 = vunpack.i.l.bf16 %v6903_v23  ;;  %v4949_v51 = vunpack.i.h.bf16 %v4947_v26 }
 0x28b   : > { %5006 = vrot.lane.b32.xlu1 %v5005_v27, %s8626_s28  ;;  %5011 = vrot.lane.b32.xlu0 %v5010_v28, %s8626_s28 }
 0x28c   : > { %v5020_v50 = vpack.i.bf16 %v4948_v34, %v4908_v63  ;;  %v1047_v58 = vsel %vm744_vm4, %v4918_v46, %v4919_v45  ;;  %v1048_v59 = vsel %vm744_vm4, %v4919_v45, %v6776_v35  ;;  %v1026_v63 = vsel %vm727_vm5, %v4948_v34, %v4949_v51 }
 0x28d   : > { %v6911_v36 = vpop.permute.xlu0 %4921  ;;  %v4952_v37 = vpop.permute.xlu1 %4951  ;;  %v5045_v3 = vpack.i.bf16 %v1048_v59, %v1047_v58  ;;  %v5050_v4 = vpack.i.bf16 %v4949_v51, %v1026_v63  ;;  %v976_v63 = vld [vmem:[%s8628_s6 + $0x18] sm:$0xff] }
 0x28e   : > { %v4953_v47 = vunpack.i.l.bf16 %v4952_v37  ;;  %v4924_v60 = vunpack.i.h.bf16 %v6911_v36  ;;  %v4923_v61 = vunpack.i.l.bf16 %v6911_v36  ;;  %v4954_v62 = vunpack.i.h.bf16 %v4952_v37 }
 0x28f   : > { %5016 = vrot.lane.b32.xlu1 %v5015_v40, %s8626_s28  ;;  %5026 = vrot.lane.b32.xlu0 %v5025_v41, %s8626_s28 }
 0x290   : > { %v5035_v56 = vpack.i.bf16 %v4953_v47, %v4913_v12  ;;  %v1037_v6 = vsel %vm735_vm3, %v4953_v47, %v4954_v62  ;;  %v1038_v7 = vsel %vm735_vm3, %v4954_v62, %v6770_v25  ;;  %v1059_v8 = vsel %vm753_vm6, %v4923_v61, %v4924_v60  ;;  %v975_v62 = vld [vmem:[%s8628_s6 + $0x10] sm:$0xff] }
 0x291   : > { %v4957_v49 = vpop.permute.xlu1 %4956  ;;  %v6919_v53 = vpop.permute.xlu0 %4926  ;;  %v1060_v9 = vsel %vm753_vm6, %v4924_v60, %v6789_v48  ;;  %v5055_v16 = vpack.i.bf16 %v1038_v7, %v1037_v6  ;;  %v973_v60 = vld [vmem:[%s8628_s6] sm:$0xff] }
 0x292   : > { %v4959_v10 = vunpack.i.h.bf16 %v4957_v49  ;;  %v4958_v11 = vunpack.i.l.bf16 %v4957_v49  ;;  %v5065_v17 = vpack.i.bf16 %v1060_v9, %v1059_v8  ;;  %v4929_v36 = vunpack.i.h.bf16 %v6919_v53 }
 0x293   : > { %5021 = vrot.lane.b32.xlu1 %v5020_v50, %s8626_s28  ;;  %5031 = vrot.lane.b32.xlu0 %v5030_v44, %s8626_s28  ;;  %v4928_v42 = vunpack.i.l.bf16 %v6919_v53 }
 0x294   : > { %v1049_v27 = vsel %vm744_vm4, %v4958_v11, %v4959_v10  ;;  %v1050_v28 = vsel %vm744_vm4, %v4959_v10, %v6776_v35  ;;  %v5060_v40 = vpack.i.bf16 %v4958_v11, %v4918_v46  ;;  %v1072_v52 = vsel %vm762_vm7, %v4929_v36, %v6797_v57 }
 0x295   : > { %v4962_v54 = vpop.permute.xlu1 %4961  ;;  %v4972_v0 = vpop.permute.xlu0 %4971  ;;  %v5070_v43 = vpack.i.bf16 %v1050_v28, %v1049_v27  ;;  %v1071_v46 = vsel %vm762_vm7, %v4928_v42, %v4929_v36 }
 0x296   : > { %v4974_v12 = vunpack.i.h.bf16 %v4972_v0  ;;  %v4973_v13 = vunpack.i.l.bf16 %v4972_v0  ;;  %v4964_v20 = vunpack.i.h.bf16 %v4962_v54  ;;  %v4963_v21 = vunpack.i.l.bf16 %v4962_v54 }
 0x297   : > { %5041 = vrot.lane.b32.xlu1 %v5040_v55, %s8626_s28  ;;  %5036 = vrot.lane.b32.xlu0 %v5035_v56, %s8626_s28  ;;  %v966_v55 = vld [vmem:[%s8627_s5 + $0x8] sm:$0xff]  ;;  %v5085_v56 = vpack.i.bf16 %v1072_v52, %v1071_v46 }
 0x298   : > { %v1199_v29 = vsel %vm829_vm8, %v6815_v19, %v4973_v13  ;;  %v1200_v33 = vsel %vm829_vm8, %v4973_v13, %v4974_v12  ;;  %v1061_v44 = vsel %vm753_vm6, %v4963_v21, %v4964_v20  ;;  %v1062_v45 = vsel %vm753_vm6, %v4964_v20, %v6789_v48  ;;  %4409 = vmatprep.mubr.msk.f32.mxu1 %vm1271_vm10, %v966_v55 }
 0x299   : > { %v4967_v2 = vpop.permute.xlu1 %4966  ;;  %v5080_v50 = vpack.i.bf16 %v1062_v45, %v1061_v44  ;;  %v5075_v51 = vpack.i.bf16 %v4963_v21, %v4923_v61  ;;  %v974_v61 = vld [vmem:[%s8628_s6 + $0x8] sm:$0xff] }
 0x29a   : > { %v4969_v47 = vunpack.i.h.bf16 %v4967_v2  ;;  %v4968_v49 = vunpack.i.l.bf16 %v4967_v2 }
 0x29b   : > { %5046 = vrot.lane.b32.xlu1 %v5045_v3, %s8626_s28  ;;  %5051 = vrot.lane.b32.xlu0 %v5050_v4, %s8626_s28 }
 0x29c   : > { %v1073_v53 = vsel %vm762_vm7, %v4968_v49, %v4969_v47  ;;  %v1074_v54 = vsel %vm762_vm7, %v4969_v47, %v6797_v57  ;;  %v5095_v59 = vpack.i.bf16 %v4968_v49, %v4928_v42 }
 0x29d   : > { %v4977_v15 = vpop.permute.xlu1 %4976  ;;  %v5090_v58 = vpack.i.bf16 %v1074_v54, %v1073_v53 }
 0x29e   : > { %v4979_v23 = vunpack.i.h.bf16 %v4977_v15  ;;  %v4978_v26 = vunpack.i.l.bf16 %v4977_v15 }
 0x29f   : > { %5056 = vrot.lane.b32.xlu1 %v5055_v16, %s8626_s28  ;;  %5066 = vrot.lane.b32.xlu0 %v5065_v17, %s8626_s28 }
 0x2a0   : > { %v1201_v32 = vsel %vm829_vm8, %v6815_v19, %v4978_v26  ;;  %v1202_v34 = vsel %vm829_vm8, %v4978_v26, %v4979_v23 }
 0x2a1   : > { %v4473_v37 = vpack.c.bf16 %v1202_v34, %v1200_v33  ;;  %v4475_v41 = vpack.c.bf16 %v1201_v32, %v1199_v29 }
 0x2a3   : > { %4474 = vmatprep.subr.bf16.mxu1 %v4473_v37  ;;  %5061 = vrot.lane.b32.xlu1 %v5060_v40, %s8626_s28 }
 0x2a4   : > { %5071 = vrot.lane.b32.xlu0 %v5070_v43, %s8626_s28  ;;  %4476 = vmatpush1.bf16.msra.mxu1 %v4475_v41 }
 0x2a7   : > { %5081 = vrot.lane.b32.xlu1 %v5080_v50, %s8626_s28 }
 0x2a8   : > { %5076 = vrot.lane.b32.xlu0 %v5075_v51, %s8626_s28 }
 0x2ab   : > { %5086 = vrot.lane.b32.xlu1 %v5085_v56, %s8626_s28 }
 0x2ac   : > { %5091 = vrot.lane.b32.xlu0 %v5090_v58, %s8626_s28 }
 0x2af   : > { %5096 = vrot.lane.b32.xlu1 %v5095_v59, %s8626_s28 }
 0x2b0   : > { %1077 = vperm.xlu0 %4889, %v973_v60  }
 0x2b3   : > { %1082 = vperm.xlu1 %4888, %v974_v61  }
 0x2b4   : > { %1087 = vperm.xlu0 %4889, %v975_v62  }
 0x2b7   : > { %1092 = vperm.xlu1 %4888, %v976_v63  }
 0x2f1   : > { %v4982_v0 = vpop.permute.xlu0 %4981  ;;  %v4987_v2 = vpop.permute.xlu1 %4986 }
 0x2f2   : > { %v4984_v9 = vunpack.i.h.bf16 %v4982_v0  ;;  %v4983_v10 = vunpack.i.l.bf16 %v4982_v0  ;;  %v4989_v20 = vunpack.i.h.bf16 %v4987_v2  ;;  %v4988_v21 = vunpack.i.l.bf16 %v4987_v2 }
 0x2f4   : > { %v1204_v23 = vsel %vm829_vm8, %v4983_v10, %v4984_v9  ;;  %v1208_v44 = vsel %vm829_vm8, %v4988_v21, %v4989_v20 }
 0x2f5   : > { %v4992_v3 = vpop.permute.xlu0 %4991 }
 0x2f6   : > { %v4994_v42 = vunpack.i.h.bf16 %v4992_v3  ;;  %v4993_v43 = vunpack.i.l.bf16 %v4992_v3 }
 0x2f8   : > { %v1212_v60 = vsel %vm829_vm8, %v4993_v43, %v4994_v42 }
 0x2f9   : > { %v6984_v4 = vpop.permute.xlu1 %4996  ;;  %v5002_v6 = vpop.permute.xlu0 %5001 }
 0x2fa   : > { %v5003_v11 = vunpack.i.l.bf16 %v5002_v6  ;;  %v5004_v15 = vunpack.i.h.bf16 %v5002_v6  ;;  %v4999_v58 = vunpack.i.h.bf16 %v6984_v4  ;;  %v4998_v59 = vunpack.i.l.bf16 %v6984_v4 }
 0x2fc   : > { %v1203_v26 = vsel %vm829_vm8, %v5003_v11, %v4983_v10 }
 0x2fd   : > { %v5007_v7 = vpop.permute.xlu1 %5006  ;;  %v5012_v8 = vpop.permute.xlu0 %5011 }
 0x2fe   : > { %v5008_v27 = vunpack.i.l.bf16 %v5007_v7  ;;  %v5009_v37 = vunpack.i.h.bf16 %v5007_v7  ;;  %v5013_v47 = vunpack.i.l.bf16 %v5012_v8  ;;  %v5014_v54 = vunpack.i.h.bf16 %v5012_v8 }
 0x300   : > { %v1207_v45 = vsel %vm829_vm8, %v5008_v27, %v4988_v21  ;;  %v1211_v61 = vsel %vm829_vm8, %v5013_v47, %v4993_v43 }
 0x301   : > { %v5017_v12 = vpop.permute.xlu1 %5016  ;;  %v6986_v13 = vpop.permute.xlu0 %5026 }
 0x302   : > { %v5019_v16 = vunpack.i.h.bf16 %v5017_v12  ;;  %v5018_v17 = vunpack.i.l.bf16 %v5017_v12  ;;  %v5029_v4 = vunpack.i.h.bf16 %v6986_v13  ;;  %v5028_v11 = vunpack.i.l.bf16 %v6986_v13 }
 0x303   : > { %v1216_v12 = vsel %vm829_vm8, %v4998_v59, %v4999_v58 }
 0x304   : > { %v1205_v28 = vsel %vm829_vm8, %v5004_v15, %v5018_v17  ;;  %v1206_v29 = vsel %vm829_vm8, %v5018_v17, %v5019_v16 }
 0x305   : > { %v5022_v32 = vpop.permute.xlu1 %5021  ;;  %v5032_v33 = vpop.permute.xlu0 %5031  ;;  %v4477_v34 = vpack.c.bf16 %v1206_v29, %v1204_v23  ;;  %v4479_v36 = vpack.c.bf16 %v1205_v28, %v1203_v26 }
 0x306   : > { %v5034_v40 = vunpack.i.h.bf16 %v5032_v33  ;;  %v5033_v41 = vunpack.i.l.bf16 %v5032_v33  ;;  %v5023_v62 = vunpack.i.l.bf16 %v5022_v32  ;;  %v5024_v8 = vunpack.i.h.bf16 %v5022_v32 }
 0x307   : > { %4478 = vmatprep.subr.bf16.mxu1 %v4477_v34  ;;  %v1220_v34 = vsel %vm829_vm8, %v5028_v11, %v5029_v4 }
 0x308   : > { %v1209_v49 = vsel %vm829_vm8, %v5009_v37, %v5033_v41  ;;  %4480 = vmatpush1.bf16.msra.mxu1 %v4479_v36  ;;  %v1210_v50 = vsel %vm829_vm8, %v5033_v41, %v5034_v40  ;;  %v1215_v15 = vsel %vm829_vm8, %v5023_v62, %v4998_v59 }
 0x309   : > { %v5042_v51 = vpop.permute.xlu1 %5041  ;;  %v5037_v46 = vpop.permute.xlu0 %5036  ;;  %v4481_v52 = vpack.c.bf16 %v1210_v50, %v1208_v44  ;;  %v4483_v53 = vpack.c.bf16 %v1209_v49, %v1207_v45 }
 0x30a   : > { %v5044_v55 = vunpack.i.h.bf16 %v5042_v51  ;;  %v5043_v56 = vunpack.i.l.bf16 %v5042_v51  ;;  %v5038_v16 = vunpack.i.l.bf16 %v5037_v46  ;;  %v5039_v28 = vunpack.i.h.bf16 %v5037_v46 }
 0x30b   : > { %4482 = vmatprep.subr.bf16.mxu1 %v4481_v52 }
 0x30c   : > { %v1213_v63 = vsel %vm829_vm8, %v5014_v54, %v5043_v56  ;;  %4484 = vmatpush1.bf16.msra.mxu1 %v4483_v53  ;;  %v1214_v0 = vsel %vm829_vm8, %v5043_v56, %v5044_v55  ;;  %v1219_v13 = vsel %vm829_vm8, %v5038_v16, %v5028_v11 }
 0x30d   : > { %v5047_v2 = vpop.permute.xlu1 %5046  ;;  %v5052_v3 = vpop.permute.xlu0 %5051  ;;  %v4485_v6 = vpack.c.bf16 %v1214_v0, %v1212_v60  ;;  %v4487_v7 = vpack.c.bf16 %v1213_v63, %v1211_v61 }
 0x30e   : > { %v5054_v9 = vunpack.i.h.bf16 %v5052_v3  ;;  %v5053_v10 = vunpack.i.l.bf16 %v5052_v3  ;;  %v5049_v37 = vunpack.i.h.bf16 %v5047_v2  ;;  %v5048_v40 = vunpack.i.l.bf16 %v5047_v2 }
 0x30f   : > { %4486 = vmatprep.subr.bf16.mxu1 %v4485_v6 }
 0x310   : > { %v1217_v17 = vsel %vm829_vm8, %v5024_v8, %v5053_v10  ;;  %4488 = vmatpush1.bf16.msra.mxu1 %v4487_v7  ;;  %v1218_v20 = vsel %vm829_vm8, %v5053_v10, %v5054_v9  ;;  %v1224_v55 = vsel %vm829_vm8, %v5048_v40, %v5049_v37  ;;  %v969_v37 = vld [vmem:[%s8627_s5 + $0x20] sm:$0xff] }
 0x311   : > { %v5057_v21 = vpop.permute.xlu1 %5056  ;;  %v5067_v23 = vpop.permute.xlu0 %5066  ;;  %v4489_v26 = vpack.c.bf16 %v1218_v20, %v1216_v12  ;;  %v4491_v27 = vpack.c.bf16 %v1217_v17, %v1215_v15 }
 0x312   : > { %v5059_v29 = vunpack.i.h.bf16 %v5057_v21  ;;  %v5058_v32 = vunpack.i.l.bf16 %v5057_v21  ;;  %v5069_v51 = vunpack.i.h.bf16 %v5067_v23  ;;  %v5068_v46 = vunpack.i.l.bf16 %v5067_v23 }
 0x313   : > { %4490 = vmatprep.subr.bf16.mxu1 %v4489_v26 }
 0x314   : > { %v1221_v33 = vsel %vm829_vm8, %v5039_v28, %v5058_v32  ;;  %4492 = vmatpush1.bf16.msra.mxu1 %v4491_v27  ;;  %v1222_v36 = vsel %vm829_vm8, %v5058_v32, %v5059_v29  ;;  %v1228_v2 = vsel %vm829_vm8, %v5068_v46, %v5069_v51 }
 0x315   : > { %v5062_v41 = vpop.permute.xlu1 %5061  ;;  %v4493_v42 = vpack.c.bf16 %v1222_v36, %v1220_v34  ;;  %v4495_v43 = vpack.c.bf16 %v1221_v33, %v1219_v13  ;;  %v965_v13 = vld [vmem:[%s8627_s5] sm:$0xff]  ;;  %v968_v33 = vld [vmem:[%s8627_s5 + $0x18] sm:$0xff]  ;;  %v967_v34 = vld [vmem:[%s8627_s5 + $0x10] sm:$0xff] }
 0x316   : > { %v5064_v44 = vunpack.i.h.bf16 %v5062_v41  ;;  %v5063_v45 = vunpack.i.l.bf16 %v5062_v41  ;;  %v5072_v47 = vpop.permute.xlu0 %5071  ;;  %v970_v36 = vld [vmem:[%s8627_s5 + $0x28] sm:$0xff]  ;;  %v971_v41 = vld [vmem:[%s8627_s5 + $0x30] sm:$0xff] }
 0x317   : > { %v5074_v49 = vunpack.i.h.bf16 %v5072_v47  ;;  %v5073_v50 = vunpack.i.l.bf16 %v5072_v47  ;;  %4494 = vmatprep.subr.bf16.mxu1 %v4493_v42 }
 0x318   : > { %v1223_v52 = vsel %vm829_vm8, %v5063_v45, %v5048_v40  ;;  %4496 = vmatpush1.bf16.msra.mxu1 %v4495_v43  ;;  %v972_v40 = vld [vmem:[%s8627_s5 + $0x38] sm:$0xff] }
 0x319   : > { %v1225_v53 = vsel %vm829_vm8, %v5064_v44, %v5073_v50  ;;  %v5082_v54 = vpop.permute.xlu1 %5081  ;;  %v1226_v56 = vsel %vm829_vm8, %v5073_v50, %v5074_v49 }
 0x31a   : > { %v5084_v58 = vunpack.i.h.bf16 %v5082_v54  ;;  %v5083_v59 = vunpack.i.l.bf16 %v5082_v54  ;;  %v5077_v60 = vpop.permute.xlu0 %5076  ;;  %v4497_v61 = vpack.c.bf16 %v1226_v56, %v1224_v55  ;;  %v4499_v62 = vpack.c.bf16 %v1225_v53, %v1223_v52 }
 0x31b   : > { %v5079_v63 = vunpack.i.h.bf16 %v5077_v60  ;;  %v5078_v0 = vunpack.i.l.bf16 %v5077_v60 }
 0x31c   : > { %4498 = vmatprep.subr.bf16.mxu1 %v4497_v61  ;;  %v1230_v3 = vsel %vm829_vm8, %v5083_v59, %v5084_v58 }
 0x31d   : > { %v1229_v6 = vsel %vm829_vm8, %v5079_v63, %v5083_v59  ;;  %v1227_v7 = vsel %vm829_vm8, %v5078_v0, %v5068_v46  ;;  %4500 = vmatpush1.bf16.msra.mxu1 %v4499_v62  ;;  %v5087_v8 = vpop.permute.xlu1 %5086  ;;  %v4501_v9 = vpack.c.bf16 %v1230_v3, %v1228_v2 }
 0x31e   : > { %v5089_v10 = vunpack.i.h.bf16 %v5087_v8  ;;  %v5088_v4 = vunpack.i.l.bf16 %v5087_v8  ;;  %v5092_v11 = vpop.permute.xlu0 %5091  ;;  %v4503_v12 = vpack.c.bf16 %v1229_v6, %v1227_v7 }
 0x31f   : > { %v5094_v15 = vunpack.i.h.bf16 %v5092_v11  ;;  %v5093_v16 = vunpack.i.l.bf16 %v5092_v11  ;;  %4502 = vmatprep.subr.bf16.mxu1 %v4501_v9 }
 0x320   : > { %v1232_v17 = vsel %vm829_vm8, %v5088_v4, %v5089_v10 }
 0x321   : > { %4504 = vmatpush1.bf16.msra.mxu1 %v4503_v12  ;;  %v5097_v20 = vpop.permute.xlu1 %5096  ;;  %v1234_v21 = vsel %vm829_vm8, %v5093_v16, %v5094_v15 }
 0x322   : > { %v5099_v23 = vunpack.i.h.bf16 %v5097_v20  ;;  %v5098_v26 = vunpack.i.l.bf16 %v5097_v20  ;;  %v4505_v27 = vpack.c.bf16 %v1234_v21, %v1232_v17 }
 0x324   : > { %v1231_v28 = vsel %vm829_vm8, %v5098_v26, %v5088_v4  ;;  %v1233_v29 = vsel %vm829_vm8, %v5099_v23, %v5093_v16  ;;  %4506 = vmatprep.subr.bf16.mxu1 %v4505_v27 }
 0x325   : > { %v4507_v32 = vpack.c.bf16 %v1233_v29, %v1231_v28 }
 0x327   : > { %4508 = vmatpush1.bf16.msra.mxu1 %v4507_v32 }
 0x32a   : > { %1349 = vmatmul.mubr.f32.vlgmr.msra.gmra.mrb[4].mxu1 %v965_v13 }
 0x32b   : > { %4410 = vmatprep.mubr.msk.f32.mxu1 %vm1271_vm10, %v968_v33 }
 0x32e   : > { %1355 = vmatmul.mubr.f32.gmra.mrb[6].mxu1 %v967_v34 }
 0x32f   : > { %4411 = vmatprep.mubr.msk.f32.mxu1 %vm1271_vm10, %v970_v36  ;;  %v1078_v42 = vpop.permute.xlu0 %1077 }
 0x332   : > { %1361 = vmatmul.mubr.f32.gmra.mrb[8].mxu1 %v969_v37  ;;  %v1083_v50 = vpop.permute.xlu1 %1082 }
 0x333   : > { %4412 = vmatprep.mubr.msk.f32.mxu1 %vm1271_vm10, %v972_v40  ;;  %v1088_v58 = vpop.permute.xlu0 %1087 }
 0x336   : > { %1367 = vmatmul.mubr.f32.gmra.mrb[10].mxu1 %v971_v41  ;;  %v1093_v3 = vpop.permute.xlu1 %1092 }
 0x3fd   : > { %v1350_v43 = vpop.f32.mrb[4].mxu1 }
 0x3fe   : > { %v1351_v44 = vadd.f32 %v1350_v43, %v1078_v42  ;;  %v1352_v45 = vpop.f32.mrb[5].mxu1 }
 0x3ff   : > { %v1353_v47 = vadd.f32 %v1352_v45, %v1078_v42 }
 0x400   : > { %v1373_v49 = vmul.f32 %v1351_v44, %v6844_v22 }
 0x401   : > { %v1374_v51 = vmul.f32 %v1353_v47, %v6846_v24  ;;  %v1356_v46 = vpop.f32.mrb[6].mxu1 }
 0x402   : > { %v1357_v52 = vadd.f32 %v1356_v46, %v1083_v50  ;;  %v1358_v53 = vpop.f32.mrb[7].mxu1 }
 0x403   : > { %v1359_v54 = vadd.f32 %v1358_v53, %v1083_v50  ;;  %v5100_v55 = vpack.i.bf16 %v1374_v51, %v1373_v49 }
 0x404   : > { %v1375_v56 = vmul.f32 %v1357_v52, %v6844_v22 }
 0x405   : > { %v1376_v59 = vmul.f32 %v1359_v54, %v6846_v24  ;;  %v1362_v60 = vpop.f32.mrb[8].mxu1  ;;  %5101 = vrot.lane.b32.xlu0 %v5100_v55, %s8629_s11 }
 0x406   : > { %v1363_v61 = vadd.f32 %v1362_v60, %v1088_v58  ;;  %v1364_v62 = vpop.f32.mrb[9].mxu1 }
 0x407   : > { %v1365_v63 = vadd.f32 %v1364_v62, %v1088_v58  ;;  %v5145_v0 = vpack.i.bf16 %v1376_v59, %v1375_v56 }
 0x408   : > { %v1377_v2 = vmul.f32 %v1363_v61, %v6844_v22 }
 0x409   : > { %v1378_v6 = vmul.f32 %v1365_v63, %v6846_v24  ;;  %v1368_v7 = vpop.f32.mrb[10].mxu1  ;;  %5146 = vrot.lane.b32.xlu1 %v5145_v0, %s8629_s11  ;;  %5106 = vrot.lane.b32.xlu0 %v5100_v55, %s8630_s0 }
 0x40a   : > { %v1369_v8 = vadd.f32 %v1368_v7, %v1093_v3  ;;  %v1370_v9 = vpop.f32.mrb[11].mxu1 }
 0x40b   : > { %v1371_v10 = vadd.f32 %v1370_v9, %v1093_v3  ;;  %v5190_v4 = vpack.i.bf16 %v1378_v6, %v1377_v2 }
 0x40c   : > { %v1379_v11 = vmul.f32 %v1369_v8, %v6844_v22 }
 0x40d   : > { %v1380_v12 = vmul.f32 %v1371_v10, %v6846_v24  ;;  %5151 = vrot.lane.b32.xlu1 %v5145_v0, %s8630_s0  ;;  %5111 = vrot.lane.b32.xlu0 %v5100_v55, %s8631_s4 }
 0x40f   : > { %v5235_v15 = vpack.i.bf16 %v1380_v12, %v1379_v11 }
 0x411   : > { %5156 = vrot.lane.b32.xlu1 %v5145_v0, %s8631_s4  ;;  %5116 = vrot.lane.b32.xlu0 %v5100_v55, %s8632_s24 }
 0x415   : > { %5161 = vrot.lane.b32.xlu1 %v5145_v0, %s8632_s24  ;;  %5121 = vrot.lane.b32.xlu0 %v5100_v55, %s8633_s25 }
 0x419   : > { %5166 = vrot.lane.b32.xlu1 %v5145_v0, %s8633_s25  ;;  %5126 = vrot.lane.b32.xlu0 %v5100_v55, %s8623_s2 }
 0x41d   : > { %5171 = vrot.lane.b32.xlu1 %v5145_v0, %s8623_s2  ;;  %5131 = vrot.lane.b32.xlu0 %v5100_v55, %s8624_s27 }
 0x421   : > { %5176 = vrot.lane.b32.xlu1 %v5145_v0, %s8624_s27  ;;  %5136 = vrot.lane.b32.xlu0 %v5100_v55, %s8626_s28 }
 0x425   : > { %5181 = vrot.lane.b32.xlu1 %v5145_v0, %s8626_s28  ;;  %5141 = vrot.lane.b32.xlu0 %v5100_v55, %s8625_s3 }
 0x429   : > { %5186 = vrot.lane.b32.xlu1 %v5145_v0, %s8625_s3  ;;  %5191 = vrot.lane.b32.xlu0 %v5190_v4, %s8629_s11 }
 0x42d   : > { %5236 = vrot.lane.b32.xlu1 %v5235_v15, %s8629_s11  ;;  %5196 = vrot.lane.b32.xlu0 %v5190_v4, %s8630_s0 }
 0x431   : > { %5241 = vrot.lane.b32.xlu1 %v5235_v15, %s8630_s0  ;;  %5201 = vrot.lane.b32.xlu0 %v5190_v4, %s8631_s4 }
 0x435   : > { %5246 = vrot.lane.b32.xlu1 %v5235_v15, %s8631_s4  ;;  %5206 = vrot.lane.b32.xlu0 %v5190_v4, %s8632_s24 }
 0x439   : > { %5251 = vrot.lane.b32.xlu1 %v5235_v15, %s8632_s24  ;;  %5211 = vrot.lane.b32.xlu0 %v5190_v4, %s8633_s25 }
 0x43d   : > { %5256 = vrot.lane.b32.xlu1 %v5235_v15, %s8633_s25  ;;  %5216 = vrot.lane.b32.xlu0 %v5190_v4, %s8623_s2 }
 0x441   : > { %5261 = vrot.lane.b32.xlu1 %v5235_v15, %s8623_s2  ;;  %5221 = vrot.lane.b32.xlu0 %v5190_v4, %s8624_s27 }
 0x445   : > { %5266 = vrot.lane.b32.xlu1 %v5235_v15, %s8624_s27  ;;  %5226 = vrot.lane.b32.xlu0 %v5190_v4, %s8626_s28 }
 0x449   : > { %5271 = vrot.lane.b32.xlu1 %v5235_v15, %s8626_s28  ;;  %5231 = vrot.lane.b32.xlu0 %v5190_v4, %s8625_s3 }
 0x44d   : > { %5276 = vrot.lane.b32.xlu1 %v5235_v15, %s8625_s3 }
 0x477   : > { %v7092_v16 = vpop.permute.xlu0 %5101 }
 0x478   : > { %v5104_v17 = vunpack.i.h.bf16 %v7092_v16  ;;  %v5103_v20 = vunpack.i.l.bf16 %v7092_v16 }
 0x47a   : > { %v1414_v21 = vsel %vm702_vm0, %v5103_v20, %v5104_v17 }
 0x47b   : > { %v5280_v23 = vpack.i.bf16 %v5104_v17, %v1414_v21  ;;  %v5147_v26 = vpop.permute.xlu1 %5146  ;;  %v7097_v27 = vpop.permute.xlu0 %5106 }
 0x47c   : > { %v5149_v28 = vunpack.i.h.bf16 %v5147_v26  ;;  %v5148_v29 = vunpack.i.l.bf16 %v5147_v26  ;;  %v5109_v32 = vunpack.i.h.bf16 %v7097_v27  ;;  %v5108_v13 = vunpack.i.l.bf16 %v7097_v27 }
 0x47d   : > { %5281 = vrot.lane.b32.xlu0 %v5280_v23, %s8626_s28  ;;  %v1413_v23 = vsel %vm702_vm0, %v6756_v5, %v5103_v20 }
 0x47e   : > { %v1416_v33 = vsel %vm702_vm0, %v5148_v29, %v5149_v28  ;;  %v1438_v34 = vsel %vm711_vm1, %v5108_v13, %v5109_v32  ;;  %v1415_v21 = vsel %vm702_vm0, %v6756_v5, %v5148_v29 }
 0x47f   : > { %v5325_v36 = vpack.i.bf16 %v5149_v28, %v1416_v33  ;;  %v5285_v37 = vpack.i.bf16 %v5109_v32, %v1438_v34  ;;  %v5152_v40 = vpop.permute.xlu1 %5151  ;;  %v5112_v41 = vpop.permute.xlu0 %5111  ;;  %v5310_v28 = vpack.i.bf16 %v1415_v21, %v1413_v23  ;;  %v1437_v33 = vsel %vm711_vm1, %v6759_v14, %v5108_v13 }
 0x480   : > { %v5154_v42 = vunpack.i.h.bf16 %v5152_v40  ;;  %v5153_v43 = vunpack.i.l.bf16 %v5152_v40  ;;  %v5114_v44 = vunpack.i.h.bf16 %v5112_v41  ;;  %v5113_v45 = vunpack.i.l.bf16 %v5112_v41 }
 0x481   : > { %5326 = vrot.lane.b32.xlu1 %v5325_v36, %s8626_s28  ;;  %5286 = vrot.lane.b32.xlu0 %v5285_v37, %s8626_s28 }
 0x482   : > { %v1440_v47 = vsel %vm711_vm1, %v5153_v43, %v5154_v42  ;;  %v1462_v49 = vsel %vm720_vm2, %v5113_v45, %v5114_v44  ;;  %v1439_v32 = vsel %vm711_vm1, %v6759_v14, %v5153_v43 }
 0x483   : > { %v5330_v50 = vpack.i.bf16 %v5154_v42, %v1440_v47  ;;  %v5290_v51 = vpack.i.bf16 %v5114_v44, %v1462_v49  ;;  %v5157_v46 = vpop.permute.xlu1 %5156  ;;  %v5117_v52 = vpop.permute.xlu0 %5116  ;;  %v5315_v40 = vpack.i.bf16 %v1439_v32, %v1437_v33  ;;  %v1461_v44 = vsel %vm720_vm2, %v6763_v18, %v5113_v45 }
 0x484   : > { %v5159_v53 = vunpack.i.h.bf16 %v5157_v46  ;;  %v5158_v54 = vunpack.i.l.bf16 %v5157_v46  ;;  %v5119_v55 = vunpack.i.h.bf16 %v5117_v52  ;;  %v5118_v56 = vunpack.i.l.bf16 %v5117_v52 }
 0x485   : > { %5331 = vrot.lane.b32.xlu1 %v5330_v50, %s8626_s28  ;;  %5291 = vrot.lane.b32.xlu0 %v5290_v51, %s8626_s28 }
 0x486   : > { %v1464_v58 = vsel %vm720_vm2, %v5158_v54, %v5159_v53  ;;  %v1485_v59 = vsel %vm727_vm5, %v5118_v56, %v5119_v55  ;;  %v1463_v20 = vsel %vm720_vm2, %v6763_v18, %v5158_v54 }
 0x487   : > { %v5335_v60 = vpack.i.bf16 %v5159_v53, %v1464_v58  ;;  %v5295_v61 = vpack.i.bf16 %v5119_v55, %v1485_v59  ;;  %v5162_v62 = vpop.permute.xlu1 %5161  ;;  %v7112_v63 = vpop.permute.xlu0 %5121  ;;  %v5320_v52 = vpack.i.bf16 %v1463_v20, %v1461_v44 }
 0x488   : > { %v5164_v0 = vunpack.i.h.bf16 %v5162_v62  ;;  %v5163_v2 = vunpack.i.l.bf16 %v5162_v62  ;;  %v5124_v3 = vunpack.i.h.bf16 %v7112_v63  ;;  %v5123_v6 = vunpack.i.l.bf16 %v7112_v63 }
 0x489   : > { %5336 = vrot.lane.b32.xlu1 %v5335_v60, %s8626_s28  ;;  %5296 = vrot.lane.b32.xlu0 %v5295_v61, %s8626_s28 }
 0x48a   : > { %v1486_v7 = vsel %vm727_vm5, %v5163_v2, %v5164_v0  ;;  %v1506_v8 = vsel %vm735_vm3, %v5124_v3, %v6770_v25  ;;  %v1505_v9 = vsel %vm735_vm3, %v5123_v6, %v5124_v3  ;;  %v5305_v15 = vpack.i.bf16 %v5163_v2, %v5118_v56 }
 0x48b   : > { %v5340_v10 = vpack.i.bf16 %v5164_v0, %v1486_v7  ;;  %v7124_v4 = vpop.permute.xlu1 %5166  ;;  %v7126_v11 = vpop.permute.xlu0 %5126  ;;  %v5300_v12 = vpack.i.bf16 %v1506_v8, %v1505_v9 }
 0x48c   : > { %v5168_v7 = vunpack.i.l.bf16 %v7124_v4  ;;  %v5129_v33 = vunpack.i.h.bf16 %v7126_v11 }
 0x48d   : > { %5341 = vrot.lane.b32.xlu1 %v5340_v10, %s8626_s28  ;;  %5301 = vrot.lane.b32.xlu0 %v5300_v12, %s8626_s28 }
 0x48e   : > { %v5395_v32 = vpack.i.bf16 %v5168_v7, %v5123_v6  ;;  %v1530_v63 = vsel %vm744_vm4, %v5129_v33, %v6776_v35 }
 0x48f   : > { %v7130_v16 = vpop.permute.xlu1 %5171  ;;  %v7132_v17 = vpop.permute.xlu0 %5131 }
 0x491   : > { %5306 = vrot.lane.b32.xlu0 %v5305_v15, %s8626_s28 }
 0x493   : > { %v7139_v26 = vpop.permute.xlu1 %5176  ;;  %v5137_v27 = vpop.permute.xlu0 %5136 }
 0x494   : > { %v5139_v34 = vunpack.i.h.bf16 %v5137_v27  ;;  %v5138_v36 = vunpack.i.l.bf16 %v5137_v27 }
 0x495   : > { %5311 = vrot.lane.b32.xlu0 %v5310_v28, %s8626_s28 }
 0x496   : > { %v1804_v43 = vsel %vm829_vm8, %v5138_v36, %v5139_v34  ;;  %v1803_v47 = vsel %vm829_vm8, %v6815_v19, %v5138_v36 }
 0x497   : > { %v5182_v29 = vpop.permute.xlu1 %5181  ;;  %v7146_v37 = vpop.permute.xlu0 %5141 }
 0x498   : > { %v5184_v41 = vunpack.i.h.bf16 %v5182_v29  ;;  %v5183_v42 = vunpack.i.l.bf16 %v5182_v29 }
 0x499   : > { %5316 = vrot.lane.b32.xlu0 %v5315_v40, %s8626_s28  ;;  %v5128_v40 = vunpack.i.l.bf16 %v7126_v11 }
 0x49a   : > { %v1806_v13 = vsel %vm829_vm8, %v5183_v42, %v5184_v41  ;;  %v1805_v49 = vsel %vm829_vm8, %v6815_v19, %v5183_v42 }
 0x49b   : > { %v7159_v50 = vpop.permute.xlu1 %5186  ;;  %v7161_v51 = vpop.permute.xlu0 %5191  ;;  %v4509_v46 = vpack.c.bf16 %v1806_v13, %v1804_v43  ;;  %v4511_v53 = vpack.c.bf16 %v1805_v49, %v1803_v47  ;;  %v1529_v11 = vsel %vm744_vm4, %v5128_v40, %v5129_v33 }
 0x49c   : > { %v5194_v45 = vunpack.i.h.bf16 %v7161_v51  ;;  %v5193_v54 = vunpack.i.l.bf16 %v7161_v51 }
 0x49d   : > { %4510 = vmatprep.subr.bf16.mxu0 %v4509_v46  ;;  %5321 = vrot.lane.b32.xlu0 %v5320_v52, %s8626_s28 }
 0x49e   : > { %v1418_v55 = vsel %vm702_vm0, %v5193_v54, %v5194_v45  ;;  %4512 = vmatpush1.bf16.msra.mxu0 %v4511_v53 }
 0x49f   : > { %v5345_v56 = vpack.i.bf16 %v5194_v45, %v1418_v55  ;;  %v5237_v58 = vpop.permute.xlu1 %5236  ;;  %v7167_v59 = vpop.permute.xlu0 %5196  ;;  %v5415_v55 = vpack.i.bf16 %v1530_v63, %v1529_v11 }
 0x4a0   : > { %v5239_v60 = vunpack.i.h.bf16 %v5237_v58  ;;  %v5238_v61 = vunpack.i.l.bf16 %v5237_v58  ;;  %v5199_v62 = vunpack.i.h.bf16 %v7167_v59  ;;  %v5198_v0 = vunpack.i.l.bf16 %v7167_v59 }
 0x4a1   : > { %5346 = vrot.lane.b32.xlu1 %v5345_v56, %s8626_s28  ;;  %v5169_v56 = vunpack.i.h.bf16 %v7124_v4 }
 0x4a2   : > { %v1420_v2 = vsel %vm702_vm0, %v5238_v61, %v5239_v60  ;;  %v1442_v3 = vsel %vm711_vm1, %v5198_v0, %v5199_v62  ;;  %v1419_v58 = vsel %vm702_vm0, %v6756_v5, %v5238_v61 }
 0x4a3   : > { %v5390_v8 = vpack.i.bf16 %v5239_v60, %v1420_v2  ;;  %v5350_v9 = vpack.i.bf16 %v5199_v62, %v1442_v3  ;;  %v5242_v10 = vpop.permute.xlu1 %5241  ;;  %v7177_v12 = vpop.permute.xlu0 %5201  ;;  %v1417_v62 = vsel %vm702_vm0, %v6756_v5, %v5193_v54  ;;  %v5173_v2 = vunpack.i.l.bf16 %v7130_v16 }
 0x4a4   : > { %v5244_v15 = vunpack.i.h.bf16 %v5242_v10  ;;  %v5243_v21 = vunpack.i.l.bf16 %v5242_v10  ;;  %v5204_v23 = vunpack.i.h.bf16 %v7177_v12  ;;  %v5203_v27 = vunpack.i.l.bf16 %v7177_v12 }
 0x4a5   : > { %5351 = vrot.lane.b32.xlu1 %v5350_v9, %s8626_s28  ;;  %5391 = vrot.lane.b32.xlu0 %v5390_v8, %s8626_s28  ;;  %v5370_v4 = vpack.i.bf16 %v1419_v58, %v1417_v62  ;;  %v1508_v61 = vsel %vm735_vm3, %v5169_v56, %v6770_v25  ;;  %v1507_v10 = vsel %vm735_vm3, %v5168_v7, %v5169_v56  ;;  %v5133_v7 = vunpack.i.l.bf16 %v7132_v17 }
 0x4a6   : > { %v1466_v28 = vsel %vm720_vm2, %v5203_v27, %v5204_v23  ;;  %v1444_v20 = vsel %vm711_vm1, %v5243_v21, %v5244_v15  ;;  %v5430_v54 = vpack.i.bf16 %v5173_v2, %v5128_v40  ;;  %v5375_v33 = vpack.i.bf16 %v1508_v61, %v1507_v10 }
 0x4a7   : > { %v5355_v34 = vpack.i.bf16 %v5204_v23, %v1466_v28  ;;  %v5247_v36 = vpop.permute.xlu1 %5246  ;;  %v5207_v29 = vpop.permute.xlu0 %5206  ;;  %v5410_v6 = vpack.i.bf16 %v5244_v15, %v1444_v20  ;;  %v5134_v23 = vunpack.i.h.bf16 %v7132_v17  ;;  %v5178_v61 = vunpack.i.l.bf16 %v7139_v26 }
 0x4a8   : > { %v5209_v41 = vunpack.i.h.bf16 %v5207_v29  ;;  %v5208_v42 = vunpack.i.l.bf16 %v5207_v29  ;;  %v5249_v49 = vunpack.i.h.bf16 %v5247_v36  ;;  %v5248_v51 = vunpack.i.l.bf16 %v5247_v36 }
 0x4a9   : > { %5356 = vrot.lane.b32.xlu1 %v5355_v34, %s8626_s28  ;;  %5396 = vrot.lane.b32.xlu0 %v5395_v32, %s8626_s28  ;;  %v1443_v34 = vsel %vm711_vm1, %v6759_v14, %v5243_v21  ;;  %v1441_v29 = vsel %vm711_vm1, %v6759_v14, %v5198_v0  ;;  %v1465_v0 = vsel %vm720_vm2, %v6763_v18, %v5203_v27 }
 0x4aa   : > { %v1487_v44 = vsel %vm727_vm5, %v5208_v42, %v5209_v41  ;;  %v1468_v60 = vsel %vm720_vm2, %v5248_v51, %v5249_v49  ;;  %v1467_v21 = vsel %vm720_vm2, %v6763_v18, %v5248_v51  ;;  %v5380_v17 = vpack.i.bf16 %v1443_v34, %v1441_v29 }
 0x4ab   : > { %v5360_v43 = vpack.i.bf16 %v5209_v41, %v1487_v44  ;;  %v5252_v13 = vpop.permute.xlu1 %5251  ;;  %v7196_v47 = vpop.permute.xlu0 %5211  ;;  %v5425_v3 = vpack.i.bf16 %v5249_v49, %v1468_v60  ;;  %v1554_v41 = vsel %vm753_vm6, %v5134_v23, %v6789_v48  ;;  %v5465_v34 = vpack.i.bf16 %v5178_v61, %v5133_v7 }
 0x4ac   : > { %v5253_v46 = vunpack.i.l.bf16 %v5252_v13  ;;  %v5254_v15 = vunpack.i.h.bf16 %v5252_v13  ;;  %v5214_v63 = vunpack.i.h.bf16 %v7196_v47  ;;  %v1553_v13 = vsel %vm753_vm6, %v5133_v7, %v5134_v23 }
 0x4ad   : > { %5361 = vrot.lane.b32.xlu1 %v5360_v43, %s8626_s28  ;;  %5411 = vrot.lane.b32.xlu0 %v5410_v6, %s8626_s28  ;;  %v5213_v6 = vunpack.i.l.bf16 %v7196_v47  ;;  %v5450_v58 = vpack.i.bf16 %v1554_v41, %v1553_v13 }
 0x4ae   : > { %v5365_v52 = vpack.i.bf16 %v5253_v46, %v5208_v42  ;;  %v1488_v36 = vsel %vm727_vm5, %v5253_v46, %v5254_v15 }
 0x4af   : > { %v7201_v53 = vpop.permute.xlu1 %5256  ;;  %v7203_v45 = vpop.permute.xlu0 %5216  ;;  %v5445_v42 = vpack.i.bf16 %v5254_v15, %v1488_v36  ;;  %v1509_v56 = vsel %vm735_vm3, %v5213_v6, %v5214_v63 }
 0x4b0   : > { %v5259_v11 = vunpack.i.h.bf16 %v7201_v53  ;;  %v5258_v49 = vunpack.i.l.bf16 %v7201_v53  ;;  %v1510_v53 = vsel %vm735_vm3, %v5214_v63, %v6770_v25  ;;  %v5219_v36 = vunpack.i.h.bf16 %v7203_v45 }
 0x4b1   : > { %5366 = vrot.lane.b32.xlu1 %v5365_v52, %s8626_s28  ;;  %5416 = vrot.lane.b32.xlu0 %v5415_v55, %s8626_s28  ;;  %v5385_v52 = vpack.i.bf16 %v1467_v21, %v1465_v0  ;;  %v5218_v29 = vunpack.i.l.bf16 %v7203_v45 }
 0x4b2   : > { %v1512_v60 = vsel %vm735_vm3, %v5259_v11, %v6770_v25  ;;  %v1511_v62 = vsel %vm735_vm3, %v5258_v49, %v5259_v11 }
 0x4b3   : > { %v7214_v8 = vpop.permute.xlu1 %5261  ;;  %v7216_v9 = vpop.permute.xlu0 %5221  ;;  %v5460_v10 = vpack.i.bf16 %v1512_v60, %v1511_v62  ;;  %v1533_v7 = vsel %vm744_vm4, %v5218_v29, %v5219_v36  ;;  %v5189_v60 = vunpack.i.h.bf16 %v7159_v50 }
 0x4b4   : > { %v5264_v15 = vunpack.i.h.bf16 %v7214_v8 }
 0x4b5   : > { %5371 = vrot.lane.b32.xlu1 %v5370_v4, %s8626_s28  ;;  %5426 = vrot.lane.b32.xlu0 %v5425_v3, %s8626_s28  ;;  %v5174_v3 = vunpack.i.h.bf16 %v7130_v16  ;;  %v5400_v4 = vpack.i.bf16 %v1510_v53, %v1509_v56 }
 0x4b7   : > { %v7226_v28 = vpop.permute.xlu1 %5266  ;;  %v5227_v32 = vpop.permute.xlu0 %5226  ;;  %v1532_v23 = vsel %vm744_vm4, %v5174_v3, %v6776_v35 }
 0x4b8   : > { %v5229_v40 = vunpack.i.h.bf16 %v5227_v32  ;;  %v5228_v20 = vunpack.i.l.bf16 %v5227_v32  ;;  %v5405_v32 = vpack.i.bf16 %v5258_v49, %v5213_v6  ;;  %v5224_v49 = vunpack.i.h.bf16 %v7216_v9 }
 0x4b9   : > { %5376 = vrot.lane.b32.xlu1 %v5375_v33, %s8626_s28  ;;  %5431 = vrot.lane.b32.xlu0 %v5430_v54, %s8626_s28  ;;  %v5263_v54 = vunpack.i.l.bf16 %v7214_v8  ;;  %v1531_v33 = vsel %vm744_vm4, %v5173_v2, %v5174_v3  ;;  %v5143_v8 = vunpack.i.l.bf16 %v7146_v37  ;;  %v1534_v2 = vsel %vm744_vm4, %v5219_v36, %v6776_v35 }
 0x4ba   : > { %v1808_v51 = vsel %vm829_vm8, %v5228_v20, %v5229_v40  ;;  %v1807_v46 = vsel %vm829_vm8, %v6815_v19, %v5228_v20  ;;  %v5144_v40 = vunpack.i.h.bf16 %v7146_v37  ;;  %v1536_v20 = vsel %vm744_vm4, %v5264_v15, %v6776_v35 }
 0x4bb   : > { %v5272_v44 = vpop.permute.xlu1 %5271  ;;  %v1535_v41 = vsel %vm744_vm4, %v5263_v54, %v5264_v15  ;;  %v5420_v16 = vpack.i.bf16 %v1532_v23, %v1531_v33  ;;  %v5435_v63 = vpack.i.bf16 %v1534_v2, %v1533_v7  ;;  %v5440_v11 = vpack.i.bf16 %v5263_v54, %v5218_v29  ;;  %v5232_v3 = vpop.permute.xlu0 %5231 }
 0x4bc   : > { %v5274_v43 = vunpack.i.h.bf16 %v5272_v44  ;;  %v5273_v59 = vunpack.i.l.bf16 %v5272_v44  ;;  %v5480_v45 = vpack.i.bf16 %v1536_v20, %v1535_v41  ;;  %v1578_v21 = vsel %vm762_vm7, %v5144_v40, %v6797_v57 }
 0x4bd   : > { %5381 = vrot.lane.b32.xlu1 %v5380_v17, %s8626_s28  ;;  %5446 = vrot.lane.b32.xlu0 %v5445_v42, %s8626_s28  ;;  %v1577_v37 = vsel %vm762_vm7, %v5143_v8, %v5144_v40  ;;  %v5269_v42 = vunpack.i.h.bf16 %v7226_v28  ;;  %v5268_v44 = vunpack.i.l.bf16 %v7226_v28  ;;  %v5179_v17 = vunpack.i.h.bf16 %v7139_v26  ;;  %v1388_v40 = vld [vmem:[%s8635_s7 + $0x8] sm:$0xff] }
 0x4be   : > { %v1810_v47 = vsel %vm829_vm8, %v5273_v59, %v5274_v43  ;;  %v1809_v12 = vsel %vm829_vm8, %v6815_v19, %v5273_v59  ;;  %v5485_v6 = vpack.i.bf16 %v1578_v21, %v1577_v37  ;;  %v5188_v26 = vunpack.i.l.bf16 %v7159_v50 }
 0x4bf   : > { %v4513_v27 = vpack.c.bf16 %v1810_v47, %v1808_v51  ;;  %v4515_v55 = vpack.c.bf16 %v1809_v12, %v1807_v46  ;;  %v1560_v43 = vsel %vm753_vm6, %v5269_v42, %v6789_v48  ;;  %v1559_v59 = vsel %vm753_vm6, %v5268_v44, %v5269_v42  ;;  %v5277_v13 = vpop.permute.xlu1 %5276 }
 0x4c0   : > { %v1556_v28 = vsel %vm753_vm6, %v5179_v17, %v6789_v48  ;;  %v1555_v0 = vsel %vm753_vm6, %v5178_v61, %v5179_v17  ;;  %v5223_v51 = vunpack.i.l.bf16 %v7216_v9  ;;  %v5495_v47 = vpack.i.bf16 %v1560_v43, %v1559_v59 }
 0x4c1   : > { %5386 = vrot.lane.b32.xlu1 %v5385_v52, %s8626_s28  ;;  %4514 = vmatprep.subr.bf16.mxu0 %v4513_v27  ;;  %v5279_v46 = vunpack.i.h.bf16 %v5277_v13  ;;  %v5278_v12 = vunpack.i.l.bf16 %v5277_v13  ;;  %v5455_v52 = vpack.i.bf16 %v1556_v28, %v1555_v0  ;;  %v5500_v27 = vpack.i.bf16 %v5188_v26, %v5143_v8 }
 0x4c2   : > { %5451 = vrot.lane.b32.xlu0 %v5450_v58, %s8626_s28  ;;  %4516 = vmatpush1.bf16.msra.mxu0 %v4515_v55  ;;  %v1558_v55 = vsel %vm753_vm6, %v5224_v49, %v6789_v48  ;;  %v1557_v53 = vsel %vm753_vm6, %v5223_v51, %v5224_v49  ;;  %v5475_v61 = vpack.i.bf16 %v5268_v44, %v5223_v51  ;;  %v5234_v54 = vunpack.i.h.bf16 %v5232_v3 }
 0x4c3   : > { %v1584_v56 = vsel %vm762_vm7, %v5279_v46, %v6797_v57  ;;  %v1583_v58 = vsel %vm762_vm7, %v5278_v12, %v5279_v46  ;;  %v5470_v9 = vpack.i.bf16 %v1558_v55, %v1557_v53  ;;  %v1580_v15 = vsel %vm762_vm7, %v5189_v60, %v6797_v57 }
 0x4c4   : > { %v5510_v62 = vpack.i.bf16 %v1584_v56, %v1583_v58  ;;  %v1579_v50 = vsel %vm762_vm7, %v5188_v26, %v5189_v60  ;;  %v5233_v23 = vunpack.i.l.bf16 %v5232_v3  ;;  %v1582_v33 = vsel %vm762_vm7, %v5234_v54, %v6797_v57 }
 0x4c5   : > { %5401 = vrot.lane.b32.xlu1 %v5400_v4, %s8626_s28  ;;  %v1382_v4 = vld [vmem:[%s8634_s1 + $0x8] sm:$0xff] }
 0x4c6   : > { %5461 = vrot.lane.b32.xlu0 %v5460_v10, %s8626_s28  ;;  %v1387_v10 = vld [vmem:[%s8635_s7] sm:$0xff]  ;;  %2018 = vmatprep.mubr.f32.mxu0 %v1382_v4  ;;  %v5515_v29 = vpack.i.bf16 %v5278_v12, %v5233_v23 }
 0x4c9   : > { %5406 = vrot.lane.b32.xlu1 %v5405_v32, %s8626_s28  ;;  %v5490_v32 = vpack.i.bf16 %v1580_v15, %v1579_v50 }
 0x4ca   : > { %5466 = vrot.lane.b32.xlu0 %v5465_v34, %s8626_s28  ;;  %v1581_v34 = vsel %vm762_vm7, %v5233_v23, %v5234_v54 }
 0x4cb   : > { %v5505_v36 = vpack.i.bf16 %v1582_v33, %v1581_v34 }
 0x4cd   : > { %5421 = vrot.lane.b32.xlu1 %v5420_v16, %s8626_s28 }
 0x4ce   : > { %5481 = vrot.lane.b32.xlu0 %v5480_v45, %s8626_s28 }
 0x4d1   : > { %5436 = vrot.lane.b32.xlu1 %v5435_v63, %s8626_s28 }
 0x4d2   : > { %5486 = vrot.lane.b32.xlu0 %v5485_v6, %s8626_s28 }
 0x4d5   : > { %5441 = vrot.lane.b32.xlu1 %v5440_v11, %s8626_s28 }
 0x4d6   : > { %5496 = vrot.lane.b32.xlu0 %v5495_v47, %s8626_s28 }
 0x4d9   : > { %5456 = vrot.lane.b32.xlu1 %v5455_v52, %s8626_s28 }
 0x4da   : > { %5501 = vrot.lane.b32.xlu0 %v5500_v27, %s8626_s28 }
 0x4dd   : > { %5471 = vrot.lane.b32.xlu1 %v5470_v9, %s8626_s28 }
 0x4de   : > { %5511 = vrot.lane.b32.xlu0 %v5510_v62, %s8626_s28 }
 0x4e1   : > { %5476 = vrot.lane.b32.xlu1 %v5475_v61, %s8626_s28 }
 0x4e2   : > { %1587 = vperm.xlu0 %4889, %v1387_v10  }
 0x4e5   : > { %5491 = vrot.lane.b32.xlu1 %v5490_v32, %s8626_s28 }
 0x4e9   : > { %5506 = vrot.lane.b32.xlu1 %v5505_v36, %s8626_s28 }
 0x4ed   : > { %5516 = vrot.lane.b32.xlu1 %v5515_v29, %s8626_s28 }
 0x4ef   : > { %v5282_v8 = vpop.permute.xlu0 %5281 }
 0x4f0   : > { %v5284_v20 = vunpack.i.h.bf16 %v5282_v8  ;;  %v5283_v41 = vunpack.i.l.bf16 %v5282_v8 }
 0x4f1   : > { %1592 = vperm.xlu1 %4888, %v1388_v40  }
 0x4f2   : > { %v1812_v21 = vsel %vm829_vm8, %v5283_v41, %v5284_v20 }
 0x4f3   : > { %v5327_v16 = vpop.permute.xlu1 %5326  ;;  %v7341_v2 = vpop.permute.xlu0 %5286 }
 0x4f4   : > { %v5329_v7 = vunpack.i.h.bf16 %v5327_v16  ;;  %v5328_v45 = vunpack.i.l.bf16 %v5327_v16  ;;  %v5289_v32 = vunpack.i.h.bf16 %v7341_v2  ;;  %v5288_v33 = vunpack.i.l.bf16 %v7341_v2 }
 0x4f6   : > { %v1814_v37 = vsel %vm829_vm8, %v5328_v45, %v5329_v7 }
 0x4f7   : > { %v7345_v42 = vpop.permute.xlu0 %5291  ;;  %v4517_v44 = vpack.c.bf16 %v1814_v37, %v1812_v21  ;;  %v5332_v6 = vpop.permute.xlu1 %5331 }
 0x4f8   : > { %v5334_v54 = vunpack.i.h.bf16 %v5332_v6  ;;  %v5333_v23 = vunpack.i.l.bf16 %v5332_v6 }
 0x4f9   : > { %4518 = vmatprep.subr.bf16.mxu0 %v4517_v44 }
 0x4fa   : > { %v1822_v21 = vsel %vm829_vm8, %v5333_v23, %v5334_v54 }
 0x4fb   : > { %v7347_v17 = vpop.permute.xlu0 %5296  ;;  %v7353_v0 = vpop.permute.xlu1 %5336 }
 0x4fc   : > { %v5339_v7 = vunpack.i.h.bf16 %v7353_v0 }
 0x4ff   : > { %v7349_v63 = vpop.permute.xlu0 %5301  ;;  %v7357_v47 = vpop.permute.xlu1 %5341 }
 0x503   : > { %v7351_v43 = vpop.permute.xlu0 %5306 }
 0x507   : > { %v5312_v59 = vpop.permute.xlu0 %5311 }
 0x508   : > { %v5314_v13 = vunpack.i.h.bf16 %v5312_v59  ;;  %v5313_v28 = vunpack.i.l.bf16 %v5312_v59 }
 0x50a   : > { %v1811_v11 = vsel %vm829_vm8, %v5313_v28, %v5283_v41  ;;  %v1813_v26 = vsel %vm829_vm8, %v5314_v13, %v5328_v45  ;;  %v5338_v45 = vunpack.i.l.bf16 %v7353_v0 }
 0x50b   : > { %v4519_v49 = vpack.c.bf16 %v1813_v26, %v1811_v11  ;;  %v5317_v51 = vpop.permute.xlu0 %5316  ;;  %v1820_v11 = vsel %vm829_vm8, %v5288_v33, %v5289_v32 }
 0x50c   : > { %v5319_v34 = vunpack.i.h.bf16 %v5317_v51  ;;  %v5318_v36 = vunpack.i.l.bf16 %v5317_v51  ;;  %v4525_v26 = vpack.c.bf16 %v1822_v21, %v1820_v11  ;;  %v5309_v11 = vunpack.i.h.bf16 %v7351_v43 }
 0x50d   : > { %4520 = vmatpush1.bf16.msra.mxu0 %v4519_v49 }
 0x50e   : > { %v1819_v0 = vsel %vm829_vm8, %v5318_v36, %v5288_v33  ;;  %v1821_v49 = vsel %vm829_vm8, %v5319_v34, %v5333_v23 }
 0x50f   : > { %v7359_v46 = vpop.permute.xlu0 %5321 }
 0x513   : > { %v5347_v12 = vpop.permute.xlu1 %5346 }
 0x514   : > { %v5349_v52 = vunpack.i.h.bf16 %v5347_v12  ;;  %v5348_v27 = vunpack.i.l.bf16 %v5347_v12  ;;  %v5294_v12 = vunpack.i.h.bf16 %v7345_v42 }
 0x516   : > { %v1816_v9 = vsel %vm829_vm8, %v5348_v27, %v5349_v52  ;;  %v5293_v52 = vunpack.i.l.bf16 %v7345_v42 }
 0x517   : > { %v7361_v55 = vpop.permute.xlu1 %5351  ;;  %v5392_v53 = vpop.permute.xlu0 %5391 }
 0x518   : > { %v5394_v56 = vunpack.i.h.bf16 %v5392_v53  ;;  %v5393_v58 = vunpack.i.l.bf16 %v5392_v53  ;;  %v5354_v37 = vunpack.i.h.bf16 %v7361_v55  ;;  %v5353_v44 = vunpack.i.l.bf16 %v7361_v55 }
 0x519   : > { %v1830_v55 = vsel %vm829_vm8, %v5338_v45, %v5339_v7  ;;  %v5324_v53 = vunpack.i.h.bf16 %v7359_v46  ;;  %v1828_v32 = vsel %vm829_vm8, %v5293_v52, %v5294_v12 }
 0x51a   : > { %v1818_v60 = vsel %vm829_vm8, %v5393_v58, %v5394_v56  ;;  %v5323_v56 = vunpack.i.l.bf16 %v7359_v46 }
 0x51b   : > { %v7365_v62 = vpop.permute.xlu1 %5356  ;;  %v7367_v3 = vpop.permute.xlu0 %5396  ;;  %v4521_v4 = vpack.c.bf16 %v1818_v60, %v1816_v9  ;;  %v4527_v60 = vpack.c.bf16 %v1821_v49, %v1819_v0 }
 0x51c   : > { %v5359_v33 = vunpack.i.h.bf16 %v7365_v62  ;;  %v5358_v34 = vunpack.i.l.bf16 %v7365_v62  ;;  %v5344_v62 = vunpack.i.h.bf16 %v7357_v47 }
 0x51d   : > { %4522 = vmatprep.subr.bf16.mxu0 %v4521_v4 }
 0x51f   : > { %v7369_v61 = vpop.permute.xlu1 %5361  ;;  %v5412_v10 = vpop.permute.xlu0 %5411 }
 0x520   : > { %v5414_v8 = vunpack.i.h.bf16 %v5412_v10  ;;  %v5413_v20 = vunpack.i.l.bf16 %v5412_v10 }
 0x522   : > { %v1826_v51 = vsel %vm829_vm8, %v5413_v20, %v5414_v8 }
 0x523   : > { %v7371_v15 = vpop.permute.xlu1 %5366  ;;  %v7373_v50 = vpop.permute.xlu0 %5416 }
 0x527   : > { %v5372_v29 = vpop.permute.xlu1 %5371  ;;  %v7377_v40 = vpop.permute.xlu0 %5426 }
 0x528   : > { %v5374_v41 = vunpack.i.h.bf16 %v5372_v29  ;;  %v5373_v16 = vunpack.i.l.bf16 %v5372_v29  ;;  %v5429_v10 = vunpack.i.h.bf16 %v7377_v40  ;;  %v5428_v54 = vunpack.i.l.bf16 %v7377_v40 }
 0x52a   : > { %v1815_v2 = vsel %vm829_vm8, %v5373_v16, %v5348_v27  ;;  %v1817_v6 = vsel %vm829_vm8, %v5374_v41, %v5393_v58  ;;  %v1824_v27 = vsel %vm829_vm8, %v5353_v44, %v5354_v37  ;;  %v4533_v41 = vpack.c.bf16 %v1830_v55, %v1828_v32 }
 0x52b   : > { %v7386_v59 = vpop.permute.xlu1 %5376  ;;  %v7388_v13 = vpop.permute.xlu0 %5431  ;;  %v4523_v28 = vpack.c.bf16 %v1817_v6, %v1815_v2  ;;  %v4529_v4 = vpack.c.bf16 %v1826_v51, %v1824_v27  ;;  %v1827_v16 = vsel %vm829_vm8, %v5323_v56, %v5293_v52  ;;  %v1829_v37 = vsel %vm829_vm8, %v5324_v53, %v5338_v45 }
 0x52c   : > { %v1834_v2 = vsel %vm829_vm8, %v5428_v54, %v5429_v10  ;;  %v5343_v6 = vunpack.i.l.bf16 %v7357_v47  ;;  %v4535_v45 = vpack.c.bf16 %v1829_v37, %v1827_v16  ;;  %v5364_v55 = vunpack.i.h.bf16 %v7369_v61 }
 0x52d   : > { %4524 = vmatpush1.bf16.msra.mxu0 %v4523_v28  ;;  %v1832_v28 = vsel %vm829_vm8, %v5358_v34, %v5359_v33  ;;  %v5379_v53 = vunpack.i.h.bf16 %v7386_v59  ;;  %v5378_v56 = vunpack.i.l.bf16 %v7386_v59  ;;  %v5304_v32 = vunpack.i.h.bf16 %v7349_v63 }
 0x52e   : > { %4526 = vmatprep.subr.bf16.mxu0 %v4525_v26  ;;  %v5308_v26 = vunpack.i.l.bf16 %v7351_v43  ;;  %v4537_v49 = vpack.c.bf16 %v1834_v2, %v1832_v28  ;;  %v1838_v27 = vsel %vm829_vm8, %v5343_v6, %v5344_v62  ;;  %v5363_v43 = vunpack.i.l.bf16 %v7369_v61 }
 0x52f   : > { %v5382_v58 = vpop.permute.xlu1 %5381  ;;  %v7400_v9 = vpop.permute.xlu0 %5446  ;;  %v5369_v61 = vunpack.i.h.bf16 %v7371_v15  ;;  %v5303_v59 = vunpack.i.l.bf16 %v7349_v63  ;;  %v5368_v33 = vunpack.i.l.bf16 %v7371_v15  ;;  %v5399_v15 = vunpack.i.h.bf16 %v7367_v3 }
 0x530   : > { %v5384_v42 = vunpack.i.h.bf16 %v5382_v58  ;;  %v5383_v23 = vunpack.i.l.bf16 %v5382_v58  ;;  %v5449_v51 = vunpack.i.h.bf16 %v7400_v9  ;;  %v5448_v47 = vunpack.i.l.bf16 %v7400_v9 }
 0x531   : > { %4528 = vmatpush1.bf16.msra.mxu0 %v4527_v60  ;;  %v5398_v2 = vunpack.i.l.bf16 %v7367_v3  ;;  %v1839_v62 = vsel %vm829_vm8, %v5368_v33, %v5363_v43 }
 0x532   : > { %4530 = vmatprep.subr.bf16.mxu0 %v4529_v4  ;;  %v1823_v46 = vsel %vm829_vm8, %v5383_v23, %v5353_v44  ;;  %v1825_v36 = vsel %vm829_vm8, %v5384_v42, %v5413_v20  ;;  %v5299_v20 = vunpack.i.h.bf16 %v7347_v17  ;;  %v5298_v44 = vunpack.i.l.bf16 %v7347_v17 }
 0x533   : > { %v5387_v29 = vpop.permute.xlu1 %5386  ;;  %v4531_v8 = vpack.c.bf16 %v1825_v36, %v1823_v46  ;;  %v1837_v42 = vsel %vm829_vm8, %v5309_v11, %v5343_v6  ;;  %v1842_v23 = vsel %vm829_vm8, %v5448_v47, %v5449_v51  ;;  %v1844_v6 = vsel %vm829_vm8, %v5303_v59, %v5304_v32 }
 0x534   : > { %v5389_v40 = vunpack.i.h.bf16 %v5387_v29  ;;  %v5388_v7 = vunpack.i.l.bf16 %v5387_v29  ;;  %v7410_v21 = vpop.permute.xlu0 %5451  ;;  %v1836_v60 = vsel %vm829_vm8, %v5298_v44, %v5299_v20  ;;  %v1845_v11 = vsel %vm829_vm8, %v5399_v15, %v5378_v56 }
 0x535   : > { %4532 = vmatpush1.bf16.msra.mxu0 %v4531_v8  ;;  %v4541_v10 = vpack.c.bf16 %v1838_v27, %v1836_v60  ;;  %v1841_v8 = vsel %vm829_vm8, %v5369_v61, %v5448_v47  ;;  %v1843_v3 = vsel %vm829_vm8, %v5398_v2, %v5303_v59  ;;  %v5434_v60 = vunpack.i.h.bf16 %v7388_v13 }
 0x536   : > { %4534 = vmatprep.subr.bf16.mxu0 %v4533_v41  ;;  %v1831_v52 = vsel %vm829_vm8, %v5388_v7, %v5358_v34  ;;  %v1833_v17 = vsel %vm829_vm8, %v5389_v40, %v5428_v54  ;;  %v1835_v54 = vsel %vm829_vm8, %v5308_v26, %v5298_v44  ;;  %v1840_v34 = vsel %vm829_vm8, %v5363_v43, %v5364_v55 }
 0x537   : > { %v7421_v0 = vpop.permute.xlu1 %5401  ;;  %v4539_v9 = vpack.c.bf16 %v1833_v17, %v1831_v52  ;;  %v4543_v36 = vpack.c.bf16 %v1837_v42, %v1835_v54  ;;  %v4545_v29 = vpack.c.bf16 %v1842_v23, %v1840_v34  ;;  %v1846_v41 = vsel %vm829_vm8, %v5378_v56, %v5379_v53 }
 0x538   : > { %v7425_v12 = vpop.permute.xlu0 %5461  ;;  %v5404_v16 = vunpack.i.h.bf16 %v7421_v0  ;;  %v5403_v40 = vunpack.i.l.bf16 %v7421_v0  ;;  %v4547_v44 = vpack.c.bf16 %v1841_v8, %v1839_v62  ;;  %v4549_v28 = vpack.c.bf16 %v1846_v41, %v1844_v6 }
 0x539   : > { %4536 = vmatpush1.bf16.msra.mxu0 %v4535_v45  ;;  %v5464_v7 = vunpack.i.h.bf16 %v7425_v12  ;;  %v5463_v63 = vunpack.i.l.bf16 %v7425_v12  ;;  %v5419_v52 = vunpack.i.h.bf16 %v7373_v50  ;;  %v5418_v17 = vunpack.i.l.bf16 %v7373_v50 }
 0x53a   : > { %4538 = vmatprep.subr.bf16.mxu0 %v4537_v49  ;;  %v1848_v45 = vsel %vm829_vm8, %v5403_v40, %v5404_v16  ;;  %v4551_v55 = vpack.c.bf16 %v1845_v11, %v1843_v3  ;;  %v5433_v54 = vunpack.i.l.bf16 %v7388_v13 }
 0x53b   : > { %v5407_v58 = vpop.permute.xlu1 %5406  ;;  %v1850_v49 = vsel %vm829_vm8, %v5463_v63, %v5464_v7  ;;  %v1852_v59 = vsel %vm829_vm8, %v5418_v17, %v5419_v52  ;;  %v5453_v7 = vunpack.i.l.bf16 %v7410_v21 }
 0x53c   : > { %v7435_v4 = vpop.permute.xlu0 %5466  ;;  %v5409_v26 = vunpack.i.h.bf16 %v5407_v58  ;;  %v5408_v0 = vunpack.i.l.bf16 %v5407_v58  ;;  %v4553_v43 = vpack.c.bf16 %v1850_v49, %v1848_v45  ;;  %v1851_v13 = vsel %vm829_vm8, %v5433_v54, %v5418_v17 }
 0x53d   : > { %4540 = vmatpush1.bf16.msra.mxu0 %v4539_v9 }
 0x53e   : > { %4542 = vmatprep.subr.bf16.mxu0 %v4541_v10  ;;  %v1847_v58 = vsel %vm829_vm8, %v5408_v0, %v5403_v40  ;;  %v1849_v9 = vsel %vm829_vm8, %v5409_v26, %v5463_v63  ;;  %v5454_v40 = vunpack.i.h.bf16 %v7410_v21  ;;  %v5468_v26 = vunpack.i.l.bf16 %v7435_v4 }
 0x53f   : > { %v5422_v46 = vpop.permute.xlu1 %5421  ;;  %v4555_v32 = vpack.c.bf16 %v1849_v9, %v1847_v58 }
 0x540   : > { %v5482_v37 = vpop.permute.xlu0 %5481  ;;  %v5424_v51 = vunpack.i.h.bf16 %v5422_v46  ;;  %v5423_v47 = vunpack.i.l.bf16 %v5422_v46 }
 0x541   : > { %4544 = vmatpush1.bf16.msra.mxu0 %v4543_v36  ;;  %v5484_v42 = vunpack.i.h.bf16 %v5482_v37  ;;  %v5483_v23 = vunpack.i.l.bf16 %v5482_v37 }
 0x542   : > { %4546 = vmatprep.subr.bf16.mxu0 %v4545_v29  ;;  %v1854_v10 = vsel %vm829_vm8, %v5423_v47, %v5424_v51  ;;  %v1853_v33 = vsel %vm829_vm8, %v5434_v60, %v5423_v47  ;;  %v1860_v51 = vsel %vm829_vm8, %v5453_v7, %v5454_v40 }
 0x543   : > { %v5437_v20 = vpop.permute.xlu1 %5436  ;;  %v4557_v36 = vpack.c.bf16 %v1854_v10, %v1852_v59  ;;  %v1858_v16 = vsel %vm829_vm8, %v5483_v23, %v5484_v42  ;;  %v4559_v37 = vpack.c.bf16 %v1853_v33, %v1851_v13  ;;  %v1381_v13 = vld [vmem:[%s8634_s1] sm:$0xff] }
 0x544   : > { %v7458_v12 = vpop.permute.xlu0 %5486  ;;  %v5439_v53 = vunpack.i.h.bf16 %v5437_v20  ;;  %v5438_v56 = vunpack.i.l.bf16 %v5437_v20 }
 0x545   : > { %4548 = vmatpush1.bf16.msra.mxu0 %v4547_v44  ;;  %v5469_v44 = vunpack.i.h.bf16 %v7435_v4  ;;  %v1859_v4 = vsel %vm829_vm8, %v5468_v26, %v5453_v7  ;;  %v1383_v26 = vld [vmem:[%s8634_s1 + $0x10] sm:$0xff] }
 0x546   : > { %4550 = vmatprep.subr.bf16.mxu0 %v4549_v28  ;;  %v1856_v29 = vsel %vm829_vm8, %v5438_v56, %v5439_v53 }
 0x547   : > { %v5442_v27 = vpop.permute.xlu1 %5441  ;;  %v4561_v15 = vpack.c.bf16 %v1858_v16, %v1856_v29 }
 0x548   : > { %v5497_v50 = vpop.permute.xlu0 %5496  ;;  %v5444_v34 = vunpack.i.h.bf16 %v5442_v27  ;;  %v5443_v46 = vunpack.i.l.bf16 %v5442_v27 }
 0x549   : > { %4552 = vmatpush1.bf16.msra.mxu0 %v4551_v55  ;;  %v5499_v0 = vunpack.i.h.bf16 %v5497_v50  ;;  %v5498_v45 = vunpack.i.l.bf16 %v5497_v50  ;;  %v5489_v55 = vunpack.i.h.bf16 %v7458_v12 }
 0x54a   : > { %4554 = vmatprep.subr.bf16.mxu0 %v4553_v43  ;;  %v1855_v6 = vsel %vm829_vm8, %v5443_v46, %v5438_v56  ;;  %v1857_v20 = vsel %vm829_vm8, %v5444_v34, %v5483_v23  ;;  %v5488_v43 = vunpack.i.l.bf16 %v7458_v12 }
 0x54b   : > { %v5457_v61 = vpop.permute.xlu1 %5456  ;;  %v4563_v49 = vpack.c.bf16 %v1857_v20, %v1855_v6  ;;  %v1866_v53 = vsel %vm829_vm8, %v5498_v45, %v5499_v0  ;;  %v1384_v20 = vld [vmem:[%s8634_s1 + $0x18] sm:$0xff]  ;;  %v1386_v0 = vld [vmem:[%s8634_s1 + $0x28] sm:$0xff] }
 0x54c   : > { %v5459_v8 = vunpack.i.h.bf16 %v5457_v61  ;;  %v5458_v41 = vunpack.i.l.bf16 %v5457_v61  ;;  %v5502_v28 = vpop.permute.xlu0 %5501  ;;  %v1868_v12 = vsel %vm829_vm8, %v5488_v43, %v5489_v55 }
 0x54d   : > { %4556 = vmatpush1.bf16.msra.mxu0 %v4555_v32  ;;  %v5504_v50 = vunpack.i.h.bf16 %v5502_v28  ;;  %v5503_v61 = vunpack.i.l.bf16 %v5502_v28 }
 0x54e   : > { %4558 = vmatprep.subr.bf16.mxu0 %v4557_v36  ;;  %v1862_v11 = vsel %vm829_vm8, %v5458_v41, %v5459_v8  ;;  %v1861_v47 = vsel %vm829_vm8, %v5469_v44, %v5458_v41 }
 0x54f   : > { %v5472_v63 = vpop.permute.xlu1 %5471  ;;  %v4565_v17 = vpack.c.bf16 %v1862_v11, %v1860_v51  ;;  %v4567_v9 = vpack.c.bf16 %v1861_v47, %v1859_v4  ;;  %v1867_v16 = vsel %vm829_vm8, %v5503_v61, %v5488_v43 }
 0x550   : > { %v5474_v2 = vunpack.i.h.bf16 %v5472_v63  ;;  %v5473_v62 = vunpack.i.l.bf16 %v5472_v63  ;;  %v5512_v56 = vpop.permute.xlu0 %5511  ;;  %v1385_v63 = vld [vmem:[%s8634_s1 + $0x20] sm:$0xff] }
 0x551   : > { %4560 = vmatpush1.bf16.msra.mxu0 %v4559_v37  ;;  %v5514_v32 = vunpack.i.h.bf16 %v5512_v56  ;;  %v5513_v59 = vunpack.i.l.bf16 %v5512_v56 }
 0x552   : > { %4562 = vmatprep.subr.bf16.mxu0 %v4561_v15  ;;  %v1864_v27 = vsel %vm829_vm8, %v5473_v62, %v5474_v2 }
 0x553   : > { %v5477_v21 = vpop.permute.xlu1 %5476  ;;  %v4569_v60 = vpack.c.bf16 %v1866_v53, %v1864_v27  ;;  %v1874_v7 = vsel %vm829_vm8, %v5513_v59, %v5514_v32 }
 0x554   : > { %v5479_v3 = vunpack.i.h.bf16 %v5477_v21  ;;  %v5478_v52 = vunpack.i.l.bf16 %v5477_v21 }
 0x555   : > { %4564 = vmatpush1.bf16.msra.mxu0 %v4563_v49 }
 0x556   : > { %4566 = vmatprep.subr.bf16.mxu0 %v4565_v17  ;;  %v1863_v42 = vsel %vm829_vm8, %v5478_v52, %v5473_v62  ;;  %v1865_v23 = vsel %vm829_vm8, %v5479_v3, %v5498_v45 }
 0x557   : > { %v5492_v58 = vpop.permute.xlu1 %5491  ;;  %v4571_v46 = vpack.c.bf16 %v1865_v23, %v1863_v42 }
 0x558   : > { %v5494_v10 = vunpack.i.h.bf16 %v5492_v58  ;;  %v5493_v54 = vunpack.i.l.bf16 %v5492_v58 }
 0x559   : > { %4568 = vmatpush1.bf16.msra.mxu0 %v4567_v9 }
 0x55a   : > { %4570 = vmatprep.subr.bf16.mxu0 %v4569_v60  ;;  %v1870_v33 = vsel %vm829_vm8, %v5493_v54, %v5494_v10  ;;  %v1869_v29 = vsel %vm829_vm8, %v5504_v50, %v5493_v54 }
 0x55b   : > { %v5507_v34 = vpop.permute.xlu1 %5506  ;;  %v4573_v36 = vpack.c.bf16 %v1870_v33, %v1868_v12  ;;  %v4575_v15 = vpack.c.bf16 %v1869_v29, %v1867_v16 }
 0x55c   : > { %v5509_v8 = vunpack.i.h.bf16 %v5507_v34  ;;  %v5508_v41 = vunpack.i.l.bf16 %v5507_v34 }
 0x55d   : > { %4572 = vmatpush1.bf16.msra.mxu0 %v4571_v46 }
 0x55e   : > { %4574 = vmatprep.subr.bf16.mxu0 %v4573_v36  ;;  %v1872_v40 = vsel %vm829_vm8, %v5508_v41, %v5509_v8 }
 0x55f   : > { %v5517_v37 = vpop.permute.xlu1 %5516  ;;  %v4577_v2 = vpack.c.bf16 %v1874_v7, %v1872_v40 }
 0x560   : > { %v5519_v62 = vunpack.i.h.bf16 %v5517_v37  ;;  %v5518_v6 = vunpack.i.l.bf16 %v5517_v37  ;;  %2019 = vmatmul.mubr.f32.vlgmr.msra.gmra.mrb[0].mxu0 %v1381_v13 }
 0x561   : > { %4576 = vmatpush1.bf16.msra.mxu0 %v4575_v15  ;;  %2024 = vmatprep.mubr.f32.mxu0 %v1385_v63  ;;  %v1588_v45 = vpop.permute.xlu0 %1587 }
 0x562   : > { %v1871_v44 = vsel %vm829_vm8, %v5518_v6, %v5508_v41  ;;  %v1873_v28 = vsel %vm829_vm8, %v5519_v62, %v5513_v59  ;;  %4578 = vmatprep.subr.bf16.mxu0 %v4577_v2 }
 0x563   : > { %v4579_v11 = vpack.c.bf16 %v1873_v28, %v1871_v44 }
 0x564   : > { %2025 = vmatmul.mubr.f32.gmra.mrb[2].mxu0 %v1384_v20 }
 0x565   : > { %4580 = vmatpush1.bf16.msra.mxu0 %v4579_v11  ;;  %2095 = vmatprep.mubr.f32.mxu0 %v6586_v1 }
 0x568   : > { %4413 = vmatmul.mubr.msk.f32.vlgmr.msra.gmra.mrb[0].mxu0 %vm1947_vm11, %v1383_v26 }
 0x569   : > { %2101 = vmatprep.mubr.f32.mxu0 %v6586_v1 }
 0x56c   : > { %4414 = vmatmul.mubr.msk.f32.gmra.mrb[2].mxu0 %vm1947_vm11, %v1386_v0 }
 0x570   : > { %v1593_v52 = vpop.permute.xlu1 %1592 }
 0x63b   : > { %v2097_v21 = vpop.f32.mrb[0].mxu0 }
 0x63c   : > { %v4764_v49 = vadd.f32 %v2097_v21, %v1588_v45  ;;  %v2099_v51 = vpop.f32.mrb[1].mxu0 }
 0x63d   : > { %v4765_v47 = vadd.f32 %v2099_v51, %v1588_v45 }
 0x63e   : > { %v2108_v3 = vmul.f32 %v4764_v49, %v6844_v22 }
 0x63f   : > { %v2109_v17 = vmul.f32 %v4765_v47, %v6846_v24  ;;  %v2103_v27 = vpop.f32.mrb[2].mxu0 }
 0x640   : > { %v4766_v55 = vadd.f32 %v2103_v27, %v1593_v52  ;;  %v2105_v43 = vpop.f32.mrb[3].mxu0 }
 0x641   : > { %v4767_v4 = vadd.f32 %v2105_v43, %v1593_v52  ;;  %v5520_v53 = vpack.i.bf16 %v2109_v17, %v2108_v3 }
 0x642   : > { %v2110_v56 = vmul.f32 %v4766_v55, %v6844_v22 }
 0x643   : > { %v2111_v58 = vmul.f32 %v4767_v4, %v6846_v24  ;;  %5521 = vrot.lane.b32.xlu0 %v5520_v53, %s8629_s11 }
 0x645   : > { %v5560_v9 = vpack.i.bf16 %v2111_v58, %v2110_v56 }
 0x647   : > { %5561 = vrot.lane.b32.xlu1 %v5560_v9, %s8629_s11  ;;  %5526 = vrot.lane.b32.xlu0 %v5520_v53, %s8630_s0 }
 0x64b   : > { %5566 = vrot.lane.b32.xlu1 %v5560_v9, %s8630_s0  ;;  %5531 = vrot.lane.b32.xlu0 %v5520_v53, %s8631_s4 }
 0x64f   : > { %5571 = vrot.lane.b32.xlu1 %v5560_v9, %s8631_s4  ;;  %5536 = vrot.lane.b32.xlu0 %v5520_v53, %s8632_s24 }
 0x653   : > { %5576 = vrot.lane.b32.xlu1 %v5560_v9, %s8632_s24  ;;  %5541 = vrot.lane.b32.xlu0 %v5520_v53, %s8633_s25 }
 0x657   : > { %5581 = vrot.lane.b32.xlu1 %v5560_v9, %s8633_s25  ;;  %5546 = vrot.lane.b32.xlu0 %v5520_v53, %s8623_s2 }
 0x65b   : > { %5586 = vrot.lane.b32.xlu1 %v5560_v9, %s8623_s2  ;;  %5551 = vrot.lane.b32.xlu0 %v5520_v53, %s8624_s27 }
 0x65f   : > { %5591 = vrot.lane.b32.xlu1 %v5560_v9, %s8624_s27  ;;  %5556 = vrot.lane.b32.xlu0 %v5520_v53, %s8625_s3 }
 0x663   : > { %5596 = vrot.lane.b32.xlu1 %v5560_v9, %s8625_s3  ;;  %5601 = vrot.lane.b32.xlu0 %v5520_v53, %s8626_s28 }
 0x667   : > { %5606 = vrot.lane.b32.xlu1 %v5560_v9, %s8626_s28 }
 0x6b5   : > { %v5522_v60 = vpop.permute.xlu0 %5521 }
 0x6b6   : > { %v5524_v10 = vunpack.i.h.bf16 %v5522_v60  ;;  %v5523_v54 = vunpack.i.l.bf16 %v5522_v60 }
 0x6b8   : > { %v2131_v42 = vsel %vm702_vm0, %v5523_v54, %v5524_v10  ;;  %v2130_v62 = vsel %vm702_vm0, %v6756_v5, %v5523_v54 }
 0x6b9   : > { %v5610_v23 = vpack.i.bf16 %v5524_v10, %v2131_v42  ;;  %v5562_v50 = vpop.permute.xlu1 %5561  ;;  %v5527_v12 = vpop.permute.xlu0 %5526 }
 0x6ba   : > { %v5529_v61 = vunpack.i.h.bf16 %v5527_v12  ;;  %v5528_v32 = vunpack.i.l.bf16 %v5527_v12  ;;  %v5563_v33 = vunpack.i.l.bf16 %v5562_v50  ;;  %v5564_v20 = vunpack.i.h.bf16 %v5562_v50 }
 0x6bb   : > { %5611 = vrot.lane.b32.xlu0 %v5610_v23, %s8626_s28 }
 0x6bc   : > { %v2143_v59 = vsel %vm711_vm1, %v5528_v32, %v5529_v61  ;;  %v2132_v13 = vsel %vm702_vm0, %v6756_v5, %v5563_v33  ;;  %v2142_v51 = vsel %vm711_vm1, %v6759_v14, %v5528_v32  ;;  %v2133_v55 = vsel %vm702_vm0, %v5563_v33, %v5564_v20 }
 0x6bd   : > { %v5615_v34 = vpack.i.bf16 %v5529_v61, %v2143_v59  ;;  %v5567_v46 = vpop.permute.xlu1 %5566  ;;  %v5532_v36 = vpop.permute.xlu0 %5531  ;;  %v5630_v26 = vpack.i.bf16 %v2132_v13, %v2130_v62  ;;  %v5645_v56 = vpack.i.bf16 %v5564_v20, %v2133_v55 }
 0x6be   : > { %v5534_v29 = vunpack.i.h.bf16 %v5532_v36  ;;  %v5533_v8 = vunpack.i.l.bf16 %v5532_v36  ;;  %v5568_v63 = vunpack.i.l.bf16 %v5567_v46  ;;  %v5569_v43 = vunpack.i.h.bf16 %v5567_v46 }
 0x6bf   : > { %5616 = vrot.lane.b32.xlu1 %v5615_v34, %s8626_s28 }
 0x6c0   : > { %v2155_v41 = vsel %vm720_vm2, %v5533_v8, %v5534_v29  ;;  %v2144_v0 = vsel %vm711_vm1, %v6759_v14, %v5568_v63  ;;  %v2154_v47 = vsel %vm720_vm2, %v6763_v18, %v5533_v8  ;;  %v2145_v54 = vsel %vm711_vm1, %v5568_v63, %v5569_v43 }
 0x6c1   : > { %v5620_v16 = vpack.i.bf16 %v5534_v29, %v2155_v41  ;;  %v5572_v40 = vpop.permute.xlu1 %5571  ;;  %v5537_v7 = vpop.permute.xlu0 %5536  ;;  %v5635_v17 = vpack.i.bf16 %v2144_v0, %v2142_v51  ;;  %v5660_v23 = vpack.i.bf16 %v5569_v43, %v2145_v54 }
 0x6c2   : > { %v5573_v37 = vunpack.i.l.bf16 %v5572_v40  ;;  %v5539_v15 = vunpack.i.h.bf16 %v5537_v7  ;;  %v5538_v2 = vunpack.i.l.bf16 %v5537_v7  ;;  %v5574_v42 = vunpack.i.h.bf16 %v5572_v40 }
 0x6c3   : > { %5621 = vrot.lane.b32.xlu0 %v5620_v16, %s8626_s28 }
 0x6c4   : > { %v2166_v6 = vsel %vm727_vm5, %v5538_v2, %v5539_v15  ;;  %v2156_v45 = vsel %vm720_vm2, %v6763_v18, %v5573_v37  ;;  %v2157_v59 = vsel %vm720_vm2, %v5573_v37, %v5574_v42 }
 0x6c5   : > { %v5625_v44 = vpack.i.bf16 %v5539_v15, %v2166_v6  ;;  %v5577_v28 = vpop.permute.xlu1 %5576  ;;  %v5542_v11 = vpop.permute.xlu0 %5541  ;;  %v5640_v27 = vpack.i.bf16 %v2156_v45, %v2154_v47  ;;  %v5670_v36 = vpack.i.bf16 %v5574_v42, %v2157_v59 }
 0x6c6   : > { %v5544_v21 = vunpack.i.h.bf16 %v5542_v11  ;;  %v5543_v49 = vunpack.i.l.bf16 %v5542_v11  ;;  %v5578_v58 = vunpack.i.l.bf16 %v5577_v28  ;;  %v5579_v33 = vunpack.i.h.bf16 %v5577_v28 }
 0x6c7   : > { %5626 = vrot.lane.b32.xlu1 %v5625_v44, %s8626_s28  ;;  %5631 = vrot.lane.b32.xlu0 %v5630_v26, %s8626_s28 }
 0x6c8   : > { %v2177_v4 = vsel %vm735_vm3, %v5544_v21, %v6770_v25  ;;  %v2176_v53 = vsel %vm735_vm3, %v5543_v49, %v5544_v21  ;;  %v5650_v50 = vpack.i.bf16 %v5578_v58, %v5538_v2  ;;  %v2167_v16 = vsel %vm727_vm5, %v5578_v58, %v5579_v33 }
 0x6c9   : > { %v5582_v3 = vpop.permute.xlu1 %5581  ;;  %v7557_v52 = vpop.permute.xlu0 %5546  ;;  %v5655_v10 = vpack.i.bf16 %v2177_v4, %v2176_v53  ;;  %v5680_v62 = vpack.i.bf16 %v5579_v33, %v2167_v16  ;;  %v2117_v16 = vld [vmem:[%s8569_s9 + $0x8] sm:$0xff] }
 0x6ca   : > { %v5583_v12 = vunpack.i.l.bf16 %v5582_v3  ;;  %v5549_v34 = vunpack.i.h.bf16 %v7557_v52  ;;  %v5548_v46 = vunpack.i.l.bf16 %v7557_v52  ;;  %v5584_v29 = vunpack.i.h.bf16 %v5582_v3 }
 0x6cb   : > { %5636 = vrot.lane.b32.xlu1 %v5635_v17, %s8626_s28  ;;  %5641 = vrot.lane.b32.xlu0 %v5640_v27, %s8626_s28 }
 0x6cc   : > { %v5665_v8 = vpack.i.bf16 %v5583_v12, %v5543_v49  ;;  %v2189_v40 = vsel %vm744_vm4, %v5549_v34, %v6776_v35  ;;  %v2188_v7 = vsel %vm744_vm4, %v5548_v46, %v5549_v34  ;;  %v2179_v6 = vsel %vm735_vm3, %v5584_v29, %v6770_v25 }
 0x6cd   : > { %v5587_v9 = vpop.permute.xlu1 %5586  ;;  %v7565_v60 = vpop.permute.xlu0 %5551  ;;  %v5675_v28 = vpack.i.bf16 %v2189_v40, %v2188_v7  ;;  %v2178_v11 = vsel %vm735_vm3, %v5583_v12, %v5584_v29 }
 0x6ce   : > { %v5554_v63 = vunpack.i.h.bf16 %v7565_v60  ;;  %v5553_v37 = vunpack.i.l.bf16 %v7565_v60  ;;  %v5589_v20 = vunpack.i.h.bf16 %v5587_v9  ;;  %v5588_v26 = vunpack.i.l.bf16 %v5587_v9 }
 0x6cf   : > { %5646 = vrot.lane.b32.xlu1 %v5645_v56, %s8626_s28  ;;  %5656 = vrot.lane.b32.xlu0 %v5655_v10, %s8626_s28  ;;  %v5685_v55 = vpack.i.bf16 %v2179_v6, %v2178_v11 }
 0x6d0   : > { %v2201_v21 = vsel %vm753_vm6, %v5554_v63, %v6789_v48  ;;  %v2200_v49 = vsel %vm753_vm6, %v5553_v37, %v5554_v63  ;;  %v2191_v17 = vsel %vm744_vm4, %v5589_v20, %v6776_v35  ;;  %v2190_v4 = vsel %vm744_vm4, %v5588_v26, %v5589_v20 }
 0x6d1   : > { %v7570_v61 = vpop.permute.xlu1 %5591  ;;  %v7572_v32 = vpop.permute.xlu0 %5556  ;;  %v5695_v58 = vpack.i.bf16 %v2201_v21, %v2200_v49  ;;  %v5690_v9 = vpack.i.bf16 %v5588_v26, %v5548_v46  ;;  %v5700_v60 = vpack.i.bf16 %v2191_v17, %v2190_v4 }
 0x6d2   : > { %v5594_v53 = vunpack.i.h.bf16 %v7570_v61  ;;  %v5593_v56 = vunpack.i.l.bf16 %v7570_v61  ;;  %v5559_v42 = vunpack.i.h.bf16 %v7572_v32 }
 0x6d3   : > { %5651 = vrot.lane.b32.xlu1 %v5650_v50, %s8626_s28  ;;  %5661 = vrot.lane.b32.xlu0 %v5660_v23, %s8626_s28  ;;  %v5558_v23 = vunpack.i.l.bf16 %v7572_v32 }
 0x6d4   : > { %v2203_v10 = vsel %vm753_vm6, %v5594_v53, %v6789_v48  ;;  %v2202_v54 = vsel %vm753_vm6, %v5593_v56, %v5594_v53  ;;  %v5705_v59 = vpack.i.bf16 %v5593_v56, %v5553_v37  ;;  %v2213_v33 = vsel %vm762_vm7, %v5559_v42, %v6797_v57 }
 0x6d5   : > { %v7579_v41 = vpop.permute.xlu1 %5596  ;;  %v5602_v13 = vpop.permute.xlu0 %5601  ;;  %v5710_v61 = vpack.i.bf16 %v2203_v10, %v2202_v54  ;;  %v2212_v34 = vsel %vm762_vm7, %v5558_v23, %v5559_v42 }
 0x6d6   : > { %v5604_v15 = vunpack.i.h.bf16 %v5602_v13  ;;  %v5603_v2 = vunpack.i.l.bf16 %v5602_v13  ;;  %v5599_v50 = vunpack.i.h.bf16 %v7579_v41  ;;  %v5598_v12 = vunpack.i.l.bf16 %v7579_v41  ;;  %v2116_v13 = vld [vmem:[%s8569_s9] sm:$0xff] }
 0x6d7   : > { %5671 = vrot.lane.b32.xlu1 %v5670_v36, %s8626_s28  ;;  %5666 = vrot.lane.b32.xlu0 %v5665_v8, %s8626_s28  ;;  %v2113_v36 = vld [vmem:[%s8568_s8 + $0x8] sm:$0xff]  ;;  %v5715_v29 = vpack.i.bf16 %v2213_v33, %v2212_v34 }
 0x6d8   : > { %v2330_v51 = vsel %vm829_vm8, %v6815_v19, %v5603_v2  ;;  %v2331_v3 = vsel %vm829_vm8, %v5603_v2, %v5604_v15  ;;  %v2215_v46 = vsel %vm762_vm7, %v5599_v50, %v6797_v57  ;;  %v2214_v32 = vsel %vm762_vm7, %v5598_v12, %v5599_v50  ;;  %4415 = vmatprep.mubr.msk.f32.mxu1 %vm1271_vm10, %v2113_v36 }
 0x6d9   : > { %v5607_v44 = vpop.permute.xlu1 %5606  ;;  %v5720_v8 = vpack.i.bf16 %v2215_v46, %v2214_v32  ;;  %v5725_v41 = vpack.i.bf16 %v5598_v12, %v5558_v23 }
 0x6da   : > { %v5609_v0 = vunpack.i.h.bf16 %v5607_v44  ;;  %v5608_v45 = vunpack.i.l.bf16 %v5607_v44 }
 0x6db   : > { %5676 = vrot.lane.b32.xlu1 %v5675_v28, %s8626_s28  ;;  %5681 = vrot.lane.b32.xlu0 %v5680_v62, %s8626_s28 }
 0x6dc   : > { %v2332_v47 = vsel %vm829_vm8, %v6815_v19, %v5608_v45  ;;  %v2333_v52 = vsel %vm829_vm8, %v5608_v45, %v5609_v0 }
 0x6dd   : > { %v4581_v27 = vpack.c.bf16 %v2333_v52, %v2331_v3  ;;  %v4583_v43 = vpack.c.bf16 %v2332_v47, %v2330_v51 }
 0x6df   : > { %4582 = vmatprep.subr.bf16.mxu1 %v4581_v27  ;;  %5686 = vrot.lane.b32.xlu1 %v5685_v55, %s8626_s28 }
 0x6e0   : > { %5696 = vrot.lane.b32.xlu0 %v5695_v58, %s8626_s28  ;;  %4584 = vmatpush1.bf16.msra.mxu1 %v4583_v43 }
 0x6e3   : > { %5691 = vrot.lane.b32.xlu1 %v5690_v9, %s8626_s28 }
 0x6e4   : > { %5701 = vrot.lane.b32.xlu0 %v5700_v60, %s8626_s28 }
 0x6e7   : > { %5711 = vrot.lane.b32.xlu1 %v5710_v61, %s8626_s28 }
 0x6e8   : > { %5706 = vrot.lane.b32.xlu0 %v5705_v59, %s8626_s28 }
 0x6eb   : > { %5716 = vrot.lane.b32.xlu1 %v5715_v29, %s8626_s28 }
 0x6ec   : > { %5721 = vrot.lane.b32.xlu0 %v5720_v8, %s8626_s28 }
 0x6ef   : > { %5726 = vrot.lane.b32.xlu1 %v5725_v41, %s8626_s28 }
 0x6f0   : > { %2218 = vperm.xlu0 %4889, %v2116_v13  }
 0x6f3   : > { %2223 = vperm.xlu1 %4888, %v2117_v16  }
 0x72d   : > { %v5612_v40 = vpop.permute.xlu0 %5611 }
 0x72e   : > { %v5614_v6 = vunpack.i.h.bf16 %v5612_v40  ;;  %v5613_v20 = vunpack.i.l.bf16 %v5612_v40 }
 0x730   : > { %v2335_v51 = vsel %vm829_vm8, %v5613_v20, %v5614_v6 }
 0x731   : > { %v5617_v7 = vpop.permute.xlu1 %5616 }
 0x732   : > { %v5619_v21 = vunpack.i.h.bf16 %v5617_v7  ;;  %v5618_v49 = vunpack.i.l.bf16 %v5617_v7 }
 0x734   : > { %v2339_v10 = vsel %vm829_vm8, %v5618_v49, %v5619_v21 }
 0x735   : > { %v5622_v63 = vpop.permute.xlu0 %5621 }
 0x736   : > { %v5624_v9 = vunpack.i.h.bf16 %v5622_v63  ;;  %v5623_v60 = vunpack.i.l.bf16 %v5622_v63 }
 0x738   : > { %v2343_v8 = vsel %vm829_vm8, %v5623_v60, %v5624_v9 }
 0x739   : > { %v7640_v37 = vpop.permute.xlu1 %5626  ;;  %v5632_v15 = vpop.permute.xlu0 %5631 }
 0x73a   : > { %v5633_v44 = vunpack.i.l.bf16 %v5632_v15  ;;  %v5634_v26 = vunpack.i.h.bf16 %v5632_v15  ;;  %v5629_v36 = vunpack.i.h.bf16 %v7640_v37  ;;  %v5628_v29 = vunpack.i.l.bf16 %v7640_v37 }
 0x73c   : > { %v2334_v47 = vsel %vm829_vm8, %v5633_v44, %v5613_v20 }
 0x73d   : > { %v5637_v2 = vpop.permute.xlu1 %5636  ;;  %v5642_v62 = vpop.permute.xlu0 %5641 }
 0x73e   : > { %v5638_v3 = vunpack.i.l.bf16 %v5637_v2  ;;  %v5639_v53 = vunpack.i.h.bf16 %v5637_v2  ;;  %v5643_v42 = vunpack.i.l.bf16 %v5642_v62  ;;  %v5644_v34 = vunpack.i.h.bf16 %v5642_v62 }
 0x740   : > { %v2338_v54 = vsel %vm829_vm8, %v5638_v3, %v5618_v49  ;;  %v2342_v41 = vsel %vm829_vm8, %v5643_v42, %v5623_v60 }
 0x741   : > { %v5647_v28 = vpop.permute.xlu1 %5646  ;;  %v7642_v11 = vpop.permute.xlu0 %5656 }
 0x742   : > { %v5649_v0 = vunpack.i.h.bf16 %v5647_v28  ;;  %v5648_v45 = vunpack.i.l.bf16 %v5647_v28  ;;  %v5659_v37 = vunpack.i.h.bf16 %v7642_v11  ;;  %v5658_v44 = vunpack.i.l.bf16 %v7642_v11 }
 0x743   : > { %v2347_v28 = vsel %vm829_vm8, %v5628_v29, %v5629_v36 }
 0x744   : > { %v2336_v52 = vsel %vm829_vm8, %v5634_v26, %v5648_v45  ;;  %v2337_v17 = vsel %vm829_vm8, %v5648_v45, %v5649_v0 }
 0x745   : > { %v5652_v27 = vpop.permute.xlu1 %5651  ;;  %v5662_v55 = vpop.permute.xlu0 %5661  ;;  %v4585_v43 = vpack.c.bf16 %v2337_v17, %v2335_v51  ;;  %v4587_v4 = vpack.c.bf16 %v2336_v52, %v2334_v47 }
 0x746   : > { %v5664_v56 = vunpack.i.h.bf16 %v5662_v55  ;;  %v5663_v58 = vunpack.i.l.bf16 %v5662_v55  ;;  %v5653_v13 = vunpack.i.l.bf16 %v5652_v27  ;;  %v5654_v62 = vunpack.i.h.bf16 %v5652_v27 }
 0x747   : > { %4586 = vmatprep.subr.bf16.mxu1 %v4585_v43  ;;  %v2351_v43 = vsel %vm829_vm8, %v5658_v44, %v5659_v37 }
 0x748   : > { %v2340_v23 = vsel %vm829_vm8, %v5639_v53, %v5663_v58  ;;  %4588 = vmatpush1.bf16.msra.mxu1 %v4587_v4  ;;  %v2341_v50 = vsel %vm829_vm8, %v5663_v58, %v5664_v56  ;;  %v2346_v26 = vsel %vm829_vm8, %v5653_v13, %v5628_v29 }
 0x749   : > { %v5672_v12 = vpop.permute.xlu1 %5671  ;;  %v5667_v61 = vpop.permute.xlu0 %5666  ;;  %v4589_v59 = vpack.c.bf16 %v2341_v50, %v2339_v10  ;;  %v4591_v33 = vpack.c.bf16 %v2340_v23, %v2338_v54 }
 0x74a   : > { %v5674_v46 = vunpack.i.h.bf16 %v5672_v12  ;;  %v5673_v32 = vunpack.i.l.bf16 %v5672_v12  ;;  %v5668_v0 = vunpack.i.l.bf16 %v5667_v61  ;;  %v5669_v3 = vunpack.i.h.bf16 %v5667_v61 }
 0x74b   : > { %4590 = vmatprep.subr.bf16.mxu1 %v4589_v59 }
 0x74c   : > { %v2344_v16 = vsel %vm829_vm8, %v5644_v34, %v5673_v32  ;;  %4592 = vmatpush1.bf16.msra.mxu1 %v4591_v33  ;;  %v2345_v40 = vsel %vm829_vm8, %v5673_v32, %v5674_v46  ;;  %v2350_v11 = vsel %vm829_vm8, %v5668_v0, %v5658_v44 }
 0x74d   : > { %v5677_v7 = vpop.permute.xlu1 %5676  ;;  %v5682_v63 = vpop.permute.xlu0 %5681  ;;  %v4593_v15 = vpack.c.bf16 %v2345_v40, %v2343_v8  ;;  %v4595_v2 = vpack.c.bf16 %v2344_v16, %v2342_v41 }
 0x74e   : > { %v5684_v6 = vunpack.i.h.bf16 %v5682_v63  ;;  %v5683_v20 = vunpack.i.l.bf16 %v5682_v63  ;;  %v5679_v53 = vunpack.i.h.bf16 %v5677_v7  ;;  %v5678_v56 = vunpack.i.l.bf16 %v5677_v7 }
 0x74f   : > { %4594 = vmatprep.subr.bf16.mxu1 %v4593_v15 }
 0x750   : > { %v2348_v45 = vsel %vm829_vm8, %v5654_v62, %v5683_v20  ;;  %4596 = vmatpush1.bf16.msra.mxu1 %v4595_v2  ;;  %v2349_v21 = vsel %vm829_vm8, %v5683_v20, %v5684_v6  ;;  %v2355_v46 = vsel %vm829_vm8, %v5678_v56, %v5679_v53 }
 0x751   : > { %v5687_v49 = vpop.permute.xlu1 %5686  ;;  %v4597_v51 = vpack.c.bf16 %v2349_v21, %v2347_v28  ;;  %v4599_v47 = vpack.c.bf16 %v2348_v45, %v2346_v26 }
 0x752   : > { %v5689_v52 = vunpack.i.h.bf16 %v5687_v49  ;;  %v5688_v17 = vunpack.i.l.bf16 %v5687_v49  ;;  %v5697_v27 = vpop.permute.xlu0 %5696 }
 0x753   : > { %4598 = vmatprep.subr.bf16.mxu1 %v4597_v51  ;;  %v5699_v12 = vunpack.i.h.bf16 %v5697_v27  ;;  %v5698_v61 = vunpack.i.l.bf16 %v5697_v27 }
 0x754   : > { %v2352_v55 = vsel %vm829_vm8, %v5669_v3, %v5688_v17  ;;  %4600 = vmatpush1.bf16.msra.mxu1 %v4599_v47  ;;  %v2353_v4 = vsel %vm829_vm8, %v5688_v17, %v5689_v52 }
 0x755   : > { %v5692_v58 = vpop.permute.xlu1 %5691  ;;  %v4601_v9 = vpack.c.bf16 %v2353_v4, %v2351_v43  ;;  %v4603_v60 = vpack.c.bf16 %v2352_v55, %v2350_v11  ;;  %v2359_v7 = vsel %vm829_vm8, %v5698_v61, %v5699_v12  ;;  %v2112_v11 = vld [vmem:[%s8568_s8] sm:$0xff]  ;;  %v2115_v55 = vld [vmem:[%s8568_s8 + $0x18] sm:$0xff]  ;;  %v2114_v43 = vld [vmem:[%s8568_s8 + $0x10] sm:$0xff] }
 0x756   : > { %v5694_v10 = vunpack.i.h.bf16 %v5692_v58  ;;  %v5693_v54 = vunpack.i.l.bf16 %v5692_v58  ;;  %v5702_v42 = vpop.permute.xlu0 %5701 }
 0x757   : > { %v5704_v23 = vunpack.i.h.bf16 %v5702_v42  ;;  %v5703_v50 = vunpack.i.l.bf16 %v5702_v42  ;;  %4602 = vmatprep.subr.bf16.mxu1 %v4601_v9 }
 0x758   : > { %v2354_v59 = vsel %vm829_vm8, %v5693_v54, %v5678_v56  ;;  %4604 = vmatpush1.bf16.msra.mxu1 %v4603_v60 }
 0x759   : > { %v2356_v33 = vsel %vm829_vm8, %v5694_v10, %v5703_v50  ;;  %v5712_v34 = vpop.permute.xlu1 %5711  ;;  %v2357_v32 = vsel %vm829_vm8, %v5703_v50, %v5704_v23 }
 0x75a   : > { %v5714_v36 = vunpack.i.h.bf16 %v5712_v34  ;;  %v5713_v29 = vunpack.i.l.bf16 %v5712_v34  ;;  %v5707_v8 = vpop.permute.xlu0 %5706  ;;  %v4605_v41 = vpack.c.bf16 %v2357_v32, %v2355_v46  ;;  %v4607_v13 = vpack.c.bf16 %v2356_v33, %v2354_v59 }
 0x75b   : > { %v5709_v16 = vunpack.i.h.bf16 %v5707_v8  ;;  %v5708_v40 = vunpack.i.l.bf16 %v5707_v8  ;;  %v6597_v8 = vmov 0.0|0.0  }
 0x75c   : > { %4606 = vmatprep.subr.bf16.mxu1 %v4605_v41  ;;  %v2361_v63 = vsel %vm829_vm8, %v5713_v29, %v5714_v36 }
 0x75d   : > { %v2360_v15 = vsel %vm829_vm8, %v5709_v16, %v5713_v29  ;;  %v2358_v2 = vsel %vm829_vm8, %v5708_v40, %v5698_v61  ;;  %4608 = vmatpush1.bf16.msra.mxu1 %v4607_v13  ;;  %v5717_v62 = vpop.permute.xlu1 %5716  ;;  %v4609_v6 = vpack.c.bf16 %v2361_v63, %v2359_v7  ;;  %v2501_v63 = vld [vmem:[%s8570_s10] sm:$0x1] }
 0x75e   : > { %v5719_v20 = vunpack.i.h.bf16 %v5717_v62  ;;  %v5718_v37 = vunpack.i.l.bf16 %v5717_v62  ;;  %v5722_v44 = vpop.permute.xlu0 %5721  ;;  %v4611_v28 = vpack.c.bf16 %v2360_v15, %v2358_v2  ;;  %v2577_v15 = vld [vmem:[%s8572_s12] sm:$0xff] }
 0x75f   : > { %v5724_v26 = vunpack.i.h.bf16 %v5722_v44  ;;  %v5723_v0 = vunpack.i.l.bf16 %v5722_v44  ;;  %4610 = vmatprep.subr.bf16.mxu1 %v4609_v6  ;;  %v2502_v2 = vld [vmem:[#allocation2] sm:$0x1]  ;;  %v2580_v44 = vld [vmem:[%s8573_s13 + $0x8] sm:$0xff] }
 0x760   : > { %v2363_v45 = vsel %vm829_vm8, %v5718_v37, %v5719_v20 }
 0x761   : > { %4612 = vmatpush1.bf16.msra.mxu1 %v4611_v28  ;;  %v5727_v21 = vpop.permute.xlu1 %5726  ;;  %v2365_v49 = vsel %vm829_vm8, %v5723_v0, %v5724_v26  ;;  %v2579_v28 = vld [vmem:[%s8573_s13] sm:$0xff] }
 0x762   : > { %v5729_v51 = vunpack.i.h.bf16 %v5727_v21  ;;  %v5728_v47 = vunpack.i.l.bf16 %v5727_v21  ;;  %v4613_v3 = vpack.c.bf16 %v2365_v49, %v2363_v45 }
 0x764   : > { %v2362_v52 = vsel %vm829_vm8, %v5728_v47, %v5718_v37  ;;  %v2364_v17 = vsel %vm829_vm8, %v5729_v51, %v5723_v0  ;;  %4614 = vmatprep.subr.bf16.mxu1 %v4613_v3  ;;  %v2578_v37 = vld [vmem:[%s8572_s12 + $0x8] sm:$0xff] }
 0x765   : > { %v4615_v27 = vpack.c.bf16 %v2364_v17, %v2362_v52 }
 0x767   : > { %4616 = vmatpush1.bf16.msra.mxu1 %v4615_v27 }
 0x768   : > { %4617 = vmatprep.subr.bf16.mxu1 %v6597_v8 }
 0x76a   : > { %2473 = vmatmul.mubr.f32.vlgmr.msra.gmra.mrb[12].mxu1 %v2112_v11 }
 0x76b   : > { %4416 = vmatprep.mubr.msk.f32.mxu1 %vm1271_vm10, %v2115_v55 }
 0x76e   : > { %2479 = vmatmul.mubr.f32.gmra.mrb[14].mxu1 %v2114_v43 }
 0x76f   : > { %v2219_v4 = vpop.permute.xlu0 %2218  ;;  %4449 = vmatprep.mubr.msk.f32.mxu1 %vm6598_vm12, %v6586_v1 }
 0x772   : > { %v2224_v10 = vpop.permute.xlu1 %2223 }
 0x83d   : > { %v2474_v53 = vpop.f32.mrb[12].mxu1 }
 0x83e   : > { %v2475_v56 = vadd.f32 %v2474_v53, %v2219_v4  ;;  %v2476_v58 = vpop.f32.mrb[13].mxu1 }
 0x83f   : > { %v2477_v9 = vadd.f32 %v2476_v58, %v2219_v4 }
 0x840   : > { %v7691_v60 = vmul.f32 %v2475_v56, %v6844_v22 }
 0x841   : > { %v7694_v54 = vmul.f32 %v2477_v9, %v6846_v24  ;;  %v2480_v42 = vpop.f32.mrb[14].mxu1 }
 0x842   : > { %v2489_v23 = vmul.f32 %v7691_v60, %v6844_v22  ;;  %v2481_v50 = vadd.f32 %v2480_v42, %v2224_v10  ;;  %v2482_v12 = vpop.f32.mrb[15].mxu1 }
 0x843   : > { %v2490_v61 = vmul.f32 %v7694_v54, %v6846_v24  ;;  %v2483_v59 = vadd.f32 %v2482_v12, %v2224_v10 }
 0x844   : > { %v2487_v33 = vmul.f32 %v2481_v50, %v6844_v22 }
 0x845   : > { %v2488_v34 = vmul.f32 %v2483_v59, %v6846_v24  ;;  %v2493_v46 = vadd.f32 %v2490_v61, %v2489_v23 }
 0x846   : > { %v2491_v32 = vmul.f32 %v2487_v33, %v6844_v22 }
 0x847   : > { %v2492_v36 = vmul.f32 %v2488_v34, %v6846_v24  ;;  %2494 = vadd.xlane.f32.xlu0 %v2493_v46 }
 0x849   : > { %v2496_v29 = vadd.f32 %v2492_v36, %v2491_v32 }
 0x84b   : > { %2497 = vadd.xlane.f32.xlu1 %v2496_v29 }
 0x8d4   : > { %v2495_v41 = vpop.xlane.xlu0 %2494 }
 0x8d5   : > { %v2499_v16 = vmul.f32 0.0051020407, %v2495_v41 }
 0x8d8   : > { %v2498_v13 = vpop.xlane.xlu1 %2497 }
 0x8d9   : > { %v2500_v40 = vmul.f32 0.0051020407, %v2498_v13 }
 0x8db   : > { %v4618_v7 = vpack.c.bf16 %v2500_v40, %v2499_v16 }
 0x8dd   : > { %4619 = vmatpush3.bf16.msra.mxu1 %v4618_v7 }
 0x8e0   : > { %4450 = vmatmul.mubr.msk.f32.vlgmr.msra.gmra.mrb[16].mxu1 %vm1271_vm10, %v2501_v63 }
 0x8e1   : > { %4454 = vmatprep.mubr.msk.f32.mxu1 %vm2581_vm13, %v2577_v15 }
 0x9b3   : > { %v2572_v1 = vpop.f32.mrb[16].mxu1 }
 0x9b4   : > { %v2573_v62 = vadd.f32 %v2572_v1, %v2502_v2  ;;  %v4451_v6 = vpop.f32.mrb[17].mxu1 }
 0x9b6   : > { %v2576_v20 = vmax.f32 %v2573_v62, 0.0 }
 0x9b8   : > { %4452 = vmatprep.subr.msk.mxu1 %vm2588_vm14, %v2576_v20 }
 0x9b9   : > { %4453 = vmatpush3.msk.msra.mxu1 %vm2588_vm14, %v2576_v20 }
 0x9ba   : > { %4455 = vmatmul.mubr.msk.f32.vlgmr.msra.gmra.mrb[18].mxu1 %vm2581_vm13, %v2578_v37 }
 0xa8d   : > { %v4456_v26 = vpop.f32.mrb[18].mxu1 }
 0xa8e   : > { %v2664_v0 = vadd.f32 %v4456_v26, %v2580_v44  ;;  %v2658_v45 = vpop.f32.mrb[19].mxu1 }
 0xa8f   : > { %v2659_v21 = vadd.f32 %v2658_v45, %v2579_v28 }
 0xa90   : > { %v2668_v49 = vsub.f32 0.0, %v2664_v0 }
 0xa91   : > { %v2667_v51 = vsub.f32 0.0, %v2659_v21 }
 0xa92   : > { %v2671_v47 = vmul.f32 1.442695, %v2668_v49 }
 0xa93   : > { %v2669_v3 = vmul.f32 1.442695, %v2667_v51 }
 0xa94   : > { %6570 = vpow2.f32 %v2671_v47 }
 0xa95   : > { %6572 = vpow2.f32 %v2669_v3 }
 0xa9e   : > { %v6571_v52 = vpop.eup %6570 }
 0xa9f   : > { %v6573_v17 = vpop.eup %6572  ;;  %v2674_v27 = vadd.f32 1.0, %v6571_v52 }
 0xaa0   : > { %v2673_v11 = vadd.f32 1.0, %v6573_v17 }
 0xaa1   : > { %6574 = vrcp.f32 %v2674_v27 }
 0xaa2   : > { %6576 = vrcp.f32 %v2673_v11 }
 0xaab   : > { %v6575_v55 = vpop.eup %6574 }
 0xaac   : > { %v6577_v43 = vpop.eup %6576  ;;  %2686 = vperm.xlu1 %4888, %v6575_v55  }
 0xaad   : > { %2681 = vperm.xlu0 %4889, %v6577_v43  }
 0xb2b   : > { %v2687_v4 = vpop.permute.xlu1 %2686 }
 0xb2c   : > { %v2691_v53 = vmul.f32 %v2687_v4, %v2487_v33  ;;  %v2692_v56 = vmul.f32 %v2687_v4, %v2488_v34  ;;  %v2682_v58 = vpop.permute.xlu0 %2681 }
 0xb2d   : > { %v2689_v9 = vmul.f32 %v2682_v58, %v7691_v60  ;;  %v2690_v10 = vmul.f32 %v2682_v58, %v7694_v54 }
 0xb2e   : > { %v7724_v42 = vadd.f32 %v2691_v53, %v6857_v38  ;;  %v7727_v23 = vadd.f32 %v2692_v56, %v6860_v39 }
 0xb2f   : > { %v7730_v50 = vadd.f32 %v2689_v9, %v6849_v30  ;;  %v7733_v12 = vadd.f32 %v2690_v10, %v6852_v31 }
 0xb30   : > { %v5730_v61 = vpack.i.bf16 %v7727_v23, %v7724_v42 }
 0xb31   : > { %v5765_v60 = vpack.i.bf16 %v7733_v12, %v7730_v50 }
 0xb32   : > { %5731 = vrot.lane.b32.xlu1 %v5730_v61, %s8629_s11 }
 0xb33   : > { %5766 = vrot.lane.b32.xlu0 %v5765_v60, %s8629_s11 }
 0xb36   : > { %5736 = vrot.lane.b32.xlu1 %v5730_v61, %s8630_s0 }
 0xb37   : > { %5771 = vrot.lane.b32.xlu0 %v5765_v60, %s8630_s0 }
 0xb3a   : > { %5741 = vrot.lane.b32.xlu1 %v5730_v61, %s8631_s4 }
 0xb3b   : > { %5776 = vrot.lane.b32.xlu0 %v5765_v60, %s8631_s4 }
 0xb3e   : > { %5746 = vrot.lane.b32.xlu1 %v5730_v61, %s8632_s24 }
 0xb3f   : > { %5781 = vrot.lane.b32.xlu0 %v5765_v60, %s8632_s24 }
 0xb42   : > { %5751 = vrot.lane.b32.xlu1 %v5730_v61, %s8633_s25 }
 0xb43   : > { %5786 = vrot.lane.b32.xlu0 %v5765_v60, %s8633_s25 }
 0xb46   : > { %5756 = vrot.lane.b32.xlu1 %v5730_v61, %s8623_s2 }
 0xb47   : > { %5791 = vrot.lane.b32.xlu0 %v5765_v60, %s8623_s2 }
 0xb4a   : > { %5761 = vrot.lane.b32.xlu1 %v5730_v61, %s8624_s27 }
 0xb4b   : > { %5796 = vrot.lane.b32.xlu0 %v5765_v60, %s8624_s27 }
 0xb4e   : > { %5806 = vrot.lane.b32.xlu1 %v5730_v61, %s8625_s3 }
 0xb4f   : > { %5801 = vrot.lane.b32.xlu0 %v5765_v60, %s8625_s3 }
 0xb52   : > { %5811 = vrot.lane.b32.xlu1 %v5730_v61, %s8626_s28 }
 0xb53   : > { %5816 = vrot.lane.b32.xlu0 %v5765_v60, %s8626_s28 }
 0xba4   : > { %v5732_v54 = vpop.permute.xlu1 %5731 }
 0xba5   : > { %v5734_v59 = vunpack.i.h.bf16 %v5732_v54  ;;  %v5733_v33 = vunpack.i.l.bf16 %v5732_v54  ;;  %v5767_v34 = vpop.permute.xlu0 %5766 }
 0xba6   : > { %v5769_v26 = vunpack.i.h.bf16 %v5767_v34  ;;  %v5768_v0 = vunpack.i.l.bf16 %v5767_v34 }
 0xba7   : > { %v2718_v46 = vsel %vm702_vm0, %v5733_v33, %v5734_v59  ;;  %v2717_v10 = vsel %vm702_vm0, %v6756_v5, %v5733_v33 }
 0xba8   : > { %v5820_v32 = vpack.i.bf16 %v5734_v59, %v2718_v46  ;;  %v5737_v36 = vpop.permute.xlu1 %5736  ;;  %v2716_v56 = vsel %vm702_vm0, %v5768_v0, %v5769_v26  ;;  %v2715_v60 = vsel %vm702_vm0, %v6756_v5, %v5768_v0 }
 0xba9   : > { %v5739_v29 = vunpack.i.h.bf16 %v5737_v36  ;;  %v5738_v8 = vunpack.i.l.bf16 %v5737_v36  ;;  %v5772_v41 = vpop.permute.xlu0 %5771  ;;  %v5855_v61 = vpack.i.bf16 %v5769_v26, %v2716_v56 }
 0xbaa   : > { %5821 = vrot.lane.b32.xlu1 %v5820_v32, %s8626_s28  ;;  %v5774_v51 = vunpack.i.h.bf16 %v5772_v41  ;;  %v5773_v47 = vunpack.i.l.bf16 %v5772_v41 }
 0xbab   : > { %v2730_v13 = vsel %vm711_vm1, %v5738_v8, %v5739_v29  ;;  %v2729_v54 = vsel %vm711_vm1, %v6759_v14, %v5738_v8 }
 0xbac   : > { %v5825_v16 = vpack.i.bf16 %v5739_v29, %v2730_v13  ;;  %v5742_v40 = vpop.permute.xlu1 %5741  ;;  %v2728_v58 = vsel %vm711_vm1, %v5773_v47, %v5774_v51  ;;  %v2727_v46 = vsel %vm711_vm1, %v6759_v14, %v5773_v47 }
 0xbad   : > { %v5744_v7 = vunpack.i.h.bf16 %v5742_v40  ;;  %v5743_v63 = vunpack.i.l.bf16 %v5742_v40  ;;  %v5777_v15 = vpop.permute.xlu0 %5776  ;;  %v5865_v59 = vpack.i.bf16 %v5774_v51, %v2728_v58  ;;  %v5870_v13 = vpack.i.bf16 %v2729_v54, %v2727_v46 }
 0xbae   : > { %5826 = vrot.lane.b32.xlu0 %v5825_v16, %s8626_s28  ;;  %v5779_v32 = vunpack.i.h.bf16 %v5777_v15  ;;  %v5778_v36 = vunpack.i.l.bf16 %v5777_v15  ;;  %v5860_v16 = vpack.i.bf16 %v2717_v10, %v2715_v60 }
 0xbaf   : > { %v2742_v2 = vsel %vm720_vm2, %v5743_v63, %v5744_v7  ;;  %v2741_v15 = vsel %vm720_vm2, %v6763_v18, %v5743_v63 }
 0xbb0   : > { %v5830_v1 = vpack.i.bf16 %v5744_v7, %v2742_v2  ;;  %v5747_v62 = vpop.permute.xlu1 %5746  ;;  %v2740_v8 = vsel %vm720_vm2, %v5778_v36, %v5779_v32  ;;  %v2739_v2 = vsel %vm720_vm2, %v6763_v18, %v5778_v36 }
 0xbb1   : > { %v5749_v6 = vunpack.i.h.bf16 %v5747_v62  ;;  %v5748_v20 = vunpack.i.l.bf16 %v5747_v62  ;;  %v5782_v37 = vpop.permute.xlu0 %5781 }
 0xbb2   : > { %v5783_v44 = vunpack.i.l.bf16 %v5782_v37  ;;  %5831 = vrot.lane.b32.xlu1 %v5830_v1, %s8626_s28  ;;  %v5784_v29 = vunpack.i.h.bf16 %v5782_v37 }
 0xbb3   : > { %v2752_v28 = vsel %vm727_vm5, %v5748_v20, %v5749_v6 }
 0xbb4   : > { %v5835_v45 = vpack.i.bf16 %v5749_v6, %v2752_v28  ;;  %v5840_v21 = vpack.i.bf16 %v5748_v20, %v5783_v44  ;;  %v5752_v49 = vpop.permute.xlu1 %5751  ;;  %v2751_v40 = vsel %vm727_vm5, %v5783_v44, %v5784_v29  ;;  %v5875_v20 = vpack.i.bf16 %v5779_v32, %v2740_v8 }
 0xbb5   : > { %v5754_v3 = vunpack.i.h.bf16 %v5752_v49  ;;  %v5753_v52 = vunpack.i.l.bf16 %v5752_v49  ;;  %v7764_v17 = vpop.permute.xlu0 %5786  ;;  %v5890_v37 = vpack.i.bf16 %v5784_v29, %v2751_v40 }
 0xbb6   : > { %v5788_v27 = vunpack.i.l.bf16 %v7764_v17  ;;  %5836 = vrot.lane.b32.xlu0 %v5835_v45, %s8626_s28  ;;  %5841 = vrot.lane.b32.xlu1 %v5840_v21, %s8626_s28  ;;  %v5880_v21 = vpack.i.bf16 %v2741_v15, %v2739_v2  ;;  %v5789_v63 = vunpack.i.h.bf16 %v7764_v17 }
 0xbb7   : > { %v2764_v11 = vsel %vm735_vm3, %v5754_v3, %v6770_v25  ;;  %v2763_v55 = vsel %vm735_vm3, %v5753_v52, %v5754_v3 }
 0xbb8   : > { %v5850_v43 = vpack.i.bf16 %v5753_v52, %v5788_v27  ;;  %v5757_v4 = vpop.permute.xlu1 %5756  ;;  %v5845_v53 = vpack.i.bf16 %v2764_v11, %v2763_v55  ;;  %v2762_v60 = vsel %vm735_vm3, %v5789_v63, %v6770_v25  ;;  %v2761_v54 = vsel %vm735_vm3, %v5788_v27, %v5789_v63 }
 0xbb9   : > { %v5792_v9 = vpop.permute.xlu0 %5791  ;;  %v5759_v1 = vunpack.i.h.bf16 %v5757_v4  ;;  %v5758_v62 = vunpack.i.l.bf16 %v5757_v4  ;;  %v5900_v27 = vpack.i.bf16 %v2762_v60, %v2761_v54 }
 0xbba   : > { %5851 = vrot.lane.b32.xlu0 %v5850_v43, %s8626_s28  ;;  %5846 = vrot.lane.b32.xlu1 %v5845_v53, %s8626_s28  ;;  %v5794_v6 = vunpack.i.h.bf16 %v5792_v9  ;;  %v5793_v28 = vunpack.i.l.bf16 %v5792_v9 }
 0xbbb   : > { %v2776_v49 = vsel %vm744_vm4, %v5759_v1, %v6776_v35  ;;  %v2775_v3 = vsel %vm744_vm4, %v5758_v62, %v5759_v1 }
 0xbbc   : > { %v7784_v34 = vpop.permute.xlu1 %5761  ;;  %v2774_v52 = vsel %vm744_vm4, %v5794_v6, %v6776_v35  ;;  %v2773_v43 = vsel %vm744_vm4, %v5793_v28, %v5794_v6  ;;  %v5895_v4 = vpack.i.bf16 %v5758_v62, %v5793_v28  ;;  %v5885_v46 = vpack.i.bf16 %v2776_v49, %v2775_v3  ;;  %v2698_v6 = vld [vmem:[%s8574_s14 + $0x8] sm:$0xff] }
 0xbbd   : > { %v7788_v41 = vpop.permute.xlu0 %5796  ;;  %v5764_v58 = vunpack.i.h.bf16 %v7784_v34  ;;  %v5763_v9 = vunpack.i.l.bf16 %v7784_v34  ;;  %4421 = vmatprep.mubr.msk.f32.mxu1 %vm1271_vm10, %v2698_v6 }
 0xbbe   : > { %5866 = vrot.lane.b32.xlu1 %v5865_v59, %s8626_s28  ;;  %5856 = vrot.lane.b32.xlu0 %v5855_v61, %s8626_s28  ;;  %v5905_v59 = vpack.i.bf16 %v2774_v52, %v2773_v43  ;;  %v5798_v17 = vunpack.i.l.bf16 %v7788_v41 }
 0xbbf   : > { %v2788_v34 = vsel %vm753_vm6, %v5764_v58, %v6789_v48  ;;  %v2787_v32 = vsel %vm753_vm6, %v5763_v9, %v5764_v58 }
 0xbc0   : > { %v7792_v33 = vpop.permute.xlu1 %5806 }
 0xbc1   : > { %v7796_v7 = vpop.permute.xlu0 %5801  ;;  %v5808_v15 = vunpack.i.l.bf16 %v7792_v33 }
 0xbc2   : > { %5871 = vrot.lane.b32.xlu1 %v5870_v13, %s8626_s28  ;;  %5861 = vrot.lane.b32.xlu0 %v5860_v16, %s8626_s28  ;;  %v5804_v36 = vunpack.i.h.bf16 %v7796_v7  ;;  %v5803_v29 = vunpack.i.l.bf16 %v7796_v7  ;;  %v5910_v13 = vpack.i.bf16 %v2788_v34, %v2787_v32  ;;  %v5799_v16 = vunpack.i.h.bf16 %v7788_v41 }
 0xbc3   : > { %v5915_v7 = vpack.i.bf16 %v5763_v9, %v5798_v17  ;;  %v5809_v41 = vunpack.i.h.bf16 %v7792_v33  ;;  %v2702_v33 = vld [vmem:[%s8575_s15 + $0x8] sm:$0xff] }
 0xbc4   : > { %v5812_v26 = vpop.permute.xlu1 %5811  ;;  %v2798_v8 = vsel %vm762_vm7, %v5804_v36, %v6797_v57  ;;  %v2797_v40 = vsel %vm762_vm7, %v5803_v29, %v5804_v36  ;;  %v2786_v1 = vsel %vm753_vm6, %v5799_v16, %v6789_v48  ;;  %v2785_v62 = vsel %vm753_vm6, %v5798_v17, %v5799_v16 }
 0xbc5   : > { %v5814_v44 = vunpack.i.h.bf16 %v5812_v26  ;;  %v5813_v0 = vunpack.i.l.bf16 %v5812_v26  ;;  %v5817_v45 = vpop.permute.xlu0 %5816  ;;  %v5930_v2 = vpack.i.bf16 %v2798_v8, %v2797_v40  ;;  %v2800_v28 = vsel %vm762_vm7, %v5809_v41, %v6797_v57 }
 0xbc6   : > { %v5819_v51 = vunpack.i.h.bf16 %v5817_v45  ;;  %v5818_v47 = vunpack.i.l.bf16 %v5817_v45  ;;  %5891 = vrot.lane.b32.xlu1 %v5890_v37, %s8626_s28  ;;  %5876 = vrot.lane.b32.xlu0 %v5875_v20, %s8626_s28  ;;  %v5935_v20 = vpack.i.bf16 %v5808_v15, %v5803_v29  ;;  %v5920_v37 = vpack.i.bf16 %v2786_v1, %v2785_v62 }
 0xbc7   : > { %v2917_v11 = vsel %vm829_vm8, %v6815_v19, %v5813_v0  ;;  %v2918_v55 = vsel %vm829_vm8, %v5813_v0, %v5814_v44  ;;  %v2799_v26 = vsel %vm762_vm7, %v5808_v15, %v5809_v41  ;;  %v2701_v0 = vld [vmem:[%s8575_s15] sm:$0xff] }
 0xbc8   : > { %v2915_v53 = vsel %vm829_vm8, %v6815_v19, %v5818_v47  ;;  %v2916_v56 = vsel %vm829_vm8, %v5818_v47, %v5819_v51  ;;  %v5925_v44 = vpack.i.bf16 %v2800_v28, %v2799_v26 }
 0xbc9   : > { %v4620_v10 = vpack.c.bf16 %v2918_v55, %v2916_v56  ;;  %v4622_v61 = vpack.c.bf16 %v2917_v11, %v2915_v53 }
 0xbca   : > { %5896 = vrot.lane.b32.xlu1 %v5895_v4, %s8626_s28  ;;  %5881 = vrot.lane.b32.xlu0 %v5880_v21, %s8626_s28 }
 0xbcb   : > { %4621 = vmatprep.subr.bf16.mxu1 %v4620_v10 }
 0xbcc   : > { %4623 = vmatpush1.bf16.msra.mxu1 %v4622_v61 }
 0xbce   : > { %5906 = vrot.lane.b32.xlu1 %v5905_v59, %s8626_s28  ;;  %5886 = vrot.lane.b32.xlu0 %v5885_v46, %s8626_s28 }
 0xbd2   : > { %5911 = vrot.lane.b32.xlu1 %v5910_v13, %s8626_s28  ;;  %5901 = vrot.lane.b32.xlu0 %v5900_v27, %s8626_s28 }
 0xbd6   : > { %5931 = vrot.lane.b32.xlu1 %v5930_v2, %s8626_s28  ;;  %5916 = vrot.lane.b32.xlu0 %v5915_v7, %s8626_s28 }
 0xbda   : > { %5936 = vrot.lane.b32.xlu1 %v5935_v20, %s8626_s28  ;;  %5921 = vrot.lane.b32.xlu0 %v5920_v37, %s8626_s28 }
 0xbde   : > { %2808 = vperm.xlu1 %4888, %v2702_v33   ;;  %5926 = vrot.lane.b32.xlu0 %v5925_v44, %s8626_s28 }
 0xbe2   : > { %2803 = vperm.xlu0 %4889, %v2701_v0  }
 0xc1c   : > { %v5822_v45 = vpop.permute.xlu1 %5821 }
 0xc1d   : > { %v5824_v52 = vunpack.i.h.bf16 %v5822_v45  ;;  %v5823_v11 = vunpack.i.l.bf16 %v5822_v45 }
 0xc1f   : > { %v2922_v60 = vsel %vm829_vm8, %v5823_v11, %v5824_v52 }
 0xc20   : > { %v5827_v21 = vpop.permute.xlu0 %5826 }
 0xc21   : > { %v5829_v9 = vunpack.i.h.bf16 %v5827_v21  ;;  %v5828_v10 = vunpack.i.l.bf16 %v5827_v21 }
 0xc23   : > { %v2926_v13 = vsel %vm829_vm8, %v5828_v10, %v5829_v9 }
 0xc24   : > { %v5832_v63 = vpop.permute.xlu1 %5831 }
 0xc25   : > { %v5834_v27 = vunpack.i.h.bf16 %v5832_v63  ;;  %v5833_v16 = vunpack.i.l.bf16 %v5832_v63 }
 0xc27   : > { %v2930_v33 = vsel %vm829_vm8, %v5833_v16, %v5834_v27 }
 0xc28   : > { %v7865_v49 = vpop.permute.xlu0 %5836  ;;  %v7867_v51 = vpop.permute.xlu1 %5841 }
 0xc29   : > { %v5839_v44 = vunpack.i.h.bf16 %v7865_v49  ;;  %v5838_v0 = vunpack.i.l.bf16 %v7865_v49 }
 0xc2c   : > { %v7869_v47 = vpop.permute.xlu0 %5851  ;;  %v7871_v3 = vpop.permute.xlu1 %5846 }
 0xc30   : > { %v5867_v55 = vpop.permute.xlu1 %5866  ;;  %v5857_v43 = vpop.permute.xlu0 %5856 }
 0xc31   : > { %v5869_v4 = vunpack.i.h.bf16 %v5867_v55  ;;  %v5868_v53 = vunpack.i.l.bf16 %v5867_v55  ;;  %v5859_v56 = vunpack.i.h.bf16 %v5857_v43  ;;  %v5858_v58 = vunpack.i.l.bf16 %v5857_v43 }
 0xc32   : > { %v5844_v43 = vunpack.i.h.bf16 %v7867_v51 }
 0xc33   : > { %v2920_v61 = vsel %vm829_vm8, %v5858_v58, %v5859_v56  ;;  %v2924_v34 = vsel %vm829_vm8, %v5868_v53, %v5869_v4 }
 0xc34   : > { %v5872_v54 = vpop.permute.xlu1 %5871  ;;  %v5862_v59 = vpop.permute.xlu0 %5861  ;;  %v4624_v46 = vpack.c.bf16 %v2922_v60, %v2920_v61  ;;  %v4628_v1 = vpack.c.bf16 %v2926_v13, %v2924_v34  ;;  %v2934_v61 = vsel %vm829_vm8, %v5838_v0, %v5839_v44  ;;  %v5849_v34 = vunpack.i.h.bf16 %v7871_v3 }
 0xc35   : > { %v5874_v32 = vunpack.i.h.bf16 %v5872_v54  ;;  %v5873_v36 = vunpack.i.l.bf16 %v5872_v54  ;;  %v5864_v29 = vunpack.i.h.bf16 %v5862_v59  ;;  %v5863_v17 = vunpack.i.l.bf16 %v5862_v59 }
 0xc36   : > { %4625 = vmatprep.subr.bf16.mxu1 %v4624_v46  ;;  %v2933_v59 = vsel %vm829_vm8, %v5844_v43, %v5838_v0  ;;  %v5854_v46 = vunpack.i.h.bf16 %v7869_v47 }
 0xc37   : > { %v2921_v8 = vsel %vm829_vm8, %v5864_v29, %v5823_v11  ;;  %v2919_v40 = vsel %vm829_vm8, %v5863_v17, %v5858_v58  ;;  %v2925_v62 = vsel %vm829_vm8, %v5874_v32, %v5828_v10  ;;  %v2923_v41 = vsel %vm829_vm8, %v5873_v36, %v5868_v53 }
 0xc38   : > { %v5892_v7 = vpop.permute.xlu1 %5891  ;;  %v5877_v15 = vpop.permute.xlu0 %5876  ;;  %v4626_v2 = vpack.c.bf16 %v2921_v8, %v2919_v40  ;;  %v4630_v63 = vpack.c.bf16 %v2925_v62, %v2923_v41  ;;  %v5843_v53 = vunpack.i.l.bf16 %v7867_v51  ;;  %v5848_v51 = vunpack.i.l.bf16 %v7871_v3 }
 0xc39   : > { %v5879_v6 = vunpack.i.h.bf16 %v5877_v15  ;;  %v5878_v20 = vunpack.i.l.bf16 %v5877_v15  ;;  %v5894_v37 = vunpack.i.h.bf16 %v5892_v7  ;;  %v5893_v28 = vunpack.i.l.bf16 %v5892_v7 }
 0xc3a   : > { %4627 = vmatpush1.bf16.msra.mxu1 %v4626_v2  ;;  %v5853_v8 = vunpack.i.l.bf16 %v7869_v47  ;;  %v2937_v15 = vsel %vm829_vm8, %v5854_v46, %v5848_v51 }
 0xc3b   : > { %4629 = vmatprep.subr.bf16.mxu1 %v4628_v1  ;;  %v2928_v26 = vsel %vm829_vm8, %v5878_v20, %v5879_v6  ;;  %v2932_v4 = vsel %vm829_vm8, %v5893_v28, %v5894_v37  ;;  %v2931_v60 = vsel %vm829_vm8, %v5843_v53, %v5893_v28  ;;  %v2938_v1 = vsel %vm829_vm8, %v5848_v51, %v5849_v34 }
 0xc3c   : > { %v5897_v45 = vpop.permute.xlu1 %5896  ;;  %v5882_v21 = vpop.permute.xlu0 %5881  ;;  %v4632_v52 = vpack.c.bf16 %v2930_v33, %v2928_v26  ;;  %v4636_v54 = vpack.c.bf16 %v2934_v61, %v2932_v4 }
 0xc3d   : > { %v5884_v11 = vunpack.i.h.bf16 %v5882_v21  ;;  %v5883_v55 = vunpack.i.l.bf16 %v5882_v21  ;;  %v5898_v2 = vunpack.i.l.bf16 %v5897_v45 }
 0xc3e   : > { %4631 = vmatpush1.bf16.msra.mxu1 %v4630_v63 }
 0xc3f   : > { %v2929_v56 = vsel %vm829_vm8, %v5884_v11, %v5833_v16  ;;  %v2927_v58 = vsel %vm829_vm8, %v5883_v55, %v5878_v20  ;;  %4633 = vmatprep.subr.bf16.mxu1 %v4632_v52  ;;  %v4638_v16 = vpack.c.bf16 %v2933_v59, %v2931_v60  ;;  %v5899_v20 = vunpack.i.h.bf16 %v5897_v45 }
 0xc40   : > { %v5907_v9 = vpop.permute.xlu1 %5906  ;;  %v5887_v49 = vpop.permute.xlu0 %5886  ;;  %v4634_v10 = vpack.c.bf16 %v2929_v56, %v2927_v58 }
 0xc41   : > { %v5909_v32 = vunpack.i.h.bf16 %v5907_v9  ;;  %v5908_v36 = vunpack.i.l.bf16 %v5907_v9  ;;  %v5889_v29 = vunpack.i.h.bf16 %v5887_v49  ;;  %v5888_v17 = vunpack.i.l.bf16 %v5887_v49 }
 0xc42   : > { %4635 = vmatpush1.bf16.msra.mxu1 %v4634_v10 }
 0xc43   : > { %4637 = vmatprep.subr.bf16.mxu1 %v4636_v54  ;;  %v2940_v41 = vsel %vm829_vm8, %v5908_v36, %v5909_v32  ;;  %v2942_v6 = vsel %vm829_vm8, %v5888_v17, %v5889_v29  ;;  %v2939_v33 = vsel %vm829_vm8, %v5898_v2, %v5908_v36  ;;  %v2941_v44 = vsel %vm829_vm8, %v5899_v20, %v5888_v17 }
 0xc44   : > { %v5912_v13 = vpop.permute.xlu1 %5911  ;;  %v5902_v27 = vpop.permute.xlu0 %5901  ;;  %v4644_v63 = vpack.c.bf16 %v2942_v6, %v2940_v41  ;;  %v4646_v53 = vpack.c.bf16 %v2941_v44, %v2939_v33 }
 0xc45   : > { %v5904_v40 = vunpack.i.h.bf16 %v5902_v27  ;;  %v5903_v7 = vunpack.i.l.bf16 %v5902_v27  ;;  %v5914_v0 = vunpack.i.h.bf16 %v5912_v13  ;;  %v5913_v21 = vunpack.i.l.bf16 %v5912_v13 }
 0xc46   : > { %4639 = vmatpush1.bf16.msra.mxu1 %v4638_v16 }
 0xc47   : > { %v2935_v3 = vsel %vm829_vm8, %v5853_v8, %v5903_v7  ;;  %v2936_v62 = vsel %vm829_vm8, %v5903_v7, %v5904_v40  ;;  %v2946_v9 = vsel %vm829_vm8, %v5913_v21, %v5914_v0  ;;  %v2697_v8 = vld [vmem:[%s8574_s14] sm:$0xff]  ;;  %v2700_v40 = vld [vmem:[%s8574_s14 + $0x18] sm:$0xff]  ;;  %v2699_v7 = vld [vmem:[%s8574_s14 + $0x10] sm:$0xff] }
 0xc48   : > { %v5932_v37 = vpop.permute.xlu1 %5931  ;;  %v5917_v28 = vpop.permute.xlu0 %5916  ;;  %v4640_v47 = vpack.c.bf16 %v2938_v1, %v2936_v62  ;;  %v4642_v26 = vpack.c.bf16 %v2937_v15, %v2935_v3 }
 0xc49   : > { %v5919_v52 = vunpack.i.h.bf16 %v5917_v28  ;;  %v5918_v43 = vunpack.i.l.bf16 %v5917_v28  ;;  %v5934_v56 = vunpack.i.h.bf16 %v5932_v37  ;;  %v5933_v58 = vunpack.i.l.bf16 %v5932_v37 }
 0xc4a   : > { %4641 = vmatprep.subr.bf16.mxu1 %v4640_v47 }
 0xc4b   : > { %4643 = vmatpush1.bf16.msra.mxu1 %v4642_v26  ;;  %v2945_v49 = vsel %vm829_vm8, %v5919_v52, %v5913_v21  ;;  %v2948_v17 = vsel %vm829_vm8, %v5933_v58, %v5934_v56 }
 0xc4c   : > { %v5937_v11 = vpop.permute.xlu1 %5936  ;;  %v5922_v55 = vpop.permute.xlu0 %5921  ;;  %4645 = vmatprep.subr.bf16.mxu1 %v4644_v63 }
 0xc4d   : > { %v5924_v4 = vunpack.i.h.bf16 %v5922_v55  ;;  %v5923_v45 = vunpack.i.l.bf16 %v5922_v55  ;;  %v5938_v10 = vunpack.i.l.bf16 %v5937_v11  ;;  %v5939_v34 = vunpack.i.h.bf16 %v5937_v11 }
 0xc4f   : > { %v2943_v61 = vsel %vm829_vm8, %v5918_v43, %v5923_v45  ;;  %4647 = vmatpush1.bf16.msra.mxu1 %v4646_v53  ;;  %v2944_v60 = vsel %vm829_vm8, %v5923_v45, %v5924_v4  ;;  %v2947_v36 = vsel %vm829_vm8, %v5938_v10, %v5933_v58 }
 0xc50   : > { %v5927_v54 = vpop.permute.xlu0 %5926  ;;  %v4648_v59 = vpack.c.bf16 %v2946_v9, %v2944_v60  ;;  %v4650_v46 = vpack.c.bf16 %v2945_v49, %v2943_v61 }
 0xc51   : > { %v5929_v51 = vunpack.i.h.bf16 %v5927_v54  ;;  %v5928_v32 = vunpack.i.l.bf16 %v5927_v54 }
 0xc52   : > { %4649 = vmatprep.subr.bf16.mxu1 %v4648_v59 }
 0xc53   : > { %v2949_v29 = vsel %vm829_vm8, %v5939_v34, %v5928_v32  ;;  %4651 = vmatpush1.bf16.msra.mxu1 %v4650_v46  ;;  %v2950_v13 = vsel %vm829_vm8, %v5928_v32, %v5929_v51 }
 0xc54   : > { %v4652_v27 = vpack.c.bf16 %v2950_v13, %v2948_v17  ;;  %v4654_v16 = vpack.c.bf16 %v2949_v29, %v2947_v36 }
 0xc56   : > { %4653 = vmatprep.subr.bf16.mxu1 %v4652_v27 }
 0xc57   : > { %4655 = vmatpush1.bf16.msra.mxu1 %v4654_v16 }
 0xc5a   : > { %3058 = vmatmul.mubr.f32.vlgmr.msra.gmra.mrb[20].mxu1 %v2697_v8 }
 0xc5b   : > { %4422 = vmatprep.mubr.msk.f32.mxu1 %vm1271_vm10, %v2700_v40 }
 0xc5d   : > { %v2809_v6 = vpop.permute.xlu1 %2808 }
 0xc5e   : > { %3064 = vmatmul.mubr.f32.gmra.mrb[22].mxu1 %v2699_v7 }
 0xc61   : > { %v2804_v15 = vpop.permute.xlu0 %2803 }
 0xd2d   : > { %v3059_v2 = vpop.f32.mrb[20].mxu1 }
 0xd2e   : > { %v3060_v1 = vadd.f32 %v3059_v2, %v2804_v15  ;;  %v3061_v3 = vpop.f32.mrb[21].mxu1 }
 0xd2f   : > { %v3062_v62 = vadd.f32 %v3061_v3, %v2804_v15 }
 0xd30   : > { %v3070_v41 = vmul.f32 %v3060_v1, %v6844_v22 }
 0xd31   : > { %v3071_v20 = vmul.f32 %v3062_v62, %v6846_v24  ;;  %v3065_v37 = vpop.f32.mrb[22].mxu1 }
 0xd32   : > { %v3066_v28 = vadd.f32 %v3065_v37, %v2809_v6  ;;  %v3067_v47 = vpop.f32.mrb[23].mxu1 }
 0xd33   : > { %v3068_v26 = vadd.f32 %v3067_v47, %v2809_v6  ;;  %v5940_v33 = vpack.i.bf16 %v3071_v20, %v3070_v41 }
 0xd34   : > { %v3072_v44 = vmul.f32 %v3066_v28, %v6844_v22 }
 0xd35   : > { %v3073_v0 = vmul.f32 %v3068_v26, %v6846_v24  ;;  %5941 = vrot.lane.b32.xlu0 %v5940_v33, %s8629_s11 }
 0xd37   : > { %v5980_v21 = vpack.i.bf16 %v3073_v0, %v3072_v44 }
 0xd39   : > { %5981 = vrot.lane.b32.xlu1 %v5980_v21, %s8629_s11  ;;  %5946 = vrot.lane.b32.xlu0 %v5940_v33, %s8630_s0 }
 0xd3d   : > { %5986 = vrot.lane.b32.xlu1 %v5980_v21, %s8630_s0  ;;  %5951 = vrot.lane.b32.xlu0 %v5940_v33, %s8631_s4 }
 0xd41   : > { %5991 = vrot.lane.b32.xlu1 %v5980_v21, %s8631_s4  ;;  %5956 = vrot.lane.b32.xlu0 %v5940_v33, %s8632_s24 }
 0xd45   : > { %5996 = vrot.lane.b32.xlu1 %v5980_v21, %s8632_s24  ;;  %5961 = vrot.lane.b32.xlu0 %v5940_v33, %s8633_s25 }
 0xd49   : > { %6001 = vrot.lane.b32.xlu1 %v5980_v21, %s8633_s25  ;;  %5966 = vrot.lane.b32.xlu0 %v5940_v33, %s8623_s2 }
 0xd4d   : > { %6006 = vrot.lane.b32.xlu1 %v5980_v21, %s8623_s2  ;;  %5971 = vrot.lane.b32.xlu0 %v5940_v33, %s8624_s27 }
 0xd51   : > { %6011 = vrot.lane.b32.xlu1 %v5980_v21, %s8624_s27  ;;  %5976 = vrot.lane.b32.xlu0 %v5940_v33, %s8625_s3 }
 0xd55   : > { %6016 = vrot.lane.b32.xlu1 %v5980_v21, %s8625_s3  ;;  %6021 = vrot.lane.b32.xlu0 %v5940_v33, %s8626_s28 }
 0xd59   : > { %6026 = vrot.lane.b32.xlu1 %v5980_v21, %s8626_s28 }
 0xda7   : > { %v5942_v63 = vpop.permute.xlu0 %5941 }
 0xda8   : > { %v5944_v52 = vunpack.i.h.bf16 %v5942_v63  ;;  %v5943_v11 = vunpack.i.l.bf16 %v5942_v63 }
 0xdaa   : > { %v3093_v55 = vsel %vm702_vm0, %v5943_v11, %v5944_v52  ;;  %v3092_v27 = vsel %vm702_vm0, %v6756_v5, %v5943_v11 }
 0xdab   : > { %v6030_v43 = vpack.i.bf16 %v5944_v52, %v3093_v55  ;;  %v5982_v4 = vpop.permute.xlu1 %5981  ;;  %v5947_v45 = vpop.permute.xlu0 %5946 }
 0xdac   : > { %v5949_v53 = vunpack.i.h.bf16 %v5947_v45  ;;  %v5948_v56 = vunpack.i.l.bf16 %v5947_v45  ;;  %v5983_v9 = vunpack.i.l.bf16 %v5982_v4  ;;  %v5984_v8 = vunpack.i.h.bf16 %v5982_v4 }
 0xdad   : > { %6031 = vrot.lane.b32.xlu0 %v6030_v43, %s8626_s28 }
 0xdae   : > { %v3105_v58 = vsel %vm711_vm1, %v5948_v56, %v5949_v53  ;;  %v3094_v46 = vsel %vm702_vm0, %v6756_v5, %v5983_v9  ;;  %v3104_v6 = vsel %vm711_vm1, %v6759_v14, %v5948_v56  ;;  %v3095_v33 = vsel %vm702_vm0, %v5983_v9, %v5984_v8 }
 0xdaf   : > { %v6035_v49 = vpack.i.bf16 %v5949_v53, %v3105_v58  ;;  %v5987_v10 = vpop.permute.xlu1 %5986  ;;  %v5952_v61 = vpop.permute.xlu0 %5951  ;;  %v6050_v2 = vpack.i.bf16 %v3094_v46, %v3092_v27  ;;  %v6065_v63 = vpack.i.bf16 %v5984_v8, %v3095_v33 }
 0xdb0   : > { %v5954_v60 = vunpack.i.h.bf16 %v5952_v61  ;;  %v5953_v54 = vunpack.i.l.bf16 %v5952_v61  ;;  %v5988_v36 = vunpack.i.l.bf16 %v5987_v10  ;;  %v5989_v44 = vunpack.i.h.bf16 %v5987_v10 }
 0xdb1   : > { %6036 = vrot.lane.b32.xlu1 %v6035_v49, %s8626_s28 }
 0xdb2   : > { %v3117_v59 = vsel %vm720_vm2, %v5953_v54, %v5954_v60  ;;  %v3106_v1 = vsel %vm711_vm1, %v6759_v14, %v5988_v36  ;;  %v3116_v20 = vsel %vm720_vm2, %v6763_v18, %v5953_v54  ;;  %v3107_v4 = vsel %vm711_vm1, %v5988_v36, %v5989_v44 }
 0xdb3   : > { %v6040_v34 = vpack.i.bf16 %v5954_v60, %v3117_v59  ;;  %v5992_v51 = vpop.permute.xlu1 %5991  ;;  %v5957_v32 = vpop.permute.xlu0 %5956  ;;  %v6055_v47 = vpack.i.bf16 %v3106_v1, %v3104_v6  ;;  %v6080_v53 = vpack.i.bf16 %v5989_v44, %v3107_v4 }
 0xdb4   : > { %v5993_v29 = vunpack.i.l.bf16 %v5992_v51  ;;  %v5959_v17 = vunpack.i.h.bf16 %v5957_v32  ;;  %v5958_v13 = vunpack.i.l.bf16 %v5957_v32  ;;  %v5994_v45 = vunpack.i.h.bf16 %v5992_v51 }
 0xdb5   : > { %6041 = vrot.lane.b32.xlu0 %v6040_v34, %s8626_s28 }
 0xdb6   : > { %v3128_v16 = vsel %vm727_vm5, %v5958_v13, %v5959_v17  ;;  %v3118_v3 = vsel %vm720_vm2, %v6763_v18, %v5993_v29  ;;  %v3119_v10 = vsel %vm720_vm2, %v5993_v29, %v5994_v45 }
 0xdb7   : > { %v6045_v40 = vpack.i.bf16 %v5959_v17, %v3128_v16  ;;  %v5997_v7 = vpop.permute.xlu1 %5996  ;;  %v5962_v15 = vpop.permute.xlu0 %5961  ;;  %v6060_v26 = vpack.i.bf16 %v3118_v3, %v3116_v20  ;;  %v6090_v59 = vpack.i.bf16 %v5994_v45, %v3119_v10 }
 0xdb8   : > { %v5964_v62 = vunpack.i.h.bf16 %v5962_v15  ;;  %v5963_v41 = vunpack.i.l.bf16 %v5962_v15  ;;  %v5998_v52 = vunpack.i.l.bf16 %v5997_v7  ;;  %v5999_v61 = vunpack.i.h.bf16 %v5997_v7 }
 0xdb9   : > { %6046 = vrot.lane.b32.xlu1 %v6045_v40, %s8626_s28  ;;  %6051 = vrot.lane.b32.xlu0 %v6050_v2, %s8626_s28 }
 0xdba   : > { %v3139_v0 = vsel %vm735_vm3, %v5964_v62, %v6770_v25  ;;  %v3138_v21 = vsel %vm735_vm3, %v5963_v41, %v5964_v62  ;;  %v6070_v56 = vpack.i.bf16 %v5998_v52, %v5958_v13  ;;  %v3129_v36 = vsel %vm727_vm5, %v5998_v52, %v5999_v61 }
 0xdbb   : > { %v6002_v37 = vpop.permute.xlu1 %6001  ;;  %v7966_v28 = vpop.permute.xlu0 %5966  ;;  %v6075_v43 = vpack.i.bf16 %v3139_v0, %v3138_v21  ;;  %v6100_v40 = vpack.i.bf16 %v5999_v61, %v3129_v36 }
 0xdbc   : > { %v6003_v58 = vunpack.i.l.bf16 %v6002_v37  ;;  %v5969_v60 = vunpack.i.h.bf16 %v7966_v28  ;;  %v5968_v54 = vunpack.i.l.bf16 %v7966_v28  ;;  %v6004_v46 = vunpack.i.h.bf16 %v6002_v37 }
 0xdbd   : > { %6056 = vrot.lane.b32.xlu1 %v6055_v47, %s8626_s28  ;;  %6061 = vrot.lane.b32.xlu0 %v6060_v26, %s8626_s28 }
 0xdbe   : > { %v6085_v34 = vpack.i.bf16 %v6003_v58, %v5963_v41  ;;  %v3151_v29 = vsel %vm744_vm4, %v5969_v60, %v6776_v35  ;;  %v3150_v17 = vsel %vm744_vm4, %v5968_v54, %v5969_v60  ;;  %v3141_v7 = vsel %vm735_vm3, %v6004_v46, %v6770_v25 }
 0xdbf   : > { %v6007_v11 = vpop.permute.xlu1 %6006  ;;  %v7974_v55 = vpop.permute.xlu0 %5971  ;;  %v6095_v1 = vpack.i.bf16 %v3151_v29, %v3150_v17  ;;  %v3140_v3 = vsel %vm735_vm3, %v6003_v58, %v6004_v46  ;;  %v3078_v17 = vld [vmem:[%s8577_s17] sm:$0xff] }
 0xdc0   : > { %v5974_v13 = vunpack.i.h.bf16 %v7974_v55  ;;  %v5973_v27 = vunpack.i.l.bf16 %v7974_v55  ;;  %v6009_v15 = vunpack.i.h.bf16 %v6007_v11  ;;  %v6008_v62 = vunpack.i.l.bf16 %v6007_v11 }
 0xdc1   : > { %6066 = vrot.lane.b32.xlu1 %v6065_v63, %s8626_s28  ;;  %6076 = vrot.lane.b32.xlu0 %v6075_v43, %s8626_s28  ;;  %v6105_v21 = vpack.i.bf16 %v3141_v7, %v3140_v3 }
 0xdc2   : > { %v3163_v20 = vsel %vm753_vm6, %v5974_v13, %v6789_v48  ;;  %v3162_v37 = vsel %vm753_vm6, %v5973_v27, %v5974_v13  ;;  %v3153_v44 = vsel %vm744_vm4, %v6009_v15, %v6776_v35  ;;  %v3152_v52 = vsel %vm744_vm4, %v6008_v62, %v6009_v15  ;;  %v3079_v13 = vld [vmem:[%s8577_s17 + $0x8] sm:$0xff] }
 0xdc3   : > { %v7979_v9 = vpop.permute.xlu1 %6011  ;;  %v7981_v49 = vpop.permute.xlu0 %5976  ;;  %v6115_v43 = vpack.i.bf16 %v3163_v20, %v3162_v37  ;;  %v6110_v4 = vpack.i.bf16 %v6008_v62, %v5968_v54  ;;  %v6120_v45 = vpack.i.bf16 %v3153_v44, %v3152_v52 }
 0xdc4   : > { %v6014_v11 = vunpack.i.h.bf16 %v7979_v9  ;;  %v6013_v55 = vunpack.i.l.bf16 %v7979_v9  ;;  %v5979_v58 = vunpack.i.h.bf16 %v7981_v49  ;;  %v5978_v10 = vunpack.i.l.bf16 %v7981_v49 }
 0xdc5   : > { %6071 = vrot.lane.b32.xlu1 %v6070_v56, %s8626_s28  ;;  %6081 = vrot.lane.b32.xlu0 %v6080_v53, %s8626_s28 }
 0xdc6   : > { %v3165_v53 = vsel %vm753_vm6, %v6014_v11, %v6789_v48  ;;  %v3164_v56 = vsel %vm753_vm6, %v6013_v55, %v6014_v11  ;;  %v6125_v54 = vpack.i.bf16 %v6013_v55, %v5973_v27  ;;  %v3174_v46 = vsel %vm762_vm7, %v5978_v10, %v5979_v58 }
 0xdc7   : > { %v7988_v51 = vpop.permute.xlu1 %6016  ;;  %v6022_v32 = vpop.permute.xlu0 %6021  ;;  %v6130_v60 = vpack.i.bf16 %v3165_v53, %v3164_v56 }
 0xdc8   : > { %v6024_v16 = vunpack.i.h.bf16 %v6022_v32  ;;  %v6023_v8 = vunpack.i.l.bf16 %v6022_v32  ;;  %v6019_v9 = vunpack.i.h.bf16 %v7988_v51  ;;  %v6018_v61 = vunpack.i.l.bf16 %v7988_v51  ;;  %v3075_v51 = vld [vmem:[%s8576_s16 + $0x8] sm:$0xff] }
 0xdc9   : > { %6091 = vrot.lane.b32.xlu1 %v6090_v59, %s8626_s28  ;;  %6086 = vrot.lane.b32.xlu0 %v6085_v34, %s8626_s28  ;;  %v3175_v59 = vsel %vm762_vm7, %v5979_v58, %v6797_v57 }
 0xdca   : > { %v3292_v28 = vsel %vm829_vm8, %v6815_v19, %v6023_v8  ;;  %v3293_v26 = vsel %vm829_vm8, %v6023_v8, %v6024_v16  ;;  %v3177_v34 = vsel %vm762_vm7, %v6019_v9, %v6797_v57  ;;  %v3176_v49 = vsel %vm762_vm7, %v6018_v61, %v6019_v9  ;;  %4423 = vmatprep.mubr.msk.f32.mxu0 %vm1271_vm10, %v3075_v51 }
 0xdcb   : > { %v6027_v2 = vpop.permute.xlu1 %6026  ;;  %v6135_v32 = vpack.i.bf16 %v3175_v59, %v3174_v46  ;;  %v6140_v36 = vpack.i.bf16 %v3177_v34, %v3176_v49  ;;  %v6145_v29 = vpack.i.bf16 %v6018_v61, %v5978_v10 }
 0xdcc   : > { %v6029_v41 = vunpack.i.h.bf16 %v6027_v2  ;;  %v6028_v6 = vunpack.i.l.bf16 %v6027_v2 }
 0xdcd   : > { %6096 = vrot.lane.b32.xlu1 %v6095_v1, %s8626_s28  ;;  %6101 = vrot.lane.b32.xlu0 %v6100_v40, %s8626_s28 }
 0xdce   : > { %v3294_v47 = vsel %vm829_vm8, %v6815_v19, %v6028_v6  ;;  %v3295_v33 = vsel %vm829_vm8, %v6028_v6, %v6029_v41 }
 0xdcf   : > { %v4656_v0 = vpack.c.bf16 %v3295_v33, %v3293_v26  ;;  %v4658_v63 = vpack.c.bf16 %v3294_v47, %v3292_v28 }
 0xdd1   : > { %4657 = vmatprep.subr.bf16.mxu0 %v4656_v0  ;;  %6106 = vrot.lane.b32.xlu1 %v6105_v21, %s8626_s28 }
 0xdd2   : > { %6116 = vrot.lane.b32.xlu0 %v6115_v43, %s8626_s28  ;;  %4659 = vmatpush1.bf16.msra.mxu0 %v4658_v63 }
 0xdd5   : > { %6111 = vrot.lane.b32.xlu1 %v6110_v4, %s8626_s28 }
 0xdd6   : > { %6121 = vrot.lane.b32.xlu0 %v6120_v45, %s8626_s28 }
 0xdd9   : > { %6131 = vrot.lane.b32.xlu1 %v6130_v60, %s8626_s28 }
 0xdda   : > { %6126 = vrot.lane.b32.xlu0 %v6125_v54, %s8626_s28 }
 0xddd   : > { %6136 = vrot.lane.b32.xlu1 %v6135_v32, %s8626_s28 }
 0xdde   : > { %6141 = vrot.lane.b32.xlu0 %v6140_v36, %s8626_s28 }
 0xde1   : > { %6146 = vrot.lane.b32.xlu1 %v6145_v29, %s8626_s28 }
 0xde2   : > { %3180 = vperm.xlu0 %4889, %v3078_v17  }
 0xde5   : > { %3185 = vperm.xlu1 %4888, %v3079_v13  }
 0xe1f   : > { %v6032_v27 = vpop.permute.xlu0 %6031 }
 0xe20   : > { %v6034_v1 = vunpack.i.h.bf16 %v6032_v27  ;;  %v6033_v3 = vunpack.i.l.bf16 %v6032_v27 }
 0xe22   : > { %v3297_v33 = vsel %vm829_vm8, %v6033_v3, %v6034_v1 }
 0xe23   : > { %v6037_v16 = vpop.permute.xlu1 %6036 }
 0xe24   : > { %v6039_v47 = vunpack.i.h.bf16 %v6037_v16  ;;  %v6038_v26 = vunpack.i.l.bf16 %v6037_v16 }
 0xe26   : > { %v3301_v10 = vsel %vm829_vm8, %v6038_v26, %v6039_v47 }
 0xe27   : > { %v6042_v8 = vpop.permute.xlu0 %6041 }
 0xe28   : > { %v6044_v56 = vunpack.i.h.bf16 %v6042_v8  ;;  %v6043_v58 = vunpack.i.l.bf16 %v6042_v8 }
 0xe2a   : > { %v3305_v13 = vsel %vm829_vm8, %v6043_v58, %v6044_v56 }
 0xe2b   : > { %v8049_v40 = vpop.permute.xlu1 %6046  ;;  %v6052_v7 = vpop.permute.xlu0 %6051 }
 0xe2c   : > { %v6053_v62 = vunpack.i.l.bf16 %v6052_v7  ;;  %v6054_v20 = vunpack.i.h.bf16 %v6052_v7  ;;  %v6049_v29 = vunpack.i.h.bf16 %v8049_v40  ;;  %v6048_v17 = vunpack.i.l.bf16 %v8049_v40 }
 0xe2e   : > { %v3296_v44 = vsel %vm829_vm8, %v6053_v62, %v6033_v3 }
 0xe2f   : > { %v6057_v15 = vpop.permute.xlu1 %6056  ;;  %v6062_v2 = vpop.permute.xlu0 %6061 }
 0xe30   : > { %v6058_v0 = vunpack.i.l.bf16 %v6057_v15  ;;  %v6059_v4 = vunpack.i.h.bf16 %v6057_v15  ;;  %v6063_v61 = vunpack.i.l.bf16 %v6062_v2  ;;  %v6064_v51 = vunpack.i.h.bf16 %v6062_v2 }
 0xe32   : > { %v3300_v9 = vsel %vm829_vm8, %v6058_v0, %v6038_v26  ;;  %v3304_v27 = vsel %vm829_vm8, %v6063_v61, %v6043_v58 }
 0xe33   : > { %v6067_v41 = vpop.permute.xlu1 %6066  ;;  %v8051_v6 = vpop.permute.xlu0 %6076 }
 0xe34   : > { %v6069_v37 = vunpack.i.h.bf16 %v6067_v41  ;;  %v6068_v28 = vunpack.i.l.bf16 %v6067_v41  ;;  %v6079_v40 = vunpack.i.h.bf16 %v8051_v6 }
 0xe36   : > { %v3298_v21 = vsel %vm829_vm8, %v6054_v20, %v6068_v28  ;;  %v3299_v63 = vsel %vm829_vm8, %v6068_v28, %v6069_v37  ;;  %v6078_v37 = vunpack.i.l.bf16 %v8051_v6  ;;  %v3309_v28 = vsel %vm829_vm8, %v6048_v17, %v6049_v29 }
 0xe37   : > { %v6072_v52 = vpop.permute.xlu1 %6071  ;;  %v6082_v11 = vpop.permute.xlu0 %6081  ;;  %v4660_v55 = vpack.c.bf16 %v3299_v63, %v3297_v33  ;;  %v4662_v43 = vpack.c.bf16 %v3298_v21, %v3296_v44 }
 0xe38   : > { %v6084_v45 = vunpack.i.h.bf16 %v6082_v11  ;;  %v6083_v53 = vunpack.i.l.bf16 %v6082_v11  ;;  %v6073_v16 = vunpack.i.l.bf16 %v6072_v52  ;;  %v6074_v62 = vunpack.i.h.bf16 %v6072_v52 }
 0xe39   : > { %4661 = vmatprep.subr.bf16.mxu0 %v4660_v55 }
 0xe3a   : > { %v3302_v60 = vsel %vm829_vm8, %v6059_v4, %v6083_v53  ;;  %4663 = vmatpush1.bf16.msra.mxu0 %v4662_v43  ;;  %v3303_v54 = vsel %vm829_vm8, %v6083_v53, %v6084_v45  ;;  %v3308_v47 = vsel %vm829_vm8, %v6073_v16, %v6048_v17  ;;  %v3313_v45 = vsel %vm829_vm8, %v6078_v37, %v6079_v40 }
 0xe3b   : > { %v6092_v59 = vpop.permute.xlu1 %6091  ;;  %v6087_v46 = vpop.permute.xlu0 %6086  ;;  %v4664_v34 = vpack.c.bf16 %v3303_v54, %v3301_v10  ;;  %v4666_v49 = vpack.c.bf16 %v3302_v60, %v3300_v9 }
 0xe3c   : > { %v6094_v32 = vunpack.i.h.bf16 %v6092_v59  ;;  %v6093_v36 = vunpack.i.l.bf16 %v6092_v59  ;;  %v6088_v26 = vunpack.i.l.bf16 %v6087_v46  ;;  %v6089_v52 = vunpack.i.h.bf16 %v6087_v46 }
 0xe3d   : > { %4665 = vmatprep.subr.bf16.mxu0 %v4664_v34 }
 0xe3e   : > { %v3306_v8 = vsel %vm829_vm8, %v6064_v51, %v6093_v36  ;;  %4667 = vmatpush1.bf16.msra.mxu0 %v4666_v49  ;;  %v3307_v7 = vsel %vm829_vm8, %v6093_v36, %v6094_v32  ;;  %v3312_v6 = vsel %vm829_vm8, %v6088_v26, %v6078_v37 }
 0xe3f   : > { %v6097_v15 = vpop.permute.xlu1 %6096  ;;  %v6102_v1 = vpop.permute.xlu0 %6101  ;;  %v4668_v2 = vpack.c.bf16 %v3307_v7, %v3305_v13  ;;  %v4670_v3 = vpack.c.bf16 %v3306_v8, %v3304_v27 }
 0xe40   : > { %v6104_v41 = vunpack.i.h.bf16 %v6102_v1  ;;  %v6103_v20 = vunpack.i.l.bf16 %v6102_v1  ;;  %v6099_v56 = vunpack.i.h.bf16 %v6097_v15  ;;  %v6098_v58 = vunpack.i.l.bf16 %v6097_v15 }
 0xe41   : > { %4669 = vmatprep.subr.bf16.mxu0 %v4668_v2 }
 0xe42   : > { %v3310_v33 = vsel %vm829_vm8, %v6074_v62, %v6103_v20  ;;  %4671 = vmatpush1.bf16.msra.mxu0 %v4670_v3  ;;  %v3311_v44 = vsel %vm829_vm8, %v6103_v20, %v6104_v41  ;;  %v3317_v17 = vsel %vm829_vm8, %v6098_v58, %v6099_v56  ;;  %v3077_v56 = vld [vmem:[%s8576_s16 + $0x18] sm:$0xff] }
 0xe43   : > { %v6107_v0 = vpop.permute.xlu1 %6106  ;;  %v4672_v21 = vpack.c.bf16 %v3311_v44, %v3309_v28  ;;  %v4674_v63 = vpack.c.bf16 %v3310_v33, %v3308_v47 }
 0xe44   : > { %v6109_v11 = vunpack.i.h.bf16 %v6107_v0  ;;  %v6108_v55 = vunpack.i.l.bf16 %v6107_v0  ;;  %v6117_v43 = vpop.permute.xlu0 %6116 }
 0xe45   : > { %4673 = vmatprep.subr.bf16.mxu0 %v4672_v21  ;;  %v6119_v49 = vunpack.i.h.bf16 %v6117_v43  ;;  %v6118_v51 = vunpack.i.l.bf16 %v6117_v43 }
 0xe46   : > { %v3314_v4 = vsel %vm829_vm8, %v6089_v52, %v6108_v55  ;;  %4675 = vmatpush1.bf16.msra.mxu0 %v4674_v63  ;;  %v3315_v53 = vsel %vm829_vm8, %v6108_v55, %v6109_v11 }
 0xe47   : > { %v6112_v10 = vpop.permute.xlu1 %6111  ;;  %v4676_v9 = vpack.c.bf16 %v3315_v53, %v3313_v45  ;;  %v4678_v61 = vpack.c.bf16 %v3314_v4, %v3312_v6  ;;  %v3321_v3 = vsel %vm829_vm8, %v6118_v51, %v6119_v49  ;;  %v3074_v53 = vld [vmem:[%s8576_s16] sm:$0xff] }
 0xe48   : > { %v6114_v60 = vunpack.i.h.bf16 %v6112_v10  ;;  %v6113_v54 = vunpack.i.l.bf16 %v6112_v10  ;;  %v6122_v59 = vpop.permute.xlu0 %6121 }
 0xe49   : > { %v6124_v46 = vunpack.i.h.bf16 %v6122_v59  ;;  %v6123_v34 = vunpack.i.l.bf16 %v6122_v59  ;;  %4677 = vmatprep.subr.bf16.mxu0 %v4676_v9 }
 0xe4a   : > { %v3316_v32 = vsel %vm829_vm8, %v6113_v54, %v6098_v58  ;;  %4679 = vmatpush1.bf16.msra.mxu0 %v4678_v61  ;;  %v3076_v58 = vld [vmem:[%s8576_s16 + $0x10] sm:$0xff] }
 0xe4b   : > { %v3318_v36 = vsel %vm829_vm8, %v6114_v60, %v6123_v34  ;;  %v6132_v29 = vpop.permute.xlu1 %6131  ;;  %v3319_v13 = vsel %vm829_vm8, %v6123_v34, %v6124_v46 }
 0xe4c   : > { %v6134_v27 = vunpack.i.h.bf16 %v6132_v29  ;;  %v6133_v16 = vunpack.i.l.bf16 %v6132_v29  ;;  %v6127_v8 = vpop.permute.xlu0 %6126  ;;  %v4680_v7 = vpack.c.bf16 %v3319_v13, %v3317_v17  ;;  %v4682_v15 = vpack.c.bf16 %v3318_v36, %v3316_v32 }
 0xe4d   : > { %v6129_v1 = vunpack.i.h.bf16 %v6127_v8  ;;  %v6128_v2 = vunpack.i.l.bf16 %v6127_v8 }
 0xe4e   : > { %4681 = vmatprep.subr.bf16.mxu0 %v4680_v7  ;;  %v3323_v62 = vsel %vm829_vm8, %v6133_v16, %v6134_v27 }
 0xe4f   : > { %v3322_v41 = vsel %vm829_vm8, %v6129_v1, %v6133_v16  ;;  %v3320_v20 = vsel %vm829_vm8, %v6128_v2, %v6118_v51  ;;  %4683 = vmatpush1.bf16.msra.mxu0 %v4682_v15  ;;  %v6137_v40 = vpop.permute.xlu1 %6136  ;;  %v4684_v37 = vpack.c.bf16 %v3323_v62, %v3321_v3 }
 0xe50   : > { %v6139_v28 = vunpack.i.h.bf16 %v6137_v40  ;;  %v6138_v47 = vunpack.i.l.bf16 %v6137_v40  ;;  %v6142_v26 = vpop.permute.xlu0 %6141  ;;  %v4686_v33 = vpack.c.bf16 %v3322_v41, %v3320_v20 }
 0xe51   : > { %v6144_v44 = vunpack.i.h.bf16 %v6142_v26  ;;  %v6143_v0 = vunpack.i.l.bf16 %v6142_v26  ;;  %4685 = vmatprep.subr.bf16.mxu0 %v4684_v37 }
 0xe52   : > { %v3325_v21 = vsel %vm829_vm8, %v6138_v47, %v6139_v28 }
 0xe53   : > { %4687 = vmatpush1.bf16.msra.mxu0 %v4686_v33  ;;  %v6147_v63 = vpop.permute.xlu1 %6146  ;;  %v3327_v52 = vsel %vm829_vm8, %v6143_v0, %v6144_v44 }
 0xe54   : > { %v6149_v11 = vunpack.i.h.bf16 %v6147_v63  ;;  %v6148_v55 = vunpack.i.l.bf16 %v6147_v63  ;;  %v4688_v43 = vpack.c.bf16 %v3327_v52, %v3325_v21 }
 0xe56   : > { %v3324_v6 = vsel %vm829_vm8, %v6148_v55, %v6138_v47  ;;  %v3326_v4 = vsel %vm829_vm8, %v6149_v11, %v6143_v0  ;;  %4689 = vmatprep.subr.bf16.mxu0 %v4688_v43 }
 0xe57   : > { %v4690_v45 = vpack.c.bf16 %v3326_v4, %v3324_v6 }
 0xe59   : > { %4691 = vmatpush1.bf16.msra.mxu0 %v4690_v45 }
 0xe5c   : > { %3435 = vmatmul.mubr.f32.vlgmr.msra.gmra.mrb[4].mxu0 %v3074_v53 }
 0xe5d   : > { %4424 = vmatprep.mubr.msk.f32.mxu0 %vm1271_vm10, %v3077_v56 }
 0xe60   : > { %3441 = vmatmul.mubr.f32.gmra.mrb[6].mxu0 %v3076_v58 }
 0xe61   : > { %v3181_v10 = vpop.permute.xlu0 %3180 }
 0xe64   : > { %v3186_v46 = vpop.permute.xlu1 %3185 }
 0xf2f   : > { %v3436_v9 = vpop.f32.mrb[4].mxu0 }
 0xf30   : > { %v3437_v61 = vadd.f32 %v3436_v9, %v3181_v10  ;;  %v3438_v60 = vpop.f32.mrb[5].mxu0 }
 0xf31   : > { %v3439_v54 = vadd.f32 %v3438_v60, %v3181_v10 }
 0xf32   : > { %v3447_v59 = vmul.f32 %v3437_v61, %v6844_v22 }
 0xf33   : > { %v3448_v34 = vmul.f32 %v3439_v54, %v6846_v24  ;;  %v3442_v49 = vpop.f32.mrb[6].mxu0 }
 0xf34   : > { %v3451_v51 = vadd.f32 %v3447_v59, %v7730_v50  ;;  %v3443_v32 = vadd.f32 %v3442_v49, %v3186_v46  ;;  %v3444_v36 = vpop.f32.mrb[7].mxu0 }
 0xf35   : > { %v3452_v29 = vadd.f32 %v3448_v34, %v7733_v12  ;;  %v3445_v17 = vadd.f32 %v3444_v36, %v3186_v46 }
 0xf36   : > { %v3449_v13 = vmul.f32 %v3443_v32, %v6844_v22 }
 0xf37   : > { %v3450_v27 = vmul.f32 %v3445_v17, %v6846_v24  ;;  %v6150_v16 = vpack.i.bf16 %v3452_v29, %v3451_v51 }
 0xf38   : > { %v3453_v8 = vadd.f32 %v3449_v13, %v7724_v42 }
 0xf39   : > { %v3454_v7 = vadd.f32 %v3450_v27, %v7727_v23  ;;  %6151 = vrot.lane.b32.xlu0 %v6150_v16, %s8629_s11 }
 0xf3b   : > { %v6190_v15 = vpack.i.bf16 %v3454_v7, %v3453_v8 }
 0xf3d   : > { %6191 = vrot.lane.b32.xlu1 %v6190_v15, %s8629_s11  ;;  %6156 = vrot.lane.b32.xlu0 %v6150_v16, %s8630_s0 }
 0xf41   : > { %6196 = vrot.lane.b32.xlu1 %v6190_v15, %s8630_s0  ;;  %6161 = vrot.lane.b32.xlu0 %v6150_v16, %s8631_s4 }
 0xf45   : > { %6201 = vrot.lane.b32.xlu1 %v6190_v15, %s8631_s4  ;;  %6166 = vrot.lane.b32.xlu0 %v6150_v16, %s8632_s24 }
 0xf49   : > { %6206 = vrot.lane.b32.xlu1 %v6190_v15, %s8632_s24  ;;  %6171 = vrot.lane.b32.xlu0 %v6150_v16, %s8633_s25 }
 0xf4d   : > { %6211 = vrot.lane.b32.xlu1 %v6190_v15, %s8633_s25  ;;  %6176 = vrot.lane.b32.xlu0 %v6150_v16, %s8623_s2 }
 0xf51   : > { %6216 = vrot.lane.b32.xlu1 %v6190_v15, %s8623_s2  ;;  %6181 = vrot.lane.b32.xlu0 %v6150_v16, %s8624_s27 }
 0xf55   : > { %6221 = vrot.lane.b32.xlu1 %v6190_v15, %s8624_s27  ;;  %6186 = vrot.lane.b32.xlu0 %v6150_v16, %s8625_s3 }
 0xf59   : > { %6226 = vrot.lane.b32.xlu1 %v6190_v15, %s8625_s3  ;;  %6231 = vrot.lane.b32.xlu0 %v6150_v16, %s8626_s28 }
 0xf5d   : > { %6236 = vrot.lane.b32.xlu1 %v6190_v15, %s8626_s28 }
 0xfab   : > { %v6152_v42 = vpop.permute.xlu0 %6151 }
 0xfac   : > { %v6154_v23 = vunpack.i.h.bf16 %v6152_v42  ;;  %v6153_v50 = vunpack.i.l.bf16 %v6152_v42 }
 0xfae   : > { %v3474_v12 = vsel %vm702_vm0, %v6153_v50, %v6154_v23  ;;  %v3473_v4 = vsel %vm702_vm0, %v6756_v5, %v6153_v50 }
 0xfaf   : > { %v6240_v1 = vpack.i.bf16 %v6154_v23, %v3474_v12  ;;  %v6192_v2 = vpop.permute.xlu1 %6191  ;;  %v6157_v3 = vpop.permute.xlu0 %6156 }
 0xfb0   : > { %v6159_v62 = vunpack.i.h.bf16 %v6157_v3  ;;  %v6158_v41 = vunpack.i.l.bf16 %v6157_v3  ;;  %v6193_v40 = vunpack.i.l.bf16 %v6192_v2  ;;  %v6194_v53 = vunpack.i.h.bf16 %v6192_v2 }
 0xfb1   : > { %6241 = vrot.lane.b32.xlu0 %v6240_v1, %s8626_s28 }
 0xfb2   : > { %v3486_v20 = vsel %vm711_vm1, %v6158_v41, %v6159_v62  ;;  %v3475_v0 = vsel %vm702_vm0, %v6756_v5, %v6193_v40  ;;  %v3485_v46 = vsel %vm711_vm1, %v6759_v14, %v6158_v41  ;;  %v3476_v29 = vsel %vm702_vm0, %v6193_v40, %v6194_v53 }
 0xfb3   : > { %v6245_v37 = vpack.i.bf16 %v6159_v62, %v3486_v20  ;;  %v6197_v28 = vpop.permute.xlu1 %6196  ;;  %v6162_v47 = vpop.permute.xlu0 %6161  ;;  %v6260_v56 = vpack.i.bf16 %v3475_v0, %v3473_v4  ;;  %v6275_v16 = vpack.i.bf16 %v6194_v53, %v3476_v29 }
 0xfb4   : > { %v6164_v26 = vunpack.i.h.bf16 %v6162_v47  ;;  %v6163_v33 = vunpack.i.l.bf16 %v6162_v47  ;;  %v6198_v11 = vunpack.i.l.bf16 %v6197_v28  ;;  %v6199_v17 = vunpack.i.h.bf16 %v6197_v28 }
 0xfb5   : > { %6246 = vrot.lane.b32.xlu1 %v6245_v37, %s8626_s28 }
 0xfb6   : > { %v3498_v44 = vsel %vm720_vm2, %v6163_v33, %v6164_v26  ;;  %v3487_v61 = vsel %vm711_vm1, %v6759_v14, %v6198_v11  ;;  %v3497_v34 = vsel %vm720_vm2, %v6763_v18, %v6163_v33  ;;  %v3488_v23 = vsel %vm711_vm1, %v6198_v11, %v6199_v17 }
 0xfb7   : > { %v6250_v21 = vpack.i.bf16 %v6164_v26, %v3498_v44  ;;  %v6202_v63 = vpop.permute.xlu1 %6201  ;;  %v6167_v52 = vpop.permute.xlu0 %6166  ;;  %v6265_v49 = vpack.i.bf16 %v3487_v61, %v3485_v46  ;;  %v6290_v12 = vpack.i.bf16 %v6199_v17, %v3488_v23 }
 0xfb8   : > { %v6203_v55 = vunpack.i.l.bf16 %v6202_v63  ;;  %v6169_v43 = vunpack.i.h.bf16 %v6167_v52  ;;  %v6168_v6 = vunpack.i.l.bf16 %v6167_v52  ;;  %v6204_v50 = vunpack.i.h.bf16 %v6202_v63 }
 0xfb9   : > { %6251 = vrot.lane.b32.xlu0 %v6250_v21, %s8626_s28 }
 0xfba   : > { %v3509_v45 = vsel %vm727_vm5, %v6168_v6, %v6169_v43  ;;  %v3499_v60 = vsel %vm720_vm2, %v6763_v18, %v6203_v55  ;;  %v3500_v41 = vsel %vm720_vm2, %v6203_v55, %v6204_v50 }
 0xfbb   : > { %v6255_v58 = vpack.i.bf16 %v6169_v43, %v3509_v45  ;;  %v6207_v10 = vpop.permute.xlu1 %6206  ;;  %v6172_v9 = vpop.permute.xlu0 %6171  ;;  %v6270_v51 = vpack.i.bf16 %v3499_v60, %v3497_v34  ;;  %v6300_v28 = vpack.i.bf16 %v6204_v50, %v3500_v41 }
 0xfbc   : > { %v6174_v54 = vunpack.i.h.bf16 %v6172_v9  ;;  %v6173_v59 = vunpack.i.l.bf16 %v6172_v9  ;;  %v6208_v8 = vunpack.i.l.bf16 %v6207_v10  ;;  %v6209_v20 = vunpack.i.h.bf16 %v6207_v10 }
 0xfbd   : > { %6256 = vrot.lane.b32.xlu1 %v6255_v58, %s8626_s28  ;;  %6261 = vrot.lane.b32.xlu0 %v6260_v56, %s8626_s28 }
 0xfbe   : > { %v3520_v13 = vsel %vm735_vm3, %v6174_v54, %v6770_v25  ;;  %v3519_v27 = vsel %vm735_vm3, %v6173_v59, %v6174_v54  ;;  %v6280_v1 = vpack.i.bf16 %v6208_v8, %v6168_v6  ;;  %v3510_v0 = vsel %vm727_vm5, %v6208_v8, %v6209_v20 }
 0xfbf   : > { %v6212_v32 = vpop.permute.xlu1 %6211  ;;  %v8146_v36 = vpop.permute.xlu0 %6176  ;;  %v6285_v7 = vpack.i.bf16 %v3520_v13, %v3519_v27  ;;  %v6310_v6 = vpack.i.bf16 %v6209_v20, %v3510_v0 }
 0xfc0   : > { %v6213_v2 = vunpack.i.l.bf16 %v6212_v32  ;;  %v6179_v40 = vunpack.i.h.bf16 %v8146_v36  ;;  %v6178_v37 = vunpack.i.l.bf16 %v8146_v36  ;;  %v6214_v47 = vunpack.i.h.bf16 %v6212_v32 }
 0xfc1   : > { %6266 = vrot.lane.b32.xlu1 %v6265_v49, %s8626_s28  ;;  %6271 = vrot.lane.b32.xlu0 %v6270_v51, %s8626_s28 }
 0xfc2   : > { %v6295_v26 = vpack.i.bf16 %v6213_v2, %v6173_v59  ;;  %v3532_v21 = vsel %vm744_vm4, %v6179_v40, %v6776_v35  ;;  %v3531_v63 = vsel %vm744_vm4, %v6178_v37, %v6179_v40  ;;  %v3522_v4 = vsel %vm735_vm3, %v6214_v47, %v6770_v25 }
 0xfc3   : > { %v6217_v15 = vpop.permute.xlu1 %6216  ;;  %v8154_v42 = vpop.permute.xlu0 %6181  ;;  %v6305_v45 = vpack.i.bf16 %v3532_v21, %v3531_v63  ;;  %v3521_v58 = vsel %vm735_vm3, %v6213_v2, %v6214_v47 }
 0xfc4   : > { %v6184_v52 = vunpack.i.h.bf16 %v8154_v42  ;;  %v6183_v11 = vunpack.i.l.bf16 %v8154_v42  ;;  %v6219_v53 = vunpack.i.h.bf16 %v6217_v15  ;;  %v6218_v10 = vunpack.i.l.bf16 %v6217_v15 }
 0xfc5   : > { %6276 = vrot.lane.b32.xlu1 %v6275_v16, %s8626_s28  ;;  %6286 = vrot.lane.b32.xlu0 %v6285_v7, %s8626_s28  ;;  %v6315_v51 = vpack.i.bf16 %v3522_v4, %v3521_v58 }
 0xfc6   : > { %v3544_v60 = vsel %vm753_vm6, %v6184_v52, %v6789_v48  ;;  %v3543_v54 = vsel %vm753_vm6, %v6183_v11, %v6184_v52  ;;  %v3534_v32 = vsel %vm744_vm4, %v6219_v53, %v6776_v35  ;;  %v3533_v17 = vsel %vm744_vm4, %v6218_v10, %v6219_v53 }
 0xfc7   : > { %v8159_v3 = vpop.permute.xlu1 %6221  ;;  %v8161_v62 = vpop.permute.xlu0 %6186  ;;  %v6325_v13 = vpack.i.bf16 %v3544_v60, %v3543_v54  ;;  %v6330_v8 = vpack.i.bf16 %v3534_v32, %v3533_v17  ;;  %v6320_v7 = vpack.i.bf16 %v6218_v10, %v6178_v37  ;;  %v3456_v37 = vld [vmem:[%s8578_s18 + $0x8] sm:$0xff] }
 0xfc8   : > { %v6224_v27 = vunpack.i.h.bf16 %v8159_v3  ;;  %v6223_v16 = vunpack.i.l.bf16 %v8159_v3  ;;  %v6189_v23 = vunpack.i.h.bf16 %v8161_v62  ;;  %v6188_v50 = vunpack.i.l.bf16 %v8161_v62  ;;  %4425 = vmatprep.mubr.msk.f32.mxu1 %vm1271_vm10, %v3456_v37 }
 0xfc9   : > { %6281 = vrot.lane.b32.xlu1 %v6280_v1, %s8626_s28  ;;  %6291 = vrot.lane.b32.xlu0 %v6290_v12, %s8626_s28 }
 0xfca   : > { %v3546_v15 = vsel %vm753_vm6, %v6224_v27, %v6789_v48  ;;  %v3545_v42 = vsel %vm753_vm6, %v6223_v16, %v6224_v27  ;;  %v6335_v3 = vpack.i.bf16 %v6223_v16, %v6183_v11  ;;  %v3556_v41 = vsel %vm762_vm7, %v6189_v23, %v6797_v57 }
 0xfcb   : > { %v8168_v33 = vpop.permute.xlu1 %6226  ;;  %v6232_v44 = vpop.permute.xlu0 %6231  ;;  %v6340_v2 = vpack.i.bf16 %v3546_v15, %v3545_v42  ;;  %v3555_v20 = vsel %vm762_vm7, %v6188_v50, %v6189_v23 }
 0xfcc   : > { %v6234_v55 = vunpack.i.h.bf16 %v6232_v44  ;;  %v6233_v43 = vunpack.i.l.bf16 %v6232_v44  ;;  %v6229_v12 = vunpack.i.h.bf16 %v8168_v33  ;;  %v6228_v1 = vunpack.i.l.bf16 %v8168_v33  ;;  %v3459_v33 = vld [vmem:[%s8579_s19] sm:$0xff]  ;;  %v3460_v44 = vld [vmem:[%s8579_s19 + $0x8] sm:$0xff] }
 0xfcd   : > { %6301 = vrot.lane.b32.xlu1 %v6300_v28, %s8626_s28  ;;  %6296 = vrot.lane.b32.xlu0 %v6295_v26, %s8626_s28  ;;  %v6345_v28 = vpack.i.bf16 %v3556_v41, %v3555_v20 }
 0xfce   : > { %v3673_v59 = vsel %vm829_vm8, %v6815_v19, %v6233_v43  ;;  %v3674_v34 = vsel %vm829_vm8, %v6233_v43, %v6234_v55  ;;  %v3558_v40 = vsel %vm762_vm7, %v6229_v12, %v6797_v57  ;;  %v3557_v62 = vsel %vm762_vm7, %v6228_v1, %v6229_v12 }
 0xfcf   : > { %v6237_v56 = vpop.permute.xlu1 %6236  ;;  %v6350_v47 = vpack.i.bf16 %v3558_v40, %v3557_v62  ;;  %v6355_v26 = vpack.i.bf16 %v6228_v1, %v6188_v50 }
 0xfd0   : > { %v6239_v9 = vunpack.i.h.bf16 %v6237_v56  ;;  %v6238_v61 = vunpack.i.l.bf16 %v6237_v56 }
 0xfd1   : > { %6306 = vrot.lane.b32.xlu1 %v6305_v45, %s8626_s28  ;;  %6311 = vrot.lane.b32.xlu0 %v6310_v6, %s8626_s28 }
 0xfd2   : > { %v3675_v46 = vsel %vm829_vm8, %v6815_v19, %v6238_v61  ;;  %v3676_v49 = vsel %vm829_vm8, %v6238_v61, %v6239_v9 }
 0xfd3   : > { %v4694_v36 = vpack.c.bf16 %v3675_v46, %v3673_v59  ;;  %v4692_v29 = vpack.c.bf16 %v3676_v49, %v3674_v34 }
 0xfd5   : > { %4693 = vmatprep.subr.bf16.mxu1 %v4692_v29  ;;  %6316 = vrot.lane.b32.xlu1 %v6315_v51, %s8626_s28 }
 0xfd6   : > { %6326 = vrot.lane.b32.xlu0 %v6325_v13, %s8626_s28  ;;  %4695 = vmatpush1.bf16.msra.mxu1 %v4694_v36 }
 0xfd9   : > { %6321 = vrot.lane.b32.xlu1 %v6320_v7, %s8626_s28 }
 0xfda   : > { %6331 = vrot.lane.b32.xlu0 %v6330_v8, %s8626_s28 }
 0xfdd   : > { %6341 = vrot.lane.b32.xlu1 %v6340_v2, %s8626_s28 }
 0xfde   : > { %6336 = vrot.lane.b32.xlu0 %v6335_v3, %s8626_s28 }
 0xfe1   : > { %6346 = vrot.lane.b32.xlu1 %v6345_v28, %s8626_s28 }
 0xfe2   : > { %6351 = vrot.lane.b32.xlu0 %v6350_v47, %s8626_s28 }
 0xfe5   : > { %6356 = vrot.lane.b32.xlu1 %v6355_v26, %s8626_s28 }
 0xfe6   : > { %3561 = vperm.xlu0 %4889, %v3459_v33  }
 0xfe9   : > { %3566 = vperm.xlu1 %4888, %v3460_v44  }
0x1023   : > { %v6242_v0 = vpop.permute.xlu0 %6241 }
0x1024   : > { %v6244_v6 = vunpack.i.h.bf16 %v6242_v0  ;;  %v6243_v4 = vunpack.i.l.bf16 %v6242_v0 }
0x1026   : > { %v3678_v54 = vsel %vm829_vm8, %v6243_v4, %v6244_v6 }
0x1027   : > { %v6247_v21 = vpop.permute.xlu1 %6246 }
0x1028   : > { %v6249_v61 = vunpack.i.h.bf16 %v6247_v21  ;;  %v6248_v60 = vunpack.i.l.bf16 %v6247_v21 }
0x102a   : > { %v3682_v7 = vsel %vm829_vm8, %v6248_v60, %v6249_v61 }
0x102b   : > { %v6252_v63 = vpop.permute.xlu0 %6251 }
0x102c   : > { %v6254_v16 = vunpack.i.h.bf16 %v6252_v63  ;;  %v6253_v8 = vunpack.i.l.bf16 %v6252_v63 }
0x102e   : > { %v3686_v28 = vsel %vm829_vm8, %v6253_v8, %v6254_v16 }
0x102f   : > { %v8229_v52 = vpop.permute.xlu1 %6256  ;;  %v6262_v11 = vpop.permute.xlu0 %6261 }
0x1030   : > { %v6263_v45 = vunpack.i.l.bf16 %v6262_v11  ;;  %v6264_v58 = vunpack.i.h.bf16 %v6262_v11  ;;  %v6259_v62 = vunpack.i.h.bf16 %v8229_v52  ;;  %v6258_v37 = vunpack.i.l.bf16 %v8229_v52 }
0x1032   : > { %v3677_v59 = vsel %vm829_vm8, %v6263_v45, %v6243_v4  ;;  %v3690_v45 = vsel %vm829_vm8, %v6258_v37, %v6259_v62 }
0x1033   : > { %v6267_v55 = vpop.permute.xlu1 %6266  ;;  %v6272_v43 = vpop.permute.xlu0 %6271 }
0x1034   : > { %v6268_v46 = vunpack.i.l.bf16 %v6267_v55  ;;  %v6269_v17 = vunpack.i.h.bf16 %v6267_v55  ;;  %v6273_v42 = vunpack.i.l.bf16 %v6272_v43  ;;  %v6274_v41 = vunpack.i.h.bf16 %v6272_v43 }
0x1036   : > { %v3681_v15 = vsel %vm829_vm8, %v6268_v46, %v6248_v60  ;;  %v3685_v47 = vsel %vm829_vm8, %v6273_v42, %v6253_v8 }
0x1037   : > { %v6277_v53 = vpop.permute.xlu1 %6276  ;;  %v8231_v56 = vpop.permute.xlu0 %6286 }
0x1038   : > { %v6279_v10 = vunpack.i.h.bf16 %v6277_v53  ;;  %v6278_v9 = vunpack.i.l.bf16 %v6277_v53  ;;  %v6289_v52 = vunpack.i.h.bf16 %v8231_v56  ;;  %v6288_v4 = vunpack.i.l.bf16 %v8231_v56 }
0x103a   : > { %v3679_v34 = vsel %vm829_vm8, %v6264_v58, %v6278_v9  ;;  %v3680_v49 = vsel %vm829_vm8, %v6278_v9, %v6279_v10 }
0x103b   : > { %v4698_v51 = vpack.c.bf16 %v3679_v34, %v3677_v59  ;;  %v6282_v32 = vpop.permute.xlu1 %6281  ;;  %v6292_v36 = vpop.permute.xlu0 %6291  ;;  %v4696_v29 = vpack.c.bf16 %v3680_v49, %v3678_v54 }
0x103c   : > { %v6294_v13 = vunpack.i.h.bf16 %v6292_v36  ;;  %v6293_v27 = vunpack.i.l.bf16 %v6292_v36  ;;  %v6283_v26 = vunpack.i.l.bf16 %v6282_v32  ;;  %v6284_v55 = vunpack.i.h.bf16 %v6282_v32 }
0x103d   : > { %4697 = vmatprep.subr.bf16.mxu1 %v4696_v29  ;;  %v3694_v32 = vsel %vm829_vm8, %v6288_v4, %v6289_v52 }
0x103e   : > { %v3683_v23 = vsel %vm829_vm8, %v6269_v17, %v6293_v27  ;;  %4699 = vmatpush1.bf16.msra.mxu1 %v4698_v51  ;;  %v3684_v50 = vsel %vm829_vm8, %v6293_v27, %v6294_v13  ;;  %v3689_v53 = vsel %vm829_vm8, %v6283_v26, %v6258_v37 }
0x103f   : > { %v4702_v12 = vpack.c.bf16 %v3683_v23, %v3681_v15  ;;  %v6302_v1 = vpop.permute.xlu1 %6301  ;;  %v6297_v2 = vpop.permute.xlu0 %6296  ;;  %v4700_v3 = vpack.c.bf16 %v3684_v50, %v3682_v7 }
0x1040   : > { %v6304_v20 = vunpack.i.h.bf16 %v6302_v1  ;;  %v6303_v40 = vunpack.i.l.bf16 %v6302_v1  ;;  %v6298_v58 = vunpack.i.l.bf16 %v6297_v2  ;;  %v6299_v59 = vunpack.i.h.bf16 %v6297_v2 }
0x1041   : > { %4701 = vmatprep.subr.bf16.mxu1 %v4700_v3 }
0x1042   : > { %v3687_v33 = vsel %vm829_vm8, %v6274_v41, %v6303_v40  ;;  %4703 = vmatpush1.bf16.msra.mxu1 %v4702_v12  ;;  %v3688_v44 = vsel %vm829_vm8, %v6303_v40, %v6304_v20  ;;  %v3693_v56 = vsel %vm829_vm8, %v6298_v58, %v6288_v4 }
0x1043   : > { %v4706_v0 = vpack.c.bf16 %v3687_v33, %v3685_v47  ;;  %v6307_v21 = vpop.permute.xlu1 %6306  ;;  %v6312_v63 = vpop.permute.xlu0 %6311  ;;  %v4704_v11 = vpack.c.bf16 %v3688_v44, %v3686_v28 }
0x1044   : > { %v6314_v43 = vunpack.i.h.bf16 %v6312_v63  ;;  %v6313_v6 = vunpack.i.l.bf16 %v6312_v63  ;;  %v6309_v29 = vunpack.i.h.bf16 %v6307_v21  ;;  %v6308_v17 = vunpack.i.l.bf16 %v6307_v21 }
0x1045   : > { %4705 = vmatprep.subr.bf16.mxu1 %v4704_v11 }
0x1046   : > { %v3691_v10 = vsel %vm829_vm8, %v6284_v55, %v6313_v6  ;;  %4707 = vmatpush1.bf16.msra.mxu1 %v4706_v0  ;;  %v3692_v9 = vsel %vm829_vm8, %v6313_v6, %v6314_v43  ;;  %v3698_v41 = vsel %vm829_vm8, %v6308_v17, %v6309_v29 }
0x1047   : > { %v4710_v61 = vpack.c.bf16 %v3691_v10, %v3689_v53  ;;  %v6317_v60 = vpop.permute.xlu1 %6316  ;;  %v4708_v54 = vpack.c.bf16 %v3692_v9, %v3690_v45 }
0x1048   : > { %v6319_v46 = vunpack.i.h.bf16 %v6317_v60  ;;  %v6318_v34 = vunpack.i.l.bf16 %v6317_v60  ;;  %v6327_v49 = vpop.permute.xlu0 %6326 }
0x1049   : > { %4709 = vmatprep.subr.bf16.mxu1 %v4708_v54  ;;  %v6329_v50 = vunpack.i.h.bf16 %v6327_v49  ;;  %v6328_v12 = vunpack.i.l.bf16 %v6327_v49  ;;  %v3455_v49 = vld [vmem:[%s8578_s18] sm:$0xff] }
0x104a   : > { %v3695_v51 = vsel %vm829_vm8, %v6299_v59, %v6318_v34  ;;  %4711 = vmatpush1.bf16.msra.mxu1 %v4710_v61  ;;  %v3696_v36 = vsel %vm829_vm8, %v6318_v34, %v6319_v46 }
0x104b   : > { %v4714_v13 = vpack.c.bf16 %v3695_v51, %v3693_v56  ;;  %v6322_v27 = vpop.permute.xlu1 %6321  ;;  %v4712_v16 = vpack.c.bf16 %v3696_v36, %v3694_v32  ;;  %v3702_v44 = vsel %vm829_vm8, %v6328_v12, %v6329_v50  ;;  %v3458_v56 = vld [vmem:[%s8578_s18 + $0x18] sm:$0xff]  ;;  %v3457_v51 = vld [vmem:[%s8578_s18 + $0x10] sm:$0xff] }
0x104c   : > { %v6324_v8 = vunpack.i.h.bf16 %v6322_v27  ;;  %v6323_v7 = vunpack.i.l.bf16 %v6322_v27  ;;  %v6332_v15 = vpop.permute.xlu0 %6331 }
0x104d   : > { %v6334_v42 = vunpack.i.h.bf16 %v6332_v15  ;;  %v6333_v23 = vunpack.i.l.bf16 %v6332_v15  ;;  %4713 = vmatprep.subr.bf16.mxu1 %v4712_v16 }
0x104e   : > { %v3697_v1 = vsel %vm829_vm8, %v6323_v7, %v6308_v17  ;;  %4715 = vmatpush1.bf16.msra.mxu1 %v4714_v13 }
0x104f   : > { %v3699_v2 = vsel %vm829_vm8, %v6324_v8, %v6333_v23  ;;  %v6342_v3 = vpop.permute.xlu1 %6341  ;;  %v3700_v20 = vsel %vm829_vm8, %v6333_v23, %v6334_v42 }
0x1050   : > { %v4718_v40 = vpack.c.bf16 %v3699_v2, %v3697_v1  ;;  %v6344_v62 = vunpack.i.h.bf16 %v6342_v3  ;;  %v6343_v37 = vunpack.i.l.bf16 %v6342_v3  ;;  %v6337_v28 = vpop.permute.xlu0 %6336  ;;  %v4716_v47 = vpack.c.bf16 %v3700_v20, %v3698_v41 }
0x1051   : > { %v6339_v26 = vunpack.i.h.bf16 %v6337_v28  ;;  %v6338_v33 = vunpack.i.l.bf16 %v6337_v28 }
0x1052   : > { %4717 = vmatprep.subr.bf16.mxu1 %v4716_v47  ;;  %v3704_v0 = vsel %vm829_vm8, %v6343_v37, %v6344_v62 }
0x1053   : > { %v3703_v21 = vsel %vm829_vm8, %v6339_v26, %v6343_v37  ;;  %v3701_v63 = vsel %vm829_vm8, %v6338_v33, %v6328_v12  ;;  %4719 = vmatpush1.bf16.msra.mxu1 %v4718_v40  ;;  %v6347_v11 = vpop.permute.xlu1 %6346  ;;  %v4720_v55 = vpack.c.bf16 %v3704_v0, %v3702_v44 }
0x1054   : > { %v4722_v43 = vpack.c.bf16 %v3703_v21, %v3701_v63  ;;  %v6349_v6 = vunpack.i.h.bf16 %v6347_v11  ;;  %v6348_v52 = vunpack.i.l.bf16 %v6347_v11  ;;  %v6352_v4 = vpop.permute.xlu0 %6351 }
0x1055   : > { %v6354_v45 = vunpack.i.h.bf16 %v6352_v4  ;;  %v6353_v53 = vunpack.i.l.bf16 %v6352_v4  ;;  %4721 = vmatprep.subr.bf16.mxu1 %v4720_v55 }
0x1056   : > { %v3706_v58 = vsel %vm829_vm8, %v6348_v52, %v6349_v6 }
0x1057   : > { %4723 = vmatpush1.bf16.msra.mxu1 %v4722_v43  ;;  %v6357_v10 = vpop.permute.xlu1 %6356  ;;  %v3708_v9 = vsel %vm829_vm8, %v6353_v53, %v6354_v45 }
0x1058   : > { %v6359_v61 = vunpack.i.h.bf16 %v6357_v10  ;;  %v6358_v60 = vunpack.i.l.bf16 %v6357_v10  ;;  %v4724_v54 = vpack.c.bf16 %v3708_v9, %v3706_v58 }
0x105a   : > { %v3705_v59 = vsel %vm829_vm8, %v6358_v60, %v6348_v52  ;;  %v3707_v46 = vsel %vm829_vm8, %v6359_v61, %v6353_v53  ;;  %4725 = vmatprep.subr.bf16.mxu1 %v4724_v54 }
0x105b   : > { %v4726_v34 = vpack.c.bf16 %v3707_v46, %v3705_v59 }
0x105d   : > { %4727 = vmatpush1.bf16.msra.mxu1 %v4726_v34 }
0x1060   : > { %3816 = vmatmul.mubr.f32.vlgmr.msra.gmra.mrb[24].mxu1 %v3455_v49 }
0x1061   : > { %4426 = vmatprep.mubr.msk.f32.mxu1 %vm1271_vm10, %v3458_v56 }
0x1064   : > { %3822 = vmatmul.mubr.f32.gmra.mrb[26].mxu1 %v3457_v51 }
0x1065   : > { %v3562_v32 = vpop.permute.xlu0 %3561 }
0x1068   : > { %v3567_v16 = vpop.permute.xlu1 %3566 }
0x1133   : > { %v3817_v36 = vpop.f32.mrb[24].mxu1 }
0x1134   : > { %v3818_v29 = vadd.f32 %v3817_v36, %v3562_v32  ;;  %v3819_v17 = vpop.f32.mrb[25].mxu1 }
0x1135   : > { %v3820_v13 = vadd.f32 %v3819_v17, %v3562_v32 }
0x1136   : > { %v3828_v27 = vmul.f32 %v3818_v29, %v6844_v22 }
0x1137   : > { %v3829_v8 = vmul.f32 %v3820_v13, %v6846_v24  ;;  %v3823_v7 = vpop.f32.mrb[26].mxu1 }
0x1138   : > { %v3832_v15 = vadd.f32 %v3828_v27, %v6849_v30  ;;  %v3824_v42 = vadd.f32 %v3823_v7, %v3567_v16  ;;  %v3825_v23 = vpop.f32.mrb[27].mxu1 }
0x1139   : > { %v3833_v50 = vadd.f32 %v3829_v8, %v6852_v31  ;;  %v3826_v12 = vadd.f32 %v3825_v23, %v3567_v16 }
0x113a   : > { %v3830_v1 = vmul.f32 %v3824_v42, %v6844_v22 }
0x113b   : > { %v3831_v2 = vmul.f32 %v3826_v12, %v6846_v24  ;;  %v6360_v3 = vpack.i.bf16 %v3833_v50, %v3832_v15 }
0x113c   : > { %v3834_v41 = vadd.f32 %v3830_v1, %v6857_v38 }
0x113d   : > { %v3835_v20 = vadd.f32 %v3831_v2, %v6860_v39  ;;  %6361 = vrot.lane.b32.xlu0 %v6360_v3, %s8629_s11 }
0x113f   : > { %v6400_v40 = vpack.i.bf16 %v3835_v20, %v3834_v41 }
0x1141   : > { %6401 = vrot.lane.b32.xlu1 %v6400_v40, %s8629_s11  ;;  %6366 = vrot.lane.b32.xlu0 %v6360_v3, %s8630_s0  ;;  %s4438_s11 = sshll.u32 %s8637_s30, 7 }
0x1145   : > { %6406 = vrot.lane.b32.xlu1 %v6400_v40, %s8630_s0  ;;  %6371 = vrot.lane.b32.xlu0 %v6360_v3, %s8631_s4 }
0x1149   : > { %6411 = vrot.lane.b32.xlu1 %v6400_v40, %s8631_s4  ;;  %6376 = vrot.lane.b32.xlu0 %v6360_v3, %s8632_s24 }
0x114d   : > { %6416 = vrot.lane.b32.xlu1 %v6400_v40, %s8632_s24  ;;  %6381 = vrot.lane.b32.xlu0 %v6360_v3, %s8633_s25  ;;  %s8523_s24 = scalar_lea.vmem %s8582_s22, %s4438_s11 }
0x1151   : > { %6421 = vrot.lane.b32.xlu1 %v6400_v40, %s8633_s25  ;;  %6386 = vrot.lane.b32.xlu0 %v6360_v3, %s8623_s2 }
0x1155   : > { %6426 = vrot.lane.b32.xlu1 %v6400_v40, %s8623_s2  ;;  %6391 = vrot.lane.b32.xlu0 %v6360_v3, %s8624_s27 }
0x1159   : > { %6431 = vrot.lane.b32.xlu1 %v6400_v40, %s8624_s27  ;;  %6396 = vrot.lane.b32.xlu0 %v6360_v3, %s8625_s3 }
0x115d   : > { %6436 = vrot.lane.b32.xlu1 %v6400_v40, %s8625_s3  ;;  %6441 = vrot.lane.b32.xlu0 %v6360_v3, %s8626_s28 }
0x1161   : > { %6446 = vrot.lane.b32.xlu1 %v6400_v40, %s8626_s28 }
0x11af   : > { %v6362_v30 = vpop.permute.xlu0 %6361 }
0x11b0   : > { %v6364_v31 = vunpack.i.h.bf16 %v6362_v30  ;;  %v6363_v38 = vunpack.i.l.bf16 %v6362_v30 }
0x11b2   : > { %v3873_v39 = vsel %vm702_vm0, %v6363_v38, %v6364_v31  ;;  %v3872_v61 = vsel %vm702_vm0, %v6756_v5, %v6363_v38 }
0x11b3   : > { %v6450_v62 = vpack.i.bf16 %v6364_v31, %v3873_v39  ;;  %v6402_v37 = vpop.permute.xlu1 %6401  ;;  %v6367_v28 = vpop.permute.xlu0 %6366 }
0x11b4   : > { %v6369_v47 = vunpack.i.h.bf16 %v6367_v28  ;;  %v6368_v26 = vunpack.i.l.bf16 %v6367_v28  ;;  %v6403_v44 = vunpack.i.l.bf16 %v6402_v37  ;;  %v6404_v54 = vunpack.i.h.bf16 %v6402_v37 }
0x11b5   : > { %6451 = vrot.lane.b32.xlu0 %v6450_v62, %s8626_s28 }
0x11b6   : > { %v3885_v33 = vsel %vm711_vm1, %v6368_v26, %v6369_v47  ;;  %v3874_v6 = vsel %vm702_vm0, %v6756_v5, %v6403_v44  ;;  %v3884_v5 = vsel %vm711_vm1, %v6759_v14, %v6368_v26  ;;  %v3875_v8 = vsel %vm702_vm0, %v6403_v44, %v6404_v54 }
0x11b7   : > { %v6455_v0 = vpack.i.bf16 %v6369_v47, %v3885_v33  ;;  %v6407_v21 = vpop.permute.xlu1 %6406  ;;  %v6372_v63 = vpop.permute.xlu0 %6371  ;;  %v6470_v59 = vpack.i.bf16 %v3874_v6, %v3872_v61 }
0x11b8   : > { %v6374_v11 = vunpack.i.h.bf16 %v6372_v63  ;;  %v6373_v55 = vunpack.i.l.bf16 %v6372_v63  ;;  %v6408_v53 = vunpack.i.l.bf16 %v6407_v21  ;;  %v6409_v7 = vunpack.i.h.bf16 %v6407_v21 }
0x11b9   : > { %6456 = vrot.lane.b32.xlu1 %v6455_v0, %s8626_s28 }
0x11ba   : > { %v3897_v43 = vsel %vm720_vm2, %v6373_v55, %v6374_v11  ;;  %v3886_v56 = vsel %vm711_vm1, %v6759_v14, %v6408_v53  ;;  %v3896_v29 = vsel %vm720_vm2, %v6763_v18, %v6373_v55  ;;  %v6485_v14 = vpack.i.bf16 %v6404_v54, %v3875_v8 }
0x11bb   : > { %v6460_v52 = vpack.i.bf16 %v6374_v11, %v3897_v43  ;;  %v6412_v4 = vpop.permute.xlu1 %6411  ;;  %v6377_v45 = vpop.permute.xlu0 %6376  ;;  %v6475_v17 = vpack.i.bf16 %v3886_v56, %v3884_v5  ;;  %v3887_v1 = vsel %vm711_vm1, %v6408_v53, %v6409_v7 }
0x11bc   : > { %v6413_v58 = vunpack.i.l.bf16 %v6412_v4  ;;  %v6379_v10 = vunpack.i.h.bf16 %v6377_v45  ;;  %v6378_v9 = vunpack.i.l.bf16 %v6377_v45  ;;  %v6414_v2 = vunpack.i.h.bf16 %v6412_v4 }
0x11bd   : > { %6461 = vrot.lane.b32.xlu0 %v6460_v52, %s8626_s28  ;;  %v6500_v3 = vpack.i.bf16 %v6409_v7, %v3887_v1 }
0x11be   : > { %v3908_v60 = vsel %vm727_vm5, %v6378_v9, %v6379_v10  ;;  %v3898_v51 = vsel %vm720_vm2, %v6763_v18, %v6413_v58  ;;  %v3899_v31 = vsel %vm720_vm2, %v6413_v58, %v6414_v2 }
0x11bf   : > { %v6465_v46 = vpack.i.bf16 %v6379_v10, %v3908_v60  ;;  %v6417_v34 = vpop.permute.xlu1 %6416  ;;  %v6382_v49 = vpop.permute.xlu0 %6381  ;;  %v6480_v13 = vpack.i.bf16 %v3898_v51, %v3896_v29  ;;  %v6510_v37 = vpack.i.bf16 %v6414_v2, %v3899_v31  ;;  %v3857_v31 = vld [vmem:[%s8581_s21 + $0x28] sm:$0xff] }
0x11c0   : > { %v6384_v32 = vunpack.i.h.bf16 %v6382_v49  ;;  %v6383_v36 = vunpack.i.l.bf16 %v6382_v49  ;;  %v6418_v23 = vunpack.i.l.bf16 %v6417_v34  ;;  %v6419_v38 = vunpack.i.h.bf16 %v6417_v34 }
0x11c1   : > { %6466 = vrot.lane.b32.xlu1 %v6465_v46, %s8626_s28  ;;  %6471 = vrot.lane.b32.xlu0 %v6470_v59, %s8626_s28 }
0x11c2   : > { %v3919_v15 = vsel %vm735_vm3, %v6384_v32, %v6770_v25  ;;  %v3918_v42 = vsel %vm735_vm3, %v6383_v36, %v6384_v32  ;;  %v6490_v41 = vpack.i.bf16 %v6418_v23, %v6378_v9  ;;  %v3909_v44 = vsel %vm727_vm5, %v6418_v23, %v6419_v38 }
0x11c3   : > { %v6422_v27 = vpop.permute.xlu1 %6421  ;;  %v8326_v16 = vpop.permute.xlu0 %6386  ;;  %v6495_v18 = vpack.i.bf16 %v3919_v15, %v3918_v42  ;;  %v6520_v6 = vpack.i.bf16 %v6419_v38, %v3909_v44  ;;  %v3858_v38 = vld [vmem:[%s8581_s21 + $0x30] sm:$0xff] }
0x11c4   : > { %v6423_v20 = vunpack.i.l.bf16 %v6422_v27  ;;  %v6389_v39 = vunpack.i.h.bf16 %v8326_v16  ;;  %v6388_v62 = vunpack.i.l.bf16 %v8326_v16  ;;  %v6424_v28 = vunpack.i.h.bf16 %v6422_v27 }
0x11c5   : > { %6476 = vrot.lane.b32.xlu1 %v6475_v17, %s8626_s28  ;;  %6481 = vrot.lane.b32.xlu0 %v6480_v13, %s8626_s28 }
0x11c6   : > { %v6505_v47 = vpack.i.bf16 %v6423_v20, %v6383_v36  ;;  %v3931_v0 = vsel %vm744_vm4, %v6389_v39, %v6776_v35  ;;  %v3930_v21 = vsel %vm744_vm4, %v6388_v62, %v6389_v39  ;;  %v3921_v52 = vsel %vm735_vm3, %v6424_v28, %v6770_v25  ;;  %v3859_v39 = vld [vmem:[%s8581_s21 + $0x38] sm:$0xff] }
0x11c7   : > { %v6427_v50 = vpop.permute.xlu1 %6426  ;;  %v8334_v12 = vpop.permute.xlu0 %6391  ;;  %v6515_v4 = vpack.i.bf16 %v3931_v0, %v3930_v21  ;;  %v3920_v58 = vsel %vm735_vm3, %v6423_v20, %v6424_v28  ;;  %v3854_v20 = vld [vmem:[%s8581_s21 + $0x10] sm:$0xff] }
0x11c8   : > { %v6394_v63 = vunpack.i.h.bf16 %v8334_v12  ;;  %v6393_v11 = vunpack.i.l.bf16 %v8334_v12  ;;  %v6429_v45 = vunpack.i.h.bf16 %v6427_v50  ;;  %v6428_v10 = vunpack.i.l.bf16 %v6427_v50  ;;  %v3837_v12 = vld [vmem:[%s8580_s20 + $0x8] sm:$0xff] }
0x11c9   : > { %6486 = vrot.lane.b32.xlu1 %v6485_v14, %s8626_s28  ;;  %6496 = vrot.lane.b32.xlu0 %v6495_v18, %s8626_s28  ;;  %v6525_v49 = vpack.i.bf16 %v3921_v52, %v3920_v58 }
0x11ca   : > { %v3943_v60 = vsel %vm753_vm6, %v6394_v63, %v6789_v48  ;;  %v3942_v54 = vsel %vm753_vm6, %v6393_v11, %v6394_v63  ;;  %v3933_v56 = vsel %vm744_vm4, %v6429_v45, %v6776_v35  ;;  %v3932_v36 = vsel %vm744_vm4, %v6428_v10, %v6429_v45  ;;  %4427 = vmatprep.mubr.msk.f32.mxu0 %vm1271_vm10, %v3837_v12 }
0x11cb   : > { %v8339_v40 = vpop.permute.xlu1 %6431  ;;  %v8341_v30 = vpop.permute.xlu0 %6396  ;;  %v6535_v5 = vpack.i.bf16 %v3943_v60, %v3942_v54  ;;  %v6530_v13 = vpack.i.bf16 %v6428_v10, %v6388_v62 }
0x11cc   : > { %v6434_v29 = vunpack.i.h.bf16 %v8339_v40  ;;  %v6433_v17 = vunpack.i.l.bf16 %v8339_v40  ;;  %v6399_v16 = vunpack.i.h.bf16 %v8341_v30  ;;  %v6398_v8 = vunpack.i.l.bf16 %v8341_v30  ;;  %v3855_v40 = vld [vmem:[%s8581_s21 + $0x18] sm:$0xff]  ;;  %v3856_v30 = vld [vmem:[%s8581_s21 + $0x20] sm:$0xff] }
0x11cd   : > { %6491 = vrot.lane.b32.xlu1 %v6490_v41, %s8626_s28  ;;  %6501 = vrot.lane.b32.xlu0 %v6500_v3, %s8626_s28  ;;  %v3853_v41 = vld [vmem:[%s8581_s21 + $0x8] sm:$0xff] }
0x11ce   : > { %v3945_v35 = vsel %vm753_vm6, %v6434_v29, %v6789_v48  ;;  %v3944_v27 = vsel %vm753_vm6, %v6433_v17, %v6434_v29  ;;  %v6545_v14 = vpack.i.bf16 %v6433_v17, %v6393_v11  ;;  %v3955_v23 = vsel %vm762_vm7, %v6399_v16, %v6797_v57 }
0x11cf   : > { %v8348_v26 = vpop.permute.xlu1 %6436  ;;  %v6442_v33 = vpop.permute.xlu0 %6441  ;;  %v6550_v42 = vpack.i.bf16 %v3945_v35, %v3944_v27  ;;  %v3954_v48 = vsel %vm762_vm7, %v6398_v8, %v6399_v16 }
0x11d0   : > { %v6444_v55 = vunpack.i.h.bf16 %v6442_v33  ;;  %v6443_v43 = vunpack.i.l.bf16 %v6442_v33  ;;  %v6439_v7 = vunpack.i.h.bf16 %v8348_v26  ;;  %v6438_v15 = vunpack.i.l.bf16 %v8348_v26 }
0x11d1   : > { %6511 = vrot.lane.b32.xlu1 %v6510_v37, %s8626_s28  ;;  %6506 = vrot.lane.b32.xlu0 %v6505_v47, %s8626_s28  ;;  %v6555_v1 = vpack.i.bf16 %v3955_v23, %v3954_v48 }
0x11d2   : > { %v4102_v25 = vsel %vm829_vm8, %v6815_v19, %v6443_v43  ;;  %v4103_v46 = vsel %vm829_vm8, %v6443_v43, %v6444_v55  ;;  %v3957_v18 = vsel %vm762_vm7, %v6439_v7, %v6797_v57  ;;  %v3956_v50 = vsel %vm762_vm7, %v6438_v15, %v6439_v7  ;;  %v3852_v57 = vld [vmem:[%s8581_s21] sm:$0xff] }
0x11d3   : > { %v6447_v53 = vpop.permute.xlu1 %6446  ;;  %v6560_v2 = vpack.i.bf16 %v3957_v18, %v3956_v50  ;;  %v6565_v3 = vpack.i.bf16 %v6438_v15, %v6398_v8 }
0x11d4   : > { %v6449_v9 = vunpack.i.h.bf16 %v6447_v53  ;;  %v6448_v61 = vunpack.i.l.bf16 %v6447_v53 }
0x11d5   : > { %6516 = vrot.lane.b32.xlu1 %v6515_v4, %s8626_s28  ;;  %6521 = vrot.lane.b32.xlu0 %v6520_v6, %s8626_s28 }
0x11d6   : > { %v4104_v59 = vsel %vm829_vm8, %v6815_v19, %v6448_v61  ;;  %v4105_v34 = vsel %vm829_vm8, %v6448_v61, %v6449_v9  ;;  %v6540_v19 = vpack.i.bf16 %v3933_v56, %v3932_v36 }
0x11d7   : > { %v4730_v51 = vpack.c.bf16 %v4104_v59, %v4102_v25  ;;  %v4728_v32 = vpack.c.bf16 %v4105_v34, %v4103_v46 }
0x11d9   : > { %4729 = vmatprep.subr.bf16.mxu0 %v4728_v32  ;;  %6526 = vrot.lane.b32.xlu1 %v6525_v49, %s8626_s28 }
0x11da   : > { %6536 = vrot.lane.b32.xlu0 %v6535_v5, %s8626_s28  ;;  %4731 = vmatpush1.bf16.msra.mxu0 %v4730_v51 }
0x11dd   : > { %6531 = vrot.lane.b32.xlu1 %v6530_v13, %s8626_s28 }
0x11de   : > { %6541 = vrot.lane.b32.xlu0 %v6540_v19, %s8626_s28 }
0x11e1   : > { %6551 = vrot.lane.b32.xlu1 %v6550_v42, %s8626_s28 }
0x11e2   : > { %6546 = vrot.lane.b32.xlu0 %v6545_v14, %s8626_s28 }
0x11e5   : > { %6556 = vrot.lane.b32.xlu1 %v6555_v1, %s8626_s28 }
0x11e6   : > { %6561 = vrot.lane.b32.xlu0 %v6560_v2, %s8626_s28 }
0x11e9   : > { %6566 = vrot.lane.b32.xlu1 %v6565_v3, %s8626_s28 }
0x11ea   : > { %3960 = vperm.xlu0 %4889, %v3852_v57  }
0x11ed   : > { %3965 = vperm.xlu1 %4888, %v3853_v41  }
0x11ee   : > { %3970 = vperm.xlu0 %4889, %v3854_v20  }
0x11f1   : > { %3975 = vperm.xlu1 %4888, %v3855_v40  }
0x11f2   : > { %3980 = vperm.xlu0 %4889, %v3856_v30  }
0x11f5   : > { %3985 = vperm.xlu1 %4888, %v3857_v31  }
0x11f6   : > { %3990 = vperm.xlu0 %4889, %v3858_v38  }
0x11f9   : > { %3995 = vperm.xlu1 %4888, %v3859_v39  }
0x1227   : > { %v6452_v62 = vpop.permute.xlu0 %6451 }
0x1228   : > { %v6454_v0 = vunpack.i.h.bf16 %v6452_v62  ;;  %v6453_v21 = vunpack.i.l.bf16 %v6452_v62 }
0x122a   : > { %v4107_v53 = vsel %vm829_vm8, %v6453_v21, %v6454_v0 }
0x122b   : > { %v6457_v37 = vpop.permute.xlu1 %6456 }
0x122c   : > { %v6459_v4 = vunpack.i.h.bf16 %v6457_v37  ;;  %v6458_v45 = vunpack.i.l.bf16 %v6457_v37 }
0x122e   : > { %v4111_v32 = vsel %vm829_vm8, %v6458_v45, %v6459_v4 }
0x122f   : > { %v6462_v28 = vpop.permute.xlu0 %6461 }
0x1230   : > { %v6464_v56 = vunpack.i.h.bf16 %v6462_v28  ;;  %v6463_v51 = vunpack.i.l.bf16 %v6462_v28 }
0x1232   : > { %v4115_v14 = vsel %vm829_vm8, %v6463_v51, %v6464_v56 }
0x1233   : > { %v8427_v47 = vpop.permute.xlu1 %6466  ;;  %v6472_v26 = vpop.permute.xlu0 %6471 }
0x1234   : > { %v6473_v63 = vunpack.i.l.bf16 %v6472_v26  ;;  %v6474_v43 = vunpack.i.h.bf16 %v6472_v26  ;;  %v6469_v15 = vunpack.i.h.bf16 %v8427_v47  ;;  %v6468_v42 = vunpack.i.l.bf16 %v8427_v47 }
0x1236   : > { %v4106_v58 = vsel %vm829_vm8, %v6473_v63, %v6453_v21  ;;  %v4119_v31 = vsel %vm829_vm8, %v6468_v42, %v6469_v15 }
0x1237   : > { %v6477_v33 = vpop.permute.xlu1 %6476  ;;  %v6482_v44 = vpop.permute.xlu0 %6481 }
0x1238   : > { %v6478_v10 = vunpack.i.l.bf16 %v6477_v33  ;;  %v6479_v46 = vunpack.i.h.bf16 %v6477_v33  ;;  %v6483_v5 = vunpack.i.l.bf16 %v6482_v44  ;;  %v6484_v16 = vunpack.i.h.bf16 %v6482_v44 }
0x123a   : > { %v4110_v36 = vsel %vm829_vm8, %v6478_v10, %v6458_v45  ;;  %v4114_v23 = vsel %vm829_vm8, %v6483_v5, %v6463_v51 }
0x123b   : > { %v6487_v11 = vpop.permute.xlu1 %6486  ;;  %v8429_v55 = vpop.permute.xlu0 %6496 }
0x123c   : > { %v6489_v6 = vunpack.i.h.bf16 %v6487_v11  ;;  %v6488_v52 = vunpack.i.l.bf16 %v6487_v11  ;;  %v6499_v40 = vunpack.i.h.bf16 %v8429_v55  ;;  %v6498_v30 = vunpack.i.l.bf16 %v8429_v55 }
0x123e   : > { %v4108_v9 = vsel %vm829_vm8, %v6474_v43, %v6488_v52  ;;  %v4109_v61 = vsel %vm829_vm8, %v6488_v52, %v6489_v6  ;;  %v4123_v55 = vsel %vm829_vm8, %v6498_v30, %v6499_v40 }
0x123f   : > { %v4734_v60 = vpack.c.bf16 %v4108_v9, %v4106_v58  ;;  %v6492_v54 = vpop.permute.xlu1 %6491  ;;  %v6502_v25 = vpop.permute.xlu0 %6501  ;;  %v4732_v59 = vpack.c.bf16 %v4109_v61, %v4107_v53 }
0x1240   : > { %v6504_v34 = vunpack.i.h.bf16 %v6502_v25  ;;  %v6503_v49 = vunpack.i.l.bf16 %v6502_v25  ;;  %v6493_v48 = vunpack.i.l.bf16 %v6492_v54  ;;  %v6494_v57 = vunpack.i.h.bf16 %v6492_v54 }
0x1241   : > { %4733 = vmatprep.subr.bf16.mxu0 %v4732_v59 }
0x1242   : > { %v4112_v29 = vsel %vm829_vm8, %v6479_v46, %v6503_v49  ;;  %4735 = vmatpush1.bf16.msra.mxu0 %v4734_v60  ;;  %v4113_v17 = vsel %vm829_vm8, %v6503_v49, %v6504_v34  ;;  %v4118_v38 = vsel %vm829_vm8, %v6493_v48, %v6468_v42 }
0x1243   : > { %v4738_v19 = vpack.c.bf16 %v4112_v29, %v4110_v36  ;;  %v6512_v13 = vpop.permute.xlu1 %6511  ;;  %v6507_v35 = vpop.permute.xlu0 %6506  ;;  %v4736_v27 = vpack.c.bf16 %v4113_v17, %v4111_v32 }
0x1244   : > { %v6514_v8 = vunpack.i.h.bf16 %v6512_v13  ;;  %v6513_v7 = vunpack.i.l.bf16 %v6512_v13  ;;  %v6508_v39 = vunpack.i.l.bf16 %v6507_v35  ;;  %v6509_v33 = vunpack.i.h.bf16 %v6507_v35 }
0x1245   : > { %4737 = vmatprep.subr.bf16.mxu0 %v4736_v27 }
0x1246   : > { %v4116_v18 = vsel %vm829_vm8, %v6484_v16, %v6513_v7  ;;  %4739 = vmatpush1.bf16.msra.mxu0 %v4738_v19  ;;  %v4117_v50 = vsel %vm829_vm8, %v6513_v7, %v6514_v8  ;;  %v4122_v63 = vsel %vm829_vm8, %v6508_v39, %v6498_v30  ;;  %v3836_v30 = vld [vmem:[%s8580_s20] sm:$0xff]  ;;  %v3841_v39 = vld [vmem:[%s8580_s20 + $0x28] sm:$0xff] }
0x1247   : > { %v4742_v12 = vpack.c.bf16 %v4116_v18, %v4114_v23  ;;  %v6517_v1 = vpop.permute.xlu1 %6516  ;;  %v6522_v2 = vpop.permute.xlu0 %6521  ;;  %v4740_v3 = vpack.c.bf16 %v4117_v50, %v4115_v14 }
0x1248   : > { %v6524_v41 = vunpack.i.h.bf16 %v6522_v2  ;;  %v6523_v20 = vunpack.i.l.bf16 %v6522_v2  ;;  %v6519_v6 = vunpack.i.h.bf16 %v6517_v1  ;;  %v6518_v52 = vunpack.i.l.bf16 %v6517_v1 }
0x1249   : > { %4741 = vmatprep.subr.bf16.mxu0 %v4740_v3 }
0x124a   : > { %v4120_v62 = vsel %vm829_vm8, %v6494_v57, %v6523_v20  ;;  %4743 = vmatpush1.bf16.msra.mxu0 %v4742_v12  ;;  %v4121_v37 = vsel %vm829_vm8, %v6523_v20, %v6524_v41  ;;  %v4127_v49 = vsel %vm829_vm8, %v6518_v52, %v6519_v6 }
0x124b   : > { %v4746_v28 = vpack.c.bf16 %v4120_v62, %v4118_v38  ;;  %v6527_v47 = vpop.permute.xlu1 %6526  ;;  %v4744_v26 = vpack.c.bf16 %v4121_v37, %v4119_v31  ;;  %v3839_v31 = vld [vmem:[%s8580_s20 + $0x18] sm:$0xff]  ;;  %v3838_v38 = vld [vmem:[%s8580_s20 + $0x10] sm:$0xff]  ;;  %v3840_v62 = vld [vmem:[%s8580_s20 + $0x20] sm:$0xff] }
0x124c   : > { %v6529_v44 = vunpack.i.h.bf16 %v6527_v47  ;;  %v6528_v0 = vunpack.i.l.bf16 %v6527_v47  ;;  %v6537_v21 = vpop.permute.xlu0 %6536  ;;  %v3843_v37 = vld [vmem:[%s8580_s20 + $0x38] sm:$0xff]  ;;  %v3845_v47 = vld [vmem:[%s8580_s20 + $0x48] sm:$0xff] }
0x124d   : > { %4745 = vmatprep.subr.bf16.mxu0 %v4744_v26  ;;  %v6539_v54 = vunpack.i.h.bf16 %v6537_v21  ;;  %v6538_v25 = vunpack.i.l.bf16 %v6537_v21  ;;  %v3844_v26 = vld [vmem:[%s8580_s20 + $0x40] sm:$0xff] }
0x124e   : > { %v4124_v11 = vsel %vm829_vm8, %v6509_v33, %v6528_v0  ;;  %4747 = vmatpush1.bf16.msra.mxu0 %v4746_v28  ;;  %v4125_v43 = vsel %vm829_vm8, %v6528_v0, %v6529_v44  ;;  %v3842_v28 = vld [vmem:[%s8580_s20 + $0x30] sm:$0xff]  ;;  %v3847_v33 = vld [vmem:[%s8580_s20 + $0x58] sm:$0xff]  ;;  %v3849_v0 = vld [vmem:[%s8580_s20 + $0x68] sm:$0xff] }
0x124f   : > { %v4750_v4 = vpack.c.bf16 %v4124_v11, %v4122_v63  ;;  %v6532_v45 = vpop.permute.xlu1 %6531  ;;  %v4748_v53 = vpack.c.bf16 %v4125_v43, %v4123_v55  ;;  %v4131_v13 = vsel %vm829_vm8, %v6538_v25, %v6539_v54  ;;  %v3846_v44 = vld [vmem:[%s8580_s20 + $0x50] sm:$0xff]  ;;  %v3848_v21 = vld [vmem:[%s8580_s20 + $0x60] sm:$0xff]  ;;  %v3851_v63 = vld [vmem:[%s8580_s20 + $0x78] sm:$0xff] }
0x1250   : > { %v6534_v58 = vunpack.i.h.bf16 %v6532_v45  ;;  %v6533_v10 = vunpack.i.l.bf16 %v6532_v45  ;;  %v6542_v9 = vpop.permute.xlu0 %6541  ;;  %v3850_v11 = vld [vmem:[%s8580_s20 + $0x70] sm:$0xff] }
0x1251   : > { %v6544_v61 = vunpack.i.h.bf16 %v6542_v9  ;;  %v6543_v60 = vunpack.i.l.bf16 %v6542_v9  ;;  %4749 = vmatprep.subr.bf16.mxu0 %v4748_v53 }
0x1252   : > { %v4126_v59 = vsel %vm829_vm8, %v6533_v10, %v6518_v52  ;;  %4751 = vmatpush1.bf16.msra.mxu0 %v4750_v4 }
0x1253   : > { %v4128_v46 = vsel %vm829_vm8, %v6534_v58, %v6543_v60  ;;  %v6552_v34 = vpop.permute.xlu1 %6551  ;;  %v4129_v56 = vsel %vm829_vm8, %v6543_v60, %v6544_v61 }
0x1254   : > { %v4754_v51 = vpack.c.bf16 %v4128_v46, %v4126_v59  ;;  %v6554_v32 = vunpack.i.h.bf16 %v6552_v34  ;;  %v6553_v36 = vunpack.i.l.bf16 %v6552_v34  ;;  %v6547_v5 = vpop.permute.xlu0 %6546  ;;  %v4752_v29 = vpack.c.bf16 %v4129_v56, %v4127_v49 }
0x1255   : > { %v6549_v17 = vunpack.i.h.bf16 %v6547_v5  ;;  %v6548_v19 = vunpack.i.l.bf16 %v6547_v5 }
0x1256   : > { %4753 = vmatprep.subr.bf16.mxu0 %v4752_v29  ;;  %v4133_v35 = vsel %vm829_vm8, %v6553_v36, %v6554_v32 }
0x1257   : > { %v4132_v27 = vsel %vm829_vm8, %v6549_v17, %v6553_v36  ;;  %v4130_v16 = vsel %vm829_vm8, %v6548_v19, %v6538_v25  ;;  %4755 = vmatpush1.bf16.msra.mxu0 %v4754_v51  ;;  %v6557_v8 = vpop.permute.xlu1 %6556  ;;  %v4756_v7 = vpack.c.bf16 %v4133_v35, %v4131_v13 }
0x1258   : > { %v4758_v15 = vpack.c.bf16 %v4132_v27, %v4130_v16  ;;  %v6559_v42 = vunpack.i.h.bf16 %v6557_v8  ;;  %v6558_v14 = vunpack.i.l.bf16 %v6557_v8  ;;  %v6562_v23 = vpop.permute.xlu0 %6561 }
0x1259   : > { %v6564_v48 = vunpack.i.h.bf16 %v6562_v23  ;;  %v6563_v18 = vunpack.i.l.bf16 %v6562_v23  ;;  %4757 = vmatprep.subr.bf16.mxu0 %v4756_v7 }
0x125a   : > { %v4135_v50 = vsel %vm829_vm8, %v6558_v14, %v6559_v42 }
0x125b   : > { %4759 = vmatpush1.bf16.msra.mxu0 %v4758_v15  ;;  %v6567_v12 = vpop.permute.xlu1 %6566  ;;  %v4137_v1 = vsel %vm829_vm8, %v6563_v18, %v6564_v48 }
0x125c   : > { %v6569_v2 = vunpack.i.h.bf16 %v6567_v12  ;;  %v6568_v3 = vunpack.i.l.bf16 %v6567_v12  ;;  %v4760_v57 = vpack.c.bf16 %v4137_v1, %v4135_v50 }
0x125e   : > { %v4134_v41 = vsel %vm829_vm8, %v6568_v3, %v6558_v14  ;;  %v4136_v20 = vsel %vm829_vm8, %v6569_v2, %v6563_v18  ;;  %4761 = vmatprep.subr.bf16.mxu0 %v4760_v57 }
0x125f   : > { %v4762_v40 = vpack.c.bf16 %v4136_v20, %v4134_v41 }
0x1261   : > { %4763 = vmatpush1.bf16.msra.mxu0 %v4762_v40 }
0x1264   : > { %4263 = vmatmul.mubr.f32.vlgmr.msra.gmra.mrb[8].mxu0 %v3836_v30 }
0x1265   : > { %4428 = vmatprep.mubr.msk.f32.mxu0 %vm1271_vm10, %v3839_v31 }
0x1268   : > { %4269 = vmatmul.mubr.f32.gmra.mrb[10].mxu0 %v3838_v38 }
0x1269   : > { %4429 = vmatprep.mubr.msk.f32.mxu0 %vm1271_vm10, %v3841_v39  ;;  %v3961_v55 = vpop.permute.xlu0 %3960 }
0x126c   : > { %4275 = vmatmul.mubr.f32.gmra.mrb[12].mxu0 %v3840_v62  ;;  %v3966_v53 = vpop.permute.xlu1 %3965 }
0x126d   : > { %4430 = vmatprep.mubr.msk.f32.mxu0 %vm1271_vm10, %v3843_v37  ;;  %v3971_v25 = vpop.permute.xlu0 %3970 }
0x1270   : > { %4281 = vmatmul.mubr.f32.gmra.mrb[14].mxu0 %v3842_v28  ;;  %v3976_v32 = vpop.permute.xlu1 %3975 }
0x1271   : > { %4431 = vmatprep.mubr.msk.f32.mxu0 %vm1271_vm10, %v3845_v47  ;;  %v3981_v35 = vpop.permute.xlu0 %3980 }
0x1274   : > { %4287 = vmatmul.mubr.f32.gmra.mrb[16].mxu0 %v3844_v26  ;;  %v3986_v14 = vpop.permute.xlu1 %3985 }
0x1275   : > { %4432 = vmatprep.mubr.msk.f32.mxu0 %vm1271_vm10, %v3847_v33  ;;  %v3991_v2 = vpop.permute.xlu0 %3990 }
0x1278   : > { %4293 = vmatmul.mubr.f32.gmra.mrb[18].mxu0 %v3846_v44  ;;  %v3996_v31 = vpop.permute.xlu1 %3995 }
0x1279   : > { %4433 = vmatprep.mubr.msk.f32.mxu0 %vm1271_vm10, %v3849_v0 }
0x127c   : > { %4299 = vmatmul.mubr.f32.gmra.mrb[20].mxu0 %v3848_v21 }
0x127d   : > { %4434 = vmatprep.mubr.msk.f32.mxu0 %vm1271_vm10, %v3851_v63 }
0x1280   : > { %4305 = vmatmul.mubr.f32.gmra.mrb[22].mxu0 %v3850_v11 }
0x1337   : > { %v4264_v43 = vpop.f32.mrb[8].mxu0 }
0x1338   : > { %v4265_v6 = vadd.f32 %v4264_v43, %v3961_v55  ;;  %v4266_v52 = vpop.f32.mrb[9].mxu0 }
0x1339   : > { %v4267_v4 = vadd.f32 %v4266_v52, %v3961_v55 }
0x133a   : > { %v4311_v45 = vmul.f32 %v4265_v6, %v6844_v22 }
0x133b   : > { %v4312_v58 = vmul.f32 %v4267_v4, %v6846_v24  ;;  %v4270_v10 = vpop.f32.mrb[10].mxu0 }
0x133c   : > { %4327 = vst [vmem:[%s8523_s24] sm:$0xff] %v4311_v45  ;;  %v4271_v9 = vadd.f32 %v4270_v10, %v3966_v53  ;;  %v4272_v61 = vpop.f32.mrb[11].mxu0 }
0x133d   : > { %4328 = vst [vmem:[%s8523_s24 + $0x8] sm:$0xff] %v4312_v58  ;;  %v4273_v60 = vadd.f32 %v4272_v61, %v3966_v53 }
0x133e   : > { %v4313_v54 = vmul.f32 %v4271_v9, %v6844_v22 }
0x133f   : > { %v4314_v59 = vmul.f32 %v4273_v60, %v6846_v24  ;;  %v4276_v46 = vpop.f32.mrb[12].mxu0 }
0x1340   : > { %4329 = vst [vmem:[%s8523_s24 + $0x10] sm:$0xff] %v4313_v54  ;;  %v4277_v34 = vadd.f32 %v4276_v46, %v3971_v25  ;;  %v4278_v49 = vpop.f32.mrb[13].mxu0 }
0x1341   : > { %4330 = vst [vmem:[%s8523_s24 + $0x18] sm:$0xff] %v4314_v59  ;;  %v4279_v56 = vadd.f32 %v4278_v49, %v3971_v25 }
0x1342   : > { %v4315_v51 = vmul.f32 %v4277_v34, %v6844_v22 }
0x1343   : > { %v4316_v36 = vmul.f32 %v4279_v56, %v6846_v24  ;;  %v4282_v5 = vpop.f32.mrb[14].mxu0 }
0x1344   : > { %4331 = vst [vmem:[%s8523_s24 + $0x20] sm:$0xff] %v4315_v51  ;;  %v4283_v29 = vadd.f32 %v4282_v5, %v3976_v32  ;;  %v4284_v17 = vpop.f32.mrb[15].mxu0 }
0x1345   : > { %4332 = vst [vmem:[%s8523_s24 + $0x28] sm:$0xff] %v4316_v36  ;;  %v4285_v19 = vadd.f32 %v4284_v17, %v3976_v32 }
0x1346   : > { %v4317_v13 = vmul.f32 %v4283_v29, %v6844_v22 }
0x1347   : > { %v4318_v27 = vmul.f32 %v4285_v19, %v6846_v24  ;;  %v4288_v16 = vpop.f32.mrb[16].mxu0 }
0x1348   : > { %4333 = vst [vmem:[%s8523_s24 + $0x30] sm:$0xff] %v4317_v13  ;;  %v4289_v8 = vadd.f32 %v4288_v16, %v3981_v35  ;;  %v4290_v7 = vpop.f32.mrb[17].mxu0 }
0x1349   : > { %4334 = vst [vmem:[%s8523_s24 + $0x38] sm:$0xff] %v4318_v27  ;;  %v4291_v15 = vadd.f32 %v4290_v7, %v3981_v35 }
0x134a   : > { %v4319_v42 = vmul.f32 %v4289_v8, %v6844_v22 }
0x134b   : > { %v4320_v23 = vmul.f32 %v4291_v15, %v6846_v24  ;;  %v4294_v48 = vpop.f32.mrb[18].mxu0 }
0x134c   : > { %4335 = vst [vmem:[%s8523_s24 + $0x40] sm:$0xff] %v4319_v42  ;;  %v4295_v18 = vadd.f32 %v4294_v48, %v3986_v14  ;;  %v4296_v50 = vpop.f32.mrb[19].mxu0 }
0x134d   : > { %4336 = vst [vmem:[%s8523_s24 + $0x48] sm:$0xff] %v4320_v23  ;;  %v4297_v12 = vadd.f32 %v4296_v50, %v3986_v14 }
0x134e   : > { %v4321_v1 = vmul.f32 %v4295_v18, %v6844_v22 }
0x134f   : > { %v4322_v3 = vmul.f32 %v4297_v12, %v6846_v24  ;;  %v4300_v57 = vpop.f32.mrb[20].mxu0 }
0x1350   : > { %4337 = vst [vmem:[%s8523_s24 + $0x50] sm:$0xff] %v4321_v1  ;;  %v4301_v41 = vadd.f32 %v4300_v57, %v3991_v2  ;;  %v4302_v20 = vpop.f32.mrb[21].mxu0 }
0x1351   : > { %4338 = vst [vmem:[%s8523_s24 + $0x58] sm:$0xff] %v4322_v3  ;;  %v4303_v40 = vadd.f32 %v4302_v20, %v3991_v2 }
0x1352   : > { %v4323_v30 = vmul.f32 %v4301_v41, %v6844_v22 }
0x1353   : > { %v4324_v38 = vmul.f32 %v4303_v40, %v6846_v24  ;;  %v4306_v39 = vpop.f32.mrb[22].mxu0 }
0x1354   : > { %4339 = vst [vmem:[%s8523_s24 + $0x60] sm:$0xff] %v4323_v30  ;;  %v4307_v62 = vadd.f32 %v4306_v39, %v3996_v31  ;;  %v4308_v37 = vpop.f32.mrb[23].mxu0 }
0x1355   : > { %4340 = vst [vmem:[%s8523_s24 + $0x68] sm:$0xff] %v4324_v38  ;;  %v4309_v28 = vadd.f32 %v4308_v37, %v3996_v31 }
0x1356   : > { %v4325_v47 = vmul.f32 %v4307_v62, %v6844_v22 }
0x1357   : > { %v4326_v26 = vmul.f32 %v4309_v28, %v6846_v24 }
0x1358   : > { %4341 = vst [vmem:[%s8523_s24 + $0x70] sm:$0xff] %v4325_v47 }
0x1359   : > { %4342 = vst [vmem:[%s8523_s24 + $0x78] sm:$0xff] %v4326_v26 }
0x135a PF: > { %s34_s29 = sadd.s32 1, %s6584_s29  }
0x135b   : > { %p31_p4 = scmp.ge.s32.totalorder %s34_s29, 4  }
0x135d   :  { %33 = sbr.rel (!%p31_p4) target bundleno = 9 (0x9), region = 138 }

</bundles_post_ra>
